<compile_context>
chip_gen: v7x
topology: tpu7x:2x2x1
jax: 0.10.0
libtpu: 0.0.40
codegen_flags: <defaults>
</compile_context>

<pallas_src>
import jax
import jax.numpy as jnp
from jax.experimental import pallas as pl
from jax.experimental.pallas import tpu as pltpu

BN_EPS = 1e-5   # nn.BatchNorm2d default
LANE = 128      # lane-dense channel/feature padding


def _vmem_spec():
    return pl.BlockSpec(memory_space=pltpu.MemorySpace.VMEM)


# ------------------------------ Pallas kernels ------------------------------ #

def _bn_relu_pool(ys, gamma, beta):
    """Training-mode BatchNorm (single-pass batch stats) + ReLU + 2x2 max-pool.

    ys: list of 4 (M, 128) f32 conv outputs, one per pool-window offset.
    gamma/beta: (1, 128) f32 (zero-padded).  Returns pooled (M, 128) f32.
    """
    cnt = jnp.float32(4 * ys[0].shape[0])          # N * OH * OW conv outputs
    s = ys[0].sum(axis=0, keepdims=True)
    ss = (ys[0] * ys[0]).sum(axis=0, keepdims=True)
    for y in ys[1:]:
        s = s + y.sum(axis=0, keepdims=True)
        ss = ss + (y * y).sum(axis=0, keepdims=True)
    mean = s / cnt
    var = jnp.maximum(ss / cnt - mean * mean, 0.0)  # biased variance
    scale = jax.lax.rsqrt(var + BN_EPS) * gamma     # (1, 128)
    shift = beta - mean * scale                     # (1, 128)
    zs = [jnp.maximum(y * scale + shift, 0.0) for y in ys]
    return jnp.maximum(jnp.maximum(zs[0], zs[1]), jnp.maximum(zs[2], zs[3]))


def conv_bn_relu_pool_kernel(p_ref, w_ref, g_ref, b_ref, o_ref):
    """layer1: im2col-matmul conv (MXU) + BN + ReLU + fused 2x2/2 max-pool.

    p_ref: (4, M, K) bf16 pool-plane-ordered patches; w_ref: (K, 128) bf16;
    g_ref/b_ref: (1, 128) f32; o_ref: (M, 128) bf16 (lane-dense stores).
    """
    w = w_ref[...]
    ys = [jnp.dot(p_ref[q], w, preferred_element_type=jnp.float32)
          for q in range(4)]
    o_ref[...] = _bn_relu_pool(ys, g_ref[...], b_ref[...]).astype(o_ref.dtype)


def conv2_mlp_kernel(p_ref, w2_ref, g_ref, b_ref,
                     wf_ref, bf_ref, wf1_ref, bf1_ref, wl_ref, bl_ref, o_ref):
    """layer2 + flatten + fc -> ReLU -> fc1 -> ReLU -> last, fully fused.

    p_ref: (4, 25*N, 150) bf16 patches, rows ordered (ph, pw, n) so the fc's
    per-spatial-position weight slabs contract against contiguous row blocks.
    wf_ref: (25, 128, 128) bf16 decomposed fc weight (flatten folded in).
    o_ref: (N, 128) f32 logits (padded lanes are exactly zero).
    """
    w2 = w2_ref[...]
    ys = [jnp.dot(p_ref[q], w2, preferred_element_type=jnp.float32)
          for q in range(4)]
    pooled = _bn_relu_pool(ys, g_ref[...], b_ref[...])     # (25*N, 128) f32

    n = o_ref.shape[0]
    acc = jnp.zeros((n, LANE), jnp.float32)
    for p in range(25):                                     # fc over (c, h, w)
        lhs = pooled[p * n:(p + 1) * n, :].astype(jnp.bfloat16)
        acc = acc + jnp.dot(lhs, wf_ref[p], preferred_element_type=jnp.float32)
    h = jnp.maximum(acc + bf_ref[...], 0.0)
    h = jnp.dot(h.astype(jnp.bfloat16), wf1_ref[...],
                preferred_element_type=jnp.float32) + bf1_ref[...]
    h = jnp.maximum(h, 0.0)
    o_ref[...] = jnp.dot(h.astype(jnp.bfloat16), wl_ref[...],
                         preferred_element_type=jnp.float32) + bl_ref[...]


# ----------------------------- pallas_call wrappers -------------------------- #

_CPARAMS = pltpu.CompilerParams(vmem_limit_bytes=32 * 1024 * 1024)


def conv_bn_relu_pool(patches, w2d, gamma, beta):
    _, m, k = patches.shape
    cost = pl.CostEstimate(
        flops=int(2 * 4 * m * k * LANE + 10 * 4 * m * LANE),
        transcendentals=int(LANE),
        bytes_accessed=int(patches.size * 2 + w2d.size * 2 + m * LANE * 2),
    )
    return pl.pallas_call(
        conv_bn_relu_pool_kernel,
        out_shape=jax.ShapeDtypeStruct((m, LANE), jnp.bfloat16),
        in_specs=[_vmem_spec()] * 4,
        out_specs=_vmem_spec(),
        compiler_params=_CPARAMS,
        cost_estimate=cost,
    )(patches, w2d, gamma, beta)


def conv2_mlp(patches, n, w2d, gamma, beta, wf_dec, bfc, wf1, bf1, wl, bl):
    _, m, k = patches.shape
    cost = pl.CostEstimate(
        flops=int(2 * 4 * m * k * LANE + 2 * n * LANE * LANE * 27
                  + 10 * 4 * m * LANE),
        transcendentals=int(LANE),
        bytes_accessed=int(patches.size * 2
                           + (w2d.size + wf_dec.size + wf1.size + wl.size) * 2
                           + n * LANE * 4),
    )
    return pl.pallas_call(
        conv2_mlp_kernel,
        out_shape=jax.ShapeDtypeStruct((n, LANE), jnp.float32),
        in_specs=[_vmem_spec()] * 10,
        out_specs=_vmem_spec(),
        compiler_params=_CPARAMS,
        cost_estimate=cost,
    )(patches, w2d, gamma, beta, wf_dec, bfc, wf1, bf1, wl, bl)


# --------------------------------- JAX glue --------------------------------- #

def _im2col_pool_planes(x_nhwc, k, row_order):
    """Valid, stride-1 KxK im2col split into four 2x2-pool-offset planes.

    Returns (4, M, K*K*C) bf16.  Plane q = dh*2+dw holds the patches whose conv
    output lands at pool offset (dh, dw); the in-kernel pool is then max over
    planes.  Feature order is (ki, kj, c); row order (n, ph, pw) or (ph, pw, n).
    Requires even OH/OW (true for the 32x32 LeNet: 28x28 and 10x10).
    """
    n, h, w, c = x_nhwc.shape
    oh, ow = h - k + 1, w - k + 1
    ph, pw = oh // 2, ow // 2
    cols = [x_nhwc[:, i:i + oh, j:j + ow, :] for i in range(k) for j in range(k)]
    pat = jnp.concatenate(cols, axis=-1)                      # (N,OH,OW,K*K*C)
    pat = pat.reshape(n, ph, 2, pw, 2, k * k * c)
    if row_order == "nhw":
        pat = jnp.transpose(pat, (2, 4, 0, 1, 3, 5))
        pat = pat.reshape(4, n * ph * pw, k * k * c)
    else:  # "hwn"
        pat = jnp.transpose(pat, (2, 4, 1, 3, 0, 5))
        pat = pat.reshape(4, ph * pw * n, k * k * c)
    return pat.astype(jnp.bfloat16), (ph, pw)


def _conv_w2d(w):
    # torch (F, Cin, K, K) -> (K*K*Cin, 128) bf16, feature order (ki, kj, c).
    f, c, kh, kw = w.shape
    w2d = jnp.transpose(w, (2, 3, 1, 0)).reshape(kh * kw * c, f)
    return jnp.pad(w2d, ((0, 0), (0, LANE - f))).astype(jnp.bfloat16)


def _pad_lane_vec(v):
    # (F,) f32 -> (1, 128) f32, zero padded.
    return jnp.pad(v, (0, LANE - v.shape[0])).reshape(1, LANE).astype(jnp.float32)


def _fc_dec(wf):
    # torch fc weight (120, 400); flat input index = c*25 + ph*5 + pw (c < 16).
    # -> (25, 128, 128) bf16 with [p, c, j] = wf[j, c*25 + p].
    out_f, _ = wf.shape
    w = wf.T.reshape(16, 25, out_f)            # [c, p, j]
    w = jnp.transpose(w, (1, 0, 2))            # [p, c, j]
    w = jnp.pad(w, ((0, 0), (0, LANE - 16), (0, LANE - out_f)))
    return w.astype(jnp.bfloat16)


def _fc_w(w):
    # torch (out, in) -> (128, 128) bf16, zero padded.
    out_f, in_f = w.shape
    return jnp.pad(w.T, ((0, LANE - in_f), (0, LANE - out_f))).astype(jnp.bfloat16)


def lenet5_forward(x_nchw, p):
    num_classes = p['wl'].shape[0]
    assert num_classes <= LANE
    n = x_nchw.shape[0]
    x = jnp.transpose(x_nchw, (0, 2, 3, 1)).astype(jnp.bfloat16)   # NCHW -> NHWC

    # layer1: conv(C->6, 5x5) + BN + ReLU + maxpool(2), one fused kernel.
    pat1, (ph1, pw1) = _im2col_pool_planes(x, 5, "nhw")            # (4, N*196, 25C)
    a1 = conv_bn_relu_pool(pat1, _conv_w2d(p['w1']),
                           _pad_lane_vec(p['g1']), _pad_lane_vec(p['be1']))
    a1 = a1.reshape(n, ph1, pw1, LANE)[..., :6]                    # (N,14,14,6) bf16

    # layer2 + flatten + fc/ReLU/fc1/ReLU/last, one fused kernel.
    pat2, _ = _im2col_pool_planes(a1, 5, "hwn")                    # (4, 25N, 150)
    logits = conv2_mlp(pat2, n, _conv_w2d(p['w2']),
                       _pad_lane_vec(p['g2']), _pad_lane_vec(p['be2']),
                       _fc_dec(p['wf']), _pad_lane_vec(p['bf']),
                       _fc_w(p['wf1']), _pad_lane_vec(p['bf1']),
                       _fc_w(p['wl']), _pad_lane_vec(p['bl']))
    return logits[:, :num_classes]


# ------------------------------ parameter init ------------------------------ #

def init_params(key, num_classes, num_channels):
    ks = jax.random.split(key, 8)

    def unif(k, shape, fan_in):
        bound = 1.0 / jnp.sqrt(jnp.float32(fan_in))
        return jax.random.uniform(k, shape, jnp.float32, -bound, bound)

    p = {}
    # PyTorch layouts: conv (F, Cin, K, K); linear (out, in); bias (out,).
    p['w1'] = unif(ks[0], (6, num_channels, 5, 5), num_channels * 25)
    p['g1'] = jnp.ones((6,), jnp.float32)
    p['be1'] = jnp.zeros((6,), jnp.float32)
    p['w2'] = unif(ks[1], (16, 6, 5, 5), 6 * 25)
    p['g2'] = jnp.ones((16,), jnp.float32)
    p['be2'] = jnp.zeros((16,), jnp.float32)
    p['wf'] = unif(ks[2], (120, 400), 400)
    p['bf'] = unif(ks[3], (120,), 400)
    p['wf1'] = unif(ks[4], (84, 120), 120)
    p['bf1'] = unif(ks[5], (84,), 120)
    p['wl'] = unif(ks[6], (num_classes, 84), 84)
    p['bl'] = unif(ks[7], (num_classes,), 84)
    return p


if __name__ == "__main__":
    num_classes, num_channels, batch = 10, 3, 2
    key = jax.random.PRNGKey(0)
    pkey, xkey = jax.random.split(key)
    params = init_params(pkey, num_classes, num_channels)
    # LeNet5's fc(400) implies 32x32 input (32 -> 28 -> 14 -> 10 -> 5; 16*5*5=400).
    x = jax.random.normal(xkey, (batch, num_channels, 32, 32), jnp.float32)

    out = jax.jit(lenet5_forward)(x, params)
    out = jax.block_until_ready(out)
    assert out.shape == (batch, num_classes) and out.dtype == jnp.float32
    print("KERNEL_OK")
</pallas_src>

<mosaic_0001>
module attributes {stable_mosaic.version = 11 : i64} {
  func.func @conv_bn_relu_pool_kernel(%arg0: memref<4x392x75xbf16, #tpu.memory_space<vmem>>, %arg1: memref<75x128xbf16, #tpu.memory_space<vmem>>, %arg2: memref<1x128xf32, #tpu.memory_space<vmem>>, %arg3: memref<1x128xf32, #tpu.memory_space<vmem>>, %arg4: memref<392x128xbf16, #tpu.memory_space<vmem>>) attributes {dimension_semantics = [], scalar_prefetch = 0 : i64, scratch_operands = 0 : i64, tpu.core_type = #tpu.core_type<tc>} {
    %c0 = arith.constant 0 : index
    %c0_0 = arith.constant 0 : index
    %0 = vector.load %arg1[%c0, %c0_0] : memref<75x128xbf16, #tpu.memory_space<vmem>>, vector<75x128xbf16>
    %c0_1 = arith.constant 0 : index
    %c0_2 = arith.constant 0 : index
    %c0_3 = arith.constant 0 : index
    %1 = vector.load %arg0[%c0_1, %c0_2, %c0_3] : memref<4x392x75xbf16, #tpu.memory_space<vmem>>, vector<1x392x75xbf16>
    %2 = vector.shape_cast %1 : vector<1x392x75xbf16> to vector<392x75xbf16>
    %cst = arith.constant dense<0.000000e+00> : vector<392x128xf32>
    %3 = tpu.matmul %2, %0, %cst {dimension_numbers = #tpu.dot_dimension_numbers<[1], [0], [0], [1], [0, 0, 1, 1], [], []>} : vector<392x75xbf16>, vector<75x128xbf16>, vector<392x128xf32> -> vector<392x128xf32>
    %c1 = arith.constant 1 : index
    %c0_4 = arith.constant 0 : index
    %c0_5 = arith.constant 0 : index
    %4 = vector.load %arg0[%c1, %c0_4, %c0_5] : memref<4x392x75xbf16, #tpu.memory_space<vmem>>, vector<1x392x75xbf16>
    %5 = vector.shape_cast %4 : vector<1x392x75xbf16> to vector<392x75xbf16>
    %cst_6 = arith.constant dense<0.000000e+00> : vector<392x128xf32>
    %6 = tpu.matmul %5, %0, %cst_6 {dimension_numbers = #tpu.dot_dimension_numbers<[1], [0], [0], [1], [0, 0, 1, 1], [], []>} : vector<392x75xbf16>, vector<75x128xbf16>, vector<392x128xf32> -> vector<392x128xf32>
    %c2 = arith.constant 2 : index
    %c0_7 = arith.constant 0 : index
    %c0_8 = arith.constant 0 : index
    %7 = vector.load %arg0[%c2, %c0_7, %c0_8] : memref<4x392x75xbf16, #tpu.memory_space<vmem>>, vector<1x392x75xbf16>
    %8 = vector.shape_cast %7 : vector<1x392x75xbf16> to vector<392x75xbf16>
    %cst_9 = arith.constant dense<0.000000e+00> : vector<392x128xf32>
    %9 = tpu.matmul %8, %0, %cst_9 {dimension_numbers = #tpu.dot_dimension_numbers<[1], [0], [0], [1], [0, 0, 1, 1], [], []>} : vector<392x75xbf16>, vector<75x128xbf16>, vector<392x128xf32> -> vector<392x128xf32>
    %c3 = arith.constant 3 : index
    %c0_10 = arith.constant 0 : index
    %c0_11 = arith.constant 0 : index
    %10 = vector.load %arg0[%c3, %c0_10, %c0_11] : memref<4x392x75xbf16, #tpu.memory_space<vmem>>, vector<1x392x75xbf16>
    %11 = vector.shape_cast %10 : vector<1x392x75xbf16> to vector<392x75xbf16>
    %cst_12 = arith.constant dense<0.000000e+00> : vector<392x128xf32>
    %12 = tpu.matmul %11, %0, %cst_12 {dimension_numbers = #tpu.dot_dimension_numbers<[1], [0], [0], [1], [0, 0, 1, 1], [], []>} : vector<392x75xbf16>, vector<75x128xbf16>, vector<392x128xf32> -> vector<392x128xf32>
    %c0_13 = arith.constant 0 : index
    %c0_14 = arith.constant 0 : index
    %13 = vector.load %arg2[%c0_13, %c0_14] : memref<1x128xf32, #tpu.memory_space<vmem>>, vector<1x128xf32>
    %c0_15 = arith.constant 0 : index
    %c0_16 = arith.constant 0 : index
    %14 = vector.load %arg3[%c0_15, %c0_16] : memref<1x128xf32, #tpu.memory_space<vmem>>, vector<1x128xf32>
    %cst_17 = arith.constant dense<0.000000e+00> : vector<128xf32>
    %15 = vector.multi_reduction <add>, %3, %cst_17 [0] : vector<392x128xf32> to vector<128xf32>
    %16 = vector.shape_cast %15 : vector<128xf32> to vector<1x128xf32>
    %17 = arith.mulf %3, %3 : vector<392x128xf32>
    %cst_18 = arith.constant dense<0.000000e+00> : vector<128xf32>
    %18 = vector.multi_reduction <add>, %17, %cst_18 [0] : vector<392x128xf32> to vector<128xf32>
    %19 = vector.shape_cast %18 : vector<128xf32> to vector<1x128xf32>
    %cst_19 = arith.constant dense<0.000000e+00> : vector<128xf32>
    %20 = vector.multi_reduction <add>, %6, %cst_19 [0] : vector<392x128xf32> to vector<128xf32>
    %21 = vector.shape_cast %20 : vector<128xf32> to vector<1x128xf32>
    %22 = arith.addf %16, %21 : vector<1x128xf32>
    %23 = arith.mulf %6, %6 : vector<392x128xf32>
    %cst_20 = arith.constant dense<0.000000e+00> : vector<128xf32>
    %24 = vector.multi_reduction <add>, %23, %cst_20 [0] : vector<392x128xf32> to vector<128xf32>
    %25 = vector.shape_cast %24 : vector<128xf32> to vector<1x128xf32>
    %26 = arith.addf %19, %25 : vector<1x128xf32>
    %cst_21 = arith.constant dense<0.000000e+00> : vector<128xf32>
    %27 = vector.multi_reduction <add>, %9, %cst_21 [0] : vector<392x128xf32> to vector<128xf32>
    %28 = vector.shape_cast %27 : vector<128xf32> to vector<1x128xf32>
    %29 = arith.addf %22, %28 : vector<1x128xf32>
    %30 = arith.mulf %9, %9 : vector<392x128xf32>
    %cst_22 = arith.constant dense<0.000000e+00> : vector<128xf32>
    %31 = vector.multi_reduction <add>, %30, %cst_22 [0] : vector<392x128xf32> to vector<128xf32>
    %32 = vector.shape_cast %31 : vector<128xf32> to vector<1x128xf32>
    %33 = arith.addf %26, %32 : vector<1x128xf32>
    %cst_23 = arith.constant dense<0.000000e+00> : vector<128xf32>
    %34 = vector.multi_reduction <add>, %12, %cst_23 [0] : vector<392x128xf32> to vector<128xf32>
    %35 = vector.shape_cast %34 : vector<128xf32> to vector<1x128xf32>
    %36 = arith.addf %29, %35 : vector<1x128xf32>
    %37 = arith.mulf %12, %12 : vector<392x128xf32>
    %cst_24 = arith.constant dense<0.000000e+00> : vector<128xf32>
    %38 = vector.multi_reduction <add>, %37, %cst_24 [0] : vector<392x128xf32> to vector<128xf32>
    %39 = vector.shape_cast %38 : vector<128xf32> to vector<1x128xf32>
    %40 = arith.addf %33, %39 : vector<1x128xf32>
    %cst_25 = arith.constant 1.568000e+03 : f32
    %41 = vector.broadcast %cst_25 : f32 to vector<1x128xf32>
    %42 = arith.divf %36, %41 : vector<1x128xf32>
    %cst_26 = arith.constant 1.568000e+03 : f32
    %43 = vector.broadcast %cst_26 : f32 to vector<1x128xf32>
    %44 = arith.divf %40, %43 : vector<1x128xf32>
    %45 = arith.mulf %42, %42 : vector<1x128xf32>
    %46 = arith.subf %44, %45 : vector<1x128xf32>
    %cst_27 = arith.constant 0.000000e+00 : f32
    %47 = vector.broadcast %cst_27 : f32 to vector<1x128xf32>
    %48 = arith.maximumf %46, %47 : vector<1x128xf32>
    %cst_28 = arith.constant 9.99999974E-6 : f32
    %49 = vector.broadcast %cst_28 : f32 to vector<1x128xf32>
    %50 = arith.addf %48, %49 : vector<1x128xf32>
    %51 = math.rsqrt %50 : vector<1x128xf32>
    %52 = arith.mulf %51, %13 : vector<1x128xf32>
    %53 = arith.mulf %42, %52 : vector<1x128xf32>
    %54 = arith.subf %14, %53 : vector<1x128xf32>
    %55 = vector.broadcast %52 : vector<1x128xf32> to vector<392x128xf32>
    %56 = arith.mulf %3, %55 : vector<392x128xf32>
    %57 = vector.broadcast %54 : vector<1x128xf32> to vector<392x128xf32>
    %58 = arith.addf %56, %57 : vector<392x128xf32>
    %cst_29 = arith.constant 0.000000e+00 : f32
    %59 = vector.broadcast %cst_29 : f32 to vector<392x128xf32>
    %60 = arith.maximumf %58, %59 : vector<392x128xf32>
    %61 = vector.broadcast %52 : vector<1x128xf32> to vector<392x128xf32>
    %62 = arith.mulf %6, %61 : vector<392x128xf32>
    %63 = vector.broadcast %54 : vector<1x128xf32> to vector<392x128xf32>
    %64 = arith.addf %62, %63 : vector<392x128xf32>
    %cst_30 = arith.constant 0.000000e+00 : f32
    %65 = vector.broadcast %cst_30 : f32 to vector<392x128xf32>
    %66 = arith.maximumf %64, %65 : vector<392x128xf32>
    %67 = vector.broadcast %52 : vector<1x128xf32> to vector<392x128xf32>
    %68 = arith.mulf %9, %67 : vector<392x128xf32>
    %69 = vector.broadcast %54 : vector<1x128xf32> to vector<392x128xf32>
    %70 = arith.addf %68, %69 : vector<392x128xf32>
    %cst_31 = arith.constant 0.000000e+00 : f32
    %71 = vector.broadcast %cst_31 : f32 to vector<392x128xf32>
    %72 = arith.maximumf %70, %71 : vector<392x128xf32>
    %73 = vector.broadcast %52 : vector<1x128xf32> to vector<392x128xf32>
    %74 = arith.mulf %12, %73 : vector<392x128xf32>
    %75 = vector.broadcast %54 : vector<1x128xf32> to vector<392x128xf32>
    %76 = arith.addf %74, %75 : vector<392x128xf32>
    %cst_32 = arith.constant 0.000000e+00 : f32
    %77 = vector.broadcast %cst_32 : f32 to vector<392x128xf32>
    %78 = arith.maximumf %76, %77 : vector<392x128xf32>
    %79 = arith.maximumf %60, %66 : vector<392x128xf32>
    %80 = arith.maximumf %72, %78 : vector<392x128xf32>
    %81 = arith.maximumf %79, %80 : vector<392x128xf32>
    %82 = arith.truncf %81 : vector<392x128xf32> to vector<392x128xbf16>
    %c0_33 = arith.constant 0 : index
    %c0_34 = arith.constant 0 : index
    %83 = vector.load %arg4[%c0_33, %c0_34] : memref<392x128xbf16, #tpu.memory_space<vmem>>, vector<392x128xbf16>
    tpu.vector_store %arg4[%c0_33, %c0_34], %82 {strides = array<i32>} : memref<392x128xbf16, #tpu.memory_space<vmem>>, vector<392x128xbf16>,
    return
  }
}

module attributes {stable_mosaic.version = 11 : i64} {
  func.func @conv2_mlp_kernel(%arg0: memref<4x50x150xbf16, #tpu.memory_space<vmem>>, %arg1: memref<150x128xbf16, #tpu.memory_space<vmem>>, %arg2: memref<1x128xf32, #tpu.memory_space<vmem>>, %arg3: memref<1x128xf32, #tpu.memory_space<vmem>>, %arg4: memref<25x128x128xbf16, #tpu.memory_space<vmem>>, %arg5: memref<1x128xf32, #tpu.memory_space<vmem>>, %arg6: memref<128x128xbf16, #tpu.memory_space<vmem>>, %arg7: memref<1x128xf32, #tpu.memory_space<vmem>>, %arg8: memref<128x128xbf16, #tpu.memory_space<vmem>>, %arg9: memref<1x128xf32, #tpu.memory_space<vmem>>, %arg10: memref<2x128xf32, #tpu.memory_space<vmem>>) attributes {dimension_semantics = [], scalar_prefetch = 0 : i64, scratch_operands = 0 : i64, tpu.core_type = #tpu.core_type<tc>} {
    %c0 = arith.constant 0 : index
    %c0_0 = arith.constant 0 : index
    %0 = vector.load %arg1[%c0, %c0_0] : memref<150x128xbf16, #tpu.memory_space<vmem>>, vector<150x128xbf16>
    %c0_1 = arith.constant 0 : index
    %c0_2 = arith.constant 0 : index
    %c0_3 = arith.constant 0 : index
    %1 = vector.load %arg0[%c0_1, %c0_2, %c0_3] : memref<4x50x150xbf16, #tpu.memory_space<vmem>>, vector<1x50x150xbf16>
    %2 = vector.shape_cast %1 : vector<1x50x150xbf16> to vector<50x150xbf16>
    %cst = arith.constant dense<0.000000e+00> : vector<50x128xf32>
    %3 = tpu.matmul %2, %0, %cst {dimension_numbers = #tpu.dot_dimension_numbers<[1], [0], [0], [1], [0, 0, 1, 1], [], []>} : vector<50x150xbf16>, vector<150x128xbf16>, vector<50x128xf32> -> vector<50x128xf32>
    %c1 = arith.constant 1 : index
    %c0_4 = arith.constant 0 : index
    %c0_5 = arith.constant 0 : index
    %4 = vector.load %arg0[%c1, %c0_4, %c0_5] : memref<4x50x150xbf16, #tpu.memory_space<vmem>>, vector<1x50x150xbf16>
    %5 = vector.shape_cast %4 : vector<1x50x150xbf16> to vector<50x150xbf16>
    %cst_6 = arith.constant dense<0.000000e+00> : vector<50x128xf32>
    %6 = tpu.matmul %5, %0, %cst_6 {dimension_numbers = #tpu.dot_dimension_numbers<[1], [0], [0], [1], [0, 0, 1, 1], [], []>} : vector<50x150xbf16>, vector<150x128xbf16>, vector<50x128xf32> -> vector<50x128xf32>
    %c2 = arith.constant 2 : index
    %c0_7 = arith.constant 0 : index
    %c0_8 = arith.constant 0 : index
    %7 = vector.load %arg0[%c2, %c0_7, %c0_8] : memref<4x50x150xbf16, #tpu.memory_space<vmem>>, vector<1x50x150xbf16>
    %8 = vector.shape_cast %7 : vector<1x50x150xbf16> to vector<50x150xbf16>
    %cst_9 = arith.constant dense<0.000000e+00> : vector<50x128xf32>
    %9 = tpu.matmul %8, %0, %cst_9 {dimension_numbers = #tpu.dot_dimension_numbers<[1], [0], [0], [1], [0, 0, 1, 1], [], []>} : vector<50x150xbf16>, vector<150x128xbf16>, vector<50x128xf32> -> vector<50x128xf32>
    %c3 = arith.constant 3 : index
    %c0_10 = arith.constant 0 : index
    %c0_11 = arith.constant 0 : index
    %10 = vector.load %arg0[%c3, %c0_10, %c0_11] : memref<4x50x150xbf16, #tpu.memory_space<vmem>>, vector<1x50x150xbf16>
    %11 = vector.shape_cast %10 : vector<1x50x150xbf16> to vector<50x150xbf16>
    %cst_12 = arith.constant dense<0.000000e+00> : vector<50x128xf32>
    %12 = tpu.matmul %11, %0, %cst_12 {dimension_numbers = #tpu.dot_dimension_numbers<[1], [0], [0], [1], [0, 0, 1, 1], [], []>} : vector<50x150xbf16>, vector<150x128xbf16>, vector<50x128xf32> -> vector<50x128xf32>
    %c0_13 = arith.constant 0 : index
    %c0_14 = arith.constant 0 : index
    %13 = vector.load %arg2[%c0_13, %c0_14] : memref<1x128xf32, #tpu.memory_space<vmem>>, vector<1x128xf32>
    %c0_15 = arith.constant 0 : index
    %c0_16 = arith.constant 0 : index
    %14 = vector.load %arg3[%c0_15, %c0_16] : memref<1x128xf32, #tpu.memory_space<vmem>>, vector<1x128xf32>
    %cst_17 = arith.constant dense<0.000000e+00> : vector<128xf32>
    %15 = vector.multi_reduction <add>, %3, %cst_17 [0] : vector<50x128xf32> to vector<128xf32>
    %16 = vector.shape_cast %15 : vector<128xf32> to vector<1x128xf32>
    %17 = arith.mulf %3, %3 : vector<50x128xf32>
    %cst_18 = arith.constant dense<0.000000e+00> : vector<128xf32>
    %18 = vector.multi_reduction <add>, %17, %cst_18 [0] : vector<50x128xf32> to vector<128xf32>
    %19 = vector.shape_cast %18 : vector<128xf32> to vector<1x128xf32>
    %cst_19 = arith.constant dense<0.000000e+00> : vector<128xf32>
    %20 = vector.multi_reduction <add>, %6, %cst_19 [0] : vector<50x128xf32> to vector<128xf32>
    %21 = vector.shape_cast %20 : vector<128xf32> to vector<1x128xf32>
    %22 = arith.addf %16, %21 : vector<1x128xf32>
    %23 = arith.mulf %6, %6 : vector<50x128xf32>
    %cst_20 = arith.constant dense<0.000000e+00> : vector<128xf32>
    %24 = vector.multi_reduction <add>, %23, %cst_20 [0] : vector<50x128xf32> to vector<128xf32>
    %25 = vector.shape_cast %24 : vector<128xf32> to vector<1x128xf32>
    %26 = arith.addf %19, %25 : vector<1x128xf32>
    %cst_21 = arith.constant dense<0.000000e+00> : vector<128xf32>
    %27 = vector.multi_reduction <add>, %9, %cst_21 [0] : vector<50x128xf32> to vector<128xf32>
    %28 = vector.shape_cast %27 : vector<128xf32> to vector<1x128xf32>
    %29 = arith.addf %22, %28 : vector<1x128xf32>
    %30 = arith.mulf %9, %9 : vector<50x128xf32>
    %cst_22 = arith.constant dense<0.000000e+00> : vector<128xf32>
    %31 = vector.multi_reduction <add>, %30, %cst_22 [0] : vector<50x128xf32> to vector<128xf32>
    %32 = vector.shape_cast %31 : vector<128xf32> to vector<1x128xf32>
    %33 = arith.addf %26, %32 : vector<1x128xf32>
    %cst_23 = arith.constant dense<0.000000e+00> : vector<128xf32>
    %34 = vector.multi_reduction <add>, %12, %cst_23 [0] : vector<50x128xf32> to vector<128xf32>
    %35 = vector.shape_cast %34 : vector<128xf32> to vector<1x128xf32>
    %36 = arith.addf %29, %35 : vector<1x128xf32>
    %37 = arith.mulf %12, %12 : vector<50x128xf32>
    %cst_24 = arith.constant dense<0.000000e+00> : vector<128xf32>
    %38 = vector.multi_reduction <add>, %37, %cst_24 [0] : vector<50x128xf32> to vector<128xf32>
    %39 = vector.shape_cast %38 : vector<128xf32> to vector<1x128xf32>
    %40 = arith.addf %33, %39 : vector<1x128xf32>
    %cst_25 = arith.constant 2.000000e+02 : f32
    %41 = vector.broadcast %cst_25 : f32 to vector<1x128xf32>
    %42 = arith.divf %36, %41 : vector<1x128xf32>
    %cst_26 = arith.constant 2.000000e+02 : f32
    %43 = vector.broadcast %cst_26 : f32 to vector<1x128xf32>
    %44 = arith.divf %40, %43 : vector<1x128xf32>
    %45 = arith.mulf %42, %42 : vector<1x128xf32>
    %46 = arith.subf %44, %45 : vector<1x128xf32>
    %cst_27 = arith.constant 0.000000e+00 : f32
    %47 = vector.broadcast %cst_27 : f32 to vector<1x128xf32>
    %48 = arith.maximumf %46, %47 : vector<1x128xf32>
    %cst_28 = arith.constant 9.99999974E-6 : f32
    %49 = vector.broadcast %cst_28 : f32 to vector<1x128xf32>
    %50 = arith.addf %48, %49 : vector<1x128xf32>
    %51 = math.rsqrt %50 : vector<1x128xf32>
    %52 = arith.mulf %51, %13 : vector<1x128xf32>
    %53 = arith.mulf %42, %52 : vector<1x128xf32>
    %54 = arith.subf %14, %53 : vector<1x128xf32>
    %55 = vector.broadcast %52 : vector<1x128xf32> to vector<50x128xf32>
    %56 = arith.mulf %3, %55 : vector<50x128xf32>
    %57 = vector.broadcast %54 : vector<1x128xf32> to vector<50x128xf32>
    %58 = arith.addf %56, %57 : vector<50x128xf32>
    %cst_29 = arith.constant 0.000000e+00 : f32
    %59 = vector.broadcast %cst_29 : f32 to vector<50x128xf32>
    %60 = arith.maximumf %58, %59 : vector<50x128xf32>
    %61 = vector.broadcast %52 : vector<1x128xf32> to vector<50x128xf32>
    %62 = arith.mulf %6, %61 : vector<50x128xf32>
    %63 = vector.broadcast %54 : vector<1x128xf32> to vector<50x128xf32>
    %64 = arith.addf %62, %63 : vector<50x128xf32>
    %cst_30 = arith.constant 0.000000e+00 : f32
    %65 = vector.broadcast %cst_30 : f32 to vector<50x128xf32>
    %66 = arith.maximumf %64, %65 : vector<50x128xf32>
    %67 = vector.broadcast %52 : vector<1x128xf32> to vector<50x128xf32>
    %68 = arith.mulf %9, %67 : vector<50x128xf32>
    %69 = vector.broadcast %54 : vector<1x128xf32> to vector<50x128xf32>
    %70 = arith.addf %68, %69 : vector<50x128xf32>
    %cst_31 = arith.constant 0.000000e+00 : f32
    %71 = vector.broadcast %cst_31 : f32 to vector<50x128xf32>
    %72 = arith.maximumf %70, %71 : vector<50x128xf32>
    %73 = vector.broadcast %52 : vector<1x128xf32> to vector<50x128xf32>
    %74 = arith.mulf %12, %73 : vector<50x128xf32>
    %75 = vector.broadcast %54 : vector<1x128xf32> to vector<50x128xf32>
    %76 = arith.addf %74, %75 : vector<50x128xf32>
    %cst_32 = arith.constant 0.000000e+00 : f32
    %77 = vector.broadcast %cst_32 : f32 to vector<50x128xf32>
    %78 = arith.maximumf %76, %77 : vector<50x128xf32>
    %79 = arith.maximumf %60, %66 : vector<50x128xf32>
    %80 = arith.maximumf %72, %78 : vector<50x128xf32>
    %81 = arith.maximumf %79, %80 : vector<50x128xf32>
    %cst_33 = arith.constant 0.000000e+00 : f32
    %82 = vector.broadcast %cst_33 : f32 to vector<2x128xf32>
    %83 = vector.extract_strided_slice %81 {offsets = [0, 0], sizes = [2, 128], strides = [1, 1]} : vector<50x128xf32> to vector<2x128xf32>
    %84 = arith.truncf %83 : vector<2x128xf32> to vector<2x128xbf16>
    %c0_34 = arith.constant 0 : index
    %c0_35 = arith.constant 0 : index
    %c0_36 = arith.constant 0 : index
    %85 = vector.load %arg4[%c0_34, %c0_35, %c0_36] : memref<25x128x128xbf16, #tpu.memory_space<vmem>>, vector<1x128x128xbf16>
    %86 = vector.shape_cast %85 : vector<1x128x128xbf16> to vector<128x128xbf16>
    %cst_37 = arith.constant dense<0.000000e+00> : vector<2x128xf32>
    %87 = tpu.matmul %84, %86, %cst_37 {dimension_numbers = #tpu.dot_dimension_numbers<[1], [0], [0], [1], [0, 0, 1, 1], [], []>} : vector<2x128xbf16>, vector<128x128xbf16>, vector<2x128xf32> -> vector<2x128xf32>
    %88 = arith.addf %82, %87 : vector<2x128xf32>
    %89 = vector.extract_strided_slice %81 {offsets = [2, 0], sizes = [2, 128], strides = [1, 1]} : vector<50x128xf32> to vector<2x128xf32>
    %90 = arith.truncf %89 : vector<2x128xf32> to vector<2x128xbf16>
    %c1_38 = arith.constant 1 : index
    %c0_39 = arith.constant 0 : index
    %c0_40 = arith.constant 0 : index
    %91 = vector.load %arg4[%c1_38, %c0_39, %c0_40] : memref<25x128x128xbf16, #tpu.memory_space<vmem>>, vector<1x128x128xbf16>
    %92 = vector.shape_cast %91 : vector<1x128x128xbf16> to vector<128x128xbf16>
    %cst_41 = arith.constant dense<0.000000e+00> : vector<2x128xf32>
    %93 = tpu.matmul %90, %92, %cst_41 {dimension_numbers = #tpu.dot_dimension_numbers<[1], [0], [0], [1], [0, 0, 1, 1], [], []>} : vector<2x128xbf16>, vector<128x128xbf16>, vector<2x128xf32> -> vector<2x128xf32>
    %94 = arith.addf %88, %93 : vector<2x128xf32>
    %95 = vector.extract_strided_slice %81 {offsets = [4, 0], sizes = [2, 128], strides = [1, 1]} : vector<50x128xf32> to vector<2x128xf32>
    %96 = arith.truncf %95 : vector<2x128xf32> to vector<2x128xbf16>
    %c2_42 = arith.constant 2 : index
    %c0_43 = arith.constant 0 : index
    %c0_44 = arith.constant 0 : index
    %97 = vector.load %arg4[%c2_42, %c0_43, %c0_44] : memref<25x128x128xbf16, #tpu.memory_space<vmem>>, vector<1x128x128xbf16>
    %98 = vector.shape_cast %97 : vector<1x128x128xbf16> to vector<128x128xbf16>
    %cst_45 = arith.constant dense<0.000000e+00> : vector<2x128xf32>
    %99 = tpu.matmul %96, %98, %cst_45 {dimension_numbers = #tpu.dot_dimension_numbers<[1], [0], [0], [1], [0, 0, 1, 1], [], []>} : vector<2x128xbf16>, vector<128x128xbf16>, vector<2x128xf32> -> vector<2x128xf32>
    %100 = arith.addf %94, %99 : vector<2x128xf32>
    %101 = vector.extract_strided_slice %81 {offsets = [6, 0], sizes = [2, 128], strides = [1, 1]} : vector<50x128xf32> to vector<2x128xf32>
    %102 = arith.truncf %101 : vector<2x128xf32> to vector<2x128xbf16>
    %c3_46 = arith.constant 3 : index
    %c0_47 = arith.constant 0 : index
    %c0_48 = arith.constant 0 : index
    %103 = vector.load %arg4[%c3_46, %c0_47, %c0_48] : memref<25x128x128xbf16, #tpu.memory_space<vmem>>, vector<1x128x128xbf16>
    %104 = vector.shape_cast %103 : vector<1x128x128xbf16> to vector<128x128xbf16>
    %cst_49 = arith.constant dense<0.000000e+00> : vector<2x128xf32>
    %105 = tpu.matmul %102, %104, %cst_49 {dimension_numbers = #tpu.dot_dimension_numbers<[1], [0], [0], [1], [0, 0, 1, 1], [], []>} : vector<2x128xbf16>, vector<128x128xbf16>, vector<2x128xf32> -> vector<2x128xf32>
    %106 = arith.addf %100, %105 : vector<2x128xf32>
    %107 = vector.extract_strided_slice %81 {offsets = [8, 0], sizes = [2, 128], strides = [1, 1]} : vector<50x128xf32> to vector<2x128xf32>
    %108 = arith.truncf %107 : vector<2x128xf32> to vector<2x128xbf16>
    %c4 = arith.constant 4 : index
    %c0_50 = arith.constant 0 : index
    %c0_51 = arith.constant 0 : index
    %109 = vector.load %arg4[%c4, %c0_50, %c0_51] : memref<25x128x128xbf16, #tpu.memory_space<vmem>>, vector<1x128x128xbf16>
    %110 = vector.shape_cast %109 : vector<1x128x128xbf16> to vector<128x128xbf16>
    %cst_52 = arith.constant dense<0.000000e+00> : vector<2x128xf32>
    %111 = tpu.matmul %108, %110, %cst_52 {dimension_numbers = #tpu.dot_dimension_numbers<[1], [0], [0], [1], [0, 0, 1, 1], [], []>} : vector<2x128xbf16>, vector<128x128xbf16>, vector<2x128xf32> -> vector<2x128xf32>
    %112 = arith.addf %106, %111 : vector<2x128xf32>
    %113 = vector.extract_strided_slice %81 {offsets = [10, 0], sizes = [2, 128], strides = [1, 1]} : vector<50x128xf32> to vector<2x128xf32>
    %114 = arith.truncf %113 : vector<2x128xf32> to vector<2x128xbf16>
    %c5 = arith.constant 5 : index
    %c0_53 = arith.constant 0 : index
    %c0_54 = arith.constant 0 : index
    %115 = vector.load %arg4[%c5, %c0_53, %c0_54] : memref<25x128x128xbf16, #tpu.memory_space<vmem>>, vector<1x128x128xbf16>
    %116 = vector.shape_cast %115 : vector<1x128x128xbf16> to vector<128x128xbf16>
    %cst_55 = arith.constant dense<0.000000e+00> : vector<2x128xf32>
    %117 = tpu.matmul %114, %116, %cst_55 {dimension_numbers = #tpu.dot_dimension_numbers<[1], [0], [0], [1], [0, 0, 1, 1], [], []>} : vector<2x128xbf16>, vector<128x128xbf16>, vector<2x128xf32> -> vector<2x128xf32>
    %118 = arith.addf %112, %117 : vector<2x128xf32>
    %119 = vector.extract_strided_slice %81 {offsets = [12, 0], sizes = [2, 128], strides = [1, 1]} : vector<50x128xf32> to vector<2x128xf32>
    %120 = arith.truncf %119 : vector<2x128xf32> to vector<2x128xbf16>
    %c6 = arith.constant 6 : index
    %c0_56 = arith.constant 0 : index
    %c0_57 = arith.constant 0 : index
    %121 = vector.load %arg4[%c6, %c0_56, %c0_57] : memref<25x128x128xbf16, #tpu.memory_space<vmem>>, vector<1x128x128xbf16>
    %122 = vector.shape_cast %121 : vector<1x128x128xbf16> to vector<128x128xbf16>
    %cst_58 = arith.constant dense<0.000000e+00> : vector<2x128xf32>
    %123 = tpu.matmul %120, %122, %cst_58 {dimension_numbers = #tpu.dot_dimension_numbers<[1], [0], [0], [1], [0, 0, 1, 1], [], []>} : vector<2x128xbf16>, vector<128x128xbf16>, vector<2x128xf32> -> vector<2x128xf32>
    %124 = arith.addf %118, %123 : vector<2x128xf32>
    %125 = vector.extract_strided_slice %81 {offsets = [14, 0], sizes = [2, 128], strides = [1, 1]} : vector<50x128xf32> to vector<2x128xf32>
    %126 = arith.truncf %125 : vector<2x128xf32> to vector<2x128xbf16>
    %c7 = arith.constant 7 : index
    %c0_59 = arith.constant 0 : index
    %c0_60 = arith.constant 0 : index
    %127 = vector.load %arg4[%c7, %c0_59, %c0_60] : memref<25x128x128xbf16, #tpu.memory_space<vmem>>, vector<1x128x128xbf16>
    %128 = vector.shape_cast %127 : vector<1x128x128xbf16> to vector<128x128xbf16>
    %cst_61 = arith.constant dense<0.000000e+00> : vector<2x128xf32>
    %129 = tpu.matmul %126, %128, %cst_61 {dimension_numbers = #tpu.dot_dimension_numbers<[1], [0], [0], [1], [0, 0, 1, 1], [], []>} : vector<2x128xbf16>, vector<128x128xbf16>, vector<2x128xf32> -> vector<2x128xf32>
    %130 = arith.addf %124, %129 : vector<2x128xf32>
    %131 = vector.extract_strided_slice %81 {offsets = [16, 0], sizes = [2, 128], strides = [1, 1]} : vector<50x128xf32> to vector<2x128xf32>
    %132 = arith.truncf %131 : vector<2x128xf32> to vector<2x128xbf16>
    %c8 = arith.constant 8 : index
    %c0_62 = arith.constant 0 : index
    %c0_63 = arith.constant 0 : index
    %133 = vector.load %arg4[%c8, %c0_62, %c0_63] : memref<25x128x128xbf16, #tpu.memory_space<vmem>>, vector<1x128x128xbf16>
    %134 = vector.shape_cast %133 : vector<1x128x128xbf16> to vector<128x128xbf16>
    %cst_64 = arith.constant dense<0.000000e+00> : vector<2x128xf32>
    %135 = tpu.matmul %132, %134, %cst_64 {dimension_numbers = #tpu.dot_dimension_numbers<[1], [0], [0], [1], [0, 0, 1, 1], [], []>} : vector<2x128xbf16>, vector<128x128xbf16>, vector<2x128xf32> -> vector<2x128xf32>
    %136 = arith.addf %130, %135 : vector<2x128xf32>
    %137 = vector.extract_strided_slice %81 {offsets = [18, 0], sizes = [2, 128], strides = [1, 1]} : vector<50x128xf32> to vector<2x128xf32>
    %138 = arith.truncf %137 : vector<2x128xf32> to vector<2x128xbf16>
    %c9 = arith.constant 9 : index
    %c0_65 = arith.constant 0 : index
    %c0_66 = arith.constant 0 : index
    %139 = vector.load %arg4[%c9, %c0_65, %c0_66] : memref<25x128x128xbf16, #tpu.memory_space<vmem>>, vector<1x128x128xbf16>
    %140 = vector.shape_cast %139 : vector<1x128x128xbf16> to vector<128x128xbf16>
    %cst_67 = arith.constant dense<0.000000e+00> : vector<2x128xf32>
    %141 = tpu.matmul %138, %140, %cst_67 {dimension_numbers = #tpu.dot_dimension_numbers<[1], [0], [0], [1], [0, 0, 1, 1], [], []>} : vector<2x128xbf16>, vector<128x128xbf16>, vector<2x128xf32> -> vector<2x128xf32>
    %142 = arith.addf %136, %141 : vector<2x128xf32>
    %143 = vector.extract_strided_slice %81 {offsets = [20, 0], sizes = [2, 128], strides = [1, 1]} : vector<50x128xf32> to vector<2x128xf32>
    %144 = arith.truncf %143 : vector<2x128xf32> to vector<2x128xbf16>
    %c10 = arith.constant 10 : index
    %c0_68 = arith.constant 0 : index
    %c0_69 = arith.constant 0 : index
    %145 = vector.load %arg4[%c10, %c0_68, %c0_69] : memref<25x128x128xbf16, #tpu.memory_space<vmem>>, vector<1x128x128xbf16>
    %146 = vector.shape_cast %145 : vector<1x128x128xbf16> to vector<128x128xbf16>
    %cst_70 = arith.constant dense<0.000000e+00> : vector<2x128xf32>
    %147 = tpu.matmul %144, %146, %cst_70 {dimension_numbers = #tpu.dot_dimension_numbers<[1], [0], [0], [1], [0, 0, 1, 1], [], []>} : vector<2x128xbf16>, vector<128x128xbf16>, vector<2x128xf32> -> vector<2x128xf32>
    %148 = arith.addf %142, %147 : vector<2x128xf32>
    %149 = vector.extract_strided_slice %81 {offsets = [22, 0], sizes = [2, 128], strides = [1, 1]} : vector<50x128xf32> to vector<2x128xf32>
    %150 = arith.truncf %149 : vector<2x128xf32> to vector<2x128xbf16>
    %c11 = arith.constant 11 : index
    %c0_71 = arith.constant 0 : index
    %c0_72 = arith.constant 0 : index
    %151 = vector.load %arg4[%c11, %c0_71, %c0_72] : memref<25x128x128xbf16, #tpu.memory_space<vmem>>, vector<1x128x128xbf16>
    %152 = vector.shape_cast %151 : vector<1x128x128xbf16> to vector<128x128xbf16>
    %cst_73 = arith.constant dense<0.000000e+00> : vector<2x128xf32>
    %153 = tpu.matmul %150, %152, %cst_73 {dimension_numbers = #tpu.dot_dimension_numbers<[1], [0], [0], [1], [0, 0, 1, 1], [], []>} : vector<2x128xbf16>, vector<128x128xbf16>, vector<2x128xf32> -> vector<2x128xf32>
    %154 = arith.addf %148, %153 : vector<2x128xf32>
    %155 = vector.extract_strided_slice %81 {offsets = [24, 0], sizes = [2, 128], strides = [1, 1]} : vector<50x128xf32> to vector<2x128xf32>
    %156 = arith.truncf %155 : vector<2x128xf32> to vector<2x128xbf16>
    %c12 = arith.constant 12 : index
    %c0_74 = arith.constant 0 : index
    %c0_75 = arith.constant 0 : index
    %157 = vector.load %arg4[%c12, %c0_74, %c0_75] : memref<25x128x128xbf16, #tpu.memory_space<vmem>>, vector<1x128x128xbf16>
    %158 = vector.shape_cast %157 : vector<1x128x128xbf16> to vector<128x128xbf16>
    %cst_76 = arith.constant dense<0.000000e+00> : vector<2x128xf32>
    %159 = tpu.matmul %156, %158, %cst_76 {dimension_numbers = #tpu.dot_dimension_numbers<[1], [0], [0], [1], [0, 0, 1, 1], [], []>} : vector<2x128xbf16>, vector<128x128xbf16>, vector<2x128xf32> -> vector<2x128xf32>
    %160 = arith.addf %154, %159 : vector<2x128xf32>
    %161 = vector.extract_strided_slice %81 {offsets = [26, 0], sizes = [2, 128], strides = [1, 1]} : vector<50x128xf32> to vector<2x128xf32>
    %162 = arith.truncf %161 : vector<2x128xf32> to vector<2x128xbf16>
    %c13 = arith.constant 13 : index
    %c0_77 = arith.constant 0 : index
    %c0_78 = arith.constant 0 : index
    %163 = vector.load %arg4[%c13, %c0_77, %c0_78] : memref<25x128x128xbf16, #tpu.memory_space<vmem>>, vector<1x128x128xbf16>
    %164 = vector.shape_cast %163 : vector<1x128x128xbf16> to vector<128x128xbf16>
    %cst_79 = arith.constant dense<0.000000e+00> : vector<2x128xf32>
    %165 = tpu.matmul %162, %164, %cst_79 {dimension_numbers = #tpu.dot_dimension_numbers<[1], [0], [0], [1], [0, 0, 1, 1], [], []>} : vector<2x128xbf16>, vector<128x128xbf16>, vector<2x128xf32> -> vector<2x128xf32>
    %166 = arith.addf %160, %165 : vector<2x128xf32>
    %167 = vector.extract_strided_slice %81 {offsets = [28, 0], sizes = [2, 128], strides = [1, 1]} : vector<50x128xf32> to vector<2x128xf32>
    %168 = arith.truncf %167 : vector<2x128xf32> to vector<2x128xbf16>
    %c14 = arith.constant 14 : index
    %c0_80 = arith.constant 0 : index
    %c0_81 = arith.constant 0 : index
    %169 = vector.load %arg4[%c14, %c0_80, %c0_81] : memref<25x128x128xbf16, #tpu.memory_space<vmem>>, vector<1x128x128xbf16>
    %170 = vector.shape_cast %169 : vector<1x128x128xbf16> to vector<128x128xbf16>
    %cst_82 = arith.constant dense<0.000000e+00> : vector<2x128xf32>
    %171 = tpu.matmul %168, %170, %cst_82 {dimension_numbers = #tpu.dot_dimension_numbers<[1], [0], [0], [1], [0, 0, 1, 1], [], []>} : vector<2x128xbf16>, vector<128x128xbf16>, vector<2x128xf32> -> vector<2x128xf32>
    %172 = arith.addf %166, %171 : vector<2x128xf32>
    %173 = vector.extract_strided_slice %81 {offsets = [30, 0], sizes = [2, 128], strides = [1, 1]} : vector<50x128xf32> to vector<2x128xf32>
    %174 = arith.truncf %173 : vector<2x128xf32> to vector<2x128xbf16>
    %c15 = arith.constant 15 : index
    %c0_83 = arith.constant 0 : index
    %c0_84 = arith.constant 0 : index
    %175 = vector.load %arg4[%c15, %c0_83, %c0_84] : memref<25x128x128xbf16, #tpu.memory_space<vmem>>, vector<1x128x128xbf16>
    %176 = vector.shape_cast %175 : vector<1x128x128xbf16> to vector<128x128xbf16>
    %cst_85 = arith.constant dense<0.000000e+00> : vector<2x128xf32>
    %177 = tpu.matmul %174, %176, %cst_85 {dimension_numbers = #tpu.dot_dimension_numbers<[1], [0], [0], [1], [0, 0, 1, 1], [], []>} : vector<2x128xbf16>, vector<128x128xbf16>, vector<2x128xf32> -> vector<2x128xf32>
    %178 = arith.addf %172, %177 : vector<2x128xf32>
    %179 = vector.extract_strided_slice %81 {offsets = [32, 0], sizes = [2, 128], strides = [1, 1]} : vector<50x128xf32> to vector<2x128xf32>
    %180 = arith.truncf %179 : vector<2x128xf32> to vector<2x128xbf16>
    %c16 = arith.constant 16 : index
    %c0_86 = arith.constant 0 : index
    %c0_87 = arith.constant 0 : index
    %181 = vector.load %arg4[%c16, %c0_86, %c0_87] : memref<25x128x128xbf16, #tpu.memory_space<vmem>>, vector<1x128x128xbf16>
    %182 = vector.shape_cast %181 : vector<1x128x128xbf16> to vector<128x128xbf16>
    %cst_88 = arith.constant dense<0.000000e+00> : vector<2x128xf32>
    %183 = tpu.matmul %180, %182, %cst_88 {dimension_numbers = #tpu.dot_dimension_numbers<[1], [0], [0], [1], [0, 0, 1, 1], [], []>} : vector<2x128xbf16>, vector<128x128xbf16>, vector<2x128xf32> -> vector<2x128xf32>
    %184 = arith.addf %178, %183 : vector<2x128xf32>
    %185 = vector.extract_strided_slice %81 {offsets = [34, 0], sizes = [2, 128], strides = [1, 1]} : vector<50x128xf32> to vector<2x128xf32>
    %186 = arith.truncf %185 : vector<2x128xf32> to vector<2x128xbf16>
    %c17 = arith.constant 17 : index
    %c0_89 = arith.constant 0 : index
    %c0_90 = arith.constant 0 : index
    %187 = vector.load %arg4[%c17, %c0_89, %c0_90] : memref<25x128x128xbf16, #tpu.memory_space<vmem>>, vector<1x128x128xbf16>
    %188 = vector.shape_cast %187 : vector<1x128x128xbf16> to vector<128x128xbf16>
    %cst_91 = arith.constant dense<0.000000e+00> : vector<2x128xf32>
    %189 = tpu.matmul %186, %188, %cst_91 {dimension_numbers = #tpu.dot_dimension_numbers<[1], [0], [0], [1], [0, 0, 1, 1], [], []>} : vector<2x128xbf16>, vector<128x128xbf16>, vector<2x128xf32> -> vector<2x128xf32>
    %190 = arith.addf %184, %189 : vector<2x128xf32>
    %191 = vector.extract_strided_slice %81 {offsets = [36, 0], sizes = [2, 128], strides = [1, 1]} : vector<50x128xf32> to vector<2x128xf32>
    %192 = arith.truncf %191 : vector<2x128xf32> to vector<2x128xbf16>
    %c18 = arith.constant 18 : index
    %c0_92 = arith.constant 0 : index
    %c0_93 = arith.constant 0 : index
    %193 = vector.load %arg4[%c18, %c0_92, %c0_93] : memref<25x128x128xbf16, #tpu.memory_space<vmem>>, vector<1x128x128xbf16>
    %194 = vector.shape_cast %193 : vector<1x128x128xbf16> to vector<128x128xbf16>
    %cst_94 = arith.constant dense<0.000000e+00> : vector<2x128xf32>
    %195 = tpu.matmul %192, %194, %cst_94 {dimension_numbers = #tpu.dot_dimension_numbers<[1], [0], [0], [1], [0, 0, 1, 1], [], []>} : vector<2x128xbf16>, vector<128x128xbf16>, vector<2x128xf32> -> vector<2x128xf32>
    %196 = arith.addf %190, %195 : vector<2x128xf32>
    %197 = vector.extract_strided_slice %81 {offsets = [38, 0], sizes = [2, 128], strides = [1, 1]} : vector<50x128xf32> to vector<2x128xf32>
    %198 = arith.truncf %197 : vector<2x128xf32> to vector<2x128xbf16>
    %c19 = arith.constant 19 : index
    %c0_95 = arith.constant 0 : index
    %c0_96 = arith.constant 0 : index
    %199 = vector.load %arg4[%c19, %c0_95, %c0_96] : memref<25x128x128xbf16, #tpu.memory_space<vmem>>, vector<1x128x128xbf16>
    %200 = vector.shape_cast %199 : vector<1x128x128xbf16> to vector<128x128xbf16>
    %cst_97 = arith.constant dense<0.000000e+00> : vector<2x128xf32>
    %201 = tpu.matmul %198, %200, %cst_97 {dimension_numbers = #tpu.dot_dimension_numbers<[1], [0], [0], [1], [0, 0, 1, 1], [], []>} : vector<2x128xbf16>, vector<128x128xbf16>, vector<2x128xf32> -> vector<2x128xf32>
    %202 = arith.addf %196, %201 : vector<2x128xf32>
    %203 = vector.extract_strided_slice %81 {offsets = [40, 0], sizes = [2, 128], strides = [1, 1]} : vector<50x128xf32> to vector<2x128xf32>
    %204 = arith.truncf %203 : vector<2x128xf32> to vector<2x128xbf16>
    %c20 = arith.constant 20 : index
    %c0_98 = arith.constant 0 : index
    %c0_99 = arith.constant 0 : index
    %205 = vector.load %arg4[%c20, %c0_98, %c0_99] : memref<25x128x128xbf16, #tpu.memory_space<vmem>>, vector<1x128x128xbf16>
    %206 = vector.shape_cast %205 : vector<1x128x128xbf16> to vector<128x128xbf16>
    %cst_100 = arith.constant dense<0.000000e+00> : vector<2x128xf32>
    %207 = tpu.matmul %204, %206, %cst_100 {dimension_numbers = #tpu.dot_dimension_numbers<[1], [0], [0], [1], [0, 0, 1, 1], [], []>} : vector<2x128xbf16>, vector<128x128xbf16>, vector<2x128xf32> -> vector<2x128xf32>
    %208 = arith.addf %202, %207 : vector<2x128xf32>
    %209 = vector.extract_strided_slice %81 {offsets = [42, 0], sizes = [2, 128], strides = [1, 1]} : vector<50x128xf32> to vector<2x128xf32>
    %210 = arith.truncf %209 : vector<2x128xf32> to vector<2x128xbf16>
    %c21 = arith.constant 21 : index
    %c0_101 = arith.constant 0 : index
    %c0_102 = arith.constant 0 : index
    %211 = vector.load %arg4[%c21, %c0_101, %c0_102] : memref<25x128x128xbf16, #tpu.memory_space<vmem>>, vector<1x128x128xbf16>
    %212 = vector.shape_cast %211 : vector<1x128x128xbf16> to vector<128x128xbf16>
    %cst_103 = arith.constant dense<0.000000e+00> : vector<2x128xf32>
    %213 = tpu.matmul %210, %212, %cst_103 {dimension_numbers = #tpu.dot_dimension_numbers<[1], [0], [0], [1], [0, 0, 1, 1], [], []>} : vector<2x128xbf16>, vector<128x128xbf16>, vector<2x128xf32> -> vector<2x128xf32>
    %214 = arith.addf %208, %213 : vector<2x128xf32>
    %215 = vector.extract_strided_slice %81 {offsets = [44, 0], sizes = [2, 128], strides = [1, 1]} : vector<50x128xf32> to vector<2x128xf32>
    %216 = arith.truncf %215 : vector<2x128xf32> to vector<2x128xbf16>
    %c22 = arith.constant 22 : index
    %c0_104 = arith.constant 0 : index
    %c0_105 = arith.constant 0 : index
    %217 = vector.load %arg4[%c22, %c0_104, %c0_105] : memref<25x128x128xbf16, #tpu.memory_space<vmem>>, vector<1x128x128xbf16>
    %218 = vector.shape_cast %217 : vector<1x128x128xbf16> to vector<128x128xbf16>
    %cst_106 = arith.constant dense<0.000000e+00> : vector<2x128xf32>
    %219 = tpu.matmul %216, %218, %cst_106 {dimension_numbers = #tpu.dot_dimension_numbers<[1], [0], [0], [1], [0, 0, 1, 1], [], []>} : vector<2x128xbf16>, vector<128x128xbf16>, vector<2x128xf32> -> vector<2x128xf32>
    %220 = arith.addf %214, %219 : vector<2x128xf32>
    %221 = vector.extract_strided_slice %81 {offsets = [46, 0], sizes = [2, 128], strides = [1, 1]} : vector<50x128xf32> to vector<2x128xf32>
    %222 = arith.truncf %221 : vector<2x128xf32> to vector<2x128xbf16>
    %c23 = arith.constant 23 : index
    %c0_107 = arith.constant 0 : index
    %c0_108 = arith.constant 0 : index
    %223 = vector.load %arg4[%c23, %c0_107, %c0_108] : memref<25x128x128xbf16, #tpu.memory_space<vmem>>, vector<1x128x128xbf16>
    %224 = vector.shape_cast %223 : vector<1x128x128xbf16> to vector<128x128xbf16>
    %cst_109 = arith.constant dense<0.000000e+00> : vector<2x128xf32>
    %225 = tpu.matmul %222, %224, %cst_109 {dimension_numbers = #tpu.dot_dimension_numbers<[1], [0], [0], [1], [0, 0, 1, 1], [], []>} : vector<2x128xbf16>, vector<128x128xbf16>, vector<2x128xf32> -> vector<2x128xf32>
    %226 = arith.addf %220, %225 : vector<2x128xf32>
    %227 = vector.extract_strided_slice %81 {offsets = [48, 0], sizes = [2, 128], strides = [1, 1]} : vector<50x128xf32> to vector<2x128xf32>
    %228 = arith.truncf %227 : vector<2x128xf32> to vector<2x128xbf16>
    %c24 = arith.constant 24 : index
    %c0_110 = arith.constant 0 : index
    %c0_111 = arith.constant 0 : index
    %229 = vector.load %arg4[%c24, %c0_110, %c0_111] : memref<25x128x128xbf16, #tpu.memory_space<vmem>>, vector<1x128x128xbf16>
    %230 = vector.shape_cast %229 : vector<1x128x128xbf16> to vector<128x128xbf16>
    %cst_112 = arith.constant dense<0.000000e+00> : vector<2x128xf32>
    %231 = tpu.matmul %228, %230, %cst_112 {dimension_numbers = #tpu.dot_dimension_numbers<[1], [0], [0], [1], [0, 0, 1, 1], [], []>} : vector<2x128xbf16>, vector<128x128xbf16>, vector<2x128xf32> -> vector<2x128xf32>
    %232 = arith.addf %226, %231 : vector<2x128xf32>
    %c0_113 = arith.constant 0 : index
    %c0_114 = arith.constant 0 : index
    %233 = vector.load %arg5[%c0_113, %c0_114] : memref<1x128xf32, #tpu.memory_space<vmem>>, vector<1x128xf32>
    %234 = vector.broadcast %233 : vector<1x128xf32> to vector<2x128xf32>
    %235 = arith.addf %232, %234 : vector<2x128xf32>
    %cst_115 = arith.constant 0.000000e+00 : f32
    %236 = vector.broadcast %cst_115 : f32 to vector<2x128xf32>
    %237 = arith.maximumf %235, %236 : vector<2x128xf32>
    %238 = arith.truncf %237 : vector<2x128xf32> to vector<2x128xbf16>
    %c0_116 = arith.constant 0 : index
    %c0_117 = arith.constant 0 : index
    %239 = vector.load %arg6[%c0_116, %c0_117] : memref<128x128xbf16, #tpu.memory_space<vmem>>, vector<128x128xbf16>
    %cst_118 = arith.constant dense<0.000000e+00> : vector<2x128xf32>
    %240 = tpu.matmul %238, %239, %cst_118 {dimension_numbers = #tpu.dot_dimension_numbers<[1], [0], [0], [1], [0, 0, 1, 1], [], []>} : vector<2x128xbf16>, vector<128x128xbf16>, vector<2x128xf32> -> vector<2x128xf32>
    %c0_119 = arith.constant 0 : index
    %c0_120 = arith.constant 0 : index
    %241 = vector.load %arg7[%c0_119, %c0_120] : memref<1x128xf32, #tpu.memory_space<vmem>>, vector<1x128xf32>
    %242 = vector.broadcast %241 : vector<1x128xf32> to vector<2x128xf32>
    %243 = arith.addf %240, %242 : vector<2x128xf32>
    %cst_121 = arith.constant 0.000000e+00 : f32
    %244 = vector.broadcast %cst_121 : f32 to vector<2x128xf32>
    %245 = arith.maximumf %243, %244 : vector<2x128xf32>
    %246 = arith.truncf %245 : vector<2x128xf32> to vector<2x128xbf16>
    %c0_122 = arith.constant 0 : index
    %c0_123 = arith.constant 0 : index
    %247 = vector.load %arg8[%c0_122, %c0_123] : memref<128x128xbf16, #tpu.memory_space<vmem>>, vector<128x128xbf16>
    %cst_124 = arith.constant dense<0.000000e+00> : vector<2x128xf32>
    %248 = tpu.matmul %246, %247, %cst_124 {dimension_numbers = #tpu.dot_dimension_numbers<[1], [0], [0], [1], [0, 0, 1, 1], [], []>} : vector<2x128xbf16>, vector<128x128xbf16>, vector<2x128xf32> -> vector<2x128xf32>
    %c0_125 = arith.constant 0 : index
    %c0_126 = arith.constant 0 : index
    %249 = vector.load %arg9[%c0_125, %c0_126] : memref<1x128xf32, #tpu.memory_space<vmem>>, vector<1x128xf32>
    %250 = vector.broadcast %249 : vector<1x128xf32> to vector<2x128xf32>
    %251 = arith.addf %248, %250 : vector<2x128xf32>
    %c0_127 = arith.constant 0 : index
    %c0_128 = arith.constant 0 : index
    %252 = vector.load %arg10[%c0_127, %c0_128] : memref<2x128xf32, #tpu.memory_space<vmem>>, vector<2x128xf32>
    tpu.vector_store %arg10[%c0_127, %c0_128], %251 {strides = array<i32>} : memref<2x128xf32, #tpu.memory_space<vmem>>, vector<2x128xf32>,
    return
  }
}

</mosaic_0001>

<bundles_post_ra>
// kernel: lenet5_forward.2
= control target key start
LH: loop header
LB: loop body
LE: loop exit
PB: predicated region body
PF: predicated region fallthrough
CT: control target
= control target key end

     0   :  { %v8502_v0 = vmov 0.0   ;;  %vm4890_vm0 = vmmov 0   ;;  %vm305_vm1 = vcmask 1044480   ;;  %vm306_vm2 = vcmask 1045504   ;;  %s8497_s1 = inlined_call_operand.vmem [shape: bf16[75,128], index: 1, kind: input, shape index: {}]   ;;  %s8498_s0 = inlined_call_operand.vmem [shape: bf16[4,392,75], index: 0, kind: input, shape index: {}]   ;;  %s8499_s2 = inlined_call_operand.vmem [shape: f32[1,128], index: 2, kind: input, shape index: {}]   ;;  %s8500_s3 = inlined_call_operand.vmem [shape: f32[1,128], index: 3, kind: input, shape index: {}]   ;;  %s8501_s4 = inlined_call_operand.vmem [shape: bf16[392,128], index: 4, kind: output, shape index: {}]  }
   0x1   :  { %4339 = vmatprep.subr.bf16.mxu0 %v8502_v0  ;;  %4449 = vmatprep.subr.bf16.mxu1 %v8502_v0  ;;  %v4782_v1 = vld [vmem:[%s8497_s1] sm:$0xff]   ;;  %v4783_v2 = vld [vmem:[%s8497_s1 + $0x8] sm:$0xff]   ;;  %v4784_v3 = vld [vmem:[%s8497_s1 + $0x10] sm:$0xff]   ;;  %v4891_v4 = vmov 65535   ;;  %vm229_vm3 = vcmask 613376  }
   0x2   :  { %4340 = vmatpush3.bf16.msra.mxu0 %v4782_v1  ;;  %4450 = vmatpush3.bf16.msra.mxu1 %v4782_v1  ;;  %v307_v5 = vsel %vm305_vm1, 4294967295, %v4891_v4  ;;  %v4785_v6 = vld [vmem:[%s8497_s1 + $0x18] sm:$0xff]   ;;  %v4786_v7 = vld [vmem:[%s8497_s1 + $0x20] sm:$0x3f]   ;;  %v4789_v12 = vld [vmem:[%s8498_s0 + $0x8] sm:$0xff]  }
   0x3   :  { %4341 = vmatprep.subr.bf16.mxu0 %v8502_v0  ;;  %4451 = vmatprep.subr.bf16.mxu1 %v8502_v0  ;;  %v308_v8 = vsel %vm306_vm2, %v307_v5, 0  ;;  %v4787_v10 = vld [vmem:[%s8498_s0] sm:$0xff]   ;;  %v4790_v13 = vld [vmem:[%s8498_s0 + $0xcc] sm:$0xff]   ;;  %v4792_v15 = vld [vmem:[%s8498_s0 + $0xd4] sm:$0xff]  }
   0x4   :  { %4349 = vmatprep.mubr.msk.bf16.mxu0 %vm4890_vm0, %v8502_v0  ;;  %4459 = vmatprep.mubr.msk.bf16.mxu1 %vm4890_vm0, %v8502_v0  ;;  %v310_v9 = vand.u32 %v4786_v7, %v308_v8  ;;  %v4788_v11 = vld [vmem:[%s8498_s0 + $0xc4] sm:$0xff]   ;;  %v4791_v14 = vld [vmem:[%s8498_s0 + $0x10] sm:$0xff]   ;;  %v4793_v16 = vld [vmem:[%s8498_s0 + $0x18] sm:$0xff]  }
   0x5   :  { %v4794_v17 = vld [vmem:[%s8498_s0 + $0xdc] sm:$0xff]   ;;  %v4796_v19 = vld [vmem:[%s8498_s0 + $0xe4] sm:$0xff]   ;;  %v4798_v21 = vld [vmem:[%s8498_s0 + $0xec] sm:$0xff]  }
   0x6   :  { %4342 = vmatpush3.bf16.msra.mxu0 %v4783_v2  ;;  %4452 = vmatpush3.bf16.msra.mxu1 %v4783_v2  ;;  %v4795_v18 = vld [vmem:[%s8498_s0 + $0x20] sm:$0xff]   ;;  %v4797_v20 = vld [vmem:[%s8498_s0 + $0x28] sm:$0xff]   ;;  %v4799_v22 = vld [vmem:[%s8498_s0 + $0x30] sm:$0xff]  }
   0x7   :  { %4343 = vmatprep.subr.bf16.mxu0 %v8502_v0  ;;  %4453 = vmatprep.subr.bf16.mxu1 %v8502_v0  ;;  %v4800_v23 = vld [vmem:[%s8498_s0 + $0xf4] sm:$0xff]   ;;  %v4802_v25 = vld [vmem:[%s8498_s0 + $0xfc] sm:$0xff]   ;;  %v4804_v27 = vld [vmem:[%s8498_s0 + $0x104] sm:$0xff]  }
   0x8   :  { %v4801_v24 = vld [vmem:[%s8498_s0 + $0x38] sm:$0xff]   ;;  %v4803_v26 = vld [vmem:[%s8498_s0 + $0x40] sm:$0xff]   ;;  %v4805_v28 = vld [vmem:[%s8498_s0 + $0x48] sm:$0xff]  }
   0x9   :  { %v4806_v29 = vld [vmem:[%s8498_s0 + $0x10c] sm:$0xff]   ;;  %v4808_v31 = vld [vmem:[%s8498_s0 + $0x114] sm:$0xff]   ;;  %v4810_v33 = vld [vmem:[%s8498_s0 + $0x11c] sm:$0xff]  }
   0xa   :  { %4344 = vmatpush3.bf16.msra.mxu0 %v4784_v3  ;;  %4454 = vmatpush3.bf16.msra.mxu1 %v4784_v3  ;;  %v4807_v30 = vld [vmem:[%s8498_s0 + $0x50] sm:$0xff]   ;;  %v4809_v32 = vld [vmem:[%s8498_s0 + $0x58] sm:$0xff]   ;;  %v4811_v34 = vld [vmem:[%s8498_s0 + $0x60] sm:$0xff]  }
   0xb   :  { %4345 = vmatprep.subr.bf16.mxu0 %v8502_v0  ;;  %4455 = vmatprep.subr.bf16.mxu1 %v8502_v0  ;;  %v4812_v35 = vld [vmem:[%s8498_s0 + $0x124] sm:$0xff]   ;;  %v4814_v37 = vld [vmem:[%s8498_s0 + $0x12c] sm:$0xff]   ;;  %v4816_v39 = vld [vmem:[%s8498_s0 + $0x134] sm:$0xff]  }
   0xc   :  { %v4813_v36 = vld [vmem:[%s8498_s0 + $0x68] sm:$0xff]   ;;  %v4815_v38 = vld [vmem:[%s8498_s0 + $0x70] sm:$0xff]   ;;  %v4817_v40 = vld [vmem:[%s8498_s0 + $0x78] sm:$0xff]  }
   0xd   :  { %v4818_v41 = vld [vmem:[%s8498_s0 + $0x13c] sm:$0xff]   ;;  %v4820_v43 = vld [vmem:[%s8498_s0 + $0x144] sm:$0xff]   ;;  %v4822_v45 = vld [vmem:[%s8498_s0 + $0x14c] sm:$0xff]  }
   0xe   :  { %4346 = vmatpush3.bf16.msra.mxu0 %v4785_v6  ;;  %4456 = vmatpush3.bf16.msra.mxu1 %v4785_v6  ;;  %v4819_v42 = vld [vmem:[%s8498_s0 + $0x80] sm:$0xff]   ;;  %v4821_v44 = vld [vmem:[%s8498_s0 + $0x88] sm:$0xff]   ;;  %v4823_v46 = vld [vmem:[%s8498_s0 + $0x90] sm:$0xff]  }
   0xf   :  { %4347 = vmatprep.subr.bf16.mxu0 %v8502_v0  ;;  %4457 = vmatprep.subr.bf16.mxu1 %v8502_v0  ;;  %v4824_v47 = vld [vmem:[%s8498_s0 + $0x154] sm:$0xff]   ;;  %v4826_v49 = vld [vmem:[%s8498_s0 + $0x15c] sm:$0xff]   ;;  %v4828_v51 = vld [vmem:[%s8498_s0 + $0x164] sm:$0xff]  }
  0x10   :  { %v4825_v48 = vld [vmem:[%s8498_s0 + $0x98] sm:$0xff]   ;;  %v4827_v50 = vld [vmem:[%s8498_s0 + $0xa0] sm:$0xff]   ;;  %v4829_v52 = vld [vmem:[%s8498_s0 + $0xa8] sm:$0xff]  }
  0x11   :  { %v4830_v53 = vld [vmem:[%s8498_s0 + $0x16c] sm:$0xff]   ;;  %v4832_v55 = vld [vmem:[%s8498_s0 + $0x174] sm:$0xff]   ;;  %v4834_v57 = vld [vmem:[%s8498_s0 + $0x17c] sm:$0xff]  }
  0x12   :  { %4348 = vmatpush3.bf16.msra.mxu0 %v310_v9  ;;  %4458 = vmatpush3.bf16.msra.mxu1 %v310_v9  ;;  %v4831_v54 = vld [vmem:[%s8498_s0 + $0xb0] sm:$0xff]   ;;  %v4833_v56 = vld [vmem:[%s8498_s0 + $0xb8] sm:$0xff]   ;;  %v4835_v58 = vld [vmem:[%s8498_s0 + $0xc0] ss:$0 sps:$4 sm:$0xff]  }
  0x13   :  { %4559 = vmatprep.subr.bf16.mxu0 %v8502_v0  ;;  %4669 = vmatprep.subr.bf16.mxu1 %v8502_v0  ;;  %v4836_v59 = vld [vmem:[%s8498_s0 + $0x184] ss:$0 sps:$4 sm:$0xff]   ;;  %v4837_v60 = vld [vmem:[%s8498_s0 + $0x188] sm:$0xff]   ;;  %v4839_v62 = vld [vmem:[%s8498_s0 + $0x190] sm:$0xff]  }
  0x14   :  { %v4838_v61 = vld [vmem:[%s8498_s0 + $0x24c] sm:$0xff]   ;;  %v4840_v63 = vld [vmem:[%s8498_s0 + $0x254] sm:$0xff]   ;;  %v4842_v7 = vld [vmem:[%s8498_s0 + $0x25c] sm:$0xff]  }
  0x15   :  { %4350 = vmatmul.mubr.msk.bf16.vlgmr.msra.gmra.mrb[0].mxu0 %vm229_vm3, %v4787_v10  ;;  %4460 = vmatmul.mubr.msk.bf16.vlgmr.msra.gmra.mrb[0].mxu1 %vm229_vm3, %v4788_v11 }
  0x16   :  { %4560 = vmatpush3.bf16.msra.mxu0 %v4782_v1  ;;  %4670 = vmatpush3.bf16.msra.mxu1 %v4782_v1 }
  0x17   :  { %4353 = vmatprep.mubr.msk.bf16.mxu0 %vm4890_vm0, %v8502_v0  ;;  %4463 = vmatprep.mubr.msk.bf16.mxu1 %vm4890_vm0, %v8502_v0 }
  0x18   :  { %4561 = vmatprep.subr.bf16.mxu0 %v8502_v0  ;;  %4671 = vmatprep.subr.bf16.mxu1 %v8502_v0 }
  0x1a   :  { %4562 = vmatpush3.bf16.msra.mxu0 %v4783_v2  ;;  %4672 = vmatpush3.bf16.msra.mxu1 %v4783_v2 }
  0x1b   :  { %4563 = vmatprep.subr.bf16.mxu0 %v8502_v0  ;;  %4673 = vmatprep.subr.bf16.mxu1 %v8502_v0 }
  0x1d   :  { %4354 = vmatmul.mubr.msk.bf16.gmra.mrb[4].mxu0 %vm229_vm3, %v4789_v12  ;;  %4464 = vmatmul.mubr.msk.bf16.gmra.mrb[4].mxu1 %vm229_vm3, %v4790_v13 }
  0x1e   :  { %4357 = vmatprep.mubr.msk.bf16.mxu0 %vm4890_vm0, %v8502_v0  ;;  %4467 = vmatprep.mubr.msk.bf16.mxu1 %vm4890_vm0, %v8502_v0 }
  0x1f   :  { %4564 = vmatpush3.bf16.msra.mxu0 %v4784_v3  ;;  %4674 = vmatpush3.bf16.msra.mxu1 %v4784_v3 }
  0x20   :  { %4565 = vmatprep.subr.bf16.mxu0 %v8502_v0  ;;  %4675 = vmatprep.subr.bf16.mxu1 %v8502_v0 }
  0x23   :  { %4566 = vmatpush3.bf16.msra.mxu0 %v4785_v6  ;;  %4676 = vmatpush3.bf16.msra.mxu1 %v4785_v6  ;;  %v4841_v6 = vld [vmem:[%s8498_s0 + $0x198] sm:$0xff]  }
  0x24   :  { %4567 = vmatprep.subr.bf16.mxu0 %v8502_v0  ;;  %4677 = vmatprep.subr.bf16.mxu1 %v8502_v0 }
  0x25   :  { %4358 = vmatmul.mubr.msk.bf16.gmra.mrb[8].mxu0 %vm229_vm3, %v4791_v14  ;;  %4468 = vmatmul.mubr.msk.bf16.gmra.mrb[8].mxu1 %vm229_vm3, %v4792_v15 }
  0x26   :  { %4361 = vmatprep.mubr.msk.bf16.mxu0 %vm4890_vm0, %v8502_v0  ;;  %4471 = vmatprep.mubr.msk.bf16.mxu1 %vm4890_vm0, %v8502_v0 }
  0x27   :  { %4568 = vmatpush3.bf16.msra.mxu0 %v310_v9  ;;  %4678 = vmatpush3.bf16.msra.mxu1 %v310_v9 }
  0x2d   :  { %4362 = vmatmul.mubr.msk.bf16.gmra.mrb[12].mxu0 %vm229_vm3, %v4793_v16  ;;  %4472 = vmatmul.mubr.msk.bf16.gmra.mrb[12].mxu1 %vm229_vm3, %v4794_v17 }
  0x2e   :  { %4365 = vmatprep.mubr.msk.bf16.mxu0 %vm4890_vm0, %v8502_v0  ;;  %4475 = vmatprep.mubr.msk.bf16.mxu1 %vm4890_vm0, %v8502_v0 }
  0x35   :  { %4366 = vmatmul.mubr.msk.bf16.gmra.mrb[16].mxu0 %vm229_vm3, %v4795_v18  ;;  %4476 = vmatmul.mubr.msk.bf16.gmra.mrb[16].mxu1 %vm229_vm3, %v4796_v19 }
  0x36   :  { %4369 = vmatprep.mubr.msk.bf16.mxu0 %vm4890_vm0, %v8502_v0  ;;  %4479 = vmatprep.mubr.msk.bf16.mxu1 %vm4890_vm0, %v8502_v0 }
  0x3d   :  { %4370 = vmatmul.mubr.msk.bf16.gmra.mrb[20].mxu0 %vm229_vm3, %v4797_v20  ;;  %4480 = vmatmul.mubr.msk.bf16.gmra.mrb[20].mxu1 %vm229_vm3, %v4798_v21 }
  0x3e   :  { %4373 = vmatprep.mubr.msk.bf16.mxu0 %vm4890_vm0, %v8502_v0  ;;  %4483 = vmatprep.mubr.msk.bf16.mxu1 %vm4890_vm0, %v8502_v0 }
  0x45   :  { %4374 = vmatmul.mubr.msk.bf16.gmra.mrb[24].mxu0 %vm229_vm3, %v4799_v22  ;;  %4484 = vmatmul.mubr.msk.bf16.gmra.mrb[24].mxu1 %vm229_vm3, %v4800_v23 }
  0x46   :  { %4377 = vmatprep.mubr.msk.bf16.mxu0 %vm4890_vm0, %v8502_v0  ;;  %4487 = vmatprep.mubr.msk.bf16.mxu1 %vm4890_vm0, %v8502_v0 }
  0x4d   :  { %4378 = vmatmul.mubr.msk.bf16.gmra.mrb[28].mxu0 %vm229_vm3, %v4801_v24  ;;  %4488 = vmatmul.mubr.msk.bf16.gmra.mrb[28].mxu1 %vm229_vm3, %v4802_v25 }
  0x4e   :  { %4381 = vmatprep.mubr.msk.bf16.mxu0 %vm4890_vm0, %v8502_v0  ;;  %4491 = vmatprep.mubr.msk.bf16.mxu1 %vm4890_vm0, %v8502_v0 }
  0x55   :  { %4382 = vmatmul.mubr.msk.bf16.gmra.mrb[32].mxu0 %vm229_vm3, %v4803_v26  ;;  %4492 = vmatmul.mubr.msk.bf16.gmra.mrb[32].mxu1 %vm229_vm3, %v4804_v27  ;;  %v4843_v27 = vld [vmem:[%s8498_s0 + $0x1a0] sm:$0xff]  }
  0x56   :  { %4385 = vmatprep.mubr.msk.bf16.mxu0 %vm4890_vm0, %v8502_v0  ;;  %4495 = vmatprep.mubr.msk.bf16.mxu1 %vm4890_vm0, %v8502_v0 }
  0x5d   :  { %4386 = vmatmul.mubr.msk.bf16.gmra.mrb[36].mxu0 %vm229_vm3, %v4805_v28  ;;  %4496 = vmatmul.mubr.msk.bf16.gmra.mrb[36].mxu1 %vm229_vm3, %v4806_v29  ;;  %v4844_v28 = vld [vmem:[%s8498_s0 + $0x264] sm:$0xff]  }
  0x5e   :  { %4389 = vmatprep.mubr.msk.bf16.mxu0 %vm4890_vm0, %v8502_v0  ;;  %4499 = vmatprep.mubr.msk.bf16.mxu1 %vm4890_vm0, %v8502_v0 }
  0x65   :  { %4390 = vmatmul.mubr.msk.bf16.gmra.mrb[40].mxu0 %vm229_vm3, %v4807_v30  ;;  %4500 = vmatmul.mubr.msk.bf16.gmra.mrb[40].mxu1 %vm229_vm3, %v4808_v31 }
  0x66   :  { %4393 = vmatprep.mubr.msk.bf16.mxu0 %vm4890_vm0, %v8502_v0  ;;  %4503 = vmatprep.mubr.msk.bf16.mxu1 %vm4890_vm0, %v8502_v0 }
  0x6d   :  { %4394 = vmatmul.mubr.msk.bf16.gmra.mrb[44].mxu0 %vm229_vm3, %v4809_v32  ;;  %4504 = vmatmul.mubr.msk.bf16.gmra.mrb[44].mxu1 %vm229_vm3, %v4810_v33 }
  0x6e   :  { %4397 = vmatprep.mubr.msk.bf16.mxu0 %vm4890_vm0, %v8502_v0  ;;  %4507 = vmatprep.mubr.msk.bf16.mxu1 %vm4890_vm0, %v8502_v0 }
  0x75   :  { %4398 = vmatmul.mubr.msk.bf16.gmra.mrb[48].mxu0 %vm229_vm3, %v4811_v34  ;;  %4508 = vmatmul.mubr.msk.bf16.gmra.mrb[48].mxu1 %vm229_vm3, %v4812_v35 }
  0x76   :  { %4401 = vmatprep.mubr.msk.bf16.mxu0 %vm4890_vm0, %v8502_v0  ;;  %4511 = vmatprep.mubr.msk.bf16.mxu1 %vm4890_vm0, %v8502_v0 }
  0x7d   :  { %4402 = vmatmul.mubr.msk.bf16.gmra.mrb[52].mxu0 %vm229_vm3, %v4813_v36  ;;  %4512 = vmatmul.mubr.msk.bf16.gmra.mrb[52].mxu1 %vm229_vm3, %v4814_v37 }
  0x7e   :  { %4405 = vmatprep.mubr.msk.bf16.mxu0 %vm4890_vm0, %v8502_v0  ;;  %4515 = vmatprep.mubr.msk.bf16.mxu1 %vm4890_vm0, %v8502_v0 }
  0x85   :  { %4406 = vmatmul.mubr.msk.bf16.gmra.mrb[56].mxu0 %vm229_vm3, %v4815_v38  ;;  %4516 = vmatmul.mubr.msk.bf16.gmra.mrb[56].mxu1 %vm229_vm3, %v4816_v39 }
  0x86   :  { %4409 = vmatprep.mubr.msk.bf16.mxu0 %vm4890_vm0, %v8502_v0  ;;  %4519 = vmatprep.mubr.msk.bf16.mxu1 %vm4890_vm0, %v8502_v0 }
  0x8d   :  { %4410 = vmatmul.mubr.msk.bf16.gmra.mrb[60].mxu0 %vm229_vm3, %v4817_v40  ;;  %4520 = vmatmul.mubr.msk.bf16.gmra.mrb[60].mxu1 %vm229_vm3, %v4818_v41 }
  0x8e   :  { %4413 = vmatprep.mubr.msk.bf16.mxu0 %vm4890_vm0, %v8502_v0  ;;  %4523 = vmatprep.mubr.msk.bf16.mxu1 %vm4890_vm0, %v8502_v0 }
  0x95   :  { %4414 = vmatmul.mubr.msk.bf16.gmra.mrb[64].mxu0 %vm229_vm3, %v4819_v42  ;;  %4524 = vmatmul.mubr.msk.bf16.gmra.mrb[64].mxu1 %vm229_vm3, %v4820_v43 }
  0x96   :  { %4417 = vmatprep.mubr.msk.bf16.mxu0 %vm4890_vm0, %v8502_v0  ;;  %4527 = vmatprep.mubr.msk.bf16.mxu1 %vm4890_vm0, %v8502_v0 }
  0x9d   :  { %4418 = vmatmul.mubr.msk.bf16.gmra.mrb[68].mxu0 %vm229_vm3, %v4821_v44  ;;  %4528 = vmatmul.mubr.msk.bf16.gmra.mrb[68].mxu1 %vm229_vm3, %v4822_v45 }
  0x9e   :  { %4421 = vmatprep.mubr.msk.bf16.mxu0 %vm4890_vm0, %v8502_v0  ;;  %4531 = vmatprep.mubr.msk.bf16.mxu1 %vm4890_vm0, %v8502_v0 }
  0xa5   :  { %4422 = vmatmul.mubr.msk.bf16.gmra.mrb[72].mxu0 %vm229_vm3, %v4823_v46  ;;  %4532 = vmatmul.mubr.msk.bf16.gmra.mrb[72].mxu1 %vm229_vm3, %v4824_v47 }
  0xa6   :  { %4425 = vmatprep.mubr.msk.bf16.mxu0 %vm4890_vm0, %v8502_v0  ;;  %4535 = vmatprep.mubr.msk.bf16.mxu1 %vm4890_vm0, %v8502_v0 }
  0xad   :  { %4426 = vmatmul.mubr.msk.bf16.gmra.mrb[76].mxu0 %vm229_vm3, %v4825_v48  ;;  %4536 = vmatmul.mubr.msk.bf16.gmra.mrb[76].mxu1 %vm229_vm3, %v4826_v49  ;;  %v4845_v49 = vld [vmem:[%s8498_s0 + $0x1a8] sm:$0xff]  }
  0xae   :  { %4429 = vmatprep.mubr.msk.bf16.mxu0 %vm4890_vm0, %v8502_v0  ;;  %4539 = vmatprep.mubr.msk.bf16.mxu1 %vm4890_vm0, %v8502_v0 }
  0xb5   :  { %4430 = vmatmul.mubr.msk.bf16.gmra.mrb[80].mxu0 %vm229_vm3, %v4827_v50  ;;  %4540 = vmatmul.mubr.msk.bf16.gmra.mrb[80].mxu1 %vm229_vm3, %v4828_v51  ;;  %v4846_v50 = vld [vmem:[%s8498_s0 + $0x26c] sm:$0xff]  }
  0xb6   :  { %4433 = vmatprep.mubr.msk.bf16.mxu0 %vm4890_vm0, %v8502_v0  ;;  %4543 = vmatprep.mubr.msk.bf16.mxu1 %vm4890_vm0, %v8502_v0 }
  0xbd   :  { %4434 = vmatmul.mubr.msk.bf16.gmra.mrb[84].mxu0 %vm229_vm3, %v4829_v52  ;;  %4544 = vmatmul.mubr.msk.bf16.gmra.mrb[84].mxu1 %vm229_vm3, %v4830_v53 }
  0xbe   :  { %4437 = vmatprep.mubr.msk.bf16.mxu0 %vm4890_vm0, %v8502_v0  ;;  %4547 = vmatprep.mubr.msk.bf16.mxu1 %vm4890_vm0, %v8502_v0 }
  0xc5   :  { %4438 = vmatmul.mubr.msk.bf16.gmra.mrb[88].mxu0 %vm229_vm3, %v4831_v54  ;;  %4548 = vmatmul.mubr.msk.bf16.gmra.mrb[88].mxu1 %vm229_vm3, %v4832_v55 }
  0xc6   :  { %4441 = vmatprep.mubr.msk.bf16.mxu0 %vm4890_vm0, %v8502_v0  ;;  %4551 = vmatprep.mubr.msk.bf16.mxu1 %vm4890_vm0, %v8502_v0 }
  0xcd   :  { %4442 = vmatmul.mubr.msk.bf16.gmra.mrb[92].mxu0 %vm229_vm3, %v4833_v56  ;;  %4552 = vmatmul.mubr.msk.bf16.gmra.mrb[92].mxu1 %vm229_vm3, %v4834_v57 }
  0xce   :  { %4445 = vmatprep.mubr.msk.bf16.mxu0 %vm4890_vm0, %v8502_v0  ;;  %4555 = vmatprep.mubr.msk.bf16.mxu1 %vm4890_vm0, %v8502_v0 }
  0xd5   :  { %4446 = vmatmul.mubr.msk.bf16.gmra.mrb[96].mxu0 %vm229_vm3, %v4835_v58  ;;  %4556 = vmatmul.mubr.msk.bf16.gmra.mrb[96].mxu1 %vm229_vm3, %v4836_v59 }
  0xd6   :  { %4569 = vmatprep.mubr.msk.bf16.mxu0 %vm4890_vm0, %v8502_v0  ;;  %4679 = vmatprep.mubr.msk.bf16.mxu1 %vm4890_vm0, %v8502_v0 }
  0xdd   :  { %4570 = vmatmul.mubr.msk.bf16.vlgmr.msra.gmra.mrb[100].mxu0 %vm229_vm3, %v4837_v60  ;;  %4680 = vmatmul.mubr.msk.bf16.vlgmr.msra.gmra.mrb[100].mxu1 %vm229_vm3, %v4838_v61 }
  0xde   :  { %4573 = vmatprep.mubr.msk.bf16.mxu0 %vm4890_vm0, %v8502_v0  ;;  %4683 = vmatprep.mubr.msk.bf16.mxu1 %vm4890_vm0, %v8502_v0 }
  0xe5   :  { %4574 = vmatmul.mubr.msk.bf16.gmra.mrb[104].mxu0 %vm229_vm3, %v4839_v62  ;;  %4684 = vmatmul.mubr.msk.bf16.gmra.mrb[104].mxu1 %vm229_vm3, %v4840_v63 }
  0xe6   :  { %4577 = vmatprep.mubr.msk.bf16.mxu0 %vm4890_vm0, %v8502_v0  ;;  %4687 = vmatprep.mubr.msk.bf16.mxu1 %vm4890_vm0, %v8502_v0 }
  0xe8   :  { %v5280_v1 = vpop.f32.mrb[0].mxu0  ;;  %v5282_v2 = vpop.f32.mrb[0].mxu1 }
  0xe9   :  { %8813 = vst [vmem:[#allocation2_spill] sm:$0xff] %v5282_v2  ;;  %v2198_v3 = vmul.f32 %v5282_v2, %v5282_v2  ;;  %v4351_v4 = vpop.f32.mrb[1].mxu0  ;;  %v4461_v5 = vpop.f32.mrb[1].mxu1  ;;  %v2040_v8 = vmul.f32 %v5280_v1, %v5280_v1 }
  0xea   :  { %v5294_v9 = vpop.f32.mrb[2].mxu0  ;;  %v5296_v10 = vpop.f32.mrb[2].mxu1 }
  0xeb   :  { %8814 = vst [vmem:[#allocation3_spill] sm:$0xff] %v5296_v10  ;;  %v1986_v11 = vadd.f32 %v5294_v9, %v5280_v1  ;;  %v2041_v12 = vmul.f32 %v5294_v9, %v5294_v9  ;;  %v2143_v13 = vadd.f32 %v5296_v10, %v5282_v2  ;;  %v2199_v14 = vmul.f32 %v5296_v10, %v5296_v10  ;;  %v4352_v15 = vpop.f32.mrb[3].mxu0  ;;  %v4462_v16 = vpop.f32.mrb[3].mxu1 }
  0xed   :  { %v2089_v17 = vadd.f32 %v2041_v12, %v2040_v8  ;;  %v2247_v18 = vadd.f32 %v2199_v14, %v2198_v3  ;;  %4578 = vmatmul.mubr.msk.bf16.gmra.mrb[108].mxu0 %vm229_vm3, %v4841_v6  ;;  %4688 = vmatmul.mubr.msk.bf16.gmra.mrb[108].mxu1 %vm229_vm3, %v4842_v7  ;;  %v4847_v12 = vld [vmem:[%s8498_s0 + $0x1b0] sm:$0xff]  }
  0xee   :  { %4581 = vmatprep.mubr.msk.bf16.mxu0 %vm4890_vm0, %v8502_v0  ;;  %4691 = vmatprep.mubr.msk.bf16.mxu1 %vm4890_vm0, %v8502_v0 }
  0xf0   :  { %v5312_v19 = vpop.f32.mrb[4].mxu0  ;;  %v5314_v20 = vpop.f32.mrb[4].mxu1 }
  0xf1   :  { %8815 = vst [vmem:[#allocation4_spill] sm:$0xff] %v5314_v20  ;;  %v1987_v21 = vadd.f32 %v1986_v11, %v5312_v19  ;;  %v2042_v22 = vmul.f32 %v5312_v19, %v5312_v19  ;;  %v2144_v23 = vadd.f32 %v2143_v13, %v5314_v20  ;;  %v2200_v24 = vmul.f32 %v5314_v20, %v5314_v20  ;;  %v4355_v25 = vpop.f32.mrb[5].mxu0  ;;  %v4465_v26 = vpop.f32.mrb[5].mxu1  ;;  %v4848_v13 = vld [vmem:[%s8498_s0 + $0x274] sm:$0xff]  }
  0xf2   :  { %v5328_v29 = vpop.f32.mrb[6].mxu0  ;;  %v5330_v30 = vpop.f32.mrb[6].mxu1 }
  0xf3   :  { %8816 = vst [vmem:[#allocation5_spill] sm:$0xff] %v5330_v30  ;;  %v2090_v31 = vadd.f32 %v2089_v17, %v2042_v22  ;;  %v2248_v32 = vadd.f32 %v2247_v18, %v2200_v24  ;;  %v1988_v33 = vadd.f32 %v1987_v21, %v5328_v29  ;;  %v2043_v34 = vmul.f32 %v5328_v29, %v5328_v29  ;;  %v4356_v35 = vpop.f32.mrb[7].mxu0  ;;  %v4466_v36 = vpop.f32.mrb[7].mxu1 }
  0xf4   :  { %v2145_v37 = vadd.f32 %v2144_v23, %v5330_v30  ;;  %v2201_v38 = vmul.f32 %v5330_v30, %v5330_v30 }
  0xf5   :  { %v2091_v39 = vadd.f32 %v2090_v31, %v2043_v34  ;;  %4582 = vmatmul.mubr.msk.bf16.gmra.mrb[112].mxu0 %vm229_vm3, %v4843_v27  ;;  %4692 = vmatmul.mubr.msk.bf16.gmra.mrb[112].mxu1 %vm229_vm3, %v4844_v28 }
  0xf6   :  { %v2249_v40 = vadd.f32 %v2248_v32, %v2201_v38  ;;  %4585 = vmatprep.mubr.msk.bf16.mxu0 %vm4890_vm0, %v8502_v0  ;;  %4695 = vmatprep.mubr.msk.bf16.mxu1 %vm4890_vm0, %v8502_v0  ;;  %v4849_v38 = vld [vmem:[%s8498_s0 + $0x1b8] sm:$0xff]  }
  0xf8   :  { %v5344_v41 = vpop.f32.mrb[8].mxu0  ;;  %v5346_v42 = vpop.f32.mrb[8].mxu1 }
  0xf9   :  { %8817 = vst [vmem:[#allocation6_spill] sm:$0xff] %v5346_v42  ;;  %v1989_v43 = vadd.f32 %v1988_v33, %v5344_v41  ;;  %v2044_v44 = vmul.f32 %v5344_v41, %v5344_v41  ;;  %v2146_v45 = vadd.f32 %v2145_v37, %v5346_v42  ;;  %v2202_v46 = vmul.f32 %v5346_v42, %v5346_v42  ;;  %v4359_v47 = vpop.f32.mrb[9].mxu0  ;;  %v4469_v48 = vpop.f32.mrb[9].mxu1 }
  0xfa   :  { %v5360_v51 = vpop.f32.mrb[10].mxu0  ;;  %v5362_v52 = vpop.f32.mrb[10].mxu1 }
  0xfb   :  { %8818 = vst [vmem:[#allocation7_spill] sm:$0xff] %v5362_v52  ;;  %v2092_v53 = vadd.f32 %v2091_v39, %v2044_v44  ;;  %v2250_v54 = vadd.f32 %v2249_v40, %v2202_v46  ;;  %v1990_v55 = vadd.f32 %v1989_v43, %v5360_v51  ;;  %v2045_v56 = vmul.f32 %v5360_v51, %v5360_v51  ;;  %v4360_v57 = vpop.f32.mrb[11].mxu0  ;;  %v4470_v58 = vpop.f32.mrb[11].mxu1  ;;  %v4850_v39 = vld [vmem:[%s8498_s0 + $0x27c] sm:$0xff]  }
  0xfc   :  { %v2147_v59 = vadd.f32 %v2146_v45, %v5362_v52  ;;  %v2203_v60 = vmul.f32 %v5362_v52, %v5362_v52 }
  0xfd   :  { %v2093_v61 = vadd.f32 %v2092_v53, %v2045_v56  ;;  %4586 = vmatmul.mubr.msk.bf16.gmra.mrb[116].mxu0 %vm229_vm3, %v4845_v49  ;;  %4696 = vmatmul.mubr.msk.bf16.gmra.mrb[116].mxu1 %vm229_vm3, %v4846_v50 }
  0xfe   :  { %v2251_v62 = vadd.f32 %v2250_v54, %v2203_v60  ;;  %4589 = vmatprep.mubr.msk.bf16.mxu0 %vm4890_vm0, %v8502_v0  ;;  %4699 = vmatprep.mubr.msk.bf16.mxu1 %vm4890_vm0, %v8502_v0 }
 0x100   :  { %v5376_v63 = vpop.f32.mrb[12].mxu0  ;;  %v5378_v3 = vpop.f32.mrb[12].mxu1 }
 0x101   :  { %8819 = vst [vmem:[#allocation8_spill] sm:$0xff] %v5378_v3  ;;  %v1991_v4 = vadd.f32 %v1990_v55, %v5376_v63  ;;  %v2046_v5 = vmul.f32 %v5376_v63, %v5376_v63  ;;  %v2148_v6 = vadd.f32 %v2147_v59, %v5378_v3  ;;  %v2204_v7 = vmul.f32 %v5378_v3, %v5378_v3  ;;  %v4363_v8 = vpop.f32.mrb[13].mxu0  ;;  %v4473_v11 = vpop.f32.mrb[13].mxu1 }
 0x102   :  { %v5392_v14 = vpop.f32.mrb[14].mxu0  ;;  %v5394_v15 = vpop.f32.mrb[14].mxu1 }
 0x103   :  { %8820 = vst [vmem:[#allocation9_spill] sm:$0xff] %v5394_v15  ;;  %v2094_v16 = vadd.f32 %v2093_v61, %v2046_v5  ;;  %v2252_v17 = vadd.f32 %v2251_v62, %v2204_v7  ;;  %v1992_v18 = vadd.f32 %v1991_v4, %v5392_v14  ;;  %v2047_v21 = vmul.f32 %v5392_v14, %v5392_v14  ;;  %v4364_v22 = vpop.f32.mrb[15].mxu0  ;;  %v4474_v23 = vpop.f32.mrb[15].mxu1  ;;  %v4851_v5 = vld [vmem:[%s8498_s0 + $0x1c0] sm:$0xff]  }
 0x104   :  { %v2149_v24 = vadd.f32 %v2148_v6, %v5394_v15  ;;  %v2205_v25 = vmul.f32 %v5394_v15, %v5394_v15  ;;  %v4852_v6 = vld [vmem:[%s8498_s0 + $0x284] sm:$0xff]  }
 0x105   :  { %v2095_v26 = vadd.f32 %v2094_v16, %v2047_v21  ;;  %4590 = vmatmul.mubr.msk.bf16.gmra.mrb[120].mxu0 %vm229_vm3, %v4847_v12  ;;  %4700 = vmatmul.mubr.msk.bf16.gmra.mrb[120].mxu1 %vm229_vm3, %v4848_v13 }
 0x106   :  { %v2253_v27 = vadd.f32 %v2252_v17, %v2205_v25  ;;  %4593 = vmatprep.mubr.msk.bf16.mxu0 %vm4890_vm0, %v8502_v0  ;;  %4703 = vmatprep.mubr.msk.bf16.mxu1 %vm4890_vm0, %v8502_v0 }
 0x108   :  { %v5408_v28 = vpop.f32.mrb[16].mxu0  ;;  %v5410_v31 = vpop.f32.mrb[16].mxu1 }
 0x109   :  { %8821 = vst [vmem:[#allocation10_spill] sm:$0xff] %v5410_v31  ;;  %v1993_v32 = vadd.f32 %v1992_v18, %v5408_v28  ;;  %v2048_v33 = vmul.f32 %v5408_v28, %v5408_v28  ;;  %v2150_v34 = vadd.f32 %v2149_v24, %v5410_v31  ;;  %v2206_v35 = vmul.f32 %v5410_v31, %v5410_v31  ;;  %v4367_v36 = vpop.f32.mrb[17].mxu0  ;;  %v4477_v37 = vpop.f32.mrb[17].mxu1 }
 0x10a   :  { %v5424_v40 = vpop.f32.mrb[18].mxu0  ;;  %v5426_v43 = vpop.f32.mrb[18].mxu1  ;;  %v4853_v37 = vld [vmem:[%s8498_s0 + $0x1c8] sm:$0xff]  }
 0x10b   :  { %8822 = vst [vmem:[#allocation11_spill] sm:$0xff] %v5426_v43  ;;  %v2096_v44 = vadd.f32 %v2095_v26, %v2048_v33  ;;  %v2254_v45 = vadd.f32 %v2253_v27, %v2206_v35  ;;  %v1994_v46 = vadd.f32 %v1993_v32, %v5424_v40  ;;  %v2049_v47 = vmul.f32 %v5424_v40, %v5424_v40  ;;  %v4368_v48 = vpop.f32.mrb[19].mxu0  ;;  %v4478_v49 = vpop.f32.mrb[19].mxu1 }
 0x10c   :  { %v2151_v50 = vadd.f32 %v2150_v34, %v5426_v43  ;;  %v2207_v53 = vmul.f32 %v5426_v43, %v5426_v43 }
 0x10d   :  { %v2097_v54 = vadd.f32 %v2096_v44, %v2049_v47  ;;  %4594 = vmatmul.mubr.msk.bf16.gmra.mrb[124].mxu0 %vm229_vm3, %v4849_v38  ;;  %4704 = vmatmul.mubr.msk.bf16.gmra.mrb[124].mxu1 %vm229_vm3, %v4850_v39  ;;  %v4854_v38 = vld [vmem:[%s8498_s0 + $0x28c] sm:$0xff]  }
 0x10e   :  { %v2255_v55 = vadd.f32 %v2254_v45, %v2207_v53  ;;  %4597 = vmatprep.mubr.msk.bf16.mxu0 %vm4890_vm0, %v8502_v0  ;;  %4707 = vmatprep.mubr.msk.bf16.mxu1 %vm4890_vm0, %v8502_v0 }
 0x110   :  { %v5440_v56 = vpop.f32.mrb[20].mxu0  ;;  %v5442_v57 = vpop.f32.mrb[20].mxu1 }
 0x111   :  { %8823 = vst [vmem:[#allocation12_spill] sm:$0xff] %v5442_v57  ;;  %v1995_v58 = vadd.f32 %v1994_v46, %v5440_v56  ;;  %v2050_v59 = vmul.f32 %v5440_v56, %v5440_v56  ;;  %v2152_v60 = vadd.f32 %v2151_v50, %v5442_v57  ;;  %v2208_v61 = vmul.f32 %v5442_v57, %v5442_v57  ;;  %v4371_v62 = vpop.f32.mrb[21].mxu0  ;;  %v4481_v4 = vpop.f32.mrb[21].mxu1 }
 0x112   :  { %v5456_v7 = vpop.f32.mrb[22].mxu0  ;;  %v5458_v8 = vpop.f32.mrb[22].mxu1 }
 0x113   :  { %8824 = vst [vmem:[#allocation13_spill] sm:$0xff] %v5458_v8  ;;  %v2098_v11 = vadd.f32 %v2097_v54, %v2050_v59  ;;  %v2256_v12 = vadd.f32 %v2255_v55, %v2208_v61  ;;  %v1996_v13 = vadd.f32 %v1995_v58, %v5456_v7  ;;  %v2051_v16 = vmul.f32 %v5456_v7, %v5456_v7  ;;  %v4372_v17 = vpop.f32.mrb[23].mxu0  ;;  %v4482_v18 = vpop.f32.mrb[23].mxu1 }
 0x114   :  { %v2153_v21 = vadd.f32 %v2152_v60, %v5458_v8  ;;  %v2209_v22 = vmul.f32 %v5458_v8, %v5458_v8 }
 0x115   :  { %v2099_v23 = vadd.f32 %v2098_v11, %v2051_v16  ;;  %4598 = vmatmul.mubr.msk.bf16.gmra.mrb[128].mxu0 %vm229_vm3, %v4851_v5  ;;  %4708 = vmatmul.mubr.msk.bf16.gmra.mrb[128].mxu1 %vm229_vm3, %v4852_v6 }
 0x116   :  { %v2257_v24 = vadd.f32 %v2256_v12, %v2209_v22  ;;  %4601 = vmatprep.mubr.msk.bf16.mxu0 %vm4890_vm0, %v8502_v0  ;;  %4711 = vmatprep.mubr.msk.bf16.mxu1 %vm4890_vm0, %v8502_v0  ;;  %v4855_v12 = vld [vmem:[%s8498_s0 + $0x1d0] sm:$0xff]  }
 0x118   :  { %v5472_v25 = vpop.f32.mrb[24].mxu0  ;;  %v5474_v26 = vpop.f32.mrb[24].mxu1 }
 0x119   :  { %8825 = vst [vmem:[#allocation14_spill] sm:$0xff] %v5474_v26  ;;  %v1997_v27 = vadd.f32 %v1996_v13, %v5472_v25  ;;  %v2052_v32 = vmul.f32 %v5472_v25, %v5472_v25  ;;  %v2154_v33 = vadd.f32 %v2153_v21, %v5474_v26  ;;  %v2210_v34 = vmul.f32 %v5474_v26, %v5474_v26  ;;  %v4375_v35 = vpop.f32.mrb[25].mxu0  ;;  %v4485_v36 = vpop.f32.mrb[25].mxu1  ;;  %v4856_v13 = vld [vmem:[%s8498_s0 + $0x294] sm:$0xff]  }
 0x11a   :  { %v5488_v39 = vpop.f32.mrb[26].mxu0  ;;  %v5490_v44 = vpop.f32.mrb[26].mxu1 }
 0x11b   :  { %8826 = vst [vmem:[#allocation15_spill] sm:$0xff] %v5490_v44  ;;  %v2100_v45 = vadd.f32 %v2099_v23, %v2052_v32  ;;  %v2258_v46 = vadd.f32 %v2257_v24, %v2210_v34  ;;  %v1998_v47 = vadd.f32 %v1997_v27, %v5488_v39  ;;  %v2053_v48 = vmul.f32 %v5488_v39, %v5488_v39  ;;  %v4376_v49 = vpop.f32.mrb[27].mxu0  ;;  %v4486_v50 = vpop.f32.mrb[27].mxu1 }
 0x11c   :  { %v2155_v53 = vadd.f32 %v2154_v33, %v5490_v44  ;;  %v2211_v54 = vmul.f32 %v5490_v44, %v5490_v44  ;;  %v4857_v50 = vld [vmem:[%s8498_s0 + $0x1d8] sm:$0xff]  }
 0x11d   :  { %v2101_v55 = vadd.f32 %v2100_v45, %v2053_v48  ;;  %4602 = vmatmul.mubr.msk.bf16.gmra.mrb[132].mxu0 %vm229_vm3, %v4853_v37  ;;  %4712 = vmatmul.mubr.msk.bf16.gmra.mrb[132].mxu1 %vm229_vm3, %v4854_v38 }
 0x11e   :  { %v2259_v58 = vadd.f32 %v2258_v46, %v2211_v54  ;;  %4605 = vmatprep.mubr.msk.bf16.mxu0 %vm4890_vm0, %v8502_v0  ;;  %4715 = vmatprep.mubr.msk.bf16.mxu1 %vm4890_vm0, %v8502_v0 }
 0x120   :  { %v5504_v59 = vpop.f32.mrb[28].mxu0  ;;  %v5506_v60 = vpop.f32.mrb[28].mxu1 }
 0x121   :  { %8827 = vst [vmem:[#allocation16_spill] sm:$0xff] %v5506_v60  ;;  %v1999_v61 = vadd.f32 %v1998_v47, %v5504_v59  ;;  %v2054_v62 = vmul.f32 %v5504_v59, %v5504_v59  ;;  %v2156_v4 = vadd.f32 %v2155_v53, %v5506_v60  ;;  %v2212_v5 = vmul.f32 %v5506_v60, %v5506_v60  ;;  %v4379_v6 = vpop.f32.mrb[29].mxu0  ;;  %v4489_v11 = vpop.f32.mrb[29].mxu1  ;;  %v4858_v53 = vld [vmem:[%s8498_s0 + $0x29c] sm:$0xff]  }
 0x122   :  { %v5520_v16 = vpop.f32.mrb[30].mxu0  ;;  %v5522_v17 = vpop.f32.mrb[30].mxu1 }
 0x123   :  { %8828 = vst [vmem:[#allocation17_spill] sm:$0xff] %v5522_v17  ;;  %v2102_v18 = vadd.f32 %v2101_v55, %v2054_v62  ;;  %v2260_v21 = vadd.f32 %v2259_v58, %v2212_v5  ;;  %v2000_v22 = vadd.f32 %v1999_v61, %v5520_v16  ;;  %v2055_v23 = vmul.f32 %v5520_v16, %v5520_v16  ;;  %v4380_v24 = vpop.f32.mrb[31].mxu0  ;;  %v4490_v27 = vpop.f32.mrb[31].mxu1 }
 0x124   :  { %v2157_v32 = vadd.f32 %v2156_v4, %v5522_v17  ;;  %v2213_v33 = vmul.f32 %v5522_v17, %v5522_v17 }
 0x125   :  { %v2103_v34 = vadd.f32 %v2102_v18, %v2055_v23  ;;  %4606 = vmatmul.mubr.msk.bf16.gmra.mrb[136].mxu0 %vm229_vm3, %v4855_v12  ;;  %4716 = vmatmul.mubr.msk.bf16.gmra.mrb[136].mxu1 %vm229_vm3, %v4856_v13 }
 0x126   :  { %v2261_v35 = vadd.f32 %v2260_v21, %v2213_v33  ;;  %4609 = vmatprep.mubr.msk.bf16.mxu0 %vm4890_vm0, %v8502_v0  ;;  %4719 = vmatprep.mubr.msk.bf16.mxu1 %vm4890_vm0, %v8502_v0 }
 0x128   :  { %v5536_v36 = vpop.f32.mrb[32].mxu0  ;;  %v5538_v37 = vpop.f32.mrb[32].mxu1 }
 0x129   :  { %8829 = vst [vmem:[#allocation18_spill] sm:$0xff] %v5538_v37  ;;  %v2001_v38 = vadd.f32 %v2000_v22, %v5536_v36  ;;  %v2056_v45 = vmul.f32 %v5536_v36, %v5536_v36  ;;  %v2158_v46 = vadd.f32 %v2157_v32, %v5538_v37  ;;  %v2214_v47 = vmul.f32 %v5538_v37, %v5538_v37  ;;  %v4383_v48 = vpop.f32.mrb[33].mxu0  ;;  %v4493_v49 = vpop.f32.mrb[33].mxu1 }
 0x12a   :  { %v5552_v54 = vpop.f32.mrb[34].mxu0  ;;  %v5554_v55 = vpop.f32.mrb[34].mxu1 }
 0x12b   :  { %8830 = vst [vmem:[#allocation19_spill] sm:$0xff] %v5554_v55  ;;  %v2104_v58 = vadd.f32 %v2103_v34, %v2056_v45  ;;  %v2262_v61 = vadd.f32 %v2261_v35, %v2214_v47  ;;  %v2002_v62 = vadd.f32 %v2001_v38, %v5552_v54  ;;  %v2057_v4 = vmul.f32 %v5552_v54, %v5552_v54  ;;  %v4384_v5 = vpop.f32.mrb[35].mxu0  ;;  %v4494_v6 = vpop.f32.mrb[35].mxu1  ;;  %v4859_v35 = vld [vmem:[%s8498_s0 + $0x1e0] sm:$0xff]  }
 0x12c   :  { %v2159_v11 = vadd.f32 %v2158_v46, %v5554_v55  ;;  %v2215_v12 = vmul.f32 %v5554_v55, %v5554_v55  ;;  %v4860_v38 = vld [vmem:[%s8498_s0 + $0x2a4] sm:$0xff]  }
 0x12d   :  { %v2105_v13 = vadd.f32 %v2104_v58, %v2057_v4  ;;  %4610 = vmatmul.mubr.msk.bf16.gmra.mrb[140].mxu0 %vm229_vm3, %v4857_v50  ;;  %4720 = vmatmul.mubr.msk.bf16.gmra.mrb[140].mxu1 %vm229_vm3, %v4858_v53 }
 0x12e   :  { %v2263_v18 = vadd.f32 %v2262_v61, %v2215_v12  ;;  %4613 = vmatprep.mubr.msk.bf16.mxu0 %vm4890_vm0, %v8502_v0  ;;  %4723 = vmatprep.mubr.msk.bf16.mxu1 %vm4890_vm0, %v8502_v0 }
 0x130   :  { %v5568_v21 = vpop.f32.mrb[36].mxu0  ;;  %v5570_v22 = vpop.f32.mrb[36].mxu1 }
 0x131   :  { %8831 = vst [vmem:[#allocation20_spill] sm:$0xff] %v5570_v22  ;;  %v2003_v23 = vadd.f32 %v2002_v62, %v5568_v21  ;;  %v2058_v24 = vmul.f32 %v5568_v21, %v5568_v21  ;;  %v2160_v27 = vadd.f32 %v2159_v11, %v5570_v22  ;;  %v2216_v32 = vmul.f32 %v5570_v22, %v5570_v22  ;;  %v4387_v33 = vpop.f32.mrb[37].mxu0  ;;  %v4497_v34 = vpop.f32.mrb[37].mxu1 }
 0x132   :  { %v5584_v45 = vpop.f32.mrb[38].mxu0  ;;  %v5586_v46 = vpop.f32.mrb[38].mxu1  ;;  %v4862_v33 = vld [vmem:[%s8498_s0 + $0x2ac] sm:$0xff]  }
 0x133   :  { %8832 = vst [vmem:[#allocation21_spill] sm:$0xff] %v5586_v46  ;;  %v2106_v47 = vadd.f32 %v2105_v13, %v2058_v24  ;;  %v2264_v48 = vadd.f32 %v2263_v18, %v2216_v32  ;;  %v2004_v49 = vadd.f32 %v2003_v23, %v5584_v45  ;;  %v2059_v50 = vmul.f32 %v5584_v45, %v5584_v45  ;;  %v4388_v53 = vpop.f32.mrb[39].mxu0  ;;  %v4498_v58 = vpop.f32.mrb[39].mxu1  ;;  %v4861_v32 = vld [vmem:[%s8498_s0 + $0x1e8] sm:$0xff]  }
 0x134   :  { %v2161_v61 = vadd.f32 %v2160_v27, %v5586_v46  ;;  %v2217_v62 = vmul.f32 %v5586_v46, %v5586_v46 }
 0x135   :  { %v2107_v4 = vadd.f32 %v2106_v47, %v2059_v50  ;;  %4614 = vmatmul.mubr.msk.bf16.gmra.mrb[144].mxu0 %vm229_vm3, %v4859_v35  ;;  %4724 = vmatmul.mubr.msk.bf16.gmra.mrb[144].mxu1 %vm229_vm3, %v4860_v38 }
 0x136   :  { %v2265_v5 = vadd.f32 %v2264_v48, %v2217_v62  ;;  %4617 = vmatprep.mubr.msk.bf16.mxu0 %vm4890_vm0, %v8502_v0  ;;  %4727 = vmatprep.mubr.msk.bf16.mxu1 %vm4890_vm0, %v8502_v0 }
 0x138   :  { %v5600_v6 = vpop.f32.mrb[40].mxu0  ;;  %v5602_v11 = vpop.f32.mrb[40].mxu1 }
 0x139   :  { %8833 = vst [vmem:[#allocation22_spill] sm:$0xff] %v5602_v11  ;;  %v2005_v12 = vadd.f32 %v2004_v49, %v5600_v6  ;;  %v2060_v13 = vmul.f32 %v5600_v6, %v5600_v6  ;;  %v2162_v18 = vadd.f32 %v2161_v61, %v5602_v11  ;;  %v2218_v23 = vmul.f32 %v5602_v11, %v5602_v11  ;;  %v4391_v24 = vpop.f32.mrb[41].mxu0  ;;  %v4501_v27 = vpop.f32.mrb[41].mxu1 }
 0x13a   :  { %v5616_v34 = vpop.f32.mrb[42].mxu0  ;;  %v5618_v35 = vpop.f32.mrb[42].mxu1 }
 0x13b   :  { %8834 = vst [vmem:[#allocation23_spill] sm:$0xff] %v5618_v35  ;;  %v2108_v38 = vadd.f32 %v2107_v4, %v2060_v13  ;;  %v2266_v47 = vadd.f32 %v2265_v5, %v2218_v23  ;;  %v2006_v48 = vadd.f32 %v2005_v12, %v5616_v34  ;;  %v2061_v49 = vmul.f32 %v5616_v34, %v5616_v34  ;;  %v4392_v50 = vpop.f32.mrb[43].mxu0  ;;  %v4502_v53 = vpop.f32.mrb[43].mxu1 }
 0x13c   :  { %v2163_v58 = vadd.f32 %v2162_v18, %v5618_v35  ;;  %v2219_v61 = vmul.f32 %v5618_v35, %v5618_v35 }
 0x13d   :  { %v2109_v62 = vadd.f32 %v2108_v38, %v2061_v49  ;;  %4618 = vmatmul.mubr.msk.bf16.gmra.mrb[148].mxu0 %vm229_vm3, %v4861_v32  ;;  %4728 = vmatmul.mubr.msk.bf16.gmra.mrb[148].mxu1 %vm229_vm3, %v4862_v33  ;;  %v4863_v33 = vld [vmem:[%s8498_s0 + $0x1f0] sm:$0xff]  }
 0x13e   :  { %v2267_v24 = vadd.f32 %v2266_v47, %v2219_v61  ;;  %4621 = vmatprep.mubr.msk.bf16.mxu0 %vm4890_vm0, %v8502_v0  ;;  %4731 = vmatprep.mubr.msk.bf16.mxu1 %vm4890_vm0, %v8502_v0  ;;  %v4864_v38 = vld [vmem:[%s8498_s0 + $0x2b4] sm:$0xff]  }
 0x140   :  { %v5632_v4 = vpop.f32.mrb[44].mxu0  ;;  %v5634_v5 = vpop.f32.mrb[44].mxu1 }
 0x141   :  { %8835 = vst [vmem:[#allocation24_spill] sm:$0xff] %v5634_v5  ;;  %v2007_v12 = vadd.f32 %v2006_v48, %v5632_v4  ;;  %v2062_v13 = vmul.f32 %v5632_v4, %v5632_v4  ;;  %v2164_v18 = vadd.f32 %v2163_v58, %v5634_v5  ;;  %v2220_v23 = vmul.f32 %v5634_v5, %v5634_v5  ;;  %v4395_v27 = vpop.f32.mrb[45].mxu0  ;;  %v4505_v32 = vpop.f32.mrb[45].mxu1 }
 0x142   :  { %v5648_v47 = vpop.f32.mrb[46].mxu0  ;;  %v5650_v48 = vpop.f32.mrb[46].mxu1 }
 0x143   :  { %8836 = vst [vmem:[#allocation25_spill] sm:$0xff] %v5650_v48  ;;  %v2110_v49 = vadd.f32 %v2109_v62, %v2062_v13  ;;  %v2268_v50 = vadd.f32 %v2267_v24, %v2220_v23  ;;  %v2008_v53 = vadd.f32 %v2007_v12, %v5648_v47  ;;  %v2063_v58 = vmul.f32 %v5648_v47, %v5648_v47  ;;  %v4396_v61 = vpop.f32.mrb[47].mxu0  ;;  %v4506_v27 = vpop.f32.mrb[47].mxu1 }
 0x144   :  { %v2165_v32 = vadd.f32 %v2164_v18, %v5650_v48  ;;  %v2221_v0 = vmul.f32 %v5650_v48, %v5650_v48  ;;  %v8837_v62 = vmov 0.0  }
 0x145   :  { %v2111_v5 = vadd.f32 %v2110_v49, %v2063_v58  ;;  %4622 = vmatmul.mubr.msk.bf16.gmra.mrb[152].mxu0 %vm229_vm3, %v4863_v33  ;;  %4732 = vmatmul.mubr.msk.bf16.gmra.mrb[152].mxu1 %vm229_vm3, %v4864_v38  ;;  %v4865_v49 = vld [vmem:[%s8498_s0 + $0x1f8] sm:$0xff]  }
 0x146   :  { %v2269_v35 = vadd.f32 %v2268_v50, %v2221_v0  ;;  %4625 = vmatprep.mubr.msk.bf16.mxu0 %vm4890_vm0, %v8837_v62  ;;  %4735 = vmatprep.mubr.msk.bf16.mxu1 %vm4890_vm0, %v8837_v62  ;;  %v4866_v50 = vld [vmem:[%s8498_s0 + $0x2bc] sm:$0xff]  }
 0x148   :  { %v5664_v24 = vpop.f32.mrb[48].mxu0  ;;  %v5666_v12 = vpop.f32.mrb[48].mxu1 }
 0x149   :  { %8838 = vst [vmem:[#allocation26_spill] sm:$0xff] %v5666_v12  ;;  %v2009_v13 = vadd.f32 %v2008_v53, %v5664_v24  ;;  %v2064_v18 = vmul.f32 %v5664_v24, %v5664_v24  ;;  %v2166_v23 = vadd.f32 %v2165_v32, %v5666_v12  ;;  %v2222_v0 = vmul.f32 %v5666_v12, %v5666_v12  ;;  %v4399_v33 = vpop.f32.mrb[49].mxu0  ;;  %v4509_v38 = vpop.f32.mrb[49].mxu1 }
 0x14a   :  { %v5680_v58 = vpop.f32.mrb[50].mxu0  ;;  %v5682_v53 = vpop.f32.mrb[50].mxu1 }
 0x14b   :  { %8839 = vst [vmem:[#allocation27_spill] sm:$0xff] %v5682_v53  ;;  %v2112_v61 = vadd.f32 %v2111_v5, %v2064_v18  ;;  %v2270_v27 = vadd.f32 %v2269_v35, %v2222_v0  ;;  %v2010_v32 = vadd.f32 %v2009_v13, %v5680_v58  ;;  %v2065_v33 = vmul.f32 %v5680_v58, %v5680_v58  ;;  %v4400_v38 = vpop.f32.mrb[51].mxu0  ;;  %v4510_v12 = vpop.f32.mrb[51].mxu1 }
 0x14c   :  { %v2167_v48 = vadd.f32 %v2166_v23, %v5682_v53  ;;  %v2223_v11 = vmul.f32 %v5682_v53, %v5682_v53 }
 0x14d   :  { %v2113_v46 = vadd.f32 %v2112_v61, %v2065_v33  ;;  %4626 = vmatmul.mubr.msk.bf16.gmra.mrb[156].mxu0 %vm229_vm3, %v4865_v49  ;;  %4736 = vmatmul.mubr.msk.bf16.gmra.mrb[156].mxu1 %vm229_vm3, %v4866_v50  ;;  %v4867_v49 = vld [vmem:[%s8498_s0 + $0x200] sm:$0xff]  }
 0x14e   :  { %v2271_v22 = vadd.f32 %v2270_v27, %v2223_v11  ;;  %4629 = vmatprep.mubr.msk.bf16.mxu0 %vm4890_vm0, %v8837_v62  ;;  %4739 = vmatprep.mubr.msk.bf16.mxu1 %vm4890_vm0, %v8837_v62  ;;  %v4868_v50 = vld [vmem:[%s8498_s0 + $0x2c4] sm:$0xff]  }
 0x150   :  { %v5696_v35 = vpop.f32.mrb[52].mxu0  ;;  %v5698_v5 = vpop.f32.mrb[52].mxu1 }
 0x151   :  { %8840 = vst [vmem:[#allocation28_spill] sm:$0xff] %v5698_v5  ;;  %v2011_v12 = vadd.f32 %v2010_v32, %v5696_v35  ;;  %v2066_v13 = vmul.f32 %v5696_v35, %v5696_v35  ;;  %v2168_v18 = vadd.f32 %v2167_v48, %v5698_v5  ;;  %v2224_v11 = vmul.f32 %v5698_v5, %v5698_v5  ;;  %v4403_v23 = vpop.f32.mrb[53].mxu0  ;;  %v4513_v0 = vpop.f32.mrb[53].mxu1 }
 0x152   :  { %v5712_v61 = vpop.f32.mrb[54].mxu0  ;;  %v5714_v27 = vpop.f32.mrb[54].mxu1 }
 0x153   :  { %8841 = vst [vmem:[#allocation29_spill] sm:$0xff] %v5714_v27  ;;  %v2114_v32 = vadd.f32 %v2113_v46, %v2066_v13  ;;  %v2272_v33 = vadd.f32 %v2271_v22, %v2224_v11  ;;  %v2012_v48 = vadd.f32 %v2011_v12, %v5712_v61  ;;  %v2067_v38 = vmul.f32 %v5712_v61, %v5712_v61  ;;  %v4404_v23 = vpop.f32.mrb[55].mxu0  ;;  %v4514_v0 = vpop.f32.mrb[55].mxu1 }
 0x154   :  { %v2169_v5 = vadd.f32 %v2168_v18, %v5714_v27  ;;  %v2225_v53 = vmul.f32 %v5714_v27, %v5714_v27 }
 0x155   :  { %v2115_v55 = vadd.f32 %v2114_v32, %v2067_v38  ;;  %4630 = vmatmul.mubr.msk.bf16.gmra.mrb[160].mxu0 %vm229_vm3, %v4867_v49  ;;  %4740 = vmatmul.mubr.msk.bf16.gmra.mrb[160].mxu1 %vm229_vm3, %v4868_v50  ;;  %v4869_v50 = vld [vmem:[%s8498_s0 + $0x208] sm:$0xff]  }
 0x156   :  { %v2273_v37 = vadd.f32 %v2272_v33, %v2225_v53  ;;  %4633 = vmatprep.mubr.msk.bf16.mxu0 %vm4890_vm0, %v8837_v62  ;;  %4743 = vmatprep.mubr.msk.bf16.mxu1 %vm4890_vm0, %v8837_v62  ;;  %v4870_v32 = vld [vmem:[%s8498_s0 + $0x2cc] sm:$0xff]  }
 0x158   :  { %v5728_v22 = vpop.f32.mrb[56].mxu0  ;;  %v5730_v46 = vpop.f32.mrb[56].mxu1 }
 0x159   :  { %8842 = vst [vmem:[#allocation30_spill] sm:$0xff] %v5730_v46  ;;  %v2013_v12 = vadd.f32 %v2012_v48, %v5728_v22  ;;  %v2068_v13 = vmul.f32 %v5728_v22, %v5728_v22  ;;  %v2170_v18 = vadd.f32 %v2169_v5, %v5730_v46  ;;  %v2226_v53 = vmul.f32 %v5730_v46, %v5730_v46  ;;  %v4407_v11 = vpop.f32.mrb[57].mxu0  ;;  %v4517_v49 = vpop.f32.mrb[57].mxu1 }
 0x15a   :  { %v5744_v33 = vpop.f32.mrb[58].mxu0  ;;  %v5746_v48 = vpop.f32.mrb[58].mxu1 }
 0x15b   :  { %8843 = vst [vmem:[#allocation31_spill] sm:$0xff] %v5746_v48  ;;  %v2116_v38 = vadd.f32 %v2115_v55, %v2068_v13  ;;  %v2274_v23 = vadd.f32 %v2273_v37, %v2226_v53  ;;  %v2014_v5 = vadd.f32 %v2013_v12, %v5744_v33  ;;  %v2069_v0 = vmul.f32 %v5744_v33, %v5744_v33  ;;  %v4408_v11 = vpop.f32.mrb[59].mxu0  ;;  %v4518_v49 = vpop.f32.mrb[59].mxu1 }
 0x15c   :  { %v2171_v46 = vadd.f32 %v2170_v18, %v5746_v48  ;;  %v2227_v27 = vmul.f32 %v5746_v48, %v5746_v48 }
 0x15d   :  { %v2117_v17 = vadd.f32 %v2116_v38, %v2069_v0  ;;  %4634 = vmatmul.mubr.msk.bf16.gmra.mrb[164].mxu0 %vm229_vm3, %v4869_v50  ;;  %4744 = vmatmul.mubr.msk.bf16.gmra.mrb[164].mxu1 %vm229_vm3, %v4870_v32  ;;  %v4871_v32 = vld [vmem:[%s8498_s0 + $0x210] sm:$0xff]  }
 0x15e   :  { %v2275_v60 = vadd.f32 %v2274_v23, %v2227_v27  ;;  %4637 = vmatprep.mubr.msk.bf16.mxu0 %vm4890_vm0, %v8837_v62  ;;  %4747 = vmatprep.mubr.msk.bf16.mxu1 %vm4890_vm0, %v8837_v62  ;;  %v4872_v38 = vld [vmem:[%s8498_s0 + $0x2d4] sm:$0xff]  }
 0x160   :  { %v5760_v37 = vpop.f32.mrb[60].mxu0  ;;  %v5762_v55 = vpop.f32.mrb[60].mxu1 }
 0x161   :  { %8844 = vst [vmem:[#allocation32_spill] sm:$0xff] %v5762_v55  ;;  %v2015_v12 = vadd.f32 %v2014_v5, %v5760_v37  ;;  %v2070_v13 = vmul.f32 %v5760_v37, %v5760_v37  ;;  %v2172_v18 = vadd.f32 %v2171_v46, %v5762_v55  ;;  %v2228_v27 = vmul.f32 %v5762_v55, %v5762_v55  ;;  %v4411_v53 = vpop.f32.mrb[61].mxu0  ;;  %v4521_v50 = vpop.f32.mrb[61].mxu1 }
 0x162   :  { %v5776_v23 = vpop.f32.mrb[62].mxu0  ;;  %v5778_v5 = vpop.f32.mrb[62].mxu1 }
 0x163   :  { %8845 = vst [vmem:[#allocation33_spill] sm:$0xff] %v5778_v5  ;;  %v2118_v0 = vadd.f32 %v2117_v17, %v2070_v13  ;;  %v2276_v11 = vadd.f32 %v2275_v60, %v2228_v27  ;;  %v2016_v46 = vadd.f32 %v2015_v12, %v5776_v23  ;;  %v2071_v49 = vmul.f32 %v5776_v23, %v5776_v23  ;;  %v4412_v53 = vpop.f32.mrb[63].mxu0  ;;  %v4522_v50 = vpop.f32.mrb[63].mxu1 }
 0x164   :  { %v2173_v55 = vadd.f32 %v2172_v18, %v5778_v5  ;;  %v2229_v48 = vmul.f32 %v5778_v5, %v5778_v5 }
 0x165   :  { %v2119_v44 = vadd.f32 %v2118_v0, %v2071_v49  ;;  %4638 = vmatmul.mubr.msk.bf16.gmra.mrb[168].mxu0 %vm229_vm3, %v4871_v32  ;;  %4748 = vmatmul.mubr.msk.bf16.gmra.mrb[168].mxu1 %vm229_vm3, %v4872_v38  ;;  %v4873_v38 = vld [vmem:[%s8498_s0 + $0x218] sm:$0xff]  }
 0x166   :  { %v2277_v26 = vadd.f32 %v2276_v11, %v2229_v48  ;;  %4641 = vmatprep.mubr.msk.bf16.mxu0 %vm4890_vm0, %v8837_v62  ;;  %4751 = vmatprep.mubr.msk.bf16.mxu1 %vm4890_vm0, %v8837_v62  ;;  %v4874_v0 = vld [vmem:[%s8498_s0 + $0x2dc] sm:$0xff]  }
 0x168   :  { %v5792_v60 = vpop.f32.mrb[64].mxu0  ;;  %v5794_v17 = vpop.f32.mrb[64].mxu1 }
 0x169   :  { %8846 = vst [vmem:[#allocation34_spill] sm:$0xff] %v5794_v17  ;;  %v2017_v12 = vadd.f32 %v2016_v46, %v5792_v60  ;;  %v2072_v13 = vmul.f32 %v5792_v60, %v5792_v60  ;;  %v2174_v18 = vadd.f32 %v2173_v55, %v5794_v17  ;;  %v2230_v48 = vmul.f32 %v5794_v17, %v5794_v17  ;;  %v4415_v27 = vpop.f32.mrb[65].mxu0  ;;  %v4525_v32 = vpop.f32.mrb[65].mxu1 }
 0x16a   :  { %v5808_v11 = vpop.f32.mrb[66].mxu0  ;;  %v5810_v46 = vpop.f32.mrb[66].mxu1 }
 0x16b   :  { %8847 = vst [vmem:[#allocation35_spill] sm:$0xff] %v5810_v46  ;;  %v2120_v49 = vadd.f32 %v2119_v44, %v2072_v13  ;;  %v2278_v53 = vadd.f32 %v2277_v26, %v2230_v48  ;;  %v2018_v55 = vadd.f32 %v2017_v12, %v5808_v11  ;;  %v2073_v50 = vmul.f32 %v5808_v11, %v5808_v11  ;;  %v4416_v27 = vpop.f32.mrb[67].mxu0  ;;  %v4526_v32 = vpop.f32.mrb[67].mxu1 }
 0x16c   :  { %v2175_v17 = vadd.f32 %v2174_v18, %v5810_v46  ;;  %v2231_v5 = vmul.f32 %v5810_v46, %v5810_v46 }
 0x16d   :  { %v2121_v8 = vadd.f32 %v2120_v49, %v2073_v50  ;;  %4642 = vmatmul.mubr.msk.bf16.gmra.mrb[172].mxu0 %vm229_vm3, %v4873_v38  ;;  %4752 = vmatmul.mubr.msk.bf16.gmra.mrb[172].mxu1 %vm229_vm3, %v4874_v0  ;;  %v4875_v0 = vld [vmem:[%s8498_s0 + $0x220] sm:$0xff]  }
 0x16e   :  { %v2279_v57 = vadd.f32 %v2278_v53, %v2231_v5  ;;  %4645 = vmatprep.mubr.msk.bf16.mxu0 %vm4890_vm0, %v8837_v62  ;;  %4755 = vmatprep.mubr.msk.bf16.mxu1 %vm4890_vm0, %v8837_v62  ;;  %v4876_v49 = vld [vmem:[%s8498_s0 + $0x2e4] sm:$0xff]  }
 0x170   :  { %v5824_v26 = vpop.f32.mrb[68].mxu0  ;;  %v5826_v44 = vpop.f32.mrb[68].mxu1 }
 0x171   :  { %8848 = vst [vmem:[#allocation36_spill] sm:$0xff] %v5826_v44  ;;  %v2019_v12 = vadd.f32 %v2018_v55, %v5824_v26  ;;  %v2074_v13 = vmul.f32 %v5824_v26, %v5824_v26  ;;  %v2176_v18 = vadd.f32 %v2175_v17, %v5826_v44  ;;  %v2232_v5 = vmul.f32 %v5826_v44, %v5826_v44  ;;  %v4419_v48 = vpop.f32.mrb[69].mxu0  ;;  %v4529_v38 = vpop.f32.mrb[69].mxu1 }
 0x172   :  { %v5840_v53 = vpop.f32.mrb[70].mxu0  ;;  %v5842_v55 = vpop.f32.mrb[70].mxu1 }
 0x173   :  { %8849 = vst [vmem:[#allocation37_spill] sm:$0xff] %v5840_v53  ;;  %8850 = vst [vmem:[#allocation38_spill] sm:$0xff] %v5842_v55  ;;  %v2122_v50 = vadd.f32 %v2121_v8, %v2074_v13  ;;  %v2280_v27 = vadd.f32 %v2279_v57, %v2232_v5  ;;  %v2020_v17 = vadd.f32 %v2019_v12, %v5840_v53  ;;  %v4420_v48 = vpop.f32.mrb[71].mxu0  ;;  %v4530_v38 = vpop.f32.mrb[71].mxu1 }
 0x174   :  { %v2075_v32 = vmul.f32 %v5840_v53, %v5840_v53  ;;  %v2177_v44 = vadd.f32 %v2176_v18, %v5842_v55  ;;  %v2233_v46 = vmul.f32 %v5842_v55, %v5842_v55 }
 0x175   :  { %4646 = vmatmul.mubr.msk.bf16.gmra.mrb[176].mxu0 %vm229_vm3, %v4875_v0  ;;  %4756 = vmatmul.mubr.msk.bf16.gmra.mrb[176].mxu1 %vm229_vm3, %v4876_v49  ;;  %v4877_v49 = vld [vmem:[%s8498_s0 + $0x228] sm:$0xff]  }
 0x176   :  { %v2123_v43 = vadd.f32 %v2122_v50, %v2075_v32  ;;  %v2281_v31 = vadd.f32 %v2280_v27, %v2233_v46  ;;  %4649 = vmatprep.mubr.msk.bf16.mxu0 %vm4890_vm0, %v8837_v62  ;;  %4759 = vmatprep.mubr.msk.bf16.mxu1 %vm4890_vm0, %v8837_v62  ;;  %v4878_v50 = vld [vmem:[%s8498_s0 + $0x2ec] sm:$0xff]  }
 0x178   :  { %v5856_v57 = vpop.f32.mrb[72].mxu0  ;;  %v5858_v8 = vpop.f32.mrb[72].mxu1 }
 0x179   :  { %8851 = vst [vmem:[#allocation39_spill] sm:$0xff] %v5856_v57  ;;  %8852 = vst [vmem:[#allocation40_spill] sm:$0xff] %v5858_v8  ;;  %v2021_v12 = vadd.f32 %v2020_v17, %v5856_v57  ;;  %v2076_v13 = vmul.f32 %v5856_v57, %v5856_v57  ;;  %v2178_v18 = vadd.f32 %v2177_v44, %v5858_v8  ;;  %v4423_v5 = vpop.f32.mrb[73].mxu0  ;;  %v4533_v0 = vpop.f32.mrb[73].mxu1 }
 0x17a   :  { %v2234_v46 = vmul.f32 %v5858_v8, %v5858_v8  ;;  %v5872_v27 = vpop.f32.mrb[74].mxu0  ;;  %v5874_v17 = vpop.f32.mrb[74].mxu1 }
 0x17b   :  { %8853 = vst [vmem:[#allocation41_spill] sm:$0xff] %v5872_v27  ;;  %8854 = vst [vmem:[#allocation42_spill] sm:$0xff] %v5874_v17  ;;  %v2124_v32 = vadd.f32 %v2123_v43, %v2076_v13  ;;  %v2022_v44 = vadd.f32 %v2021_v12, %v5872_v27  ;;  %v2077_v38 = vmul.f32 %v5872_v27, %v5872_v27  ;;  %v4424_v5 = vpop.f32.mrb[75].mxu0  ;;  %v4534_v0 = vpop.f32.mrb[75].mxu1 }
 0x17c   :  { %v2282_v48 = vadd.f32 %v2281_v31, %v2234_v46  ;;  %v2179_v8 = vadd.f32 %v2178_v18, %v5874_v17  ;;  %v2235_v55 = vmul.f32 %v5874_v17, %v5874_v17 }
 0x17d   :  { %v2125_v15 = vadd.f32 %v2124_v32, %v2077_v38  ;;  %4650 = vmatmul.mubr.msk.bf16.gmra.mrb[180].mxu0 %vm229_vm3, %v4877_v49  ;;  %4760 = vmatmul.mubr.msk.bf16.gmra.mrb[180].mxu1 %vm229_vm3, %v4878_v50  ;;  %v4879_v50 = vld [vmem:[%s8498_s0 + $0x230] sm:$0xff]  }
 0x17e   :  { %v2283_v3 = vadd.f32 %v2282_v48, %v2235_v55  ;;  %4653 = vmatprep.mubr.msk.bf16.mxu0 %vm4890_vm0, %v8837_v62  ;;  %4763 = vmatprep.mubr.msk.bf16.mxu1 %vm4890_vm0, %v8837_v62  ;;  %v4880_v32 = vld [vmem:[%s8498_s0 + $0x2f4] sm:$0xff]  }
 0x180   :  { %v5888_v31 = vpop.f32.mrb[76].mxu0  ;;  %v5890_v43 = vpop.f32.mrb[76].mxu1 }
 0x181   :  { %8855 = vst [vmem:[#allocation43_spill] sm:$0xff] %v5888_v31  ;;  %8856 = vst [vmem:[#allocation44_spill] sm:$0xff] %v5890_v43  ;;  %v2023_v12 = vadd.f32 %v2022_v44, %v5888_v31  ;;  %v2078_v13 = vmul.f32 %v5888_v31, %v5888_v31  ;;  %v2180_v18 = vadd.f32 %v2179_v8, %v5890_v43  ;;  %v4427_v46 = vpop.f32.mrb[77].mxu0  ;;  %v4537_v49 = vpop.f32.mrb[77].mxu1 }
 0x182   :  { %v2236_v55 = vmul.f32 %v5890_v43, %v5890_v43  ;;  %v5904_v48 = vpop.f32.mrb[78].mxu0  ;;  %v5906_v44 = vpop.f32.mrb[78].mxu1 }
 0x183   :  { %8857 = vst [vmem:[#allocation45_spill] sm:$0xff] %v5904_v48  ;;  %8858 = vst [vmem:[#allocation46_spill] sm:$0xff] %v5906_v44  ;;  %v2126_v38 = vadd.f32 %v2125_v15, %v2078_v13  ;;  %v2024_v8 = vadd.f32 %v2023_v12, %v5904_v48  ;;  %v2079_v0 = vmul.f32 %v5904_v48, %v5904_v48  ;;  %v4428_v46 = vpop.f32.mrb[79].mxu0  ;;  %v4538_v49 = vpop.f32.mrb[79].mxu1 }
 0x184   :  { %v2284_v5 = vadd.f32 %v2283_v3, %v2236_v55  ;;  %v2181_v43 = vadd.f32 %v2180_v18, %v5906_v44  ;;  %v2237_v17 = vmul.f32 %v5906_v44, %v5906_v44 }
 0x185   :  { %v2127_v52 = vadd.f32 %v2126_v38, %v2079_v0  ;;  %4654 = vmatmul.mubr.msk.bf16.gmra.mrb[184].mxu0 %vm229_vm3, %v4879_v50  ;;  %4764 = vmatmul.mubr.msk.bf16.gmra.mrb[184].mxu1 %vm229_vm3, %v4880_v32  ;;  %v4881_v32 = vld [vmem:[%s8498_s0 + $0x238] sm:$0xff]  }
 0x186   :  { %v2285_v42 = vadd.f32 %v2284_v5, %v2237_v17  ;;  %4657 = vmatprep.mubr.msk.bf16.mxu0 %vm4890_vm0, %v8837_v62  ;;  %4767 = vmatprep.mubr.msk.bf16.mxu1 %vm4890_vm0, %v8837_v62  ;;  %v4882_v38 = vld [vmem:[%s8498_s0 + $0x2fc] sm:$0xff]  }
 0x188   :  { %v5920_v3 = vpop.f32.mrb[80].mxu0  ;;  %v5922_v15 = vpop.f32.mrb[80].mxu1 }
 0x189   :  { %8859 = vst [vmem:[#allocation47_spill] sm:$0xff] %v5920_v3  ;;  %8860 = vst [vmem:[#allocation48_spill] sm:$0xff] %v5922_v15  ;;  %v2025_v12 = vadd.f32 %v2024_v8, %v5920_v3  ;;  %v2080_v13 = vmul.f32 %v5920_v3, %v5920_v3  ;;  %v2182_v18 = vadd.f32 %v2181_v43, %v5922_v15  ;;  %v4431_v55 = vpop.f32.mrb[81].mxu0  ;;  %v4541_v50 = vpop.f32.mrb[81].mxu1 }
 0x18a   :  { %v2238_v17 = vmul.f32 %v5922_v15, %v5922_v15  ;;  %v5936_v5 = vpop.f32.mrb[82].mxu0  ;;  %v5938_v8 = vpop.f32.mrb[82].mxu1 }
 0x18b   :  { %8861 = vst [vmem:[#allocation49_spill] sm:$0xff] %v5936_v5  ;;  %8862 = vst [vmem:[#allocation50_spill] sm:$0xff] %v5938_v8  ;;  %v2128_v0 = vadd.f32 %v2127_v52, %v2080_v13  ;;  %v2026_v43 = vadd.f32 %v2025_v12, %v5936_v5  ;;  %v2081_v49 = vmul.f32 %v5936_v5, %v5936_v5  ;;  %v4432_v55 = vpop.f32.mrb[83].mxu0  ;;  %v4542_v50 = vpop.f32.mrb[83].mxu1 }
 0x18c   :  { %v2286_v46 = vadd.f32 %v2285_v42, %v2238_v17  ;;  %v2183_v15 = vadd.f32 %v2182_v18, %v5938_v8  ;;  %v2239_v44 = vmul.f32 %v5938_v8, %v5938_v8 }
 0x18d   :  { %v2129_v30 = vadd.f32 %v2128_v0, %v2081_v49  ;;  %4658 = vmatmul.mubr.msk.bf16.gmra.mrb[188].mxu0 %vm229_vm3, %v4881_v32  ;;  %4768 = vmatmul.mubr.msk.bf16.gmra.mrb[188].mxu1 %vm229_vm3, %v4882_v38  ;;  %v4883_v38 = vld [vmem:[%s8498_s0 + $0x240] sm:$0xff]  }
 0x18e   :  { %v2287_v20 = vadd.f32 %v2286_v46, %v2239_v44  ;;  %4661 = vmatprep.mubr.msk.bf16.mxu0 %vm4890_vm0, %v8837_v62  ;;  %4771 = vmatprep.mubr.msk.bf16.mxu1 %vm4890_vm0, %v8837_v62  ;;  %v4884_v0 = vld [vmem:[%s8498_s0 + $0x304] sm:$0xff]  }
 0x190   :  { %v5952_v42 = vpop.f32.mrb[84].mxu0  ;;  %v5954_v52 = vpop.f32.mrb[84].mxu1 }
 0x191   :  { %8863 = vst [vmem:[#allocation51_spill] sm:$0xff] %v5952_v42  ;;  %8864 = vst [vmem:[#allocation52_spill] sm:$0xff] %v5954_v52  ;;  %v2027_v12 = vadd.f32 %v2026_v43, %v5952_v42  ;;  %v2082_v13 = vmul.f32 %v5952_v42, %v5952_v42  ;;  %v2184_v18 = vadd.f32 %v2183_v15, %v5954_v52  ;;  %v4435_v17 = vpop.f32.mrb[85].mxu0  ;;  %v4545_v32 = vpop.f32.mrb[85].mxu1 }
 0x192   :  { %v2240_v44 = vmul.f32 %v5954_v52, %v5954_v52  ;;  %v5968_v46 = vpop.f32.mrb[86].mxu0  ;;  %v5970_v43 = vpop.f32.mrb[86].mxu1 }
 0x193   :  { %8865 = vst [vmem:[#allocation53_spill] sm:$0xff] %v5968_v46  ;;  %8866 = vst [vmem:[#allocation54_spill] sm:$0xff] %v5970_v43  ;;  %v2130_v49 = vadd.f32 %v2129_v30, %v2082_v13  ;;  %v2028_v15 = vadd.f32 %v2027_v12, %v5968_v46  ;;  %v2083_v50 = vmul.f32 %v5968_v46, %v5968_v46  ;;  %v4436_v17 = vpop.f32.mrb[87].mxu0  ;;  %v4546_v32 = vpop.f32.mrb[87].mxu1 }
 0x194   :  { %v2288_v55 = vadd.f32 %v2287_v20, %v2240_v44  ;;  %v2185_v52 = vadd.f32 %v2184_v18, %v5970_v43  ;;  %v2241_v8 = vmul.f32 %v5970_v43, %v5970_v43 }
 0x195   :  { %v2131_v10 = vadd.f32 %v2130_v49, %v2083_v50  ;;  %4662 = vmatmul.mubr.msk.bf16.gmra.mrb[192].mxu0 %vm229_vm3, %v4883_v38  ;;  %4772 = vmatmul.mubr.msk.bf16.gmra.mrb[192].mxu1 %vm229_vm3, %v4884_v0  ;;  %v4886_v0 = vld [vmem:[%s8498_s0 + $0x30c] ss:$0 sps:$4 sm:$0xff]  }
 0x196   :  { %v2289_v2 = vadd.f32 %v2288_v55, %v2241_v8  ;;  %4665 = vmatprep.mubr.msk.bf16.mxu0 %vm4890_vm0, %v8837_v62  ;;  %4775 = vmatprep.mubr.msk.bf16.mxu1 %vm4890_vm0, %v8837_v62  ;;  %v4885_v62 = vld [vmem:[%s8498_s0 + $0x248] ss:$0 sps:$4 sm:$0xff]  }
 0x198   :  { %v5984_v20 = vpop.f32.mrb[88].mxu0  ;;  %v5986_v30 = vpop.f32.mrb[88].mxu1 }
 0x199   :  { %8867 = vst [vmem:[#allocation55_spill] sm:$0xff] %v5984_v20  ;;  %8868 = vst [vmem:[#allocation56_spill] sm:$0xff] %v5986_v30  ;;  %v2029_v12 = vadd.f32 %v2028_v15, %v5984_v20  ;;  %v2084_v13 = vmul.f32 %v5984_v20, %v5984_v20  ;;  %v2186_v18 = vadd.f32 %v2185_v52, %v5986_v30  ;;  %v4439_v44 = vpop.f32.mrb[89].mxu0  ;;  %v4549_v38 = vpop.f32.mrb[89].mxu1 }
 0x19a   :  { %v2242_v8 = vmul.f32 %v5986_v30, %v5986_v30  ;;  %v6000_v49 = vpop.f32.mrb[90].mxu0  ;;  %v6002_v55 = vpop.f32.mrb[90].mxu1 }
 0x19b   :  { %8869 = vst [vmem:[#allocation57_spill] sm:$0xff] %v6000_v49  ;;  %8870 = vst [vmem:[#allocation58_spill] sm:$0xff] %v6002_v55  ;;  %v2132_v15 = vadd.f32 %v2131_v10, %v2084_v13  ;;  %v2030_v52 = vadd.f32 %v2029_v12, %v6000_v49  ;;  %v2085_v17 = vmul.f32 %v6000_v49, %v6000_v49  ;;  %v4440_v32 = vpop.f32.mrb[91].mxu0  ;;  %v4550_v44 = vpop.f32.mrb[91].mxu1 }
 0x19c   :  { %v2290_v50 = vadd.f32 %v2289_v2, %v2242_v8  ;;  %v2187_v38 = vadd.f32 %v2186_v18, %v6002_v55  ;;  %v2243_v30 = vmul.f32 %v6002_v55, %v6002_v55 }
 0x19d   :  { %v2133_v43 = vadd.f32 %v2132_v15, %v2085_v17  ;;  %4666 = vmatmul.mubr.msk.bf16.gmra.mrb[196].mxu0 %vm229_vm3, %v4885_v62  ;;  %4776 = vmatmul.mubr.msk.bf16.gmra.mrb[196].mxu1 %vm229_vm3, %v4886_v0 }
 0x19e   :  { %v2291_v20 = vadd.f32 %v2290_v50, %v2243_v30 }
 0x1a0   :  { %v6012_v10 = vpop.f32.mrb[92].mxu0  ;;  %v6014_v2 = vpop.f32.mrb[92].mxu1 }
 0x1a1   :  { %8871 = vst [vmem:[#allocation59_spill] sm:$0xff] %v6012_v10  ;;  %8872 = vst [vmem:[#allocation60_spill] sm:$0xff] %v6014_v2  ;;  %v2031_v12 = vadd.f32 %v2030_v52, %v6012_v10  ;;  %v2086_v13 = vmul.f32 %v6012_v10, %v6012_v10  ;;  %v2188_v18 = vadd.f32 %v2187_v38, %v6014_v2  ;;  %v4443_v15 = vpop.f32.mrb[93].mxu0  ;;  %v4553_v17 = vpop.f32.mrb[93].mxu1 }
 0x1a2   :  { %v2244_v8 = vmul.f32 %v6014_v2, %v6014_v2  ;;  %v6022_v62 = vpop.f32.mrb[94].mxu0  ;;  %v6024_v0 = vpop.f32.mrb[94].mxu1 }
 0x1a3   :  { %8873 = vst [vmem:[#allocation61_spill] sm:$0xff] %v6022_v62  ;;  %8874 = vst [vmem:[#allocation62_spill] sm:$0xff] %v6024_v0  ;;  %v2134_v30 = vadd.f32 %v2133_v43, %v2086_v13  ;;  %v2032_v32 = vadd.f32 %v2031_v12, %v6022_v62  ;;  %v2087_v52 = vmul.f32 %v6022_v62, %v6022_v62  ;;  %v4444_v44 = vpop.f32.mrb[95].mxu0  ;;  %v4554_v55 = vpop.f32.mrb[95].mxu1 }
 0x1a4   :  { %v2292_v50 = vadd.f32 %v2291_v20, %v2244_v8  ;;  %v2189_v38 = vadd.f32 %v2188_v18, %v6024_v0  ;;  %v2245_v2 = vmul.f32 %v6024_v0, %v6024_v0 }
 0x1a5   :  { %v2135_v15 = vadd.f32 %v2134_v30, %v2087_v52 }
 0x1a6   :  { %v2293_v17 = vadd.f32 %v2292_v50, %v2245_v2 }
 0x1a8   :  { %v6032_v10 = vpop.f32.mrb[96].mxu0  ;;  %v6034_v49 = vpop.f32.mrb[96].mxu1 }
 0x1a9   :  { %8875 = vst [vmem:[#allocation63_spill] sm:$0xff] %v6032_v10  ;;  %8876 = vst [vmem:[#allocation64_spill] sm:$0xff] %v6034_v49  ;;  %v2033_v43 = vadd.f32 %v2032_v32, %v6032_v10  ;;  %v2088_v20 = vmul.f32 %v6032_v10, %v6032_v10  ;;  %v2190_v12 = vadd.f32 %v2189_v38, %v6034_v49  ;;  %v4447_v13 = vpop.f32.mrb[97].mxu0  ;;  %v4557_v18 = vpop.f32.mrb[97].mxu1 }
 0x1aa   :  { %v2246_v55 = vmul.f32 %v6034_v49, %v6034_v49  ;;  %v541_v8 = vpop.f32.mrb[98].mxu0  ;;  %v1021_v44 = vpop.f32.mrb[98].mxu1 }
 0x1ab   :  { %v2034_v30 = vrot.slane %v2033_v43, 4  ;;  %v2136_v2 = vadd.f32 %v2135_v15, %v2088_v20  ;;  %v2191_v50 = vrot.slane %v2190_v12, 4  ;;  %v4448_v0 = vpop.f32.mrb[99].mxu0  ;;  %v4558_v62 = vpop.f32.mrb[99].mxu1 }
 0x1ac   :  { %v2294_v52 = vadd.f32 %v2293_v17, %v2246_v55 }
 0x1ad   :  { %v2035_v46 = vadd.f32 %v2034_v30, %v2033_v43  ;;  %v2137_v32 = vrot.slane %v2136_v2, 4  ;;  %v2192_v42 = vadd.f32 %v2191_v50, %v2190_v12 }
 0x1ae   :  { %v2295_v5 = vrot.slane %v2294_v52, 4 }
 0x1af   :  { %v2036_v10 = vrot.slane %v2035_v46, 2  ;;  %v2138_v3 = vadd.f32 %v2137_v32, %v2136_v2  ;;  %v2193_v38 = vrot.slane %v2192_v42, 2 }
 0x1b0   :  { %v2296_v48 = vadd.f32 %v2295_v5, %v2294_v52  ;;  %v6042_v31 = vpop.f32.mrb[100].mxu0  ;;  %v6044_v13 = vpop.f32.mrb[100].mxu1 }
 0x1b1   :  { %8877 = vst [vmem:[#allocation65_spill] sm:$0xff] %v6042_v31  ;;  %8878 = vst [vmem:[#allocation66_spill] sm:$0xff] %v6044_v13  ;;  %v2037_v18 = vadd.f32 %v2036_v10, %v2035_v46  ;;  %v2139_v8 = vrot.slane %v2138_v3, 2  ;;  %v2194_v44 = vadd.f32 %v2193_v38, %v2192_v42  ;;  %v4571_v20 = vpop.f32.mrb[101].mxu0  ;;  %v4681_v17 = vpop.f32.mrb[101].mxu1  ;;  %v2357_v62 = vmul.f32 %v6042_v31, %v6042_v31 }
 0x1b2   :  { %v2297_v15 = vrot.slane %v2296_v48, 2  ;;  %v2516_v0 = vmul.f32 %v6044_v13, %v6044_v13  ;;  %v6050_v43 = vpop.f32.mrb[102].mxu0  ;;  %v6052_v12 = vpop.f32.mrb[102].mxu1 }
 0x1b3   :  { %8879 = vst [vmem:[#allocation67_spill] sm:$0xff] %v6050_v43  ;;  %8880 = vst [vmem:[#allocation68_spill] sm:$0xff] %v6052_v12  ;;  %v2038_v5 = vrot.slane %v2037_v18, 1  ;;  %v2140_v55 = vadd.f32 %v2139_v8, %v2138_v3  ;;  %v2195_v30 = vrot.slane %v2194_v44, 1  ;;  %v4572_v46 = vpop.f32.mrb[103].mxu0  ;;  %v4682_v10 = vpop.f32.mrb[103].mxu1  ;;  %v2302_v42 = vadd.f32 %v6050_v43, %v6042_v31 }
 0x1b4   :  { %v2298_v2 = vadd.f32 %v2297_v15, %v2296_v48  ;;  %v2358_v50 = vmul.f32 %v6050_v43, %v6050_v43  ;;  %v2461_v52 = vadd.f32 %v6052_v12, %v6044_v13  ;;  %v2517_v32 = vmul.f32 %v6052_v12, %v6052_v12 }
 0x1b5   :  { %v2039_v38 = vadd.f32 %v2038_v5, %v2037_v18  ;;  %v2141_v20 = vrot.slane %v2140_v55, 1  ;;  %v2196_v17 = vadd.f32 %v2195_v30, %v2194_v44 }
 0x1b6   :  { %v2299_v3 = vrot.slane %v2298_v2, 1  ;;  %v2406_v8 = vadd.f32 %v2358_v50, %v2357_v62  ;;  %v2565_v48 = vadd.f32 %v2517_v32, %v2516_v0 }
 0x1b7   :  { %v2142_v15 = vadd.f32 %v2141_v20, %v2140_v55  ;;  %v6062_v46 = vadd.f32 %v2196_v17, %v2039_v38 }
 0x1b8   :  { %v2300_v10 = vadd.f32 %v2299_v3, %v2298_v2  ;;  %v6064_v31 = vpop.f32.mrb[104].mxu0  ;;  %v6066_v49 = vpop.f32.mrb[104].mxu1 }
 0x1b9   :  { %8881 = vst [vmem:[#allocation69_spill] sm:$0xff] %v6064_v31  ;;  %8882 = vst [vmem:[#allocation70_spill] sm:$0xff] %v6066_v49  ;;  %v2303_v13 = vadd.f32 %v2302_v42, %v6064_v31  ;;  %v2359_v18 = vmul.f32 %v6064_v31, %v6064_v31  ;;  %v2462_v44 = vadd.f32 %v2461_v52, %v6066_v49  ;;  %v4575_v5 = vpop.f32.mrb[105].mxu0  ;;  %v4685_v62 = vpop.f32.mrb[105].mxu1 }
 0x1ba   :  { %v6068_v43 = vadd.f32 %v2300_v10, %v2142_v15  ;;  %v2518_v0 = vmul.f32 %v6066_v49, %v6066_v49  ;;  %v6076_v55 = vpop.f32.mrb[106].mxu0  ;;  %v6078_v30 = vpop.f32.mrb[106].mxu1 }
 0x1bb   :  { %8883 = vst [vmem:[#allocation71_spill] sm:$0xff] %v6076_v55  ;;  %8884 = vst [vmem:[#allocation72_spill] sm:$0xff] %v6078_v30  ;;  %v2407_v2 = vadd.f32 %v2406_v8, %v2359_v18  ;;  %v2304_v50 = vadd.f32 %v2303_v13, %v6076_v55  ;;  %v2360_v42 = vmul.f32 %v6076_v55, %v6076_v55  ;;  %v4576_v38 = vpop.f32.mrb[107].mxu0  ;;  %v4686_v20 = vpop.f32.mrb[107].mxu1 }
 0x1bc   :  { %v2463_v32 = vadd.f32 %v2462_v44, %v6078_v30  ;;  %v2566_v52 = vadd.f32 %v2565_v48, %v2518_v0  ;;  %v2519_v17 = vmul.f32 %v6078_v30, %v6078_v30 }
 0x1bd   :  { %v2408_v3 = vadd.f32 %v2407_v2, %v2360_v42 }
 0x1be   :  { %v2567_v15 = vadd.f32 %v2566_v52, %v2519_v17 }
 0x1c0   :  { %v6086_v10 = vpop.f32.mrb[108].mxu0  ;;  %v6088_v5 = vpop.f32.mrb[108].mxu1 }
 0x1c1   :  { %8885 = vst [vmem:[#allocation73_spill] sm:$0xff] %v6086_v10  ;;  %8886 = vst [vmem:[#allocation74_spill] sm:$0xff] %v6088_v5  ;;  %v2305_v8 = vadd.f32 %v2304_v50, %v6086_v10  ;;  %v2361_v13 = vmul.f32 %v6086_v10, %v6086_v10  ;;  %v2464_v18 = vadd.f32 %v2463_v32, %v6088_v5  ;;  %v4579_v48 = vpop.f32.mrb[109].mxu0  ;;  %v4689_v62 = vpop.f32.mrb[109].mxu1 }
 0x1c2   :  { %v2520_v44 = vmul.f32 %v6088_v5, %v6088_v5  ;;  %v6096_v0 = vpop.f32.mrb[110].mxu0  ;;  %v6098_v2 = vpop.f32.mrb[110].mxu1 }
 0x1c3   :  { %8887 = vst [vmem:[#allocation75_spill] sm:$0xff] %v6096_v0  ;;  %8888 = vst [vmem:[#allocation76_spill] sm:$0xff] %v6098_v2  ;;  %v2409_v42 = vadd.f32 %v2408_v3, %v2361_v13  ;;  %v2306_v20 = vadd.f32 %v2305_v8, %v6096_v0  ;;  %v2362_v50 = vmul.f32 %v6096_v0, %v6096_v0  ;;  %v4580_v52 = vpop.f32.mrb[111].mxu0  ;;  %v4690_v17 = vpop.f32.mrb[111].mxu1 }
 0x1c4   :  { %v2568_v38 = vadd.f32 %v2567_v15, %v2520_v44  ;;  %v2465_v32 = vadd.f32 %v2464_v18, %v6098_v2  ;;  %v2521_v5 = vmul.f32 %v6098_v2, %v6098_v2 }
 0x1c5   :  { %v2410_v48 = vadd.f32 %v2409_v42, %v2362_v50 }
 0x1c6   :  { %v2569_v62 = vadd.f32 %v2568_v38, %v2521_v5 }
 0x1c8   :  { %v6106_v30 = vpop.f32.mrb[112].mxu0  ;;  %v6108_v49 = vpop.f32.mrb[112].mxu1 }
 0x1c9   :  { %8889 = vst [vmem:[#allocation77_spill] sm:$0xff] %v6106_v30  ;;  %8890 = vst [vmem:[#allocation78_spill] sm:$0xff] %v6108_v49  ;;  %v2307_v3 = vadd.f32 %v2306_v20, %v6106_v30  ;;  %v2363_v15 = vmul.f32 %v6106_v30, %v6106_v30  ;;  %v2466_v8 = vadd.f32 %v2465_v32, %v6108_v49  ;;  %v4583_v18 = vpop.f32.mrb[113].mxu0  ;;  %v4693_v44 = vpop.f32.mrb[113].mxu1 }
 0x1ca   :  { %v2522_v13 = vmul.f32 %v6108_v49, %v6108_v49  ;;  %v6116_v52 = vpop.f32.mrb[114].mxu0  ;;  %v6118_v42 = vpop.f32.mrb[114].mxu1 }
 0x1cb   :  { %8891 = vst [vmem:[#allocation79_spill] sm:$0xff] %v6116_v52  ;;  %8892 = vst [vmem:[#allocation80_spill] sm:$0xff] %v6118_v42  ;;  %v2411_v5 = vadd.f32 %v2410_v48, %v2363_v15  ;;  %v2308_v50 = vadd.f32 %v2307_v3, %v6116_v52  ;;  %v2364_v20 = vmul.f32 %v6116_v52, %v6116_v52  ;;  %v4584_v17 = vpop.f32.mrb[115].mxu0  ;;  %v4694_v2 = vpop.f32.mrb[115].mxu1 }
 0x1cc   :  { %v2570_v38 = vadd.f32 %v2569_v62, %v2522_v13  ;;  %v2467_v32 = vadd.f32 %v2466_v8, %v6118_v42  ;;  %v2523_v49 = vmul.f32 %v6118_v42, %v6118_v42 }
 0x1cd   :  { %v2412_v18 = vadd.f32 %v2411_v5, %v2364_v20 }
 0x1ce   :  { %v2571_v44 = vadd.f32 %v2570_v38, %v2523_v49 }
 0x1d0   :  { %v6126_v12 = vpop.f32.mrb[116].mxu0  ;;  %v6128_v30 = vpop.f32.mrb[116].mxu1 }
 0x1d1   :  { %8893 = vst [vmem:[#allocation81_spill] sm:$0xff] %v6126_v12  ;;  %8894 = vst [vmem:[#allocation82_spill] sm:$0xff] %v6128_v30  ;;  %v2309_v48 = vadd.f32 %v2308_v50, %v6126_v12  ;;  %v2365_v62 = vmul.f32 %v6126_v12, %v6126_v12  ;;  %v2468_v3 = vadd.f32 %v2467_v32, %v6128_v30  ;;  %v4587_v15 = vpop.f32.mrb[117].mxu0  ;;  %v4697_v8 = vpop.f32.mrb[117].mxu1 }
 0x1d2   :  { %v2524_v2 = vmul.f32 %v6128_v30, %v6128_v30  ;;  %v6136_v13 = vpop.f32.mrb[118].mxu0  ;;  %v6138_v5 = vpop.f32.mrb[118].mxu1 }
 0x1d3   :  { %8895 = vst [vmem:[#allocation83_spill] sm:$0xff] %v6136_v13  ;;  %8896 = vst [vmem:[#allocation84_spill] sm:$0xff] %v6138_v5  ;;  %v2413_v49 = vadd.f32 %v2412_v18, %v2365_v62  ;;  %v2310_v20 = vadd.f32 %v2309_v48, %v6136_v13  ;;  %v2366_v50 = vmul.f32 %v6136_v13, %v6136_v13  ;;  %v4588_v17 = vpop.f32.mrb[119].mxu0  ;;  %v4698_v42 = vpop.f32.mrb[119].mxu1 }
 0x1d4   :  { %v2572_v38 = vadd.f32 %v2571_v44, %v2524_v2  ;;  %v2469_v32 = vadd.f32 %v2468_v3, %v6138_v5  ;;  %v2525_v30 = vmul.f32 %v6138_v5, %v6138_v5 }
 0x1d5   :  { %v2414_v15 = vadd.f32 %v2413_v49, %v2366_v50 }
 0x1d6   :  { %v2573_v8 = vadd.f32 %v2572_v38, %v2525_v30 }
 0x1d8   :  { %v6146_v12 = vpop.f32.mrb[120].mxu0  ;;  %v6148_v52 = vpop.f32.mrb[120].mxu1 }
 0x1d9   :  { %8897 = vst [vmem:[#allocation85_spill] sm:$0xff] %v6146_v12  ;;  %8898 = vst [vmem:[#allocation86_spill] sm:$0xff] %v6148_v52  ;;  %v2311_v18 = vadd.f32 %v2310_v20, %v6146_v12  ;;  %v2367_v44 = vmul.f32 %v6146_v12, %v6146_v12  ;;  %v2470_v48 = vadd.f32 %v2469_v32, %v6148_v52  ;;  %v4591_v62 = vpop.f32.mrb[121].mxu0  ;;  %v4701_v3 = vpop.f32.mrb[121].mxu1 }
 0x1da   :  { %v2526_v42 = vmul.f32 %v6148_v52, %v6148_v52  ;;  %v6156_v2 = vpop.f32.mrb[122].mxu0  ;;  %v6158_v49 = vpop.f32.mrb[122].mxu1 }
 0x1db   :  { %8899 = vst [vmem:[#allocation87_spill] sm:$0xff] %v6156_v2  ;;  %8900 = vst [vmem:[#allocation88_spill] sm:$0xff] %v6158_v49  ;;  %v2415_v30 = vadd.f32 %v2414_v15, %v2367_v44  ;;  %v2312_v50 = vadd.f32 %v2311_v18, %v6156_v2  ;;  %v2368_v20 = vmul.f32 %v6156_v2, %v6156_v2  ;;  %v4592_v17 = vpop.f32.mrb[123].mxu0  ;;  %v4702_v5 = vpop.f32.mrb[123].mxu1 }
 0x1dc   :  { %v2574_v38 = vadd.f32 %v2573_v8, %v2526_v42  ;;  %v2471_v32 = vadd.f32 %v2470_v48, %v6158_v49  ;;  %v2527_v52 = vmul.f32 %v6158_v49, %v6158_v49 }
 0x1dd   :  { %v2416_v62 = vadd.f32 %v2415_v30, %v2368_v20 }
 0x1de   :  { %v2575_v3 = vadd.f32 %v2574_v38, %v2527_v52 }
 0x1e0   :  { %v6166_v12 = vpop.f32.mrb[124].mxu0  ;;  %v6168_v13 = vpop.f32.mrb[124].mxu1 }
 0x1e1   :  { %8901 = vst [vmem:[#allocation89_spill] sm:$0xff] %v6166_v12  ;;  %8902 = vst [vmem:[#allocation90_spill] sm:$0xff] %v6168_v13  ;;  %v2313_v15 = vadd.f32 %v2312_v50, %v6166_v12  ;;  %v2369_v8 = vmul.f32 %v6166_v12, %v6166_v12  ;;  %v2472_v18 = vadd.f32 %v2471_v32, %v6168_v13  ;;  %v4595_v44 = vpop.f32.mrb[125].mxu0  ;;  %v4705_v48 = vpop.f32.mrb[125].mxu1 }
 0x1e2   :  { %v2528_v5 = vmul.f32 %v6168_v13, %v6168_v13  ;;  %v6176_v42 = vpop.f32.mrb[126].mxu0  ;;  %v6178_v30 = vpop.f32.mrb[126].mxu1 }
 0x1e3   :  { %8903 = vst [vmem:[#allocation91_spill] sm:$0xff] %v6176_v42  ;;  %8904 = vst [vmem:[#allocation92_spill] sm:$0xff] %v6178_v30  ;;  %v2417_v52 = vadd.f32 %v2416_v62, %v2369_v8  ;;  %v2314_v20 = vadd.f32 %v2313_v15, %v6176_v42  ;;  %v2370_v50 = vmul.f32 %v6176_v42, %v6176_v42  ;;  %v4596_v17 = vpop.f32.mrb[127].mxu0  ;;  %v4706_v49 = vpop.f32.mrb[127].mxu1 }
 0x1e4   :  { %v2576_v38 = vadd.f32 %v2575_v3, %v2528_v5  ;;  %v2473_v32 = vadd.f32 %v2472_v18, %v6178_v30  ;;  %v2529_v13 = vmul.f32 %v6178_v30, %v6178_v30 }
 0x1e5   :  { %v2418_v44 = vadd.f32 %v2417_v52, %v2370_v50 }
 0x1e6   :  { %v2577_v48 = vadd.f32 %v2576_v38, %v2529_v13 }
 0x1e8   :  { %v6186_v12 = vpop.f32.mrb[128].mxu0  ;;  %v6188_v2 = vpop.f32.mrb[128].mxu1 }
 0x1e9   :  { %8905 = vst [vmem:[#allocation93_spill] sm:$0xff] %v6186_v12  ;;  %8906 = vst [vmem:[#allocation94_spill] sm:$0xff] %v6188_v2  ;;  %v2315_v62 = vadd.f32 %v2314_v20, %v6186_v12  ;;  %v2371_v3 = vmul.f32 %v6186_v12, %v6186_v12  ;;  %v2474_v15 = vadd.f32 %v2473_v32, %v6188_v2  ;;  %v4599_v8 = vpop.f32.mrb[129].mxu0  ;;  %v4709_v18 = vpop.f32.mrb[129].mxu1 }
 0x1ea   :  { %v2530_v49 = vmul.f32 %v6188_v2, %v6188_v2  ;;  %v6196_v5 = vpop.f32.mrb[130].mxu0  ;;  %v6198_v52 = vpop.f32.mrb[130].mxu1 }
 0x1eb   :  { %8907 = vst [vmem:[#allocation95_spill] sm:$0xff] %v6196_v5  ;;  %8908 = vst [vmem:[#allocation96_spill] sm:$0xff] %v6198_v52  ;;  %v2419_v13 = vadd.f32 %v2418_v44, %v2371_v3  ;;  %v2316_v50 = vadd.f32 %v2315_v62, %v6196_v5  ;;  %v2372_v20 = vmul.f32 %v6196_v5, %v6196_v5  ;;  %v4600_v17 = vpop.f32.mrb[131].mxu0  ;;  %v4710_v30 = vpop.f32.mrb[131].mxu1 }
 0x1ec   :  { %v2578_v38 = vadd.f32 %v2577_v48, %v2530_v49  ;;  %v2475_v32 = vadd.f32 %v2474_v15, %v6198_v52  ;;  %v2531_v2 = vmul.f32 %v6198_v52, %v6198_v52 }
 0x1ed   :  { %v2420_v8 = vadd.f32 %v2419_v13, %v2372_v20 }
 0x1ee   :  { %v2579_v18 = vadd.f32 %v2578_v38, %v2531_v2 }
 0x1f0   :  { %v6206_v12 = vpop.f32.mrb[132].mxu0  ;;  %v6208_v42 = vpop.f32.mrb[132].mxu1 }
 0x1f1   :  { %8909 = vst [vmem:[#allocation97_spill] sm:$0xff] %v6206_v12  ;;  %8910 = vst [vmem:[#allocation98_spill] sm:$0xff] %v6208_v42  ;;  %v2317_v44 = vadd.f32 %v2316_v50, %v6206_v12  ;;  %v2373_v48 = vmul.f32 %v6206_v12, %v6206_v12  ;;  %v2476_v62 = vadd.f32 %v2475_v32, %v6208_v42  ;;  %v4603_v3 = vpop.f32.mrb[133].mxu0  ;;  %v4713_v15 = vpop.f32.mrb[133].mxu1 }
 0x1f2   :  { %v2532_v30 = vmul.f32 %v6208_v42, %v6208_v42  ;;  %v6216_v49 = vpop.f32.mrb[134].mxu0  ;;  %v6218_v13 = vpop.f32.mrb[134].mxu1 }
 0x1f3   :  { %8911 = vst [vmem:[#allocation99_spill] sm:$0xff] %v6216_v49  ;;  %8912 = vst [vmem:[#allocation100_spill] sm:$0xff] %v6218_v13  ;;  %v2421_v2 = vadd.f32 %v2420_v8, %v2373_v48  ;;  %v2318_v20 = vadd.f32 %v2317_v44, %v6216_v49  ;;  %v2374_v50 = vmul.f32 %v6216_v49, %v6216_v49  ;;  %v4604_v17 = vpop.f32.mrb[135].mxu0  ;;  %v4714_v52 = vpop.f32.mrb[135].mxu1 }
 0x1f4   :  { %v2580_v38 = vadd.f32 %v2579_v18, %v2532_v30  ;;  %v2477_v32 = vadd.f32 %v2476_v62, %v6218_v13  ;;  %v2533_v42 = vmul.f32 %v6218_v13, %v6218_v13 }
 0x1f5   :  { %v2422_v3 = vadd.f32 %v2421_v2, %v2374_v50 }
 0x1f6   :  { %v2581_v15 = vadd.f32 %v2580_v38, %v2533_v42 }
 0x1f8   :  { %v6226_v12 = vpop.f32.mrb[136].mxu0  ;;  %v6228_v5 = vpop.f32.mrb[136].mxu1 }
 0x1f9   :  { %8913 = vst [vmem:[#allocation101_spill] sm:$0xff] %v6226_v12  ;;  %8914 = vst [vmem:[#allocation102_spill] sm:$0xff] %v6228_v5  ;;  %v2319_v8 = vadd.f32 %v2318_v20, %v6226_v12  ;;  %v2375_v18 = vmul.f32 %v6226_v12, %v6226_v12  ;;  %v2478_v44 = vadd.f32 %v2477_v32, %v6228_v5  ;;  %v4607_v48 = vpop.f32.mrb[137].mxu0  ;;  %v4717_v62 = vpop.f32.mrb[137].mxu1 }
 0x1fa   :  { %v2534_v52 = vmul.f32 %v6228_v5, %v6228_v5  ;;  %v6236_v30 = vpop.f32.mrb[138].mxu0  ;;  %v6238_v2 = vpop.f32.mrb[138].mxu1 }
 0x1fb   :  { %8915 = vst [vmem:[#allocation103_spill] sm:$0xff] %v6236_v30  ;;  %8916 = vst [vmem:[#allocation104_spill] sm:$0xff] %v6238_v2  ;;  %v2423_v42 = vadd.f32 %v2422_v3, %v2375_v18  ;;  %v2320_v50 = vadd.f32 %v2319_v8, %v6236_v30  ;;  %v2376_v20 = vmul.f32 %v6236_v30, %v6236_v30  ;;  %v4608_v17 = vpop.f32.mrb[139].mxu0  ;;  %v4718_v13 = vpop.f32.mrb[139].mxu1 }
 0x1fc   :  { %v2582_v38 = vadd.f32 %v2581_v15, %v2534_v52  ;;  %v2479_v32 = vadd.f32 %v2478_v44, %v6238_v2  ;;  %v2535_v5 = vmul.f32 %v6238_v2, %v6238_v2 }
 0x1fd   :  { %v2424_v48 = vadd.f32 %v2423_v42, %v2376_v20 }
 0x1fe   :  { %v2583_v62 = vadd.f32 %v2582_v38, %v2535_v5 }
 0x200   :  { %v6246_v12 = vpop.f32.mrb[140].mxu0  ;;  %v6248_v49 = vpop.f32.mrb[140].mxu1 }
 0x201   :  { %8917 = vst [vmem:[#allocation105_spill] sm:$0xff] %v6246_v12  ;;  %8918 = vst [vmem:[#allocation106_spill] sm:$0xff] %v6248_v49  ;;  %v2321_v3 = vadd.f32 %v2320_v50, %v6246_v12  ;;  %v2377_v15 = vmul.f32 %v6246_v12, %v6246_v12  ;;  %v2480_v8 = vadd.f32 %v2479_v32, %v6248_v49  ;;  %v4611_v18 = vpop.f32.mrb[141].mxu0  ;;  %v4721_v44 = vpop.f32.mrb[141].mxu1 }
 0x202   :  { %v2536_v13 = vmul.f32 %v6248_v49, %v6248_v49  ;;  %v6256_v52 = vpop.f32.mrb[142].mxu0  ;;  %v6258_v42 = vpop.f32.mrb[142].mxu1 }
 0x203   :  { %8919 = vst [vmem:[#allocation107_spill] sm:$0xff] %v6256_v52  ;;  %8920 = vst [vmem:[#allocation108_spill] sm:$0xff] %v6258_v42  ;;  %v2425_v5 = vadd.f32 %v2424_v48, %v2377_v15  ;;  %v2322_v20 = vadd.f32 %v2321_v3, %v6256_v52  ;;  %v2378_v50 = vmul.f32 %v6256_v52, %v6256_v52  ;;  %v4612_v17 = vpop.f32.mrb[143].mxu0  ;;  %v4722_v2 = vpop.f32.mrb[143].mxu1 }
 0x204   :  { %v2584_v38 = vadd.f32 %v2583_v62, %v2536_v13  ;;  %v2481_v32 = vadd.f32 %v2480_v8, %v6258_v42  ;;  %v2537_v49 = vmul.f32 %v6258_v42, %v6258_v42 }
 0x205   :  { %v2426_v18 = vadd.f32 %v2425_v5, %v2378_v50 }
 0x206   :  { %v2585_v44 = vadd.f32 %v2584_v38, %v2537_v49 }
 0x208   :  { %v6266_v12 = vpop.f32.mrb[144].mxu0  ;;  %v6268_v30 = vpop.f32.mrb[144].mxu1 }
 0x209   :  { %8921 = vst [vmem:[#allocation109_spill] sm:$0xff] %v6266_v12  ;;  %8922 = vst [vmem:[#allocation110_spill] sm:$0xff] %v6268_v30  ;;  %v2323_v48 = vadd.f32 %v2322_v20, %v6266_v12  ;;  %v2379_v62 = vmul.f32 %v6266_v12, %v6266_v12  ;;  %v2482_v3 = vadd.f32 %v2481_v32, %v6268_v30  ;;  %v4615_v15 = vpop.f32.mrb[145].mxu0  ;;  %v4725_v8 = vpop.f32.mrb[145].mxu1 }
 0x20a   :  { %v2538_v2 = vmul.f32 %v6268_v30, %v6268_v30  ;;  %v6276_v13 = vpop.f32.mrb[146].mxu0  ;;  %v6278_v5 = vpop.f32.mrb[146].mxu1 }
 0x20b   :  { %8923 = vst [vmem:[#allocation111_spill] sm:$0xff] %v6276_v13  ;;  %8924 = vst [vmem:[#allocation112_spill] sm:$0xff] %v6278_v5  ;;  %v2427_v49 = vadd.f32 %v2426_v18, %v2379_v62  ;;  %v2324_v50 = vadd.f32 %v2323_v48, %v6276_v13  ;;  %v2380_v20 = vmul.f32 %v6276_v13, %v6276_v13  ;;  %v4616_v17 = vpop.f32.mrb[147].mxu0  ;;  %v4726_v42 = vpop.f32.mrb[147].mxu1 }
 0x20c   :  { %v2586_v38 = vadd.f32 %v2585_v44, %v2538_v2  ;;  %v2483_v32 = vadd.f32 %v2482_v3, %v6278_v5  ;;  %v2539_v30 = vmul.f32 %v6278_v5, %v6278_v5 }
 0x20d   :  { %v2428_v15 = vadd.f32 %v2427_v49, %v2380_v20 }
 0x20e   :  { %v2587_v8 = vadd.f32 %v2586_v38, %v2539_v30 }
 0x210   :  { %v6286_v12 = vpop.f32.mrb[148].mxu0  ;;  %v6288_v52 = vpop.f32.mrb[148].mxu1 }
 0x211   :  { %8925 = vst [vmem:[#allocation113_spill] sm:$0xff] %v6286_v12  ;;  %8926 = vst [vmem:[#allocation114_spill] sm:$0xff] %v6288_v52  ;;  %v2325_v18 = vadd.f32 %v2324_v50, %v6286_v12  ;;  %v2381_v44 = vmul.f32 %v6286_v12, %v6286_v12  ;;  %v2484_v48 = vadd.f32 %v2483_v32, %v6288_v52  ;;  %v4619_v62 = vpop.f32.mrb[149].mxu0  ;;  %v4729_v3 = vpop.f32.mrb[149].mxu1 }
 0x212   :  { %v2540_v42 = vmul.f32 %v6288_v52, %v6288_v52  ;;  %v6296_v2 = vpop.f32.mrb[150].mxu0  ;;  %v6298_v49 = vpop.f32.mrb[150].mxu1 }
 0x213   :  { %8927 = vst [vmem:[#allocation115_spill] sm:$0xff] %v6296_v2  ;;  %8928 = vst [vmem:[#allocation116_spill] sm:$0xff] %v6298_v49  ;;  %v2429_v30 = vadd.f32 %v2428_v15, %v2381_v44  ;;  %v2326_v20 = vadd.f32 %v2325_v18, %v6296_v2  ;;  %v2382_v50 = vmul.f32 %v6296_v2, %v6296_v2  ;;  %v4620_v17 = vpop.f32.mrb[151].mxu0  ;;  %v4730_v5 = vpop.f32.mrb[151].mxu1 }
 0x214   :  { %v2588_v38 = vadd.f32 %v2587_v8, %v2540_v42  ;;  %v2485_v32 = vadd.f32 %v2484_v48, %v6298_v49  ;;  %v2541_v52 = vmul.f32 %v6298_v49, %v6298_v49 }
 0x215   :  { %v2430_v62 = vadd.f32 %v2429_v30, %v2382_v50 }
 0x216   :  { %v2589_v3 = vadd.f32 %v2588_v38, %v2541_v52 }
 0x218   :  { %v6306_v12 = vpop.f32.mrb[152].mxu0  ;;  %v6308_v13 = vpop.f32.mrb[152].mxu1 }
 0x219   :  { %8929 = vst [vmem:[#allocation117_spill] sm:$0xff] %v6306_v12  ;;  %8930 = vst [vmem:[#allocation118_spill] sm:$0xff] %v6308_v13  ;;  %v2327_v15 = vadd.f32 %v2326_v20, %v6306_v12  ;;  %v2383_v8 = vmul.f32 %v6306_v12, %v6306_v12  ;;  %v2486_v18 = vadd.f32 %v2485_v32, %v6308_v13  ;;  %v4623_v44 = vpop.f32.mrb[153].mxu0  ;;  %v4733_v48 = vpop.f32.mrb[153].mxu1 }
 0x21a   :  { %v2542_v5 = vmul.f32 %v6308_v13, %v6308_v13  ;;  %v6316_v42 = vpop.f32.mrb[154].mxu0  ;;  %v6318_v30 = vpop.f32.mrb[154].mxu1 }
 0x21b   :  { %8931 = vst [vmem:[#allocation119_spill] sm:$0xff] %v6316_v42  ;;  %8932 = vst [vmem:[#allocation120_spill] sm:$0xff] %v6318_v30  ;;  %v2431_v52 = vadd.f32 %v2430_v62, %v2383_v8  ;;  %v2328_v50 = vadd.f32 %v2327_v15, %v6316_v42  ;;  %v2384_v20 = vmul.f32 %v6316_v42, %v6316_v42  ;;  %v4624_v17 = vpop.f32.mrb[155].mxu0  ;;  %v4734_v49 = vpop.f32.mrb[155].mxu1 }
 0x21c   :  { %v2590_v38 = vadd.f32 %v2589_v3, %v2542_v5  ;;  %v2487_v32 = vadd.f32 %v2486_v18, %v6318_v30  ;;  %v2543_v13 = vmul.f32 %v6318_v30, %v6318_v30 }
 0x21d   :  { %v2432_v44 = vadd.f32 %v2431_v52, %v2384_v20 }
 0x21e   :  { %v2591_v48 = vadd.f32 %v2590_v38, %v2543_v13 }
 0x220   :  { %v6326_v12 = vpop.f32.mrb[156].mxu0  ;;  %v6328_v2 = vpop.f32.mrb[156].mxu1 }
 0x221   :  { %8933 = vst [vmem:[#allocation121_spill] sm:$0xff] %v6326_v12  ;;  %8934 = vst [vmem:[#allocation122_spill] sm:$0xff] %v6328_v2  ;;  %v2329_v62 = vadd.f32 %v2328_v50, %v6326_v12  ;;  %v2385_v3 = vmul.f32 %v6326_v12, %v6326_v12  ;;  %v2488_v15 = vadd.f32 %v2487_v32, %v6328_v2  ;;  %v4627_v8 = vpop.f32.mrb[157].mxu0  ;;  %v4737_v18 = vpop.f32.mrb[157].mxu1 }
 0x222   :  { %v2544_v49 = vmul.f32 %v6328_v2, %v6328_v2  ;;  %v6336_v5 = vpop.f32.mrb[158].mxu0  ;;  %v6338_v52 = vpop.f32.mrb[158].mxu1 }
 0x223   :  { %8935 = vst [vmem:[#allocation123_spill] sm:$0xff] %v6336_v5  ;;  %8936 = vst [vmem:[#allocation124_spill] sm:$0xff] %v6338_v52  ;;  %v2433_v13 = vadd.f32 %v2432_v44, %v2385_v3  ;;  %v2330_v20 = vadd.f32 %v2329_v62, %v6336_v5  ;;  %v2386_v50 = vmul.f32 %v6336_v5, %v6336_v5  ;;  %v4628_v17 = vpop.f32.mrb[159].mxu0  ;;  %v4738_v30 = vpop.f32.mrb[159].mxu1 }
 0x224   :  { %v2592_v38 = vadd.f32 %v2591_v48, %v2544_v49  ;;  %v2489_v32 = vadd.f32 %v2488_v15, %v6338_v52  ;;  %v2545_v2 = vmul.f32 %v6338_v52, %v6338_v52 }
 0x225   :  { %v2434_v8 = vadd.f32 %v2433_v13, %v2386_v50 }
 0x226   :  { %v2593_v18 = vadd.f32 %v2592_v38, %v2545_v2 }
 0x228   :  { %v6346_v12 = vpop.f32.mrb[160].mxu0  ;;  %v6348_v42 = vpop.f32.mrb[160].mxu1 }
 0x229   :  { %8937 = vst [vmem:[#allocation125_spill] sm:$0xff] %v6346_v12  ;;  %8938 = vst [vmem:[#allocation126_spill] sm:$0xff] %v6348_v42  ;;  %v2331_v44 = vadd.f32 %v2330_v20, %v6346_v12  ;;  %v2387_v48 = vmul.f32 %v6346_v12, %v6346_v12  ;;  %v2490_v62 = vadd.f32 %v2489_v32, %v6348_v42  ;;  %v4631_v3 = vpop.f32.mrb[161].mxu0  ;;  %v4741_v15 = vpop.f32.mrb[161].mxu1 }
 0x22a   :  { %v2546_v30 = vmul.f32 %v6348_v42, %v6348_v42  ;;  %v6356_v49 = vpop.f32.mrb[162].mxu0  ;;  %v6358_v13 = vpop.f32.mrb[162].mxu1 }
 0x22b   :  { %8939 = vst [vmem:[#allocation127_spill] sm:$0xff] %v6356_v49  ;;  %8940 = vst [vmem:[#allocation128_spill] sm:$0xff] %v6358_v13  ;;  %v2435_v2 = vadd.f32 %v2434_v8, %v2387_v48  ;;  %v2332_v50 = vadd.f32 %v2331_v44, %v6356_v49  ;;  %v2388_v20 = vmul.f32 %v6356_v49, %v6356_v49  ;;  %v4632_v17 = vpop.f32.mrb[163].mxu0  ;;  %v4742_v52 = vpop.f32.mrb[163].mxu1 }
 0x22c   :  { %v2594_v38 = vadd.f32 %v2593_v18, %v2546_v30  ;;  %v2491_v32 = vadd.f32 %v2490_v62, %v6358_v13  ;;  %v2547_v42 = vmul.f32 %v6358_v13, %v6358_v13 }
 0x22d   :  { %v2436_v3 = vadd.f32 %v2435_v2, %v2388_v20 }
 0x22e   :  { %v2595_v15 = vadd.f32 %v2594_v38, %v2547_v42 }
 0x230   :  { %v6366_v12 = vpop.f32.mrb[164].mxu0  ;;  %v6368_v5 = vpop.f32.mrb[164].mxu1 }
 0x231   :  { %8941 = vst [vmem:[#allocation129_spill] sm:$0xff] %v6366_v12  ;;  %8942 = vst [vmem:[#allocation130_spill] sm:$0xff] %v6368_v5  ;;  %v2333_v8 = vadd.f32 %v2332_v50, %v6366_v12  ;;  %v2389_v18 = vmul.f32 %v6366_v12, %v6366_v12  ;;  %v2492_v44 = vadd.f32 %v2491_v32, %v6368_v5  ;;  %v4635_v48 = vpop.f32.mrb[165].mxu0  ;;  %v4745_v62 = vpop.f32.mrb[165].mxu1 }
 0x232   :  { %v2548_v52 = vmul.f32 %v6368_v5, %v6368_v5  ;;  %v6376_v30 = vpop.f32.mrb[166].mxu0  ;;  %v6378_v2 = vpop.f32.mrb[166].mxu1 }
 0x233   :  { %8943 = vst [vmem:[#allocation131_spill] sm:$0xff] %v6376_v30  ;;  %8944 = vst [vmem:[#allocation132_spill] sm:$0xff] %v6378_v2  ;;  %v2437_v42 = vadd.f32 %v2436_v3, %v2389_v18  ;;  %v2334_v20 = vadd.f32 %v2333_v8, %v6376_v30  ;;  %v2390_v50 = vmul.f32 %v6376_v30, %v6376_v30  ;;  %v4636_v17 = vpop.f32.mrb[167].mxu0  ;;  %v4746_v13 = vpop.f32.mrb[167].mxu1 }
 0x234   :  { %v2596_v38 = vadd.f32 %v2595_v15, %v2548_v52  ;;  %v2493_v32 = vadd.f32 %v2492_v44, %v6378_v2  ;;  %v2549_v5 = vmul.f32 %v6378_v2, %v6378_v2 }
 0x235   :  { %v2438_v48 = vadd.f32 %v2437_v42, %v2390_v50 }
 0x236   :  { %v2597_v62 = vadd.f32 %v2596_v38, %v2549_v5 }
 0x238   :  { %v6386_v12 = vpop.f32.mrb[168].mxu0  ;;  %v6388_v49 = vpop.f32.mrb[168].mxu1 }
 0x239   :  { %8945 = vst [vmem:[#allocation133_spill] sm:$0xff] %v6386_v12  ;;  %8946 = vst [vmem:[#allocation134_spill] sm:$0xff] %v6388_v49  ;;  %v2335_v3 = vadd.f32 %v2334_v20, %v6386_v12  ;;  %v2391_v15 = vmul.f32 %v6386_v12, %v6386_v12  ;;  %v2494_v8 = vadd.f32 %v2493_v32, %v6388_v49  ;;  %v4639_v18 = vpop.f32.mrb[169].mxu0  ;;  %v4749_v44 = vpop.f32.mrb[169].mxu1 }
 0x23a   :  { %v2550_v13 = vmul.f32 %v6388_v49, %v6388_v49  ;;  %v6396_v52 = vpop.f32.mrb[170].mxu0  ;;  %v6398_v42 = vpop.f32.mrb[170].mxu1 }
 0x23b   :  { %8947 = vst [vmem:[#allocation135_spill] sm:$0xff] %v6396_v52  ;;  %8948 = vst [vmem:[#allocation136_spill] sm:$0xff] %v6398_v42  ;;  %v2439_v5 = vadd.f32 %v2438_v48, %v2391_v15  ;;  %v2336_v50 = vadd.f32 %v2335_v3, %v6396_v52  ;;  %v2392_v20 = vmul.f32 %v6396_v52, %v6396_v52  ;;  %v4640_v17 = vpop.f32.mrb[171].mxu0  ;;  %v4750_v2 = vpop.f32.mrb[171].mxu1 }
 0x23c   :  { %v2598_v38 = vadd.f32 %v2597_v62, %v2550_v13  ;;  %v2495_v32 = vadd.f32 %v2494_v8, %v6398_v42  ;;  %v2551_v49 = vmul.f32 %v6398_v42, %v6398_v42 }
 0x23d   :  { %v2440_v18 = vadd.f32 %v2439_v5, %v2392_v20 }
 0x23e   :  { %v2599_v44 = vadd.f32 %v2598_v38, %v2551_v49 }
 0x240   :  { %v6406_v12 = vpop.f32.mrb[172].mxu0  ;;  %v6408_v30 = vpop.f32.mrb[172].mxu1 }
 0x241   :  { %8949 = vst [vmem:[#allocation137_spill] sm:$0xff] %v6406_v12  ;;  %8950 = vst [vmem:[#allocation138_spill] sm:$0xff] %v6408_v30  ;;  %v2337_v48 = vadd.f32 %v2336_v50, %v6406_v12  ;;  %v2393_v62 = vmul.f32 %v6406_v12, %v6406_v12  ;;  %v2496_v3 = vadd.f32 %v2495_v32, %v6408_v30  ;;  %v4643_v15 = vpop.f32.mrb[173].mxu0  ;;  %v4753_v8 = vpop.f32.mrb[173].mxu1 }
 0x242   :  { %v2552_v2 = vmul.f32 %v6408_v30, %v6408_v30  ;;  %v6416_v13 = vpop.f32.mrb[174].mxu0  ;;  %v6418_v5 = vpop.f32.mrb[174].mxu1 }
 0x243   :  { %8951 = vst [vmem:[#allocation139_spill] sm:$0xff] %v6416_v13  ;;  %8952 = vst [vmem:[#allocation140_spill] sm:$0xff] %v6418_v5  ;;  %v2441_v49 = vadd.f32 %v2440_v18, %v2393_v62  ;;  %v2338_v20 = vadd.f32 %v2337_v48, %v6416_v13  ;;  %v2394_v50 = vmul.f32 %v6416_v13, %v6416_v13  ;;  %v4644_v17 = vpop.f32.mrb[175].mxu0  ;;  %v4754_v42 = vpop.f32.mrb[175].mxu1 }
 0x244   :  { %v2600_v38 = vadd.f32 %v2599_v44, %v2552_v2  ;;  %v2497_v32 = vadd.f32 %v2496_v3, %v6418_v5  ;;  %v2553_v30 = vmul.f32 %v6418_v5, %v6418_v5 }
 0x245   :  { %v2442_v15 = vadd.f32 %v2441_v49, %v2394_v50 }
 0x246   :  { %v2601_v8 = vadd.f32 %v2600_v38, %v2553_v30 }
 0x248   :  { %v6426_v12 = vpop.f32.mrb[176].mxu0  ;;  %v6428_v52 = vpop.f32.mrb[176].mxu1 }
 0x249   :  { %8953 = vst [vmem:[#allocation141_spill] sm:$0xff] %v6426_v12  ;;  %8954 = vst [vmem:[#allocation142_spill] sm:$0xff] %v6428_v52  ;;  %v2339_v18 = vadd.f32 %v2338_v20, %v6426_v12  ;;  %v2395_v44 = vmul.f32 %v6426_v12, %v6426_v12  ;;  %v2498_v48 = vadd.f32 %v2497_v32, %v6428_v52  ;;  %v4647_v62 = vpop.f32.mrb[177].mxu0  ;;  %v4757_v3 = vpop.f32.mrb[177].mxu1 }
 0x24a   :  { %v2554_v42 = vmul.f32 %v6428_v52, %v6428_v52  ;;  %v6436_v2 = vpop.f32.mrb[178].mxu0  ;;  %v6438_v49 = vpop.f32.mrb[178].mxu1 }
 0x24b   :  { %8955 = vst [vmem:[#allocation143_spill] sm:$0xff] %v6436_v2  ;;  %8956 = vst [vmem:[#allocation144_spill] sm:$0xff] %v6438_v49  ;;  %v2443_v30 = vadd.f32 %v2442_v15, %v2395_v44  ;;  %v2340_v50 = vadd.f32 %v2339_v18, %v6436_v2  ;;  %v2396_v20 = vmul.f32 %v6436_v2, %v6436_v2  ;;  %v4648_v17 = vpop.f32.mrb[179].mxu0  ;;  %v4758_v5 = vpop.f32.mrb[179].mxu1 }
 0x24c   :  { %v2602_v38 = vadd.f32 %v2601_v8, %v2554_v42  ;;  %v2499_v32 = vadd.f32 %v2498_v48, %v6438_v49  ;;  %v2555_v52 = vmul.f32 %v6438_v49, %v6438_v49 }
 0x24d   :  { %v2444_v62 = vadd.f32 %v2443_v30, %v2396_v20 }
 0x24e   :  { %v2603_v3 = vadd.f32 %v2602_v38, %v2555_v52 }
 0x250   :  { %v6446_v12 = vpop.f32.mrb[180].mxu0  ;;  %v6448_v13 = vpop.f32.mrb[180].mxu1 }
 0x251   :  { %8957 = vst [vmem:[#allocation145_spill] sm:$0xff] %v6446_v12  ;;  %8958 = vst [vmem:[#allocation146_spill] sm:$0xff] %v6448_v13  ;;  %v2341_v15 = vadd.f32 %v2340_v50, %v6446_v12  ;;  %v2397_v8 = vmul.f32 %v6446_v12, %v6446_v12  ;;  %v2500_v18 = vadd.f32 %v2499_v32, %v6448_v13  ;;  %v4651_v44 = vpop.f32.mrb[181].mxu0  ;;  %v4761_v48 = vpop.f32.mrb[181].mxu1 }
 0x252   :  { %v2556_v5 = vmul.f32 %v6448_v13, %v6448_v13  ;;  %v6456_v42 = vpop.f32.mrb[182].mxu0  ;;  %v6458_v30 = vpop.f32.mrb[182].mxu1 }
 0x253   :  { %8959 = vst [vmem:[#allocation147_spill] sm:$0xff] %v6456_v42  ;;  %8960 = vst [vmem:[#allocation148_spill] sm:$0xff] %v6458_v30  ;;  %v2445_v52 = vadd.f32 %v2444_v62, %v2397_v8  ;;  %v2342_v20 = vadd.f32 %v2341_v15, %v6456_v42  ;;  %v2398_v50 = vmul.f32 %v6456_v42, %v6456_v42  ;;  %v4652_v17 = vpop.f32.mrb[183].mxu0  ;;  %v4762_v49 = vpop.f32.mrb[183].mxu1 }
 0x254   :  { %v2604_v38 = vadd.f32 %v2603_v3, %v2556_v5  ;;  %v2501_v32 = vadd.f32 %v2500_v18, %v6458_v30  ;;  %v2557_v13 = vmul.f32 %v6458_v30, %v6458_v30 }
 0x255   :  { %v2446_v44 = vadd.f32 %v2445_v52, %v2398_v50 }
 0x256   :  { %v2605_v48 = vadd.f32 %v2604_v38, %v2557_v13 }
 0x258   :  { %v6466_v12 = vpop.f32.mrb[184].mxu0  ;;  %v6468_v2 = vpop.f32.mrb[184].mxu1 }
 0x259   :  { %8961 = vst [vmem:[#allocation149_spill] sm:$0xff] %v6466_v12  ;;  %8962 = vst [vmem:[#allocation150_spill] sm:$0xff] %v6468_v2  ;;  %v2343_v62 = vadd.f32 %v2342_v20, %v6466_v12  ;;  %v2399_v3 = vmul.f32 %v6466_v12, %v6466_v12  ;;  %v2502_v15 = vadd.f32 %v2501_v32, %v6468_v2  ;;  %v4655_v8 = vpop.f32.mrb[185].mxu0  ;;  %v4765_v18 = vpop.f32.mrb[185].mxu1 }
 0x25a   :  { %v2558_v49 = vmul.f32 %v6468_v2, %v6468_v2  ;;  %v6476_v5 = vpop.f32.mrb[186].mxu0  ;;  %v6478_v52 = vpop.f32.mrb[186].mxu1 }
 0x25b   :  { %8963 = vst [vmem:[#allocation151_spill] sm:$0xff] %v6476_v5  ;;  %8964 = vst [vmem:[#allocation152_spill] sm:$0xff] %v6478_v52  ;;  %v2447_v13 = vadd.f32 %v2446_v44, %v2399_v3  ;;  %v2344_v50 = vadd.f32 %v2343_v62, %v6476_v5  ;;  %v2400_v20 = vmul.f32 %v6476_v5, %v6476_v5  ;;  %v4656_v17 = vpop.f32.mrb[187].mxu0  ;;  %v4766_v30 = vpop.f32.mrb[187].mxu1 }
 0x25c   :  { %v2606_v38 = vadd.f32 %v2605_v48, %v2558_v49  ;;  %v2503_v32 = vadd.f32 %v2502_v15, %v6478_v52  ;;  %v2559_v2 = vmul.f32 %v6478_v52, %v6478_v52 }
 0x25d   :  { %v2448_v8 = vadd.f32 %v2447_v13, %v2400_v20 }
 0x25e   :  { %v2607_v18 = vadd.f32 %v2606_v38, %v2559_v2 }
 0x260   :  { %v6486_v12 = vpop.f32.mrb[188].mxu0  ;;  %v6488_v42 = vpop.f32.mrb[188].mxu1 }
 0x261   :  { %8965 = vst [vmem:[#allocation153_spill] sm:$0xff] %v6486_v12  ;;  %8966 = vst [vmem:[#allocation154_spill] sm:$0xff] %v6488_v42  ;;  %v2345_v44 = vadd.f32 %v2344_v50, %v6486_v12  ;;  %v2401_v48 = vmul.f32 %v6486_v12, %v6486_v12  ;;  %v2504_v62 = vadd.f32 %v2503_v32, %v6488_v42  ;;  %v4659_v3 = vpop.f32.mrb[189].mxu0  ;;  %v4769_v15 = vpop.f32.mrb[189].mxu1 }
 0x262   :  { %v2560_v30 = vmul.f32 %v6488_v42, %v6488_v42  ;;  %v6496_v49 = vpop.f32.mrb[190].mxu0  ;;  %v6498_v13 = vpop.f32.mrb[190].mxu1 }
 0x263   :  { %8967 = vst [vmem:[#allocation155_spill] sm:$0xff] %v6496_v49  ;;  %8968 = vst [vmem:[#allocation156_spill] sm:$0xff] %v6498_v13  ;;  %v2449_v2 = vadd.f32 %v2448_v8, %v2401_v48  ;;  %v2346_v20 = vadd.f32 %v2345_v44, %v6496_v49  ;;  %v2402_v50 = vmul.f32 %v6496_v49, %v6496_v49  ;;  %v4660_v17 = vpop.f32.mrb[191].mxu0  ;;  %v4770_v52 = vpop.f32.mrb[191].mxu1 }
 0x264   :  { %v2608_v38 = vadd.f32 %v2607_v18, %v2560_v30  ;;  %v2505_v32 = vadd.f32 %v2504_v62, %v6498_v13  ;;  %v2561_v42 = vmul.f32 %v6498_v13, %v6498_v13 }
 0x265   :  { %v2450_v3 = vadd.f32 %v2449_v2, %v2402_v50 }
 0x266   :  { %v2609_v15 = vadd.f32 %v2608_v38, %v2561_v42 }
 0x268   :  { %v6506_v12 = vpop.f32.mrb[192].mxu0  ;;  %v6508_v5 = vpop.f32.mrb[192].mxu1 }
 0x269   :  { %8969 = vst [vmem:[#allocation157_spill] sm:$0xff] %v6506_v12  ;;  %8970 = vst [vmem:[#allocation158_spill] sm:$0xff] %v6508_v5  ;;  %v2347_v8 = vadd.f32 %v2346_v20, %v6506_v12  ;;  %v2403_v18 = vmul.f32 %v6506_v12, %v6506_v12  ;;  %v2506_v44 = vadd.f32 %v2505_v32, %v6508_v5  ;;  %v4663_v48 = vpop.f32.mrb[193].mxu0  ;;  %v4773_v62 = vpop.f32.mrb[193].mxu1 }
 0x26a   :  { %v2562_v52 = vmul.f32 %v6508_v5, %v6508_v5  ;;  %v6516_v30 = vpop.f32.mrb[194].mxu0  ;;  %v6518_v2 = vpop.f32.mrb[194].mxu1 }
 0x26b   :  { %8971 = vst [vmem:[#allocation159_spill] sm:$0xff] %v6516_v30  ;;  %8972 = vst [vmem:[#allocation160_spill] sm:$0xff] %v6518_v2  ;;  %v2451_v42 = vadd.f32 %v2450_v3, %v2403_v18  ;;  %v2348_v50 = vadd.f32 %v2347_v8, %v6516_v30  ;;  %v2404_v20 = vmul.f32 %v6516_v30, %v6516_v30  ;;  %v4664_v17 = vpop.f32.mrb[195].mxu0  ;;  %v4774_v13 = vpop.f32.mrb[195].mxu1 }
 0x26c   :  { %v2610_v38 = vadd.f32 %v2609_v15, %v2562_v52  ;;  %v2507_v32 = vadd.f32 %v2506_v44, %v6518_v2  ;;  %v2563_v5 = vmul.f32 %v6518_v2, %v6518_v2 }
 0x26d   :  { %v2452_v48 = vadd.f32 %v2451_v42, %v2404_v20 }
 0x26e   :  { %v2611_v62 = vadd.f32 %v2610_v38, %v2563_v5 }
 0x270   :  { %v6526_v12 = vpop.f32.mrb[196].mxu0  ;;  %v6528_v49 = vpop.f32.mrb[196].mxu1 }
 0x271   :  { %8973 = vst [vmem:[#allocation161_spill] sm:$0xff] %v6526_v12  ;;  %8974 = vst [vmem:[#allocation162_spill] sm:$0xff] %v6528_v49  ;;  %v2349_v3 = vadd.f32 %v2348_v50, %v6526_v12  ;;  %v2405_v15 = vmul.f32 %v6526_v12, %v6526_v12  ;;  %v2508_v8 = vadd.f32 %v2507_v32, %v6528_v49  ;;  %v4667_v18 = vpop.f32.mrb[197].mxu0  ;;  %v4777_v44 = vpop.f32.mrb[197].mxu1 }
 0x272   :  { %v2564_v13 = vmul.f32 %v6528_v49, %v6528_v49  ;;  %v1501_v52 = vpop.f32.mrb[198].mxu0  ;;  %v1981_v17 = vpop.f32.mrb[198].mxu1 }
 0x273   :  { %v2350_v42 = vrot.slane %v2349_v3, 4  ;;  %v2453_v5 = vadd.f32 %v2452_v48, %v2405_v15  ;;  %v2509_v38 = vrot.slane %v2508_v8, 4  ;;  %v4668_v2 = vpop.f32.mrb[199].mxu0  ;;  %v4778_v30 = vpop.f32.mrb[199].mxu1 }
 0x274   :  { %v2612_v20 = vadd.f32 %v2611_v62, %v2564_v13 }
 0x275   :  { %v2351_v0 = vadd.f32 %v2350_v42, %v2349_v3  ;;  %v2454_v50 = vrot.slane %v2453_v5, 4  ;;  %v2510_v10 = vadd.f32 %v2509_v38, %v2508_v8 }
 0x276   :  { %v2613_v55 = vrot.slane %v2612_v20, 4 }
 0x277   :  { %v2352_v12 = vrot.slane %v2351_v0, 2  ;;  %v2455_v31 = vadd.f32 %v2454_v50, %v2453_v5  ;;  %v2511_v32 = vrot.slane %v2510_v10, 2 }
 0x278   :  { %v2614_v27 = vadd.f32 %v2613_v55, %v2612_v20 }
 0x279   :  { %v2353_v57 = vadd.f32 %v2352_v12, %v2351_v0  ;;  %v2456_v49 = vrot.slane %v2455_v31, 2  ;;  %v2512_v18 = vadd.f32 %v2511_v32, %v2510_v10 }
 0x27a   :  { %v2615_v44 = vrot.slane %v2614_v27, 2 }
 0x27b   :  { %v2354_v52 = vrot.slane %v2353_v57, 1  ;;  %v2457_v17 = vadd.f32 %v2456_v49, %v2455_v31  ;;  %v2513_v53 = vrot.slane %v2512_v18, 1 }
 0x27c   :  { %v2616_v48 = vadd.f32 %v2615_v44, %v2614_v27  ;;  %v2631_v27 = vlaneseq }
 0x27d   :  { %v2355_v15 = vadd.f32 %v2354_v52, %v2353_v57  ;;  %v2458_v62 = vrot.slane %v2457_v17, 1  ;;  %v2514_v8 = vadd.f32 %v2513_v53, %v2512_v18 }
 0x27e   :  { %v2617_v2 = vrot.slane %v2616_v48, 1  ;;  %v2632_v57 = vshrl.u32 %v2631_v27, 7 }
 0x27f   :  { %v2356_v30 = vadd.f32 %v2355_v15, %v6062_v46  ;;  %v2459_v3 = vadd.f32 %v2458_v62, %v2457_v17  ;;  %v1984_v46 = vld [vmem:[%s8499_s2] sm:$0x1] }
 0x280   :  { %v2618_v5 = vadd.f32 %v2617_v2, %v2616_v48  ;;  %v2633_v49 = vsub.s32 0, %v2632_v57  ;;  %v8985_v57 = vld [vmem:[#allocation57_spill] sm:$0xff] }
 0x281   :  { %v2460_v13 = vadd.f32 %v2459_v3, %v6068_v43  ;;  %v2515_v42 = vadd.f32 %v2514_v8, %v2356_v30  ;;  %v1985_v43 = vld [vmem:[%s8500_s3] sm:$0x1]  ;;  %v8975_v3 = vld [vmem:[#allocation37_spill] sm:$0xff]  ;;  %v8976_v8 = vld [vmem:[#allocation39_spill] sm:$0xff] }
 0x283   :  { %v2619_v55 = vadd.f32 %v2618_v5, %v2460_v13  ;;  %v2621_v12 = vmul.f32 0.0006377551, %v2515_v42  ;;  %v8977_v13 = vld [vmem:[#allocation41_spill] sm:$0xff]  ;;  %v8978_v42 = vld [vmem:[#allocation43_spill] sm:$0xff] }
 0x284   :  { %v8979_v5 = vld [vmem:[#allocation45_spill] sm:$0xff] }
 0x285   :  { %v2622_v0 = vmul.f32 0.0006377551, %v2619_v55  ;;  %v2623_v10 = vmul.f32 %v2621_v12, %v2621_v12  ;;  %v8980_v55 = vld [vmem:[#allocation47_spill] sm:$0xff] }
 0x287   :  { %v2624_v38 = vsub.f32 %v2622_v0, %v2623_v10  ;;  %v8982_v0 = vld [vmem:[#allocation51_spill] sm:$0xff] }
 0x289   :  { %v2625_v20 = vmax.f32 %v2624_v38, 0.0  ;;  %v8983_v38 = vld [vmem:[#allocation53_spill] sm:$0xff] }
 0x28b   :  { %v2626_v31 = vadd.f32 1e-05, %v2625_v20 }
 0x28d   :  { %4887 = vrsqrt.f32 %v2626_v31  ;;  %v8984_v31 = vld [vmem:[#allocation55_spill] sm:$0xff] }
 0x297   :  { %v4888_v53 = vpop.eup %4887 }
 0x298   :  { %v2628_v50 = vmul.f32 %v4888_v53, %v1984_v46  ;;  %v8986_v53 = vld [vmem:[#allocation59_spill] sm:$0xff] }
 0x29a   :  { %v2629_v32 = vmul.f32 %v2628_v50, %v2621_v12  ;;  %v6544_v18 = vrot.slane %v2628_v50, %v2633_v49  ;;  %v8981_v12 = vld [vmem:[#allocation49_spill] sm:$0xff] }
 0x29c   :  { %v2630_v44 = vsub.f32 %v1985_v43, %v2629_v32  ;;  %v2635_v52 = vmul.f32 %v6544_v18, %v5280_v1  ;;  %v2636_v17 = vmul.f32 %v6544_v18, %v5294_v9  ;;  %v2637_v48 = vmul.f32 %v6544_v18, %v5312_v19  ;;  %v8987_v43 = vld [vmem:[#allocation61_spill] sm:$0xff] }
 0x29d   :  { %v2638_v15 = vmul.f32 %v6544_v18, %v5328_v29  ;;  %v2639_v62 = vmul.f32 %v6544_v18, %v5344_v41  ;;  %v2640_v2 = vmul.f32 %v6544_v18, %v5360_v51  ;;  %v2641_v30 = vmul.f32 %v6544_v18, %v5376_v63 }
 0x29e   :  { %v2642_v1 = vmul.f32 %v6544_v18, %v5392_v14  ;;  %v2643_v9 = vmul.f32 %v6544_v18, %v5408_v28  ;;  %v2644_v19 = vmul.f32 %v6544_v18, %v5424_v40  ;;  %v2645_v29 = vmul.f32 %v6544_v18, %v5440_v56 }
 0x29f   :  { %v2646_v41 = vmul.f32 %v6544_v18, %v5456_v7  ;;  %v2647_v51 = vmul.f32 %v6544_v18, %v5472_v25  ;;  %v2648_v63 = vmul.f32 %v6544_v18, %v5488_v39  ;;  %v2649_v14 = vmul.f32 %v6544_v18, %v5504_v59 }
 0x2a0   :  { %v2650_v28 = vmul.f32 %v6544_v18, %v5520_v16  ;;  %v2651_v40 = vmul.f32 %v6544_v18, %v5536_v36  ;;  %v2652_v56 = vmul.f32 %v6544_v18, %v5552_v54  ;;  %v2653_v7 = vmul.f32 %v6544_v18, %v5568_v21 }
 0x2a1   :  { %v2654_v25 = vmul.f32 %v6544_v18, %v5584_v45  ;;  %v2655_v39 = vmul.f32 %v6544_v18, %v5600_v6  ;;  %v2656_v59 = vmul.f32 %v6544_v18, %v5616_v34  ;;  %v2657_v16 = vmul.f32 %v6544_v18, %v5632_v4 }
 0x2a2   :  { %v2658_v36 = vmul.f32 %v6544_v18, %v5648_v47  ;;  %v2659_v54 = vmul.f32 %v6544_v18, %v5664_v24  ;;  %v2660_v21 = vmul.f32 %v6544_v18, %v5680_v58  ;;  %v2661_v45 = vmul.f32 %v6544_v18, %v5696_v35 }
 0x2a3   :  { %v2662_v6 = vmul.f32 %v6544_v18, %v5712_v61  ;;  %v2663_v34 = vmul.f32 %v6544_v18, %v5728_v22  ;;  %v2664_v4 = vmul.f32 %v6544_v18, %v5744_v33  ;;  %v2665_v47 = vmul.f32 %v6544_v18, %v5760_v37 }
 0x2a4   :  { %v2666_v24 = vmul.f32 %v6544_v18, %v5776_v23  ;;  %v2667_v58 = vmul.f32 %v6544_v18, %v5792_v60  ;;  %v2668_v35 = vmul.f32 %v6544_v18, %v5808_v11  ;;  %v2669_v61 = vmul.f32 %v6544_v18, %v5824_v26 }
 0x2a5   :  { %v2670_v22 = vmul.f32 %v6544_v18, %v8975_v3  ;;  %v2671_v33 = vmul.f32 %v6544_v18, %v8976_v8  ;;  %v2672_v37 = vmul.f32 %v6544_v18, %v8977_v13  ;;  %v2673_v23 = vmul.f32 %v6544_v18, %v8978_v42  ;;  %v8988_v3 = vld [vmem:[#allocation63_spill] sm:$0xff]  ;;  %v8989_v42 = vld [vmem:[#allocation2_spill] sm:$0xff] }
 0x2a6   :  { %v2674_v60 = vmul.f32 %v6544_v18, %v8979_v5  ;;  %v2675_v11 = vmul.f32 %v6544_v18, %v8980_v55  ;;  %v2676_v26 = vmul.f32 %v6544_v18, %v8981_v12  ;;  %v2677_v10 = vmul.f32 %v6544_v18, %v8982_v0  ;;  %v8990_v55 = vld [vmem:[#allocation3_spill] sm:$0xff]  ;;  %v8991_v0 = vld [vmem:[#allocation4_spill] sm:$0xff] }
 0x2a7   :  { %v2678_v20 = vmul.f32 %v6544_v18, %v8983_v38  ;;  %v2679_v27 = vmul.f32 %v6544_v18, %v8984_v31  ;;  %v2680_v46 = vmul.f32 %v6544_v18, %v8985_v57  ;;  %v2681_v50 = vmul.f32 %v6544_v18, %v8986_v53  ;;  %v8992_v31 = vld [vmem:[#allocation5_spill] sm:$0xff]  ;;  %v8994_v53 = vld [vmem:[#allocation6_spill] sm:$0xff] }
 0x2a8   :  { %v2682_v32 = vmul.f32 %v6544_v18, %v8987_v43  ;;  %v2683_v8 = vmul.f32 %v6544_v18, %v8988_v3  ;;  %v6644_v13 = vrot.slane %v2630_v44, %v2633_v49  ;;  %v6648_v5 = vmul.f32 %v6544_v18, %v8989_v42 }
 0x2a9   :  { %v6652_v12 = vmul.f32 %v6544_v18, %v8990_v55  ;;  %v6656_v38 = vmul.f32 %v6544_v18, %v8991_v0  ;;  %v6660_v57 = vmul.f32 %v6544_v18, %v8992_v31  ;;  %v6664_v49 = vmul.f32 %v6544_v18, %v8994_v53 }
 0x2aa   :  { %v6667_v44 = vadd.f32 %v6644_v13, %v2635_v52  ;;  %v6670_v43 = vadd.f32 %v6644_v13, %v2636_v17  ;;  %v6673_v3 = vadd.f32 %v6644_v13, %v2637_v48  ;;  %v6676_v42 = vadd.f32 %v6644_v13, %v2638_v15 }
 0x2ab   :  { %8993 = vst [vmem:[#allocation37_spill] sm:$0xff] %v6660_v57  ;;  %8995 = vst [vmem:[#allocation39_spill] sm:$0xff] %v6664_v49  ;;  %v6679_v55 = vadd.f32 %v6644_v13, %v2639_v62  ;;  %v6682_v0 = vadd.f32 %v6644_v13, %v2640_v2  ;;  %v6685_v31 = vadd.f32 %v6644_v13, %v2641_v30 }
 0x2ac   :  { %8996 = vst [vmem:[#allocation41_spill] sm:$0xff] %v6670_v43  ;;  %8997 = vst [vmem:[#allocation43_spill] sm:$0xff] %v6673_v3  ;;  %v6688_v52 = vadd.f32 %v6644_v13, %v2642_v1  ;;  %v6691_v17 = vadd.f32 %v6644_v13, %v2643_v9  ;;  %v6694_v48 = vadd.f32 %v6644_v13, %v2644_v19 }
 0x2ad   :  { %8998 = vst [vmem:[#allocation45_spill] sm:$0xff] %v6676_v42  ;;  %8999 = vst [vmem:[#allocation47_spill] sm:$0xff] %v6679_v55  ;;  %v6697_v15 = vadd.f32 %v6644_v13, %v2645_v29  ;;  %v6700_v62 = vadd.f32 %v6644_v13, %v2646_v41  ;;  %v6703_v2 = vadd.f32 %v6644_v13, %v2647_v51 }
 0x2ae   :  { %9000 = vst [vmem:[#allocation49_spill] sm:$0xff] %v6682_v0  ;;  %9001 = vst [vmem:[#allocation51_spill] sm:$0xff] %v6685_v31  ;;  %v6706_v30 = vadd.f32 %v6644_v13, %v2648_v63  ;;  %v6709_v1 = vadd.f32 %v6644_v13, %v2649_v14  ;;  %v6712_v9 = vadd.f32 %v6644_v13, %v2650_v28 }
 0x2af   :  { %9002 = vst [vmem:[#allocation53_spill] sm:$0xff] %v6688_v52  ;;  %9003 = vst [vmem:[#allocation55_spill] sm:$0xff] %v6691_v17  ;;  %v6715_v19 = vadd.f32 %v6644_v13, %v2651_v40  ;;  %v6718_v29 = vadd.f32 %v6644_v13, %v2652_v56  ;;  %v6721_v41 = vadd.f32 %v6644_v13, %v2653_v7  ;;  %v9087_v17 = vld [vmem:[#allocation64_spill] sm:$0xff] }
 0x2b0   :  { %9004 = vst [vmem:[#allocation57_spill] sm:$0xff] %v6694_v48  ;;  %9005 = vst [vmem:[#allocation59_spill] sm:$0xff] %v6697_v15  ;;  %v6724_v51 = vadd.f32 %v6644_v13, %v2654_v25  ;;  %v6727_v63 = vadd.f32 %v6644_v13, %v2655_v39  ;;  %v6730_v14 = vadd.f32 %v6644_v13, %v2656_v59  ;;  %v9085_v15 = vld [vmem:[#allocation60_spill] sm:$0xff]  ;;  %v9086_v48 = vld [vmem:[#allocation62_spill] sm:$0xff] }
 0x2b1   :  { %9006 = vst [vmem:[#allocation61_spill] sm:$0xff] %v6700_v62  ;;  %9007 = vst [vmem:[#allocation63_spill] sm:$0xff] %v6703_v2  ;;  %v6733_v28 = vadd.f32 %v6644_v13, %v2657_v16  ;;  %v6736_v40 = vadd.f32 %v6644_v13, %v2658_v36  ;;  %v6739_v56 = vadd.f32 %v6644_v13, %v2659_v54  ;;  %v9083_v2 = vld [vmem:[#allocation56_spill] sm:$0xff]  ;;  %v9084_v62 = vld [vmem:[#allocation58_spill] sm:$0xff] }
 0x2b2   :  { %9008 = vst [vmem:[#allocation2_spill] sm:$0xff] %v6706_v30  ;;  %9009 = vst [vmem:[#allocation3_spill] sm:$0xff] %v6709_v1  ;;  %v6742_v7 = vadd.f32 %v6644_v13, %v2660_v21  ;;  %v6745_v25 = vadd.f32 %v6644_v13, %v2661_v45  ;;  %v6748_v39 = vadd.f32 %v6644_v13, %v2662_v6  ;;  %v9081_v1 = vld [vmem:[#allocation52_spill] sm:$0xff]  ;;  %v9082_v30 = vld [vmem:[#allocation54_spill] sm:$0xff] }
 0x2b3   :  { %9010 = vst [vmem:[#allocation4_spill] sm:$0xff] %v6712_v9  ;;  %9011 = vst [vmem:[#allocation5_spill] sm:$0xff] %v6715_v19  ;;  %v6751_v59 = vadd.f32 %v6644_v13, %v2663_v34  ;;  %v6754_v16 = vadd.f32 %v6644_v13, %v2664_v4  ;;  %v6757_v36 = vadd.f32 %v6644_v13, %v2665_v47  ;;  %v9079_v19 = vld [vmem:[#allocation48_spill] sm:$0xff]  ;;  %v9080_v9 = vld [vmem:[#allocation50_spill] sm:$0xff] }
 0x2b4   :  { %9012 = vst [vmem:[#allocation6_spill] sm:$0xff] %v6718_v29  ;;  %9013 = vst [vmem:[#allocation163_spill] sm:$0xff] %v6721_v41  ;;  %v6760_v54 = vadd.f32 %v6644_v13, %v2666_v24  ;;  %v6763_v21 = vadd.f32 %v6644_v13, %v2667_v58  ;;  %v6766_v45 = vadd.f32 %v6644_v13, %v2668_v35  ;;  %v9077_v41 = vld [vmem:[#allocation44_spill] sm:$0xff]  ;;  %v9078_v29 = vld [vmem:[#allocation46_spill] sm:$0xff] }
 0x2b5   :  { %9014 = vst [vmem:[#allocation164_spill] sm:$0xff] %v6724_v51  ;;  %9015 = vst [vmem:[#allocation165_spill] sm:$0xff] %v6727_v63  ;;  %v6769_v6 = vadd.f32 %v6644_v13, %v2669_v61  ;;  %v6772_v34 = vadd.f32 %v6644_v13, %v2670_v22  ;;  %v6775_v4 = vadd.f32 %v6644_v13, %v2671_v33  ;;  %v9075_v63 = vld [vmem:[#allocation40_spill] sm:$0xff]  ;;  %v9076_v51 = vld [vmem:[#allocation42_spill] sm:$0xff] }
 0x2b6   :  { %9016 = vst [vmem:[#allocation166_spill] sm:$0xff] %v6730_v14  ;;  %9017 = vst [vmem:[#allocation167_spill] sm:$0xff] %v6733_v28  ;;  %v6778_v47 = vadd.f32 %v6644_v13, %v2672_v37  ;;  %v6781_v24 = vadd.f32 %v6644_v13, %v2673_v23  ;;  %v6784_v58 = vadd.f32 %v6644_v13, %v2674_v60  ;;  %v9073_v28 = vld [vmem:[#allocation36_spill] sm:$0xff]  ;;  %v9074_v14 = vld [vmem:[#allocation38_spill] sm:$0xff] }
 0x2b7   :  { %9018 = vst [vmem:[#allocation168_spill] sm:$0xff] %v6736_v40  ;;  %9019 = vst [vmem:[#allocation169_spill] sm:$0xff] %v6739_v56  ;;  %v6787_v35 = vadd.f32 %v6644_v13, %v2675_v11  ;;  %v6790_v61 = vadd.f32 %v6644_v13, %v2676_v26  ;;  %v6793_v22 = vadd.f32 %v6644_v13, %v2677_v10  ;;  %v9045_v10 = vld [vmem:[#allocation8_spill] sm:$0xff]  ;;  %v9071_v56 = vld [vmem:[#allocation34_spill] sm:$0xff] }
 0x2b8   :  { %9020 = vst [vmem:[#allocation170_spill] sm:$0xff] %v6742_v7  ;;  %9021 = vst [vmem:[#allocation171_spill] sm:$0xff] %v6745_v25  ;;  %v6796_v33 = vadd.f32 %v6644_v13, %v2678_v20  ;;  %v6799_v37 = vadd.f32 %v6644_v13, %v2679_v27  ;;  %v6802_v23 = vadd.f32 %v6644_v13, %v2680_v46  ;;  %v9047_v27 = vld [vmem:[#allocation10_spill] sm:$0xff]  ;;  %v9069_v25 = vld [vmem:[#allocation32_spill] sm:$0xff] }
 0x2b9   :  { %9022 = vst [vmem:[#allocation172_spill] sm:$0xff] %v6748_v39  ;;  %9023 = vst [vmem:[#allocation173_spill] sm:$0xff] %v6751_v59  ;;  %v6805_v60 = vadd.f32 %v6644_v13, %v2681_v50  ;;  %v6808_v11 = vadd.f32 %v6644_v13, %v2682_v32  ;;  %v6811_v26 = vadd.f32 %v6644_v13, %v2683_v8  ;;  %v9049_v50 = vld [vmem:[#allocation12_spill] sm:$0xff]  ;;  %v9067_v59 = vld [vmem:[#allocation30_spill] sm:$0xff] }
 0x2ba   :  { %9024 = vst [vmem:[#allocation174_spill] sm:$0xff] %v6754_v16  ;;  %9025 = vst [vmem:[#allocation175_spill] sm:$0xff] %v6757_v36  ;;  %v2794_v20 = vmul.f32 %v6544_v18, %v9045_v10  ;;  %v2796_v46 = vmul.f32 %v6544_v18, %v9047_v27  ;;  %v2798_v32 = vmul.f32 %v6544_v18, %v9049_v50  ;;  %v9065_v36 = vld [vmem:[#allocation28_spill] sm:$0xff]  ;;  %v9066_v16 = vld [vmem:[#allocation29_spill] sm:$0xff] }
 0x2bb   :  { %9026 = vst [vmem:[#allocation176_spill] sm:$0xff] %v6760_v54  ;;  %9027 = vst [vmem:[#allocation177_spill] sm:$0xff] %v6763_v21  ;;  %v9063_v21 = vld [vmem:[#allocation26_spill] sm:$0xff]  ;;  %v9064_v54 = vld [vmem:[#allocation27_spill] sm:$0xff] }
 0x2bc   :  { %9028 = vst [vmem:[#allocation178_spill] sm:$0xff] %v6766_v45  ;;  %9029 = vst [vmem:[#allocation179_spill] sm:$0xff] %v6769_v6  ;;  %v9061_v6 = vld [vmem:[#allocation24_spill] sm:$0xff]  ;;  %v9062_v45 = vld [vmem:[#allocation25_spill] sm:$0xff] }
 0x2bd   :  { %9030 = vst [vmem:[#allocation180_spill] sm:$0xff] %v6772_v34  ;;  %9031 = vst [vmem:[#allocation181_spill] sm:$0xff] %v6775_v4  ;;  %v9059_v4 = vld [vmem:[#allocation22_spill] sm:$0xff]  ;;  %v9060_v34 = vld [vmem:[#allocation23_spill] sm:$0xff] }
 0x2be   :  { %9032 = vst [vmem:[#allocation182_spill] sm:$0xff] %v6778_v47  ;;  %9033 = vst [vmem:[#allocation183_spill] sm:$0xff] %v6781_v24  ;;  %v9044_v24 = vld [vmem:[#allocation7_spill] sm:$0xff]  ;;  %v9058_v47 = vld [vmem:[#allocation21_spill] sm:$0xff] }
 0x2bf   :  { %9034 = vst [vmem:[#allocation184_spill] sm:$0xff] %v6784_v58  ;;  %9035 = vst [vmem:[#allocation185_spill] sm:$0xff] %v6787_v35  ;;  %v2793_v8 = vmul.f32 %v6544_v18, %v9044_v24  ;;  %v9056_v35 = vld [vmem:[#allocation19_spill] sm:$0xff]  ;;  %v9057_v58 = vld [vmem:[#allocation20_spill] sm:$0xff] }
 0x2c0   :  { %9036 = vst [vmem:[#allocation186_spill] sm:$0xff] %v6790_v61  ;;  %9037 = vst [vmem:[#allocation187_spill] sm:$0xff] %v6793_v22  ;;  %v9046_v61 = vld [vmem:[#allocation9_spill] sm:$0xff]  ;;  %v9055_v22 = vld [vmem:[#allocation18_spill] sm:$0xff]  ;;  %v2805_v50 = vmul.f32 %v6544_v18, %v9056_v35  ;;  %v2812_v35 = vmul.f32 %v6544_v18, %v9063_v21 }
 0x2c1   :  { %9038 = vst [vmem:[#allocation188_spill] sm:$0xff] %v6796_v33  ;;  %9039 = vst [vmem:[#allocation189_spill] sm:$0xff] %v6799_v37  ;;  %v2795_v53 = vmul.f32 %v6544_v18, %v9046_v61  ;;  %v9048_v37 = vld [vmem:[#allocation11_spill] sm:$0xff]  ;;  %v9054_v33 = vld [vmem:[#allocation17_spill] sm:$0xff] }
 0x2c2   :  { %9040 = vst [vmem:[#allocation190_spill] sm:$0xff] %v6802_v23  ;;  %9041 = vst [vmem:[#allocation191_spill] sm:$0xff] %v6805_v60  ;;  %v2797_v49 = vmul.f32 %v6544_v18, %v9048_v37  ;;  %v9052_v60 = vld [vmem:[#allocation15_spill] sm:$0xff]  ;;  %v9053_v23 = vld [vmem:[#allocation16_spill] sm:$0xff]  ;;  %v2803_v27 = vmul.f32 %v6544_v18, %v9054_v33  ;;  %v2804_v37 = vmul.f32 %v6544_v18, %v9055_v22 }
 0x2c3   :  { %9042 = vst [vmem:[#allocation192_spill] sm:$0xff] %v6808_v11  ;;  %9043 = vst [vmem:[#allocation193_spill] sm:$0xff] %v6811_v26  ;;  %v9050_v11 = vld [vmem:[#allocation13_spill] sm:$0xff]  ;;  %v9051_v26 = vld [vmem:[#allocation14_spill] sm:$0xff]  ;;  %v2801_v10 = vmul.f32 %v6544_v18, %v9052_v60  ;;  %v2802_v61 = vmul.f32 %v6544_v18, %v9053_v23  ;;  %v2808_v60 = vmul.f32 %v6544_v18, %v9059_v4 }
 0x2c4   :  { %v2799_v57 = vmul.f32 %v6544_v18, %v9050_v11  ;;  %v2800_v24 = vmul.f32 %v6544_v18, %v9051_v26  ;;  %v2806_v11 = vmul.f32 %v6544_v18, %v9057_v58  ;;  %v2807_v26 = vmul.f32 %v6544_v18, %v9058_v47  ;;  %v9068_v39 = vld [vmem:[#allocation31_spill] sm:$0xff]  ;;  %v9070_v7 = vld [vmem:[#allocation33_spill] sm:$0xff] }
 0x2c5   :  { %v2809_v23 = vmul.f32 %v6544_v18, %v9060_v34  ;;  %v2810_v33 = vmul.f32 %v6544_v18, %v9061_v6  ;;  %v2811_v22 = vmul.f32 %v6544_v18, %v9062_v45  ;;  %v2813_v58 = vmul.f32 %v6544_v18, %v9064_v54  ;;  %v9072_v40 = vld [vmem:[#allocation35_spill] sm:$0xff] }
 0x2c6   :  { %v2814_v47 = vmul.f32 %v6544_v18, %v9065_v36  ;;  %v2815_v4 = vmul.f32 %v6544_v18, %v9066_v16  ;;  %v2816_v34 = vmul.f32 %v6544_v18, %v9067_v59  ;;  %v2817_v6 = vmul.f32 %v6544_v18, %v9068_v39 }
 0x2c7   :  { %v2818_v45 = vmul.f32 %v6544_v18, %v9069_v25  ;;  %v2819_v21 = vmul.f32 %v6544_v18, %v9070_v7  ;;  %v2820_v54 = vmul.f32 %v6544_v18, %v9071_v56  ;;  %v2821_v36 = vmul.f32 %v6544_v18, %v9072_v40 }
 0x2c8   :  { %v2822_v16 = vmul.f32 %v6544_v18, %v9073_v28  ;;  %v2823_v59 = vmul.f32 %v6544_v18, %v9074_v14  ;;  %v2824_v39 = vmul.f32 %v6544_v18, %v9075_v63  ;;  %v2825_v25 = vmul.f32 %v6544_v18, %v9076_v51 }
 0x2c9   :  { %v2826_v7 = vmul.f32 %v6544_v18, %v9077_v41  ;;  %v2827_v56 = vmul.f32 %v6544_v18, %v9078_v29  ;;  %v2828_v40 = vmul.f32 %v6544_v18, %v9079_v19  ;;  %v2829_v28 = vmul.f32 %v6544_v18, %v9080_v9 }
 0x2ca   :  { %v2830_v14 = vmul.f32 %v6544_v18, %v9081_v1  ;;  %v2831_v63 = vmul.f32 %v6544_v18, %v9082_v30  ;;  %v2832_v51 = vmul.f32 %v6544_v18, %v9083_v2  ;;  %v2833_v41 = vmul.f32 %v6544_v18, %v9084_v62 }
 0x2cb   :  { %v2834_v29 = vmul.f32 %v6544_v18, %v9085_v15  ;;  %v2835_v19 = vmul.f32 %v6544_v18, %v9086_v48  ;;  %v2836_v9 = vmul.f32 %v6544_v18, %v9087_v17  ;;  %v6952_v1 = vadd.f32 %v6648_v5, %v6644_v13  ;;  %v9089_v15 = vld [vmem:[#allocation37_spill] sm:$0xff]  ;;  %v9091_v48 = vld [vmem:[#allocation39_spill] sm:$0xff] }
 0x2cc   :  { %v6956_v30 = vadd.f32 %v6652_v12, %v6644_v13  ;;  %v6960_v62 = vadd.f32 %v6656_v38, %v6644_v13  ;;  %v6964_v2 = vadd.f32 %v9089_v15, %v6644_v13  ;;  %v6968_v52 = vadd.f32 %v9091_v48, %v6644_v13 }
 0x2cd   :  { %v6971_v17 = vadd.f32 %v2793_v8, %v6644_v13  ;;  %v6974_v5 = vadd.f32 %v2794_v20, %v6644_v13  ;;  %v6977_v12 = vadd.f32 %v2795_v53, %v6644_v13  ;;  %v6980_v38 = vadd.f32 %v2796_v46, %v6644_v13 }
 0x2ce   :  { %9088 = vst [vmem:[#allocation7_spill] sm:$0xff] %v6960_v62  ;;  %9090 = vst [vmem:[#allocation8_spill] sm:$0xff] %v6964_v2  ;;  %v6983_v31 = vadd.f32 %v2797_v49, %v6644_v13  ;;  %v6986_v15 = vadd.f32 %v2798_v32, %v6644_v13  ;;  %v6989_v48 = vadd.f32 %v2799_v57, %v6644_v13  ;;  %v9185_v2 = vld [vmem:[#allocation161_spill] sm:$0xff] }
 0x2cf   :  { %9092 = vst [vmem:[#allocation9_spill] sm:$0xff] %v6968_v52  ;;  %9093 = vst [vmem:[#allocation10_spill] sm:$0xff] %v6971_v17  ;;  %v6992_v8 = vadd.f32 %v2800_v24, %v6644_v13  ;;  %v6995_v20 = vadd.f32 %v2801_v10, %v6644_v13  ;;  %v6998_v53 = vadd.f32 %v2802_v61, %v6644_v13  ;;  %v9183_v17 = vld [vmem:[#allocation157_spill] sm:$0xff]  ;;  %v9184_v52 = vld [vmem:[#allocation159_spill] sm:$0xff] }
 0x2d0   :  { %9094 = vst [vmem:[#allocation11_spill] sm:$0xff] %v6974_v5  ;;  %9095 = vst [vmem:[#allocation12_spill] sm:$0xff] %v6977_v12  ;;  %v7001_v46 = vadd.f32 %v2803_v27, %v6644_v13  ;;  %v7004_v49 = vadd.f32 %v2804_v37, %v6644_v13  ;;  %v7007_v32 = vadd.f32 %v2805_v50, %v6644_v13  ;;  %v9181_v12 = vld [vmem:[#allocation153_spill] sm:$0xff]  ;;  %v9182_v5 = vld [vmem:[#allocation155_spill] sm:$0xff] }
 0x2d1   :  { %9096 = vst [vmem:[#allocation13_spill] sm:$0xff] %v6980_v38  ;;  %9097 = vst [vmem:[#allocation14_spill] sm:$0xff] %v6983_v31  ;;  %v7010_v57 = vadd.f32 %v2806_v11, %v6644_v13  ;;  %v7013_v24 = vadd.f32 %v2807_v26, %v6644_v13  ;;  %v7016_v10 = vadd.f32 %v2808_v60, %v6644_v13  ;;  %v9179_v31 = vld [vmem:[#allocation149_spill] sm:$0xff]  ;;  %v9180_v38 = vld [vmem:[#allocation151_spill] sm:$0xff] }
 0x2d2   :  { %9098 = vst [vmem:[#allocation15_spill] sm:$0xff] %v6986_v15  ;;  %9099 = vst [vmem:[#allocation16_spill] sm:$0xff] %v6989_v48  ;;  %v7019_v61 = vadd.f32 %v2809_v23, %v6644_v13  ;;  %v7022_v27 = vadd.f32 %v2810_v33, %v6644_v13  ;;  %v7025_v37 = vadd.f32 %v2811_v22, %v6644_v13  ;;  %v9177_v48 = vld [vmem:[#allocation145_spill] sm:$0xff]  ;;  %v9178_v15 = vld [vmem:[#allocation147_spill] sm:$0xff] }
 0x2d3   :  { %9100 = vst [vmem:[#allocation17_spill] sm:$0xff] %v6992_v8  ;;  %9101 = vst [vmem:[#allocation18_spill] sm:$0xff] %v6995_v20  ;;  %v7028_v50 = vadd.f32 %v2812_v35, %v6644_v13  ;;  %v7031_v11 = vadd.f32 %v2813_v58, %v6644_v13  ;;  %v7034_v26 = vadd.f32 %v2814_v47, %v6644_v13  ;;  %v9175_v20 = vld [vmem:[#allocation141_spill] sm:$0xff]  ;;  %v9176_v8 = vld [vmem:[#allocation143_spill] sm:$0xff] }
 0x2d4   :  { %9102 = vst [vmem:[#allocation19_spill] sm:$0xff] %v6998_v53  ;;  %9103 = vst [vmem:[#allocation20_spill] sm:$0xff] %v7001_v46  ;;  %v7037_v60 = vadd.f32 %v2815_v4, %v6644_v13  ;;  %v7040_v23 = vadd.f32 %v2816_v34, %v6644_v13  ;;  %v7043_v33 = vadd.f32 %v2817_v6, %v6644_v13  ;;  %v9173_v46 = vld [vmem:[#allocation137_spill] sm:$0xff]  ;;  %v9174_v53 = vld [vmem:[#allocation139_spill] sm:$0xff] }
 0x2d5   :  { %9104 = vst [vmem:[#allocation21_spill] sm:$0xff] %v7004_v49  ;;  %9105 = vst [vmem:[#allocation22_spill] sm:$0xff] %v7007_v32  ;;  %v7046_v22 = vadd.f32 %v2818_v45, %v6644_v13  ;;  %v7049_v35 = vadd.f32 %v2819_v21, %v6644_v13  ;;  %v7052_v58 = vadd.f32 %v2820_v54, %v6644_v13  ;;  %v9171_v32 = vld [vmem:[#allocation133_spill] sm:$0xff]  ;;  %v9172_v49 = vld [vmem:[#allocation135_spill] sm:$0xff] }
 0x2d6   :  { %9106 = vst [vmem:[#allocation23_spill] sm:$0xff] %v7010_v57  ;;  %9107 = vst [vmem:[#allocation24_spill] sm:$0xff] %v7013_v24  ;;  %v7055_v47 = vadd.f32 %v2821_v36, %v6644_v13  ;;  %v7058_v4 = vadd.f32 %v2822_v16, %v6644_v13  ;;  %v7061_v34 = vadd.f32 %v2823_v59, %v6644_v13  ;;  %v9169_v24 = vld [vmem:[#allocation129_spill] sm:$0xff]  ;;  %v9170_v57 = vld [vmem:[#allocation131_spill] sm:$0xff] }
 0x2d7   :  { %9108 = vst [vmem:[#allocation25_spill] sm:$0xff] %v7016_v10  ;;  %9109 = vst [vmem:[#allocation26_spill] sm:$0xff] %v7019_v61  ;;  %v7064_v6 = vadd.f32 %v2824_v39, %v6644_v13  ;;  %v7067_v45 = vadd.f32 %v2825_v25, %v6644_v13  ;;  %v7070_v21 = vadd.f32 %v2826_v7, %v6644_v13  ;;  %v9167_v61 = vld [vmem:[#allocation125_spill] sm:$0xff]  ;;  %v9168_v10 = vld [vmem:[#allocation127_spill] sm:$0xff] }
 0x2d8   :  { %9110 = vst [vmem:[#allocation27_spill] sm:$0xff] %v7022_v27  ;;  %9111 = vst [vmem:[#allocation28_spill] sm:$0xff] %v7025_v37  ;;  %v7073_v54 = vadd.f32 %v2827_v56, %v6644_v13  ;;  %v7076_v36 = vadd.f32 %v2828_v40, %v6644_v13  ;;  %v7079_v16 = vadd.f32 %v2829_v28, %v6644_v13  ;;  %v9165_v37 = vld [vmem:[#allocation121_spill] sm:$0xff]  ;;  %v9166_v27 = vld [vmem:[#allocation123_spill] sm:$0xff] }
 0x2d9   :  { %9112 = vst [vmem:[#allocation29_spill] sm:$0xff] %v7028_v50  ;;  %9113 = vst [vmem:[#allocation30_spill] sm:$0xff] %v7031_v11  ;;  %v7082_v59 = vadd.f32 %v2830_v14, %v6644_v13  ;;  %v7085_v39 = vadd.f32 %v2831_v63, %v6644_v13  ;;  %v7088_v25 = vadd.f32 %v2832_v51, %v6644_v13  ;;  %v9138_v14 = vld [vmem:[#allocation67_spill] sm:$0xff]  ;;  %v9163_v11 = vld [vmem:[#allocation117_spill] sm:$0xff] }
 0x2da   :  { %9114 = vst [vmem:[#allocation31_spill] sm:$0xff] %v7034_v26  ;;  %9115 = vst [vmem:[#allocation32_spill] sm:$0xff] %v7037_v60  ;;  %v7091_v7 = vadd.f32 %v2833_v41, %v6644_v13  ;;  %v7094_v56 = vadd.f32 %v2834_v29, %v6644_v13  ;;  %v7097_v40 = vadd.f32 %v2835_v19, %v6644_v13  ;;  %v9140_v51 = vld [vmem:[#allocation71_spill] sm:$0xff]  ;;  %v9161_v60 = vld [vmem:[#allocation113_spill] sm:$0xff] }
 0x2db   :  { %9116 = vst [vmem:[#allocation33_spill] sm:$0xff] %v7040_v23  ;;  %9117 = vst [vmem:[#allocation34_spill] sm:$0xff] %v7043_v33  ;;  %v7100_v28 = vadd.f32 %v2836_v9, %v6644_v13  ;;  %v2936_v63 = vmul.f32 %v6544_v18, %v9138_v14  ;;  %v2938_v41 = vmul.f32 %v6544_v18, %v9140_v51  ;;  %v9142_v29 = vld [vmem:[#allocation75_spill] sm:$0xff]  ;;  %v9159_v33 = vld [vmem:[#allocation109_spill] sm:$0xff] }
 0x2dc   :  { %9118 = vst [vmem:[#allocation35_spill] sm:$0xff] %v7046_v22  ;;  %9119 = vst [vmem:[#allocation36_spill] sm:$0xff] %v7049_v35  ;;  %v2940_v19 = vmul.f32 %v6544_v18, %v9142_v29  ;;  %v9157_v35 = vld [vmem:[#allocation105_spill] sm:$0xff]  ;;  %v9158_v22 = vld [vmem:[#allocation107_spill] sm:$0xff] }
 0x2dd   :  { %9120 = vst [vmem:[#allocation38_spill] sm:$0xff] %v7052_v58  ;;  %9121 = vst [vmem:[#allocation40_spill] sm:$0xff] %v7055_v47  ;;  %v9155_v47 = vld [vmem:[#allocation101_spill] sm:$0xff]  ;;  %v9156_v58 = vld [vmem:[#allocation103_spill] sm:$0xff] }
 0x2de   :  { %9122 = vst [vmem:[#allocation42_spill] sm:$0xff] %v7058_v4  ;;  %9123 = vst [vmem:[#allocation44_spill] sm:$0xff] %v7061_v34  ;;  %v9153_v34 = vld [vmem:[#allocation97_spill] sm:$0xff]  ;;  %v9154_v4 = vld [vmem:[#allocation99_spill] sm:$0xff] }
 0x2df   :  { %9124 = vst [vmem:[#allocation46_spill] sm:$0xff] %v7064_v6  ;;  %9125 = vst [vmem:[#allocation48_spill] sm:$0xff] %v7067_v45  ;;  %v9151_v45 = vld [vmem:[#allocation93_spill] sm:$0xff]  ;;  %v9152_v6 = vld [vmem:[#allocation95_spill] sm:$0xff] }
 0x2e0   :  { %9126 = vst [vmem:[#allocation50_spill] sm:$0xff] %v7070_v21  ;;  %9127 = vst [vmem:[#allocation52_spill] sm:$0xff] %v7073_v54  ;;  %v9137_v21 = vld [vmem:[#allocation65_spill] sm:$0xff]  ;;  %v9150_v54 = vld [vmem:[#allocation91_spill] sm:$0xff] }
 0x2e1   :  { %9128 = vst [vmem:[#allocation54_spill] sm:$0xff] %v7076_v36  ;;  %9129 = vst [vmem:[#allocation56_spill] sm:$0xff] %v7079_v16  ;;  %v2935_v9 = vmul.f32 %v6544_v18, %v9137_v21  ;;  %v9139_v16 = vld [vmem:[#allocation69_spill] sm:$0xff]  ;;  %v9160_v23 = vld [vmem:[#allocation111_spill] sm:$0xff] }
 0x2e2   :  { %9130 = vst [vmem:[#allocation58_spill] sm:$0xff] %v7082_v59  ;;  %9131 = vst [vmem:[#allocation60_spill] sm:$0xff] %v7085_v39  ;;  %v2937_v0 = vmul.f32 %v6544_v18, %v9139_v16  ;;  %v9147_v39 = vld [vmem:[#allocation85_spill] sm:$0xff]  ;;  %v9148_v59 = vld [vmem:[#allocation87_spill] sm:$0xff] }
 0x2e3   :  { %9132 = vst [vmem:[#allocation62_spill] sm:$0xff] %v7088_v25  ;;  %9133 = vst [vmem:[#allocation64_spill] sm:$0xff] %v7091_v7  ;;  %v9141_v25 = vld [vmem:[#allocation73_spill] sm:$0xff]  ;;  %v9146_v7 = vld [vmem:[#allocation83_spill] sm:$0xff]  ;;  %v2945_v51 = vmul.f32 %v6544_v18, %v9147_v39  ;;  %v2952_v39 = vmul.f32 %v6544_v18, %v9154_v4  ;;  %v2959_v4 = vmul.f32 %v6544_v18, %v9161_v60 }
 0x2e4   :  { %9134 = vst [vmem:[#allocation37_spill] sm:$0xff] %v7094_v56  ;;  %9135 = vst [vmem:[#allocation39_spill] sm:$0xff] %v7097_v40  ;;  %v2939_v55 = vmul.f32 %v6544_v18, %v9141_v25  ;;  %v9143_v40 = vld [vmem:[#allocation77_spill] sm:$0xff]  ;;  %v2944_v16 = vmul.f32 %v6544_v18, %v9146_v7  ;;  %v2946_v25 = vmul.f32 %v6544_v18, %v9148_v59  ;;  %v9162_v26 = vld [vmem:[#allocation115_spill] sm:$0xff] }
 0x2e5   :  { %9136 = vst [vmem:[#allocation194_spill] sm:$0xff] %v7100_v28  ;;  %v2941_v42 = vmul.f32 %v6544_v18, %v9143_v40  ;;  %v9144_v28 = vld [vmem:[#allocation79_spill] sm:$0xff]  ;;  %v9145_v56 = vld [vmem:[#allocation81_spill] sm:$0xff]  ;;  %v2948_v40 = vmul.f32 %v6544_v18, %v9150_v54  ;;  %v2951_v7 = vmul.f32 %v6544_v18, %v9153_v34  ;;  %v2953_v59 = vmul.f32 %v6544_v18, %v9155_v47 }
 0x2e6   :  { %v2942_v21 = vmul.f32 %v6544_v18, %v9144_v28  ;;  %v2943_v14 = vmul.f32 %v6544_v18, %v9145_v56  ;;  %v9149_v36 = vld [vmem:[#allocation89_spill] sm:$0xff]  ;;  %v2949_v28 = vmul.f32 %v6544_v18, %v9151_v45  ;;  %v2950_v56 = vmul.f32 %v6544_v18, %v9152_v6  ;;  %v9164_v50 = vld [vmem:[#allocation119_spill] sm:$0xff] }
 0x2e7   :  { %v2947_v29 = vmul.f32 %v6544_v18, %v9149_v36  ;;  %v2954_v36 = vmul.f32 %v6544_v18, %v9156_v58  ;;  %v2955_v54 = vmul.f32 %v6544_v18, %v9157_v35  ;;  %v2956_v45 = vmul.f32 %v6544_v18, %v9158_v22 }
 0x2e8   :  { %v2957_v6 = vmul.f32 %v6544_v18, %v9159_v33  ;;  %v2958_v34 = vmul.f32 %v6544_v18, %v9160_v23  ;;  %v2960_v47 = vmul.f32 %v6544_v18, %v9162_v26  ;;  %v2961_v58 = vmul.f32 %v6544_v18, %v9163_v11 }
 0x2e9   :  { %v2962_v35 = vmul.f32 %v6544_v18, %v9164_v50  ;;  %v2963_v22 = vmul.f32 %v6544_v18, %v9165_v37  ;;  %v2964_v33 = vmul.f32 %v6544_v18, %v9166_v27  ;;  %v2965_v23 = vmul.f32 %v6544_v18, %v9167_v61 }
 0x2ea   :  { %v2966_v60 = vmul.f32 %v6544_v18, %v9168_v10  ;;  %v2967_v26 = vmul.f32 %v6544_v18, %v9169_v24  ;;  %v2968_v11 = vmul.f32 %v6544_v18, %v9170_v57  ;;  %v2969_v50 = vmul.f32 %v6544_v18, %v9171_v32 }
 0x2eb   :  { %v2970_v37 = vmul.f32 %v6544_v18, %v9172_v49  ;;  %v2971_v27 = vmul.f32 %v6544_v18, %v9173_v46  ;;  %v2972_v61 = vmul.f32 %v6544_v18, %v9174_v53  ;;  %v2973_v10 = vmul.f32 %v6544_v18, %v9175_v20 }
 0x2ec   :  { %v2974_v24 = vmul.f32 %v6544_v18, %v9176_v8  ;;  %v2975_v57 = vmul.f32 %v6544_v18, %v9177_v48  ;;  %v2976_v32 = vmul.f32 %v6544_v18, %v9178_v15  ;;  %v2977_v49 = vmul.f32 %v6544_v18, %v9179_v31 }
 0x2ed   :  { %v2978_v46 = vmul.f32 %v6544_v18, %v9180_v38  ;;  %v2979_v53 = vmul.f32 %v6544_v18, %v9181_v12  ;;  %v2980_v20 = vmul.f32 %v6544_v18, %v9182_v5  ;;  %v2981_v8 = vmul.f32 %v6544_v18, %v9183_v17 }
 0x2ee   :  { %v2982_v48 = vmul.f32 %v6544_v18, %v9184_v52  ;;  %v2983_v15 = vmul.f32 %v6544_v18, %v9185_v2  ;;  %v7250_v31 = vadd.f32 %v2935_v9, %v6644_v13  ;;  %v7253_v38 = vadd.f32 %v2936_v63, %v6644_v13 }
 0x2ef   :  { %v7256_v12 = vadd.f32 %v2937_v0, %v6644_v13  ;;  %v7259_v5 = vadd.f32 %v2938_v41, %v6644_v13  ;;  %v7262_v17 = vadd.f32 %v2939_v55, %v6644_v13  ;;  %v7265_v52 = vadd.f32 %v2940_v19, %v6644_v13 }
 0x2f0   :  { %9186 = vst [vmem:[#allocation65_spill] sm:$0xff] %v7253_v38  ;;  %v7268_v2 = vadd.f32 %v2941_v42, %v6644_v13  ;;  %v7271_v9 = vadd.f32 %v2942_v21, %v6644_v13  ;;  %v7274_v63 = vadd.f32 %v2943_v14, %v6644_v13  ;;  %v7277_v0 = vadd.f32 %v2944_v16, %v6644_v13 }
 0x2f1   :  { %9187 = vst [vmem:[#allocation67_spill] sm:$0xff] %v7256_v12  ;;  %9188 = vst [vmem:[#allocation69_spill] sm:$0xff] %v7259_v5  ;;  %v7280_v41 = vadd.f32 %v2945_v51, %v6644_v13  ;;  %v7283_v55 = vadd.f32 %v2946_v25, %v6644_v13  ;;  %v7286_v19 = vadd.f32 %v2947_v29, %v6644_v13  ;;  %v9282_v5 = vld [vmem:[#allocation162_spill] sm:$0xff] }
 0x2f2   :  { %9189 = vst [vmem:[#allocation71_spill] sm:$0xff] %v7262_v17  ;;  %9190 = vst [vmem:[#allocation73_spill] sm:$0xff] %v7265_v52  ;;  %v7289_v42 = vadd.f32 %v2948_v40, %v6644_v13  ;;  %v7292_v21 = vadd.f32 %v2949_v28, %v6644_v13  ;;  %v7295_v14 = vadd.f32 %v2950_v56, %v6644_v13  ;;  %v9280_v52 = vld [vmem:[#allocation158_spill] sm:$0xff]  ;;  %v9281_v17 = vld [vmem:[#allocation160_spill] sm:$0xff] }
 0x2f3   :  { %9191 = vst [vmem:[#allocation75_spill] sm:$0xff] %v7268_v2  ;;  %9192 = vst [vmem:[#allocation77_spill] sm:$0xff] %v7271_v9  ;;  %v7298_v16 = vadd.f32 %v2951_v7, %v6644_v13  ;;  %v7301_v51 = vadd.f32 %v2952_v39, %v6644_v13  ;;  %v7304_v25 = vadd.f32 %v2953_v59, %v6644_v13  ;;  %v9278_v9 = vld [vmem:[#allocation154_spill] sm:$0xff]  ;;  %v9279_v2 = vld [vmem:[#allocation156_spill] sm:$0xff] }
 0x2f4   :  { %9193 = vst [vmem:[#allocation79_spill] sm:$0xff] %v7274_v63  ;;  %9194 = vst [vmem:[#allocation81_spill] sm:$0xff] %v7277_v0  ;;  %v7307_v29 = vadd.f32 %v2954_v36, %v6644_v13  ;;  %v7310_v40 = vadd.f32 %v2955_v54, %v6644_v13  ;;  %v7313_v28 = vadd.f32 %v2956_v45, %v6644_v13  ;;  %v9276_v0 = vld [vmem:[#allocation150_spill] sm:$0xff]  ;;  %v9277_v63 = vld [vmem:[#allocation152_spill] sm:$0xff] }
 0x2f5   :  { %9195 = vst [vmem:[#allocation83_spill] sm:$0xff] %v7280_v41  ;;  %9196 = vst [vmem:[#allocation85_spill] sm:$0xff] %v7283_v55  ;;  %v7316_v56 = vadd.f32 %v2957_v6, %v6644_v13  ;;  %v7319_v7 = vadd.f32 %v2958_v34, %v6644_v13  ;;  %v7322_v39 = vadd.f32 %v2959_v4, %v6644_v13  ;;  %v9274_v55 = vld [vmem:[#allocation146_spill] sm:$0xff]  ;;  %v9275_v41 = vld [vmem:[#allocation148_spill] sm:$0xff] }
 0x2f6   :  { %9197 = vst [vmem:[#allocation87_spill] sm:$0xff] %v7286_v19  ;;  %9198 = vst [vmem:[#allocation89_spill] sm:$0xff] %v7289_v42  ;;  %v7325_v59 = vadd.f32 %v2960_v47, %v6644_v13  ;;  %v7328_v36 = vadd.f32 %v2961_v58, %v6644_v13  ;;  %v7331_v54 = vadd.f32 %v2962_v35, %v6644_v13  ;;  %v9272_v42 = vld [vmem:[#allocation142_spill] sm:$0xff]  ;;  %v9273_v19 = vld [vmem:[#allocation144_spill] sm:$0xff] }
 0x2f7   :  { %9199 = vst [vmem:[#allocation91_spill] sm:$0xff] %v7292_v21  ;;  %9200 = vst [vmem:[#allocation93_spill] sm:$0xff] %v7295_v14  ;;  %v7334_v45 = vadd.f32 %v2963_v22, %v6644_v13  ;;  %v7337_v6 = vadd.f32 %v2964_v33, %v6644_v13  ;;  %v7340_v34 = vadd.f32 %v2965_v23, %v6644_v13  ;;  %v9270_v14 = vld [vmem:[#allocation138_spill] sm:$0xff]  ;;  %v9271_v21 = vld [vmem:[#allocation140_spill] sm:$0xff] }
 0x2f8   :  { %9201 = vst [vmem:[#allocation95_spill] sm:$0xff] %v7298_v16  ;;  %9202 = vst [vmem:[#allocation97_spill] sm:$0xff] %v7301_v51  ;;  %v7343_v4 = vadd.f32 %v2966_v60, %v6644_v13  ;;  %v7346_v47 = vadd.f32 %v2967_v26, %v6644_v13  ;;  %v7349_v58 = vadd.f32 %v2968_v11, %v6644_v13  ;;  %v9268_v51 = vld [vmem:[#allocation134_spill] sm:$0xff]  ;;  %v9269_v16 = vld [vmem:[#allocation136_spill] sm:$0xff] }
 0x2f9   :  { %9203 = vst [vmem:[#allocation99_spill] sm:$0xff] %v7304_v25  ;;  %9204 = vst [vmem:[#allocation101_spill] sm:$0xff] %v7307_v29  ;;  %v7352_v35 = vadd.f32 %v2969_v50, %v6644_v13  ;;  %v7355_v22 = vadd.f32 %v2970_v37, %v6644_v13  ;;  %v7358_v33 = vadd.f32 %v2971_v27, %v6644_v13  ;;  %v9266_v29 = vld [vmem:[#allocation130_spill] sm:$0xff]  ;;  %v9267_v25 = vld [vmem:[#allocation132_spill] sm:$0xff] }
 0x2fa   :  { %9205 = vst [vmem:[#allocation103_spill] sm:$0xff] %v7310_v40  ;;  %9206 = vst [vmem:[#allocation105_spill] sm:$0xff] %v7313_v28  ;;  %v7361_v23 = vadd.f32 %v2972_v61, %v6644_v13  ;;  %v7364_v60 = vadd.f32 %v2973_v10, %v6644_v13  ;;  %v7367_v26 = vadd.f32 %v2974_v24, %v6644_v13  ;;  %v9264_v28 = vld [vmem:[#allocation126_spill] sm:$0xff]  ;;  %v9265_v40 = vld [vmem:[#allocation128_spill] sm:$0xff] }
 0x2fb   :  { %9207 = vst [vmem:[#allocation107_spill] sm:$0xff] %v7316_v56  ;;  %9208 = vst [vmem:[#allocation109_spill] sm:$0xff] %v7319_v7  ;;  %v7370_v11 = vadd.f32 %v2975_v57, %v6644_v13  ;;  %v7373_v50 = vadd.f32 %v2976_v32, %v6644_v13  ;;  %v7376_v37 = vadd.f32 %v2977_v49, %v6644_v13  ;;  %v9235_v49 = vld [vmem:[#allocation68_spill] sm:$0xff]  ;;  %v9262_v7 = vld [vmem:[#allocation122_spill] sm:$0xff] }
 0x2fc   :  { %9209 = vst [vmem:[#allocation111_spill] sm:$0xff] %v7322_v39  ;;  %9210 = vst [vmem:[#allocation113_spill] sm:$0xff] %v7325_v59  ;;  %v7379_v27 = vadd.f32 %v2978_v46, %v6644_v13  ;;  %v7382_v61 = vadd.f32 %v2979_v53, %v6644_v13  ;;  %v7385_v10 = vadd.f32 %v2980_v20, %v6644_v13  ;;  %v9237_v53 = vld [vmem:[#allocation72_spill] sm:$0xff]  ;;  %v9260_v59 = vld [vmem:[#allocation118_spill] sm:$0xff] }
 0x2fd   :  { %9211 = vst [vmem:[#allocation115_spill] sm:$0xff] %v7328_v36  ;;  %9212 = vst [vmem:[#allocation117_spill] sm:$0xff] %v7331_v54  ;;  %v7388_v24 = vadd.f32 %v2981_v8, %v6644_v13  ;;  %v7391_v57 = vadd.f32 %v2982_v48, %v6644_v13  ;;  %v7394_v32 = vadd.f32 %v2983_v15, %v6644_v13  ;;  %v9239_v8 = vld [vmem:[#allocation76_spill] sm:$0xff]  ;;  %v9258_v54 = vld [vmem:[#allocation114_spill] sm:$0xff] }
 0x2fe   :  { %9213 = vst [vmem:[#allocation119_spill] sm:$0xff] %v7334_v45  ;;  %9214 = vst [vmem:[#allocation121_spill] sm:$0xff] %v7337_v6  ;;  %v3083_v46 = vmul.f32 %v6544_v18, %v9235_v49  ;;  %v3085_v20 = vmul.f32 %v6544_v18, %v9237_v53  ;;  %v3087_v48 = vmul.f32 %v6544_v18, %v9239_v8  ;;  %v9256_v6 = vld [vmem:[#allocation110_spill] sm:$0xff]  ;;  %v9257_v45 = vld [vmem:[#allocation112_spill] sm:$0xff] }
 0x2ff   :  { %9215 = vst [vmem:[#allocation123_spill] sm:$0xff] %v7340_v34  ;;  %9216 = vst [vmem:[#allocation125_spill] sm:$0xff] %v7343_v4  ;;  %v9254_v4 = vld [vmem:[#allocation106_spill] sm:$0xff]  ;;  %v9255_v34 = vld [vmem:[#allocation108_spill] sm:$0xff] }
 0x300   :  { %9217 = vst [vmem:[#allocation127_spill] sm:$0xff] %v7346_v47  ;;  %9218 = vst [vmem:[#allocation129_spill] sm:$0xff] %v7349_v58  ;;  %v9252_v58 = vld [vmem:[#allocation102_spill] sm:$0xff]  ;;  %v9253_v47 = vld [vmem:[#allocation104_spill] sm:$0xff] }
 0x301   :  { %9219 = vst [vmem:[#allocation131_spill] sm:$0xff] %v7352_v35  ;;  %9220 = vst [vmem:[#allocation133_spill] sm:$0xff] %v7355_v22  ;;  %v9250_v22 = vld [vmem:[#allocation98_spill] sm:$0xff]  ;;  %v9251_v35 = vld [vmem:[#allocation100_spill] sm:$0xff] }
 0x302   :  { %9221 = vst [vmem:[#allocation135_spill] sm:$0xff] %v7358_v33  ;;  %9222 = vst [vmem:[#allocation137_spill] sm:$0xff] %v7361_v23  ;;  %v9248_v23 = vld [vmem:[#allocation94_spill] sm:$0xff]  ;;  %v9249_v33 = vld [vmem:[#allocation96_spill] sm:$0xff] }
 0x303   :  { %9223 = vst [vmem:[#allocation139_spill] sm:$0xff] %v7364_v60  ;;  %9224 = vst [vmem:[#allocation141_spill] sm:$0xff] %v7367_v26  ;;  %v9234_v60 = vld [vmem:[#allocation66_spill] sm:$0xff]  ;;  %v9247_v26 = vld [vmem:[#allocation92_spill] sm:$0xff] }
 0x304   :  { %9225 = vst [vmem:[#allocation143_spill] sm:$0xff] %v7370_v11  ;;  %9226 = vst [vmem:[#allocation145_spill] sm:$0xff] %v7373_v50  ;;  %v3082_v15 = vmul.f32 %v6544_v18, %v9234_v60  ;;  %v9236_v50 = vld [vmem:[#allocation70_spill] sm:$0xff]  ;;  %v9259_v36 = vld [vmem:[#allocation116_spill] sm:$0xff] }
 0x305   :  { %9227 = vst [vmem:[#allocation147_spill] sm:$0xff] %v7376_v37  ;;  %9228 = vst [vmem:[#allocation149_spill] sm:$0xff] %v7379_v27  ;;  %v3084_v3 = vmul.f32 %v6544_v18, %v9236_v50  ;;  %v9244_v27 = vld [vmem:[#allocation86_spill] sm:$0xff]  ;;  %v9245_v37 = vld [vmem:[#allocation88_spill] sm:$0xff] }
 0x306   :  { %9229 = vst [vmem:[#allocation151_spill] sm:$0xff] %v7382_v61  ;;  %9230 = vst [vmem:[#allocation153_spill] sm:$0xff] %v7385_v10  ;;  %v9238_v61 = vld [vmem:[#allocation74_spill] sm:$0xff]  ;;  %v9243_v10 = vld [vmem:[#allocation84_spill] sm:$0xff]  ;;  %v3092_v53 = vmul.f32 %v6544_v18, %v9244_v27  ;;  %v3099_v27 = vmul.f32 %v6544_v18, %v9251_v35  ;;  %v3106_v35 = vmul.f32 %v6544_v18, %v9258_v54 }
 0x307   :  { %9231 = vst [vmem:[#allocation155_spill] sm:$0xff] %v7388_v24  ;;  %9232 = vst [vmem:[#allocation157_spill] sm:$0xff] %v7391_v57  ;;  %v3086_v62 = vmul.f32 %v6544_v18, %v9238_v61  ;;  %v9240_v57 = vld [vmem:[#allocation78_spill] sm:$0xff]  ;;  %v3091_v50 = vmul.f32 %v6544_v18, %v9243_v10  ;;  %v3093_v61 = vmul.f32 %v6544_v18, %v9245_v37  ;;  %v9261_v39 = vld [vmem:[#allocation120_spill] sm:$0xff] }
 0x308   :  { %9233 = vst [vmem:[#allocation159_spill] sm:$0xff] %v7394_v32  ;;  %v3088_v43 = vmul.f32 %v6544_v18, %v9240_v57  ;;  %v9241_v32 = vld [vmem:[#allocation80_spill] sm:$0xff]  ;;  %v9242_v24 = vld [vmem:[#allocation82_spill] sm:$0xff]  ;;  %v3095_v57 = vmul.f32 %v6544_v18, %v9247_v26  ;;  %v3098_v10 = vmul.f32 %v6544_v18, %v9250_v22  ;;  %v3100_v37 = vmul.f32 %v6544_v18, %v9252_v58 }
 0x309   :  { %v3089_v60 = vmul.f32 %v6544_v18, %v9241_v32  ;;  %v3090_v49 = vmul.f32 %v6544_v18, %v9242_v24  ;;  %v9246_v11 = vld [vmem:[#allocation90_spill] sm:$0xff]  ;;  %v3096_v32 = vmul.f32 %v6544_v18, %v9248_v23  ;;  %v3097_v24 = vmul.f32 %v6544_v18, %v9249_v33  ;;  %v9263_v56 = vld [vmem:[#allocation124_spill] sm:$0xff] }
 0x30a   :  { %v3094_v8 = vmul.f32 %v6544_v18, %v9246_v11  ;;  %v3101_v11 = vmul.f32 %v6544_v18, %v9253_v47  ;;  %v3102_v26 = vmul.f32 %v6544_v18, %v9254_v4  ;;  %v3103_v23 = vmul.f32 %v6544_v18, %v9255_v34 }
 0x30b   :  { %v3104_v33 = vmul.f32 %v6544_v18, %v9256_v6  ;;  %v3105_v22 = vmul.f32 %v6544_v18, %v9257_v45  ;;  %v3107_v58 = vmul.f32 %v6544_v18, %v9259_v36  ;;  %v3108_v47 = vmul.f32 %v6544_v18, %v9260_v59 }
 0x30c   :  { %v3109_v4 = vmul.f32 %v6544_v18, %v9261_v39  ;;  %v3110_v34 = vmul.f32 %v6544_v18, %v9262_v7  ;;  %v3111_v6 = vmul.f32 %v6544_v18, %v9263_v56  ;;  %v3112_v45 = vmul.f32 %v6544_v18, %v9264_v28 }
 0x30d   :  { %v3113_v54 = vmul.f32 %v6544_v18, %v9265_v40  ;;  %v3114_v36 = vmul.f32 %v6544_v18, %v9266_v29  ;;  %v3115_v59 = vmul.f32 %v6544_v18, %v9267_v25  ;;  %v3116_v39 = vmul.f32 %v6544_v18, %v9268_v51 }
 0x30e   :  { %v3117_v7 = vmul.f32 %v6544_v18, %v9269_v16  ;;  %v3118_v56 = vmul.f32 %v6544_v18, %v9270_v14  ;;  %v3119_v28 = vmul.f32 %v6544_v18, %v9271_v21  ;;  %v3120_v40 = vmul.f32 %v6544_v18, %v9272_v42 }
 0x30f   :  { %v3121_v29 = vmul.f32 %v6544_v18, %v9273_v19  ;;  %v3122_v25 = vmul.f32 %v6544_v18, %v9274_v55  ;;  %v3123_v51 = vmul.f32 %v6544_v18, %v9275_v41  ;;  %v3124_v16 = vmul.f32 %v6544_v18, %v9276_v0 }
 0x310   :  { %v3125_v14 = vmul.f32 %v6544_v18, %v9277_v63  ;;  %v3126_v21 = vmul.f32 %v6544_v18, %v9278_v9  ;;  %v3127_v42 = vmul.f32 %v6544_v18, %v9279_v2  ;;  %v3128_v19 = vmul.f32 %v6544_v18, %v9280_v52 }
 0x311   :  { %v3129_v55 = vmul.f32 %v6544_v18, %v9281_v17  ;;  %v3130_v41 = vmul.f32 %v6544_v18, %v9282_v5  ;;  %v7544_v0 = vadd.f32 %v3082_v15, %v6644_v13  ;;  %v7547_v63 = vadd.f32 %v3083_v46, %v6644_v13 }
 0x312   :  { %v7550_v9 = vadd.f32 %v3084_v3, %v6644_v13  ;;  %v7553_v2 = vadd.f32 %v3085_v20, %v6644_v13  ;;  %v7556_v52 = vadd.f32 %v3086_v62, %v6644_v13  ;;  %v7559_v17 = vadd.f32 %v3087_v48, %v6644_v13 }
 0x313   :  { %v7562_v18 = vadd.f32 %v3088_v43, %v6644_v13  ;;  %v7565_v5 = vadd.f32 %v3089_v60, %v6644_v13  ;;  %v7568_v46 = vadd.f32 %v3090_v49, %v6644_v13  ;;  %v7571_v3 = vadd.f32 %v3091_v50, %v6644_v13 }
 0x314   :  { %v7574_v20 = vadd.f32 %v3092_v53, %v6644_v13  ;;  %v7577_v62 = vadd.f32 %v3093_v61, %v6644_v13  ;;  %v7580_v48 = vadd.f32 %v3094_v8, %v6644_v13  ;;  %v7583_v43 = vadd.f32 %v3095_v57, %v6644_v13 }
 0x315   :  { %v7586_v15 = vadd.f32 %v3096_v32, %v6644_v13  ;;  %v7589_v60 = vadd.f32 %v3097_v24, %v6644_v13  ;;  %v7592_v49 = vadd.f32 %v3098_v10, %v6644_v13  ;;  %v7595_v50 = vadd.f32 %v3099_v27, %v6644_v13 }
 0x316   :  { %v7598_v53 = vadd.f32 %v3100_v37, %v6644_v13  ;;  %v7601_v61 = vadd.f32 %v3101_v11, %v6644_v13  ;;  %v7604_v8 = vadd.f32 %v3102_v26, %v6644_v13  ;;  %v7607_v57 = vadd.f32 %v3103_v23, %v6644_v13 }
 0x317   :  { %v7610_v32 = vadd.f32 %v3104_v33, %v6644_v13  ;;  %v7613_v24 = vadd.f32 %v3105_v22, %v6644_v13  ;;  %v7616_v10 = vadd.f32 %v3106_v35, %v6644_v13  ;;  %v7619_v27 = vadd.f32 %v3107_v58, %v6644_v13 }
 0x318   :  { %v7622_v37 = vadd.f32 %v3108_v47, %v6644_v13  ;;  %v7625_v11 = vadd.f32 %v3109_v4, %v6644_v13  ;;  %v7628_v26 = vadd.f32 %v3110_v34, %v6644_v13  ;;  %v7631_v23 = vadd.f32 %v3111_v6, %v6644_v13 }
 0x319   :  { %v7634_v33 = vadd.f32 %v3112_v45, %v6644_v13  ;;  %v7637_v22 = vadd.f32 %v3113_v54, %v6644_v13  ;;  %v7640_v35 = vadd.f32 %v3114_v36, %v6644_v13  ;;  %v7643_v58 = vadd.f32 %v3115_v59, %v6644_v13 }
 0x31a   :  { %v7646_v47 = vadd.f32 %v3116_v39, %v6644_v13  ;;  %v7649_v4 = vadd.f32 %v3117_v7, %v6644_v13  ;;  %v7652_v34 = vadd.f32 %v3118_v56, %v6644_v13  ;;  %v7655_v6 = vadd.f32 %v3119_v28, %v6644_v13 }
 0x31b   :  { %v7658_v45 = vadd.f32 %v3120_v40, %v6644_v13  ;;  %v7661_v54 = vadd.f32 %v3121_v29, %v6644_v13  ;;  %v7664_v36 = vadd.f32 %v3122_v25, %v6644_v13  ;;  %v7667_v59 = vadd.f32 %v3123_v51, %v6644_v13 }
 0x31c   :  { %v7670_v39 = vadd.f32 %v3124_v16, %v6644_v13  ;;  %v7673_v7 = vadd.f32 %v3125_v14, %v6644_v13  ;;  %v7676_v56 = vadd.f32 %v3126_v21, %v6644_v13  ;;  %v7679_v28 = vadd.f32 %v3127_v42, %v6644_v13  ;;  %v9292_v16 = vld [vmem:[#allocation41_spill] sm:$0xff]  ;;  %v9295_v42 = vld [vmem:[#allocation7_spill] sm:$0xff] }
 0x31d   :  { %v7682_v40 = vadd.f32 %v3128_v19, %v6644_v13  ;;  %v7685_v29 = vadd.f32 %v3129_v55, %v6644_v13  ;;  %v7688_v25 = vadd.f32 %v3130_v41, %v6644_v13  ;;  %v9288_v13 = vmax.f32 %v6952_v1, 0.0  ;;  %v9300_v55 = vld [vmem:[#allocation8_spill] sm:$0xff] }
 0x31e   :  { %9283 = vst [vmem:[#allocation161_spill] sm:$0xff] %v7673_v7  ;;  %9284 = vst [vmem:[#allocation66_spill] sm:$0xff] %v7679_v28  ;;  %v9289_v41 = vmax.f32 %v6667_v44, 0.0  ;;  %v9291_v14 = vmax.f32 %v6956_v30, 0.0  ;;  %v9293_v21 = vmax.f32 %v9292_v16, 0.0  ;;  %v9296_v12 = vmax.f32 %v9295_v42, 0.0 }
 0x31f   :  { %9285 = vst [vmem:[#allocation68_spill] sm:$0xff] %v7682_v40  ;;  %9286 = vst [vmem:[#allocation70_spill] sm:$0xff] %v7685_v29  ;;  %v9297_v28 = vld [vmem:[#allocation43_spill] sm:$0xff]  ;;  %v9301_v38 = vmax.f32 %v9300_v55, 0.0  ;;  %v9305_v44 = vld [vmem:[#allocation9_spill] sm:$0xff] }
 0x320   :  { %9287 = vst [vmem:[#allocation72_spill] sm:$0xff] %v7688_v25  ;;  %v7743_v51 = vmax.f32 %v9289_v41, %v9288_v13  ;;  %v7749_v7 = vmax.f32 %v9293_v21, %v9291_v14  ;;  %v9298_v19 = vmax.f32 %v9297_v28, 0.0  ;;  %v9302_v25 = vld [vmem:[#allocation45_spill] sm:$0xff]  ;;  %v9306_v13 = vmax.f32 %v9305_v44, 0.0  ;;  %v9307_v41 = vld [vmem:[#allocation47_spill] sm:$0xff]  ;;  %v9310_v16 = vld [vmem:[#allocation10_spill] sm:$0xff] }
 0x321   :  { %v9303_v1 = vmax.f32 %v9302_v25, 0.0  ;;  %v9308_v30 = vmax.f32 %v9307_v41, 0.0  ;;  %v9311_v14 = vmax.f32 %v9310_v16, 0.0  ;;  %v9312_v21 = vld [vmem:[#allocation49_spill] sm:$0xff] }
 0x322   :  { %9290 = vst [vmem:[#allocation74_spill] sm:$0xff] %v7743_v51  ;;  %9294 = vst [vmem:[#allocation76_spill] sm:$0xff] %v7749_v7  ;;  %v7755_v40 = vmax.f32 %v9298_v19, %v9296_v12  ;;  %v9313_v42 = vmax.f32 %v9312_v21, 0.0  ;;  %v9315_v12 = vld [vmem:[#allocation11_spill] sm:$0xff] }
 0x323   :  { %v7761_v29 = vmax.f32 %v9303_v1, %v9301_v38  ;;  %v7767_v51 = vmax.f32 %v9308_v30, %v9306_v13  ;;  %v9316_v28 = vmax.f32 %v9315_v12, 0.0  ;;  %v9317_v19 = vld [vmem:[#allocation51_spill] sm:$0xff]  ;;  %v9320_v38 = vld [vmem:[#allocation12_spill] sm:$0xff]  ;;  %v9322_v1 = vld [vmem:[#allocation53_spill] sm:$0xff] }
 0x324   :  { %9299 = vst [vmem:[#allocation78_spill] sm:$0xff] %v7755_v40  ;;  %v7773_v7 = vmax.f32 %v9313_v42, %v9311_v14  ;;  %v9318_v55 = vmax.f32 %v9317_v19, 0.0  ;;  %v9321_v25 = vmax.f32 %v9320_v38, 0.0  ;;  %v9323_v44 = vmax.f32 %v9322_v1, 0.0  ;;  %v9325_v13 = vld [vmem:[#allocation13_spill] sm:$0xff]  ;;  %v9327_v30 = vld [vmem:[#allocation55_spill] sm:$0xff] }
 0x325   :  { %9304 = vst [vmem:[#allocation80_spill] sm:$0xff] %v7761_v29  ;;  %9309 = vst [vmem:[#allocation82_spill] sm:$0xff] %v7767_v51  ;;  %v9326_v41 = vmax.f32 %v9325_v13, 0.0  ;;  %v9328_v16 = vmax.f32 %v9327_v30, 0.0  ;;  %v9330_v14 = vld [vmem:[#allocation14_spill] sm:$0xff]  ;;  %v9332_v42 = vld [vmem:[#allocation57_spill] sm:$0xff] }
 0x326   :  { %9314 = vst [vmem:[#allocation84_spill] sm:$0xff] %v7773_v7  ;;  %v7779_v40 = vmax.f32 %v9318_v55, %v9316_v28  ;;  %v7785_v29 = vmax.f32 %v9323_v44, %v9321_v25  ;;  %v9331_v21 = vmax.f32 %v9330_v14, 0.0  ;;  %v9333_v12 = vmax.f32 %v9332_v42, 0.0  ;;  %v9335_v28 = vld [vmem:[#allocation15_spill] sm:$0xff]  ;;  %v9340_v25 = vld [vmem:[#allocation16_spill] sm:$0xff]  ;;  %v9342_v44 = vld [vmem:[#allocation61_spill] sm:$0xff] }
 0x327   :  { %v7791_v51 = vmax.f32 %v9328_v16, %v9326_v41  ;;  %v9336_v19 = vmax.f32 %v9335_v28, 0.0  ;;  %v9337_v55 = vld [vmem:[#allocation59_spill] sm:$0xff]  ;;  %v9341_v1 = vmax.f32 %v9340_v25, 0.0  ;;  %v9343_v13 = vmax.f32 %v9342_v44, 0.0  ;;  %v9345_v41 = vld [vmem:[#allocation17_spill] sm:$0xff] }
 0x328   :  { %9319 = vst [vmem:[#allocation86_spill] sm:$0xff] %v7779_v40  ;;  %9324 = vst [vmem:[#allocation88_spill] sm:$0xff] %v7785_v29  ;;  %v7797_v7 = vmax.f32 %v9333_v12, %v9331_v21  ;;  %v9338_v38 = vmax.f32 %v9337_v55, 0.0  ;;  %v9346_v30 = vmax.f32 %v9345_v41, 0.0  ;;  %v9347_v16 = vld [vmem:[#allocation63_spill] sm:$0xff]  ;;  %v9350_v21 = vld [vmem:[#allocation18_spill] sm:$0xff] }
 0x329   :  { %9329 = vst [vmem:[#allocation90_spill] sm:$0xff] %v7791_v51  ;;  %v7809_v29 = vmax.f32 %v9343_v13, %v9341_v1  ;;  %v9348_v14 = vmax.f32 %v9347_v16, 0.0  ;;  %v9351_v42 = vmax.f32 %v9350_v21, 0.0  ;;  %v9352_v12 = vld [vmem:[#allocation2_spill] sm:$0xff]  ;;  %v9360_v1 = vld [vmem:[#allocation20_spill] sm:$0xff] }
 0x32a   :  { %9334 = vst [vmem:[#allocation92_spill] sm:$0xff] %v7797_v7  ;;  %v7803_v40 = vmax.f32 %v9338_v38, %v9336_v19  ;;  %v9353_v28 = vmax.f32 %v9352_v12, 0.0  ;;  %v9355_v19 = vld [vmem:[#allocation19_spill] sm:$0xff]  ;;  %v9361_v44 = vmax.f32 %v9360_v1, 0.0  ;;  %v9362_v13 = vld [vmem:[#allocation4_spill] sm:$0xff] }
 0x32b   :  { %9344 = vst [vmem:[#allocation96_spill] sm:$0xff] %v7809_v29  ;;  %v7815_v51 = vmax.f32 %v9348_v14, %v9346_v30  ;;  %v9356_v55 = vmax.f32 %v9355_v19, 0.0  ;;  %v9357_v38 = vld [vmem:[#allocation3_spill] sm:$0xff]  ;;  %v9363_v41 = vmax.f32 %v9362_v13, 0.0  ;;  %v9365_v30 = vld [vmem:[#allocation21_spill] sm:$0xff] }
 0x32c   :  { %9339 = vst [vmem:[#allocation94_spill] sm:$0xff] %v7803_v40  ;;  %v7821_v7 = vmax.f32 %v9353_v28, %v9351_v42  ;;  %v9358_v25 = vmax.f32 %v9357_v38, 0.0  ;;  %v9366_v16 = vmax.f32 %v9365_v30, 0.0  ;;  %v9367_v14 = vld [vmem:[#allocation5_spill] sm:$0xff]  ;;  %v9370_v42 = vld [vmem:[#allocation22_spill] sm:$0xff] }
 0x32d   :  { %9349 = vst [vmem:[#allocation98_spill] sm:$0xff] %v7815_v51  ;;  %v7833_v29 = vmax.f32 %v9363_v41, %v9361_v44  ;;  %v9368_v21 = vmax.f32 %v9367_v14, 0.0  ;;  %v9371_v12 = vmax.f32 %v9370_v42, 0.0  ;;  %v9372_v28 = vld [vmem:[#allocation6_spill] sm:$0xff]  ;;  %v9380_v44 = vld [vmem:[#allocation24_spill] sm:$0xff] }
 0x32e   :  { %9354 = vst [vmem:[#allocation100_spill] sm:$0xff] %v7821_v7  ;;  %v7827_v40 = vmax.f32 %v9358_v25, %v9356_v55  ;;  %v9373_v19 = vmax.f32 %v9372_v28, 0.0  ;;  %v9375_v55 = vld [vmem:[#allocation23_spill] sm:$0xff]  ;;  %v9381_v13 = vmax.f32 %v9380_v44, 0.0  ;;  %v9382_v41 = vld [vmem:[#allocation164_spill] sm:$0xff] }
 0x32f   :  { %9364 = vst [vmem:[#allocation104_spill] sm:$0xff] %v7833_v29  ;;  %v7839_v51 = vmax.f32 %v9368_v21, %v9366_v16  ;;  %v9376_v38 = vmax.f32 %v9375_v55, 0.0  ;;  %v9377_v25 = vld [vmem:[#allocation163_spill] sm:$0xff]  ;;  %v9383_v30 = vmax.f32 %v9382_v41, 0.0  ;;  %v9385_v16 = vld [vmem:[#allocation25_spill] sm:$0xff] }
 0x330   :  { %9359 = vst [vmem:[#allocation102_spill] sm:$0xff] %v7827_v40  ;;  %v7845_v7 = vmax.f32 %v9373_v19, %v9371_v12  ;;  %v9378_v1 = vmax.f32 %v9377_v25, 0.0  ;;  %v9386_v14 = vmax.f32 %v9385_v16, 0.0  ;;  %v9387_v21 = vld [vmem:[#allocation165_spill] sm:$0xff]  ;;  %v9390_v12 = vld [vmem:[#allocation26_spill] sm:$0xff] }
 0x331   :  { %9369 = vst [vmem:[#allocation106_spill] sm:$0xff] %v7839_v51  ;;  %v7857_v29 = vmax.f32 %v9383_v30, %v9381_v13  ;;  %v9388_v42 = vmax.f32 %v9387_v21, 0.0  ;;  %v9391_v28 = vmax.f32 %v9390_v12, 0.0  ;;  %v9392_v19 = vld [vmem:[#allocation166_spill] sm:$0xff]  ;;  %v9400_v13 = vld [vmem:[#allocation28_spill] sm:$0xff] }
 0x332   :  { %9374 = vst [vmem:[#allocation108_spill] sm:$0xff] %v7845_v7  ;;  %v7851_v40 = vmax.f32 %v9378_v1, %v9376_v38  ;;  %v9393_v55 = vmax.f32 %v9392_v19, 0.0  ;;  %v9395_v38 = vld [vmem:[#allocation27_spill] sm:$0xff]  ;;  %v9401_v41 = vmax.f32 %v9400_v13, 0.0  ;;  %v9402_v30 = vld [vmem:[#allocation168_spill] sm:$0xff] }
 0x333   :  { %9384 = vst [vmem:[#allocation112_spill] sm:$0xff] %v7857_v29  ;;  %v7863_v51 = vmax.f32 %v9388_v42, %v9386_v14  ;;  %v9396_v25 = vmax.f32 %v9395_v38, 0.0  ;;  %v9397_v1 = vld [vmem:[#allocation167_spill] sm:$0xff]  ;;  %v9403_v16 = vmax.f32 %v9402_v30, 0.0  ;;  %v9405_v14 = vld [vmem:[#allocation29_spill] sm:$0xff] }
 0x334   :  { %9379 = vst [vmem:[#allocation110_spill] sm:$0xff] %v7851_v40  ;;  %v7869_v7 = vmax.f32 %v9393_v55, %v9391_v28  ;;  %v9398_v44 = vmax.f32 %v9397_v1, 0.0  ;;  %v9406_v21 = vmax.f32 %v9405_v14, 0.0  ;;  %v9407_v42 = vld [vmem:[#allocation169_spill] sm:$0xff]  ;;  %v9410_v28 = vld [vmem:[#allocation30_spill] sm:$0xff] }
 0x335   :  { %9389 = vst [vmem:[#allocation114_spill] sm:$0xff] %v7863_v51  ;;  %v7881_v29 = vmax.f32 %v9403_v16, %v9401_v41  ;;  %v9408_v12 = vmax.f32 %v9407_v42, 0.0  ;;  %v9411_v19 = vmax.f32 %v9410_v28, 0.0  ;;  %v9412_v55 = vld [vmem:[#allocation170_spill] sm:$0xff]  ;;  %v9420_v41 = vld [vmem:[#allocation32_spill] sm:$0xff] }
 0x336   :  { %9394 = vst [vmem:[#allocation116_spill] sm:$0xff] %v7869_v7  ;;  %v7875_v40 = vmax.f32 %v9398_v44, %v9396_v25  ;;  %v9413_v38 = vmax.f32 %v9412_v55, 0.0  ;;  %v9415_v25 = vld [vmem:[#allocation31_spill] sm:$0xff]  ;;  %v9421_v30 = vmax.f32 %v9420_v41, 0.0  ;;  %v9422_v16 = vld [vmem:[#allocation172_spill] sm:$0xff] }
 0x337   :  { %9404 = vst [vmem:[#allocation120_spill] sm:$0xff] %v7881_v29  ;;  %v7887_v51 = vmax.f32 %v9408_v12, %v9406_v21  ;;  %v9416_v1 = vmax.f32 %v9415_v25, 0.0  ;;  %v9417_v44 = vld [vmem:[#allocation171_spill] sm:$0xff]  ;;  %v9423_v14 = vmax.f32 %v9422_v16, 0.0  ;;  %v9425_v21 = vld [vmem:[#allocation33_spill] sm:$0xff] }
 0x338   :  { %9399 = vst [vmem:[#allocation118_spill] sm:$0xff] %v7875_v40  ;;  %v7893_v7 = vmax.f32 %v9413_v38, %v9411_v19  ;;  %v9418_v13 = vmax.f32 %v9417_v44, 0.0  ;;  %v9426_v42 = vmax.f32 %v9425_v21, 0.0  ;;  %v9427_v12 = vld [vmem:[#allocation173_spill] sm:$0xff]  ;;  %v9430_v19 = vld [vmem:[#allocation34_spill] sm:$0xff] }
 0x339   :  { %9409 = vst [vmem:[#allocation122_spill] sm:$0xff] %v7887_v51  ;;  %v7905_v29 = vmax.f32 %v9423_v14, %v9421_v30  ;;  %v9428_v28 = vmax.f32 %v9427_v12, 0.0  ;;  %v9431_v55 = vmax.f32 %v9430_v19, 0.0  ;;  %v9432_v38 = vld [vmem:[#allocation174_spill] sm:$0xff]  ;;  %v9440_v30 = vld [vmem:[#allocation36_spill] sm:$0xff] }
 0x33a   :  { %9414 = vst [vmem:[#allocation124_spill] sm:$0xff] %v7893_v7  ;;  %v7899_v40 = vmax.f32 %v9418_v13, %v9416_v1  ;;  %v9433_v25 = vmax.f32 %v9432_v38, 0.0  ;;  %v9435_v1 = vld [vmem:[#allocation35_spill] sm:$0xff]  ;;  %v9441_v16 = vmax.f32 %v9440_v30, 0.0  ;;  %v9442_v14 = vld [vmem:[#allocation176_spill] sm:$0xff] }
 0x33b   :  { %9424 = vst [vmem:[#allocation128_spill] sm:$0xff] %v7905_v29  ;;  %v7911_v51 = vmax.f32 %v9428_v28, %v9426_v42  ;;  %v9436_v44 = vmax.f32 %v9435_v1, 0.0  ;;  %v9437_v13 = vld [vmem:[#allocation175_spill] sm:$0xff]  ;;  %v9443_v21 = vmax.f32 %v9442_v14, 0.0  ;;  %v9445_v42 = vld [vmem:[#allocation38_spill] sm:$0xff]  ;;  %v9447_v28 = vld [vmem:[#allocation177_spill] sm:$0xff] }
 0x33c   :  { %9419 = vst [vmem:[#allocation126_spill] sm:$0xff] %v7899_v40  ;;  %v7917_v7 = vmax.f32 %v9433_v25, %v9431_v55  ;;  %v9438_v41 = vmax.f32 %v9437_v13, 0.0  ;;  %v9446_v12 = vmax.f32 %v9445_v42, 0.0  ;;  %v9448_v19 = vmax.f32 %v9447_v28, 0.0  ;;  %v9450_v55 = vld [vmem:[#allocation40_spill] sm:$0xff]  ;;  %v9452_v25 = vld [vmem:[#allocation178_spill] sm:$0xff] }
 0x33d   :  { %9429 = vst [vmem:[#allocation130_spill] sm:$0xff] %v7911_v51  ;;  %v7929_v29 = vmax.f32 %v9443_v21, %v9441_v16  ;;  %v9451_v38 = vmax.f32 %v9450_v55, 0.0  ;;  %v9453_v1 = vmax.f32 %v9452_v25, 0.0  ;;  %v9460_v16 = vld [vmem:[#allocation44_spill] sm:$0xff] }
 0x33e   :  { %9434 = vst [vmem:[#allocation132_spill] sm:$0xff] %v7917_v7  ;;  %v7923_v40 = vmax.f32 %v9438_v41, %v9436_v44  ;;  %v7935_v51 = vmax.f32 %v9448_v19, %v9446_v12  ;;  %v9455_v44 = vld [vmem:[#allocation42_spill] sm:$0xff]  ;;  %v9457_v41 = vld [vmem:[#allocation179_spill] sm:$0xff]  ;;  %v9461_v14 = vmax.f32 %v9460_v16, 0.0  ;;  %v9462_v21 = vld [vmem:[#allocation180_spill] sm:$0xff] }
 0x33f   :  { %9444 = vst [vmem:[#allocation136_spill] sm:$0xff] %v7929_v29  ;;  %v7941_v7 = vmax.f32 %v9453_v1, %v9451_v38  ;;  %v9456_v13 = vmax.f32 %v9455_v44, 0.0  ;;  %v9458_v30 = vmax.f32 %v9457_v41, 0.0  ;;  %v9463_v42 = vmax.f32 %v9462_v21, 0.0  ;;  %v9465_v12 = vld [vmem:[#allocation46_spill] sm:$0xff]  ;;  %v9467_v19 = vld [vmem:[#allocation181_spill] sm:$0xff] }
 0x340   :  { %9439 = vst [vmem:[#allocation134_spill] sm:$0xff] %v7923_v40  ;;  %9449 = vst [vmem:[#allocation138_spill] sm:$0xff] %v7935_v51  ;;  %v9466_v28 = vmax.f32 %v9465_v12, 0.0  ;;  %v9468_v55 = vmax.f32 %v9467_v19, 0.0  ;;  %v9470_v38 = vld [vmem:[#allocation48_spill] sm:$0xff]  ;;  %v9472_v1 = vld [vmem:[#allocation182_spill] sm:$0xff] }
 0x341   :  { %9454 = vst [vmem:[#allocation140_spill] sm:$0xff] %v7941_v7  ;;  %v7947_v40 = vmax.f32 %v9458_v30, %v9456_v13  ;;  %v7953_v29 = vmax.f32 %v9463_v42, %v9461_v14  ;;  %v9471_v25 = vmax.f32 %v9470_v38, 0.0  ;;  %v9473_v44 = vmax.f32 %v9472_v1, 0.0  ;;  %v9475_v13 = vld [vmem:[#allocation50_spill] sm:$0xff]  ;;  %v9477_v30 = vld [vmem:[#allocation183_spill] sm:$0xff]  ;;  %v9480_v14 = vld [vmem:[#allocation52_spill] sm:$0xff] }
 0x342   :  { %v7959_v51 = vmax.f32 %v9468_v55, %v9466_v28  ;;  %v9476_v41 = vmax.f32 %v9475_v13, 0.0  ;;  %v9478_v16 = vmax.f32 %v9477_v30, 0.0  ;;  %v9481_v21 = vmax.f32 %v9480_v14, 0.0  ;;  %v9482_v42 = vld [vmem:[#allocation184_spill] sm:$0xff]  ;;  %v9485_v28 = vld [vmem:[#allocation54_spill] sm:$0xff]  ;;  %v9487_v55 = vld [vmem:[#allocation185_spill] sm:$0xff] }
 0x343   :  { %9459 = vst [vmem:[#allocation142_spill] sm:$0xff] %v7947_v40  ;;  %9464 = vst [vmem:[#allocation144_spill] sm:$0xff] %v7953_v29  ;;  %v7965_v7 = vmax.f32 %v9473_v44, %v9471_v25  ;;  %v9483_v12 = vmax.f32 %v9482_v42, 0.0  ;;  %v9486_v19 = vmax.f32 %v9485_v28, 0.0  ;;  %v9488_v38 = vmax.f32 %v9487_v55, 0.0  ;;  %v9490_v25 = vld [vmem:[#allocation56_spill] sm:$0xff] }
 0x344   :  { %9469 = vst [vmem:[#allocation146_spill] sm:$0xff] %v7959_v51  ;;  %v7971_v40 = vmax.f32 %v9478_v16, %v9476_v41  ;;  %v9491_v1 = vmax.f32 %v9490_v25, 0.0  ;;  %v9492_v44 = vld [vmem:[#allocation186_spill] sm:$0xff]  ;;  %v9497_v16 = vld [vmem:[#allocation187_spill] sm:$0xff] }
 0x345   :  { %9474 = vst [vmem:[#allocation148_spill] sm:$0xff] %v7965_v7  ;;  %v7977_v29 = vmax.f32 %v9483_v12, %v9481_v21  ;;  %v7983_v51 = vmax.f32 %v9488_v38, %v9486_v19  ;;  %v9493_v13 = vmax.f32 %v9492_v44, 0.0  ;;  %v9495_v41 = vld [vmem:[#allocation58_spill] sm:$0xff]  ;;  %v9498_v14 = vmax.f32 %v9497_v16, 0.0  ;;  %v9500_v21 = vld [vmem:[#allocation60_spill] sm:$0xff]  ;;  %v9507_v38 = vld [vmem:[#allocation189_spill] sm:$0xff] }
 0x346   :  { %9479 = vst [vmem:[#allocation150_spill] sm:$0xff] %v7971_v40  ;;  %v9496_v30 = vmax.f32 %v9495_v41, 0.0  ;;  %v9501_v42 = vmax.f32 %v9500_v21, 0.0  ;;  %v9502_v12 = vld [vmem:[#allocation188_spill] sm:$0xff]  ;;  %v9505_v19 = vld [vmem:[#allocation62_spill] sm:$0xff]  ;;  %v9508_v25 = vmax.f32 %v9507_v38, 0.0 }
 0x347   :  { %9484 = vst [vmem:[#allocation152_spill] sm:$0xff] %v7977_v29  ;;  %9489 = vst [vmem:[#allocation154_spill] sm:$0xff] %v7983_v51  ;;  %v7989_v7 = vmax.f32 %v9493_v13, %v9491_v1  ;;  %v9503_v28 = vmax.f32 %v9502_v12, 0.0  ;;  %v9506_v55 = vmax.f32 %v9505_v19, 0.0  ;;  %v9510_v1 = vld [vmem:[#allocation64_spill] sm:$0xff]  ;;  %v9512_v13 = vld [vmem:[#allocation190_spill] sm:$0xff] }
 0x348   :  { %v7995_v40 = vmax.f32 %v9498_v14, %v9496_v30  ;;  %v9511_v44 = vmax.f32 %v9510_v1, 0.0  ;;  %v9513_v41 = vmax.f32 %v9512_v13, 0.0  ;;  %v9515_v30 = vld [vmem:[#allocation37_spill] sm:$0xff]  ;;  %v9517_v14 = vld [vmem:[#allocation191_spill] sm:$0xff]  ;;  %v9531_v13 = vmax.f32 %v7250_v31, 0.0 }
 0x349   :  { %9494 = vst [vmem:[#allocation156_spill] sm:$0xff] %v7989_v7  ;;  %v8001_v29 = vmax.f32 %v9503_v28, %v9501_v42  ;;  %v8007_v51 = vmax.f32 %v9508_v25, %v9506_v55  ;;  %v9516_v16 = vmax.f32 %v9515_v30, 0.0  ;;  %v9518_v21 = vmax.f32 %v9517_v14, 0.0  ;;  %v9520_v42 = vld [vmem:[#allocation39_spill] sm:$0xff]  ;;  %v9522_v28 = vld [vmem:[#allocation192_spill] sm:$0xff]  ;;  %v9525_v55 = vld [vmem:[#allocation194_spill] sm:$0xff] }
 0x34a   :  { %9499 = vst [vmem:[#allocation158_spill] sm:$0xff] %v7995_v40  ;;  %v8013_v7 = vmax.f32 %v9513_v41, %v9511_v44  ;;  %v9521_v12 = vmax.f32 %v9520_v42, 0.0  ;;  %v9523_v19 = vmax.f32 %v9522_v28, 0.0  ;;  %v9526_v38 = vmax.f32 %v9525_v55, 0.0  ;;  %v9527_v25 = vld [vmem:[#allocation193_spill] sm:$0xff] }
 0x34b   :  { %9504 = vst [vmem:[#allocation160_spill] sm:$0xff] %v8001_v29  ;;  %9509 = vst [vmem:[#allocation162_spill] sm:$0xff] %v8007_v51  ;;  %v8019_v40 = vmax.f32 %v9518_v21, %v9516_v16  ;;  %v9528_v1 = vmax.f32 %v9527_v25, 0.0  ;;  %v9530_v44 = vmax.f32 %v7544_v0, 0.0  ;;  %v9532_v30 = vmax.f32 %v7547_v63, 0.0  ;;  %v9533_v16 = vld [vmem:[#allocation65_spill] sm:$0xff] }
 0x34c   :  { %9514 = vst [vmem:[#allocation41_spill] sm:$0xff] %v8013_v7  ;;  %v8025_v29 = vmax.f32 %v9523_v19, %v9521_v12  ;;  %v9534_v14 = vmax.f32 %v9533_v16, 0.0  ;;  %v9535_v42 = vmax.f32 %v7550_v9, 0.0  ;;  %v9536_v12 = vld [vmem:[#allocation67_spill] sm:$0xff]  ;;  %v9538_v55 = vmax.f32 %v7553_v2, 0.0 }
 0x34d   :  { %9519 = vst [vmem:[#allocation7_spill] sm:$0xff] %v8019_v40  ;;  %v8031_v51 = vmax.f32 %v9528_v1, %v9526_v38  ;;  %v8037_v41 = vmax.f32 %v9531_v13, %v9530_v44  ;;  %v9537_v28 = vmax.f32 %v9536_v12, 0.0  ;;  %v9539_v38 = vld [vmem:[#allocation69_spill] sm:$0xff]  ;;  %v9541_v31 = vmax.f32 %v7556_v52, 0.0  ;;  %v9542_v1 = vld [vmem:[#allocation71_spill] sm:$0xff] }
 0x34e   :  { %9524 = vst [vmem:[#allocation43_spill] sm:$0xff] %v8025_v29  ;;  %v8043_v21 = vmax.f32 %v9534_v14, %v9532_v30  ;;  %v9540_v0 = vmax.f32 %v9539_v38, 0.0  ;;  %v9543_v63 = vmax.f32 %v9542_v1, 0.0  ;;  %v9544_v13 = vmax.f32 %v7559_v17, 0.0  ;;  %v9545_v30 = vld [vmem:[#allocation73_spill] sm:$0xff] }
 0x34f   :  { %9529 = vst [vmem:[#allocation8_spill] sm:$0xff] %v8031_v51  ;;  %v8049_v19 = vmax.f32 %v9537_v28, %v9535_v42  ;;  %v9546_v9 = vmax.f32 %v9545_v30, 0.0  ;;  %v9547_v14 = vmax.f32 %v7562_v18, 0.0  ;;  %v9548_v42 = vld [vmem:[#allocation75_spill] sm:$0xff]  ;;  %v9550_v28 = vmax.f32 %v7565_v5, 0.0 }
 0x350   :  { %v8055_v25 = vmax.f32 %v9540_v0, %v9538_v55  ;;  %v8061_v44 = vmax.f32 %v9543_v63, %v9541_v31  ;;  %v9549_v2 = vmax.f32 %v9548_v42, 0.0  ;;  %v9551_v55 = vld [vmem:[#allocation77_spill] sm:$0xff]  ;;  %v9553_v0 = vmax.f32 %v7568_v46, 0.0  ;;  %v9554_v31 = vld [vmem:[#allocation79_spill] sm:$0xff] }
 0x351   :  { %v8067_v16 = vmax.f32 %v9546_v9, %v9544_v13  ;;  %v9552_v52 = vmax.f32 %v9551_v55, 0.0  ;;  %v9555_v17 = vmax.f32 %v9554_v31, 0.0  ;;  %v9556_v63 = vmax.f32 %v7571_v3, 0.0  ;;  %v9557_v13 = vld [vmem:[#allocation81_spill] sm:$0xff] }
 0x352   :  { %v8073_v12 = vmax.f32 %v9549_v2, %v9547_v14  ;;  %v9558_v18 = vmax.f32 %v9557_v13, 0.0  ;;  %v9559_v9 = vmax.f32 %v7574_v20, 0.0  ;;  %v9560_v14 = vld [vmem:[#allocation83_spill] sm:$0xff]  ;;  %v9562_v2 = vmax.f32 %v7577_v62, 0.0 }
 0x353   :  { %v8079_v38 = vmax.f32 %v9552_v52, %v9550_v28  ;;  %v8085_v1 = vmax.f32 %v9555_v17, %v9553_v0  ;;  %v9561_v5 = vmax.f32 %v9560_v14, 0.0  ;;  %v9563_v28 = vld [vmem:[#allocation85_spill] sm:$0xff]  ;;  %v9565_v52 = vmax.f32 %v7580_v48, 0.0  ;;  %v9566_v0 = vld [vmem:[#allocation87_spill] sm:$0xff] }
 0x354   :  { %v8091_v30 = vmax.f32 %v9558_v18, %v9556_v63  ;;  %v9564_v46 = vmax.f32 %v9563_v28, 0.0  ;;  %v9567_v3 = vmax.f32 %v9566_v0, 0.0  ;;  %v9568_v17 = vmax.f32 %v7583_v43, 0.0  ;;  %v9569_v63 = vld [vmem:[#allocation89_spill] sm:$0xff] }
 0x355   :  { %v8097_v42 = vmax.f32 %v9561_v5, %v9559_v9  ;;  %v9570_v20 = vmax.f32 %v9569_v63, 0.0  ;;  %v9571_v18 = vmax.f32 %v7586_v15, 0.0  ;;  %v9572_v9 = vld [vmem:[#allocation91_spill] sm:$0xff]  ;;  %v9574_v5 = vmax.f32 %v7589_v60, 0.0 }
 0x356   :  { %v8103_v55 = vmax.f32 %v9564_v46, %v9562_v2  ;;  %v8109_v31 = vmax.f32 %v9567_v3, %v9565_v52  ;;  %v9573_v62 = vmax.f32 %v9572_v9, 0.0  ;;  %v9575_v2 = vld [vmem:[#allocation93_spill] sm:$0xff]  ;;  %v9577_v46 = vmax.f32 %v7592_v49, 0.0  ;;  %v9578_v52 = vld [vmem:[#allocation95_spill] sm:$0xff] }
 0x357   :  { %v8115_v13 = vmax.f32 %v9570_v20, %v9568_v17  ;;  %v9576_v48 = vmax.f32 %v9575_v2, 0.0  ;;  %v9579_v43 = vmax.f32 %v9578_v52, 0.0  ;;  %v9580_v3 = vmax.f32 %v7595_v50, 0.0  ;;  %v9581_v17 = vld [vmem:[#allocation97_spill] sm:$0xff] }
 0x358   :  { %v8121_v14 = vmax.f32 %v9573_v62, %v9571_v18  ;;  %v9582_v15 = vmax.f32 %v9581_v17, 0.0  ;;  %v9583_v20 = vmax.f32 %v7598_v53, 0.0  ;;  %v9584_v18 = vld [vmem:[#allocation99_spill] sm:$0xff]  ;;  %v9586_v62 = vmax.f32 %v7601_v61, 0.0 }
 0x359   :  { %v8127_v28 = vmax.f32 %v9576_v48, %v9574_v5  ;;  %v8133_v0 = vmax.f32 %v9579_v43, %v9577_v46  ;;  %v9585_v60 = vmax.f32 %v9584_v18, 0.0  ;;  %v9587_v5 = vld [vmem:[#allocation101_spill] sm:$0xff]  ;;  %v9589_v48 = vmax.f32 %v7604_v8, 0.0  ;;  %v9590_v46 = vld [vmem:[#allocation103_spill] sm:$0xff] }
 0x35a   :  { %v8139_v63 = vmax.f32 %v9582_v15, %v9580_v3  ;;  %v9588_v49 = vmax.f32 %v9587_v5, 0.0  ;;  %v9591_v50 = vmax.f32 %v9590_v46, 0.0  ;;  %v9592_v43 = vmax.f32 %v7607_v57, 0.0  ;;  %v9593_v3 = vld [vmem:[#allocation105_spill] sm:$0xff] }
 0x35b   :  { %v8145_v9 = vmax.f32 %v9585_v60, %v9583_v20  ;;  %v9594_v53 = vmax.f32 %v9593_v3, 0.0  ;;  %v9595_v15 = vmax.f32 %v7610_v32, 0.0  ;;  %v9596_v20 = vld [vmem:[#allocation107_spill] sm:$0xff]  ;;  %v9598_v60 = vmax.f32 %v7613_v24, 0.0 }
 0x35c   :  { %v8151_v2 = vmax.f32 %v9588_v49, %v9586_v62  ;;  %v8157_v52 = vmax.f32 %v9591_v50, %v9589_v48  ;;  %v9597_v61 = vmax.f32 %v9596_v20, 0.0  ;;  %v9599_v62 = vld [vmem:[#allocation109_spill] sm:$0xff]  ;;  %v9601_v49 = vmax.f32 %v7616_v10, 0.0  ;;  %v9602_v48 = vld [vmem:[#allocation111_spill] sm:$0xff] }
 0x35d   :  { %v8163_v17 = vmax.f32 %v9594_v53, %v9592_v43  ;;  %v9600_v8 = vmax.f32 %v9599_v62, 0.0  ;;  %v9603_v57 = vmax.f32 %v9602_v48, 0.0  ;;  %v9604_v50 = vmax.f32 %v7619_v27, 0.0  ;;  %v9605_v43 = vld [vmem:[#allocation113_spill] sm:$0xff] }
 0x35e   :  { %v8169_v18 = vmax.f32 %v9597_v61, %v9595_v15  ;;  %v9606_v32 = vmax.f32 %v9605_v43, 0.0  ;;  %v9607_v53 = vmax.f32 %v7622_v37, 0.0  ;;  %v9608_v15 = vld [vmem:[#allocation115_spill] sm:$0xff]  ;;  %v9610_v61 = vmax.f32 %v7625_v11, 0.0 }
 0x35f   :  { %v8175_v5 = vmax.f32 %v9600_v8, %v9598_v60  ;;  %v8181_v46 = vmax.f32 %v9603_v57, %v9601_v49  ;;  %v9609_v24 = vmax.f32 %v9608_v15, 0.0  ;;  %v9611_v60 = vld [vmem:[#allocation117_spill] sm:$0xff]  ;;  %v9613_v8 = vmax.f32 %v7628_v26, 0.0  ;;  %v9614_v49 = vld [vmem:[#allocation119_spill] sm:$0xff] }
 0x360   :  { %v8187_v3 = vmax.f32 %v9606_v32, %v9604_v50  ;;  %v9612_v10 = vmax.f32 %v9611_v60, 0.0  ;;  %v9615_v27 = vmax.f32 %v9614_v49, 0.0  ;;  %v9616_v57 = vmax.f32 %v7631_v23, 0.0  ;;  %v9617_v50 = vld [vmem:[#allocation121_spill] sm:$0xff] }
 0x361   :  { %v8193_v20 = vmax.f32 %v9609_v24, %v9607_v53  ;;  %v9618_v37 = vmax.f32 %v9617_v50, 0.0  ;;  %v9619_v32 = vmax.f32 %v7634_v33, 0.0  ;;  %v9620_v53 = vld [vmem:[#allocation123_spill] sm:$0xff]  ;;  %v9622_v24 = vmax.f32 %v7637_v22, 0.0 }
 0x362   :  { %v8199_v62 = vmax.f32 %v9612_v10, %v9610_v61  ;;  %v8205_v48 = vmax.f32 %v9615_v27, %v9613_v8  ;;  %v9621_v11 = vmax.f32 %v9620_v53, 0.0  ;;  %v9623_v61 = vld [vmem:[#allocation125_spill] sm:$0xff]  ;;  %v9625_v10 = vmax.f32 %v7640_v35, 0.0  ;;  %v9626_v8 = vld [vmem:[#allocation127_spill] sm:$0xff] }
 0x363   :  { %v8211_v43 = vmax.f32 %v9618_v37, %v9616_v57  ;;  %v9624_v26 = vmax.f32 %v9623_v61, 0.0  ;;  %v9627_v23 = vmax.f32 %v9626_v8, 0.0  ;;  %v9628_v27 = vmax.f32 %v7643_v58, 0.0  ;;  %v9629_v57 = vld [vmem:[#allocation129_spill] sm:$0xff] }
 0x364   :  { %v8217_v15 = vmax.f32 %v9621_v11, %v9619_v32  ;;  %v9630_v33 = vmax.f32 %v9629_v57, 0.0  ;;  %v9631_v37 = vmax.f32 %v7646_v47, 0.0  ;;  %v9632_v32 = vld [vmem:[#allocation131_spill] sm:$0xff]  ;;  %v9634_v11 = vmax.f32 %v7649_v4, 0.0 }
 0x365   :  { %v8223_v60 = vmax.f32 %v9624_v26, %v9622_v24  ;;  %v8229_v49 = vmax.f32 %v9627_v23, %v9625_v10  ;;  %v9633_v22 = vmax.f32 %v9632_v32, 0.0  ;;  %v9635_v24 = vld [vmem:[#allocation133_spill] sm:$0xff]  ;;  %v9637_v26 = vmax.f32 %v7652_v34, 0.0  ;;  %v9638_v10 = vld [vmem:[#allocation135_spill] sm:$0xff] }
 0x366   :  { %v8235_v50 = vmax.f32 %v9630_v33, %v9628_v27  ;;  %v9636_v35 = vmax.f32 %v9635_v24, 0.0  ;;  %v9639_v58 = vmax.f32 %v9638_v10, 0.0  ;;  %v9640_v23 = vmax.f32 %v7655_v6, 0.0  ;;  %v9641_v27 = vld [vmem:[#allocation137_spill] sm:$0xff] }
 0x367   :  { %v8241_v53 = vmax.f32 %v9633_v22, %v9631_v37  ;;  %v9642_v47 = vmax.f32 %v9641_v27, 0.0  ;;  %v9643_v33 = vmax.f32 %v7658_v45, 0.0  ;;  %v9644_v37 = vld [vmem:[#allocation139_spill] sm:$0xff]  ;;  %v9646_v22 = vmax.f32 %v7661_v54, 0.0 }
 0x368   :  { %v8247_v61 = vmax.f32 %v9636_v35, %v9634_v11  ;;  %v8253_v8 = vmax.f32 %v9639_v58, %v9637_v26  ;;  %v9645_v4 = vmax.f32 %v9644_v37, 0.0  ;;  %v9647_v11 = vld [vmem:[#allocation141_spill] sm:$0xff]  ;;  %v9649_v35 = vmax.f32 %v7664_v36, 0.0  ;;  %v9650_v26 = vld [vmem:[#allocation143_spill] sm:$0xff] }
 0x369   :  { %v8259_v57 = vmax.f32 %v9642_v47, %v9640_v23  ;;  %v9648_v34 = vmax.f32 %v9647_v11, 0.0  ;;  %v9651_v6 = vmax.f32 %v9650_v26, 0.0  ;;  %v9652_v58 = vmax.f32 %v7667_v59, 0.0  ;;  %v9653_v23 = vld [vmem:[#allocation145_spill] sm:$0xff]  ;;  %v9663_v26 = vld [vmem:[#allocation151_spill] sm:$0xff] }
 0x36a   :  { %v8265_v32 = vmax.f32 %v9645_v4, %v9643_v33  ;;  %v9654_v45 = vmax.f32 %v9653_v23, 0.0  ;;  %v9655_v47 = vmax.f32 %v7670_v39, 0.0  ;;  %v9656_v33 = vld [vmem:[#allocation147_spill] sm:$0xff]  ;;  %v9658_v4 = vld [vmem:[#allocation161_spill] sm:$0xff]  ;;  %v9664_v59 = vmax.f32 %v9663_v26, 0.0 }
 0x36b   :  { %v8271_v24 = vmax.f32 %v9648_v34, %v9646_v22  ;;  %v8277_v10 = vmax.f32 %v9651_v6, %v9649_v35  ;;  %v9657_v54 = vmax.f32 %v9656_v33, 0.0  ;;  %v9659_v22 = vmax.f32 %v9658_v4, 0.0  ;;  %v9660_v11 = vld [vmem:[#allocation149_spill] sm:$0xff] }
 0x36c   :  { %v8283_v27 = vmax.f32 %v9654_v45, %v9652_v58  ;;  %v9661_v36 = vmax.f32 %v9660_v11, 0.0  ;;  %v9662_v35 = vmax.f32 %v7676_v56, 0.0  ;;  %v9665_v58 = vld [vmem:[#allocation66_spill] sm:$0xff]  ;;  %v9667_v45 = vld [vmem:[#allocation153_spill] sm:$0xff] }
 0x36d   :  { %v8289_v37 = vmax.f32 %v9657_v54, %v9655_v47  ;;  %v9666_v23 = vmax.f32 %v9665_v58, 0.0  ;;  %v9668_v39 = vmax.f32 %v9667_v45, 0.0  ;;  %v9669_v47 = vld [vmem:[#allocation68_spill] sm:$0xff]  ;;  %v9671_v54 = vld [vmem:[#allocation155_spill] sm:$0xff] }
 0x36e   :  { %v8295_v34 = vmax.f32 %v9661_v36, %v9659_v22  ;;  %v8301_v6 = vmax.f32 %v9664_v59, %v9662_v35  ;;  %v9670_v33 = vmax.f32 %v9669_v47, 0.0  ;;  %v9672_v4 = vmax.f32 %v9671_v54, 0.0  ;;  %v9673_v22 = vld [vmem:[#allocation70_spill] sm:$0xff]  ;;  %v9675_v36 = vld [vmem:[#allocation157_spill] sm:$0xff]  ;;  %v9677_v35 = vld [vmem:[#allocation72_spill] sm:$0xff] }
 0x36f   :  { %v8307_v51 = vmax.f32 %v9668_v39, %v9666_v23  ;;  %v9674_v11 = vmax.f32 %v9673_v22, 0.0  ;;  %v9676_v56 = vmax.f32 %v9675_v36, 0.0  ;;  %v9678_v26 = vmax.f32 %v9677_v35, 0.0  ;;  %v9679_v59 = vld [vmem:[#allocation159_spill] sm:$0xff]  ;;  %v9681_v23 = vld [vmem:[#allocation74_spill] sm:$0xff]  ;;  %v9682_v39 = vld [vmem:[#allocation76_spill] sm:$0xff] }
 0x370   :  { %v8313_v29 = vmax.f32 %v9672_v4, %v9670_v33  ;;  %v9680_v58 = vmax.f32 %v9679_v59, 0.0  ;;  %v3327_v45 = vmax.f32 %v9681_v23, %v8037_v41  ;;  %v3328_v47 = vmax.f32 %v9682_v39, %v8043_v21  ;;  %v9683_v33 = vld [vmem:[#allocation78_spill] sm:$0xff]  ;;  %v9684_v4 = vld [vmem:[#allocation80_spill] sm:$0xff] }
 0x371   :  { %v8319_v40 = vmax.f32 %v9676_v56, %v9674_v11  ;;  %v3329_v54 = vmax.f32 %v9683_v33, %v8049_v19  ;;  %v3330_v22 = vmax.f32 %v9684_v4, %v8055_v25  ;;  %v9685_v11 = vld [vmem:[#allocation82_spill] sm:$0xff]  ;;  %v9686_v56 = vld [vmem:[#allocation84_spill] sm:$0xff] }
 0x372   :  { %v3326_v7 = vmax.f32 %v9680_v58, %v9678_v26  ;;  %v3331_v36 = vmax.f32 %v9685_v11, %v8061_v44  ;;  %v3332_v35 = vmax.f32 %v9686_v56, %v8067_v16  ;;  %v9687_v26 = vld [vmem:[#allocation86_spill] sm:$0xff]  ;;  %v9688_v41 = vld [vmem:[#allocation88_spill] sm:$0xff] }
 0x373   :  { %v3333_v59 = vmax.f32 %v9687_v26, %v8073_v12  ;;  %v3334_v58 = vmax.f32 %v9688_v41, %v8079_v38  ;;  %v9689_v21 = vld [vmem:[#allocation90_spill] sm:$0xff]  ;;  %v9690_v19 = vld [vmem:[#allocation92_spill] sm:$0xff] }
 0x374   :  { %v3335_v23 = vmax.f32 %v9689_v21, %v8085_v1  ;;  %v3336_v39 = vmax.f32 %v9690_v19, %v8091_v30  ;;  %v9691_v25 = vld [vmem:[#allocation94_spill] sm:$0xff]  ;;  %v9692_v44 = vld [vmem:[#allocation96_spill] sm:$0xff] }
 0x375   :  { %v3337_v33 = vmax.f32 %v9691_v25, %v8097_v42  ;;  %v3338_v4 = vmax.f32 %v9692_v44, %v8103_v55  ;;  %v9693_v16 = vld [vmem:[#allocation98_spill] sm:$0xff]  ;;  %v9694_v12 = vld [vmem:[#allocation100_spill] sm:$0xff] }
 0x376   :  { %v3339_v11 = vmax.f32 %v9693_v16, %v8109_v31  ;;  %v3340_v56 = vmax.f32 %v9694_v12, %v8115_v13  ;;  %v9695_v38 = vld [vmem:[#allocation102_spill] sm:$0xff]  ;;  %v9696_v1 = vld [vmem:[#allocation104_spill] sm:$0xff] }
 0x377   :  { %v3341_v26 = vmax.f32 %v9695_v38, %v8121_v14  ;;  %v3342_v41 = vmax.f32 %v9696_v1, %v8127_v28  ;;  %v9697_v30 = vld [vmem:[#allocation106_spill] sm:$0xff]  ;;  %v9698_v42 = vld [vmem:[#allocation108_spill] sm:$0xff] }
 0x378   :  { %v3343_v21 = vmax.f32 %v9697_v30, %v8133_v0  ;;  %v3344_v19 = vmax.f32 %v9698_v42, %v8139_v63  ;;  %v9699_v55 = vld [vmem:[#allocation110_spill] sm:$0xff]  ;;  %v9700_v31 = vld [vmem:[#allocation112_spill] sm:$0xff] }
 0x379   :  { %v3345_v25 = vmax.f32 %v9699_v55, %v8145_v9  ;;  %v3346_v44 = vmax.f32 %v9700_v31, %v8151_v2  ;;  %v9701_v13 = vld [vmem:[#allocation114_spill] sm:$0xff]  ;;  %v9702_v14 = vld [vmem:[#allocation116_spill] sm:$0xff] }
 0x37a   :  { %v3347_v16 = vmax.f32 %v9701_v13, %v8157_v52  ;;  %v3348_v12 = vmax.f32 %v9702_v14, %v8163_v17  ;;  %v9703_v28 = vld [vmem:[#allocation118_spill] sm:$0xff]  ;;  %v9704_v0 = vld [vmem:[#allocation120_spill] sm:$0xff] }
 0x37b   :  { %v3349_v38 = vmax.f32 %v9703_v28, %v8169_v18  ;;  %v3350_v1 = vmax.f32 %v9704_v0, %v8175_v5  ;;  %v9705_v63 = vld [vmem:[#allocation122_spill] sm:$0xff]  ;;  %v9706_v9 = vld [vmem:[#allocation124_spill] sm:$0xff] }
 0x37c   :  { %v3351_v30 = vmax.f32 %v9705_v63, %v8181_v46  ;;  %v3352_v42 = vmax.f32 %v9706_v9, %v8187_v3  ;;  %v9707_v2 = vld [vmem:[#allocation126_spill] sm:$0xff]  ;;  %v9708_v52 = vld [vmem:[#allocation128_spill] sm:$0xff] }
 0x37d   :  { %v3353_v55 = vmax.f32 %v9707_v2, %v8193_v20  ;;  %v3354_v31 = vmax.f32 %v9708_v52, %v8199_v62  ;;  %v9709_v17 = vld [vmem:[#allocation130_spill] sm:$0xff]  ;;  %v9710_v18 = vld [vmem:[#allocation132_spill] sm:$0xff] }
 0x37e   :  { %v3355_v13 = vmax.f32 %v9709_v17, %v8205_v48  ;;  %v3356_v14 = vmax.f32 %v9710_v18, %v8211_v43  ;;  %v9711_v5 = vld [vmem:[#allocation134_spill] sm:$0xff]  ;;  %v9712_v46 = vld [vmem:[#allocation136_spill] sm:$0xff] }
 0x37f   :  { %v3357_v28 = vmax.f32 %v9711_v5, %v8217_v15  ;;  %v3358_v0 = vmax.f32 %v9712_v46, %v8223_v60  ;;  %v9713_v3 = vld [vmem:[#allocation138_spill] sm:$0xff]  ;;  %v9714_v20 = vld [vmem:[#allocation140_spill] sm:$0xff] }
 0x380   :  { %v3359_v63 = vmax.f32 %v9713_v3, %v8229_v49  ;;  %v3360_v9 = vmax.f32 %v9714_v20, %v8235_v50  ;;  %v9715_v62 = vld [vmem:[#allocation142_spill] sm:$0xff]  ;;  %v9716_v48 = vld [vmem:[#allocation144_spill] sm:$0xff] }
 0x381   :  { %v3361_v2 = vmax.f32 %v9715_v62, %v8241_v53  ;;  %v3362_v52 = vmax.f32 %v9716_v48, %v8247_v61  ;;  %v9717_v43 = vld [vmem:[#allocation146_spill] sm:$0xff]  ;;  %v9718_v15 = vld [vmem:[#allocation148_spill] sm:$0xff] }
 0x382   :  { %v3363_v17 = vmax.f32 %v9717_v43, %v8253_v8  ;;  %v3364_v18 = vmax.f32 %v9718_v15, %v8259_v57  ;;  %v9719_v60 = vld [vmem:[#allocation150_spill] sm:$0xff]  ;;  %v9720_v49 = vld [vmem:[#allocation152_spill] sm:$0xff] }
 0x383   :  { %v3365_v5 = vmax.f32 %v9719_v60, %v8265_v32  ;;  %v3366_v46 = vmax.f32 %v9720_v49, %v8271_v24  ;;  %v9721_v50 = vld [vmem:[#allocation154_spill] sm:$0xff]  ;;  %v9722_v53 = vld [vmem:[#allocation156_spill] sm:$0xff]  ;;  %v9726_v32 = vld [vmem:[#allocation41_spill] sm:$0xff] }
 0x384   :  { %v3367_v3 = vmax.f32 %v9721_v50, %v8277_v10  ;;  %v3368_v20 = vmax.f32 %v9722_v53, %v8283_v27  ;;  %v9723_v61 = vld [vmem:[#allocation158_spill] sm:$0xff]  ;;  %v9724_v8 = vld [vmem:[#allocation160_spill] sm:$0xff]  ;;  %v3372_v15 = vmax.f32 %v9726_v32, %v8307_v51  ;;  %v9727_v24 = vld [vmem:[#allocation7_spill] sm:$0xff]  ;;  %v4079_v53 = vpack.c.bf16 %v3328_v47, %v3327_v45 }
 0x385   :  { %v3369_v62 = vmax.f32 %v9723_v61, %v8289_v37  ;;  %v3370_v48 = vmax.f32 %v9724_v8, %v8295_v34  ;;  %v9725_v57 = vld [vmem:[#allocation162_spill] sm:$0xff]  ;;  %v3373_v60 = vmax.f32 %v9727_v24, %v8313_v29  ;;  %v9728_v10 = vld [vmem:[#allocation43_spill] sm:$0xff]  ;;  %v9729_v50 = vld [vmem:[#allocation8_spill] sm:$0xff]  ;;  %v4084_v37 = vpack.c.bf16 %v3330_v22, %v3329_v54 }
 0x386   :  { %v3371_v43 = vmax.f32 %v9725_v57, %v8301_v6  ;;  %v3374_v49 = vmax.f32 %v9728_v10, %v8319_v40  ;;  %v3375_v27 = vmax.f32 %v9729_v50, %v3326_v7  ;;  %v4089_v61 = vpack.c.bf16 %v3332_v35, %v3331_v36  ;;  %4080 = vst [vmem:[%s8501_s4] sm:$0xff] %v4079_v53  }
 0x387   :  { %v4094_v8 = vpack.c.bf16 %v3334_v58, %v3333_v59  ;;  %v4099_v34 = vpack.c.bf16 %v3336_v39, %v3335_v23  ;;  %v4104_v6 = vpack.c.bf16 %v3338_v4, %v3337_v33  ;;  %v4109_v57 = vpack.c.bf16 %v3340_v56, %v3339_v11  ;;  %4196 = vst [vmem:[%s8501_s4 + $0x8] sm:$0xff] %v4084_v37  }
 0x388   :  { %v4075_v32 = vpack.c.bf16 %v3375_v27, %v3375_v27  ;;  %4197 = vst [vmem:[%s8501_s4 + $0x10] sm:$0xff] %v4089_v61   ;;  %v4114_v7 = vpack.c.bf16 %v3342_v41, %v3341_v26  ;;  %v4119_v40 = vpack.c.bf16 %v3344_v19, %v3343_v21  ;;  %v4124_v29 = vpack.c.bf16 %v3346_v44, %v3345_v25 }
 0x389   :  { %4198 = vst [vmem:[%s8501_s4 + $0x18] sm:$0xff] %v4094_v8   ;;  %4199 = vst [vmem:[%s8501_s4 + $0x20] sm:$0xff] %v4099_v34   ;;  %v4129_v51 = vpack.c.bf16 %v3348_v12, %v3347_v16  ;;  %v4134_v45 = vpack.c.bf16 %v3350_v1, %v3349_v38  ;;  %v4139_v47 = vpack.c.bf16 %v3352_v42, %v3351_v30 }
 0x38a   :  { %4200 = vst [vmem:[%s8501_s4 + $0x28] sm:$0xff] %v4104_v6   ;;  %4201 = vst [vmem:[%s8501_s4 + $0x30] sm:$0xff] %v4109_v57   ;;  %v4144_v54 = vpack.c.bf16 %v3354_v31, %v3353_v55  ;;  %v4149_v22 = vpack.c.bf16 %v3356_v14, %v3355_v13  ;;  %v4154_v36 = vpack.c.bf16 %v3358_v0, %v3357_v28 }
 0x38b   :  { %4202 = vst [vmem:[%s8501_s4 + $0x38] sm:$0xff] %v4114_v7   ;;  %4203 = vst [vmem:[%s8501_s4 + $0x40] sm:$0xff] %v4119_v40   ;;  %v4159_v35 = vpack.c.bf16 %v3360_v9, %v3359_v63  ;;  %v4164_v59 = vpack.c.bf16 %v3362_v52, %v3361_v2  ;;  %v4169_v58 = vpack.c.bf16 %v3364_v18, %v3363_v17 }
 0x38c   :  { %4204 = vst [vmem:[%s8501_s4 + $0x48] sm:$0xff] %v4124_v29   ;;  %3621 = vst [vmem:[%s8501_s4 + $0xc0] sm:$0xf] %v4075_v32  ;;  %v4174_v23 = vpack.c.bf16 %v3366_v46, %v3365_v5  ;;  %v4179_v39 = vpack.c.bf16 %v3368_v20, %v3367_v3  ;;  %v4184_v33 = vpack.c.bf16 %v3370_v48, %v3369_v62 }
 0x38d   :  { %4205 = vst [vmem:[%s8501_s4 + $0x50] sm:$0xff] %v4129_v51   ;;  %4206 = vst [vmem:[%s8501_s4 + $0x58] sm:$0xff] %v4134_v45   ;;  %v4189_v4 = vpack.c.bf16 %v3372_v15, %v3371_v43  ;;  %v4194_v11 = vpack.c.bf16 %v3374_v49, %v3373_v60 }
 0x38e   :  { %4207 = vst [vmem:[%s8501_s4 + $0x60] sm:$0xff] %v4139_v47   ;;  %4208 = vst [vmem:[%s8501_s4 + $0x68] sm:$0xff] %v4144_v54  }
 0x38f   :  { %4209 = vst [vmem:[%s8501_s4 + $0x70] sm:$0xff] %v4149_v22   ;;  %4210 = vst [vmem:[%s8501_s4 + $0x78] sm:$0xff] %v4154_v36  }
 0x390   :  { %4211 = vst [vmem:[%s8501_s4 + $0x80] sm:$0xff] %v4159_v35   ;;  %4212 = vst [vmem:[%s8501_s4 + $0x88] sm:$0xff] %v4164_v59  }
 0x391   :  { %4213 = vst [vmem:[%s8501_s4 + $0x90] sm:$0xff] %v4169_v58   ;;  %4214 = vst [vmem:[%s8501_s4 + $0x98] sm:$0xff] %v4174_v23  }
 0x392   :  { %4215 = vst [vmem:[%s8501_s4 + $0xa0] sm:$0xff] %v4179_v39   ;;  %4216 = vst [vmem:[%s8501_s4 + $0xa8] sm:$0xff] %v4184_v33  }
 0x393   :  { %4217 = vst [vmem:[%s8501_s4 + $0xb0] sm:$0xff] %v4189_v4   ;;  %4218 = vst [vmem:[%s8501_s4 + $0xb8] sm:$0xff] %v4194_v11  }

// kernel: lenet5_forward.3
= control target key start
LH: loop header
LB: loop body
LE: loop exit
PB: predicated region body
PF: predicated region fallthrough
CT: control target
= control target key end

     0   :  { %v5562_v1 = vmov 0   ;;  %vm153_vm0 = vcmask 179200   ;;  %vm166_vm1 = vcmask 1042432   ;;  %s7104_s0 = inlined_call_operand.vmem [shape: bf16[4,50,150], index: 0, kind: input, shape index: {}]   ;;  %s7105_s1 = inlined_call_operand.vmem [shape: bf16[150,128], index: 1, kind: input, shape index: {}]   ;;  %s7106_s2 = inlined_call_operand.vmem [shape: f32[1,128], index: 2, kind: input, shape index: {}]   ;;  %s7107_s3 = inlined_call_operand.vmem [shape: f32[1,128], index: 3, kind: input, shape index: {}]   ;;  %s7108_s4 = inlined_call_operand.vmem [shape: bf16[25,128,128], index: 4, kind: input, shape index: {}]   ;;  %s7109_s5 = inlined_call_operand.vmem [shape: f32[1,128], index: 5, kind: input, shape index: {}]   ;;  %s7110_s6 = inlined_call_operand.vmem [shape: bf16[128,128], index: 6, kind: input, shape index: {}]   ;;  %s7111_s7 = inlined_call_operand.vmem [shape: f32[1,128], index: 7, kind: input, shape index: {}]   ;;  %s7112_s8 = inlined_call_operand.vmem [shape: bf16[128,128], index: 8, kind: input, shape index: {}]   ;;  %s7113_s9 = inlined_call_operand.vmem [shape: f32[1,128], index: 9, kind: input, shape index: {}]   ;;  %s7114_s10 = inlined_call_operand.hbm [shape: f32[2,128], index: 10, kind: output, shape index: {}]  }
   0x1   :  { %v5624_v0 = vld [vmem:[%s7105_s1] sm:$0xff]   ;;  %170 = vmatprep.subr.bf16.mxu0 %v5562_v1  ;;  %287 = vmatprep.subr.bf16.mxu1 %v5562_v1  ;;  %v5633_v2 = vld [vmem:[%s7105_s1 + $0x8] sm:$0xff]   ;;  %v5642_v3 = vld [vmem:[%s7105_s1 + $0x10] sm:$0xff]  }
   0x2   :  { %171 = vmatpush1.bf16.msra.mxu0 %v5624_v0  ;;  %288 = vmatpush1.bf16.msra.mxu1 %v5624_v0  ;;  %v5651_v4 = vld [vmem:[%s7105_s1 + $0x18] sm:$0xff]   ;;  %v5278_v5 = vld [vmem:[%s7104_s0 + $0x4] ss:$8 sps:$4 sm:$0xff]   ;;  %v5684_v9 = vld [vmem:[%s7105_s1 + $0x30] sm:$0xff]  }
   0x3   :  { %172 = vmatprep.subr.bf16.mxu0 %v5562_v1  ;;  %289 = vmatprep.subr.bf16.mxu1 %v5562_v1  ;;  %v5281_v6 = vld [vmem:[%s7104_s0 + $0x3c] ss:$8 sps:$4 sm:$0xff]   ;;  %v5677_v8 = vld [vmem:[%s7105_s1 + $0x28] sm:$0xff]   ;;  %v5279_v15 = vld [vmem:[%s7104_s0 + $0x38] ss:$8 sps:$4 sm:$0xff]  }
   0x4   :  { %3815 = vmatprep.mubr.msk.bf16.mxu0 %vm153_vm0, %v5278_v5  ;;  %v5667_v7 = vld [vmem:[%s7105_s1 + $0x20] sm:$0xff]   ;;  %3834 = vmatprep.mubr.msk.bf16.mxu1 %vm153_vm0, %v5281_v6  ;;  %v5275_v10 = vld [vmem:[%s7105_s1 + $0x48] ss:$0 sps:$4 sm:$0x77]   ;;  %v5698_v11 = vld [vmem:[%s7105_s1 + $0x38] sm:$0xff]  }
   0x5   :  { %v5700_v12 = vsel %vm166_vm1, %v5275_v10, 0  ;;  %v5707_v13 = vld [vmem:[%s7105_s1 + $0x40] sm:$0xff]   ;;  %v5282_v16 = vld [vmem:[%s7104_s0 + $0x14] ss:$8 sps:$4 sm:$0xff]   ;;  %v5286_v18 = vld [vmem:[%s7104_s0 + $0x10] ss:$8 sps:$4 sm:$0xff]  }
   0x6   :  { %173 = vmatpush1.bf16.msra.mxu0 %v5633_v2  ;;  %290 = vmatpush1.bf16.msra.mxu1 %v5633_v2  ;;  %v5276_v14 = vld [vmem:[%s7104_s0] ss:$8 sps:$4 sm:$0xff]   ;;  %v5284_v17 = vld [vmem:[%s7104_s0 + $0x4c] ss:$8 sps:$4 sm:$0xff]   ;;  %v5290_v21 = vld [vmem:[%s7104_s0 + $0x5c] ss:$8 sps:$4 sm:$0xff]  }
   0x7   :  { %174 = vmatprep.subr.bf16.mxu0 %v5562_v1  ;;  %291 = vmatprep.subr.bf16.mxu1 %v5562_v1  ;;  %v5287_v19 = vld [vmem:[%s7104_s0 + $0x48] ss:$8 sps:$4 sm:$0xff]   ;;  %v5288_v20 = vld [vmem:[%s7104_s0 + $0x24] ss:$8 sps:$4 sm:$0xff]   ;;  %v5293_v23 = vld [vmem:[%s7104_s0 + $0x58] ss:$8 sps:$4 sm:$0xff]  }
   0x8   :  { %v5292_v22 = vld [vmem:[%s7104_s0 + $0x20] ss:$8 sps:$4 sm:$0xff]   ;;  %v62_v24 = vld [vmem:[%s7104_s0 + $0x30] sm:$0x11]  ;;  %v5304_v34 = vld [vmem:[%s7104_s0 + $0x84] ss:$8 sps:$4 sm:$0xff]  }
   0x9   :  { %v3825_v25 = vld [vmem:[%s7104_s0 + $0x68] sm:$0x11]  ;;  %v3804_v26 = vcombine.high %v62_v24, %v62_v24  ;;  %v3803_v28 = vcombine.low %v62_v24, %v62_v24  ;;  %v5300_v30 = vld [vmem:[%s7104_s0 + $0x74] ss:$8 sps:$4 sm:$0xff]   ;;  %v5298_v32 = vld [vmem:[%s7104_s0 + $0x70] ss:$8 sps:$4 sm:$0xff]  }
   0xa   :  { %175 = vmatpush1.bf16.msra.mxu0 %v5642_v3  ;;  %292 = vmatpush1.bf16.msra.mxu1 %v5642_v3  ;;  %v3833_v27 = vcombine.high %v3825_v25, %v3825_v25  ;;  %v3832_v29 = vcombine.low %v3825_v25, %v3825_v25  ;;  %v5303_v31 = vld [vmem:[%s7104_s0 + $0xac] ss:$8 sps:$4 sm:$0xff]   ;;  %v5301_v33 = vld [vmem:[%s7104_s0 + $0xa8] ss:$8 sps:$4 sm:$0xff]   ;;  %v5306_v35 = vld [vmem:[%s7104_s0 + $0xbc] ss:$8 sps:$4 sm:$0xff]  }
   0xb   :  { %176 = vmatprep.subr.bf16.mxu0 %v5562_v1  ;;  %293 = vmatprep.subr.bf16.mxu1 %v5562_v1  ;;  %v5308_v36 = vld [vmem:[%s7104_s0 + $0x80] ss:$8 sps:$4 sm:$0xff]   ;;  %v5310_v38 = vld [vmem:[%s7104_s0 + $0x94] ss:$8 sps:$4 sm:$0xff]   ;;  %v5314_v42 = vld [vmem:[%s7104_s0 + $0x90] ss:$8 sps:$4 sm:$0xff]  }
   0xc   :  { %v5309_v37 = vld [vmem:[%s7104_s0 + $0xb8] ss:$8 sps:$4 sm:$0xff]   ;;  %v5312_v39 = vld [vmem:[%s7104_s0 + $0xcc] ss:$8 sps:$4 sm:$0xff]   ;;  %v5315_v43 = vld [vmem:[%s7104_s0 + $0xc8] ss:$8 sps:$4 sm:$0xff]  }
   0xd   :  { %v3844_v40 = vld [vmem:[%s7104_s0 + $0xa0] sm:$0x11]  ;;  %v3863_v41 = vld [vmem:[%s7104_s0 + $0xd8] sm:$0x11] }
   0xe   :  { %177 = vmatpush1.bf16.msra.mxu0 %v5651_v4  ;;  %294 = vmatpush1.bf16.msra.mxu1 %v5651_v4  ;;  %v3852_v44 = vcombine.high %v3844_v40, %v3844_v40  ;;  %v3871_v45 = vcombine.high %v3863_v41, %v3863_v41  ;;  %v3851_v46 = vcombine.low %v3844_v40, %v3844_v40 }
   0xf   :  { %178 = vmatprep.subr.bf16.mxu0 %v5562_v1  ;;  %295 = vmatprep.subr.bf16.mxu1 %v5562_v1  ;;  %v3870_v47 = vcombine.low %v3863_v41, %v3863_v41 }
  0x12   :  { %179 = vmatpush1.bf16.msra.mxu0 %v5667_v7  ;;  %296 = vmatpush1.bf16.msra.mxu1 %v5667_v7 }
  0x13   :  { %180 = vmatprep.subr.bf16.mxu0 %v5562_v1  ;;  %297 = vmatprep.subr.bf16.mxu1 %v5562_v1 }
  0x16   :  { %181 = vmatpush1.bf16.msra.mxu0 %v5677_v8  ;;  %298 = vmatpush1.bf16.msra.mxu1 %v5677_v8 }
  0x17   :  { %182 = vmatprep.subr.bf16.mxu0 %v5562_v1  ;;  %299 = vmatprep.subr.bf16.mxu1 %v5562_v1 }
  0x1a   :  { %183 = vmatpush1.bf16.msra.mxu0 %v5684_v9  ;;  %300 = vmatpush1.bf16.msra.mxu1 %v5684_v9 }
  0x1b   :  { %184 = vmatprep.subr.bf16.mxu0 %v5562_v1  ;;  %301 = vmatprep.subr.bf16.mxu1 %v5562_v1 }
  0x1e   :  { %185 = vmatpush1.bf16.msra.mxu0 %v5698_v11  ;;  %302 = vmatpush1.bf16.msra.mxu1 %v5698_v11 }
  0x1f   :  { %186 = vmatprep.subr.bf16.mxu0 %v5562_v1  ;;  %303 = vmatprep.subr.bf16.mxu1 %v5562_v1 }
  0x22   :  { %187 = vmatpush1.bf16.msra.mxu0 %v5707_v13  ;;  %304 = vmatpush1.bf16.msra.mxu1 %v5707_v13 }
  0x23   :  { %188 = vmatprep.subr.bf16.mxu0 %v5562_v1  ;;  %305 = vmatprep.subr.bf16.mxu1 %v5562_v1 }
  0x26   :  { %189 = vmatpush1.bf16.msra.mxu0 %v5700_v12  ;;  %306 = vmatpush1.bf16.msra.mxu1 %v5700_v12 }
  0x27   :  { %404 = vmatprep.subr.bf16.mxu0 %v5562_v1  ;;  %521 = vmatprep.subr.bf16.mxu1 %v5562_v1 }
  0x29   :  { %203 = vmatmul.mubr.bf16.vlgmr.msra.gmra.mrb[0].mxu0 %v5276_v14  ;;  %320 = vmatmul.mubr.bf16.vlgmr.msra.gmra.mrb[0].mxu1 %v5279_v15 }
  0x2a   :  { %405 = vmatpush1.bf16.msra.mxu0 %v5624_v0  ;;  %522 = vmatpush1.bf16.msra.mxu1 %v5624_v0 }
  0x2b   :  { %406 = vmatprep.subr.bf16.mxu0 %v5562_v1  ;;  %523 = vmatprep.subr.bf16.mxu1 %v5562_v1 }
  0x2c   :  { %3816 = vmatprep.mubr.msk.bf16.mxu0 %vm153_vm0, %v5282_v16  ;;  %3835 = vmatprep.mubr.msk.bf16.mxu1 %vm153_vm0, %v5284_v17 }
  0x2e   :  { %407 = vmatpush1.bf16.msra.mxu0 %v5633_v2  ;;  %524 = vmatpush1.bf16.msra.mxu1 %v5633_v2 }
  0x2f   :  { %408 = vmatprep.subr.bf16.mxu0 %v5562_v1  ;;  %525 = vmatprep.subr.bf16.mxu1 %v5562_v1 }
  0x31   :  { %211 = vmatmul.mubr.bf16.gmra.mrb[4].mxu0 %v5286_v18  ;;  %328 = vmatmul.mubr.bf16.gmra.mrb[4].mxu1 %v5287_v19 }
  0x32   :  { %409 = vmatpush1.bf16.msra.mxu0 %v5642_v3  ;;  %526 = vmatpush1.bf16.msra.mxu1 %v5642_v3 }
  0x33   :  { %410 = vmatprep.subr.bf16.mxu0 %v5562_v1  ;;  %527 = vmatprep.subr.bf16.mxu1 %v5562_v1 }
  0x34   :  { %3817 = vmatprep.mubr.msk.bf16.mxu0 %vm153_vm0, %v5288_v20  ;;  %3836 = vmatprep.mubr.msk.bf16.mxu1 %vm153_vm0, %v5290_v21 }
  0x36   :  { %411 = vmatpush1.bf16.msra.mxu0 %v5651_v4  ;;  %528 = vmatpush1.bf16.msra.mxu1 %v5651_v4 }
  0x37   :  { %412 = vmatprep.subr.bf16.mxu0 %v5562_v1  ;;  %529 = vmatprep.subr.bf16.mxu1 %v5562_v1 }
  0x39   :  { %219 = vmatmul.mubr.bf16.gmra.mrb[8].mxu0 %v5292_v22  ;;  %336 = vmatmul.mubr.bf16.gmra.mrb[8].mxu1 %v5293_v23 }
  0x3a   :  { %413 = vmatpush1.bf16.msra.mxu0 %v5667_v7  ;;  %530 = vmatpush1.bf16.msra.mxu1 %v5667_v7 }
  0x3b   :  { %414 = vmatprep.subr.bf16.mxu0 %v5562_v1  ;;  %531 = vmatprep.subr.bf16.mxu1 %v5562_v1 }
  0x3c   :  { %3818 = vmatprep.mubr.msk.bf16.mxu0 %vm153_vm0, %v3804_v26  ;;  %3837 = vmatprep.mubr.msk.bf16.mxu1 %vm153_vm0, %v3833_v27 }
  0x3e   :  { %415 = vmatpush1.bf16.msra.mxu0 %v5677_v8  ;;  %532 = vmatpush1.bf16.msra.mxu1 %v5677_v8 }
  0x3f   :  { %416 = vmatprep.subr.bf16.mxu0 %v5562_v1  ;;  %533 = vmatprep.subr.bf16.mxu1 %v5562_v1 }
  0x41   :  { %227 = vmatmul.mubr.bf16.gmra.mrb[12].mxu0 %v3803_v28  ;;  %344 = vmatmul.mubr.bf16.gmra.mrb[12].mxu1 %v3832_v29 }
  0x42   :  { %417 = vmatpush1.bf16.msra.mxu0 %v5684_v9  ;;  %534 = vmatpush1.bf16.msra.mxu1 %v5684_v9 }
  0x43   :  { %418 = vmatprep.subr.bf16.mxu0 %v5562_v1  ;;  %535 = vmatprep.subr.bf16.mxu1 %v5562_v1 }
  0x44   :  { %3853 = vmatprep.mubr.msk.bf16.mxu0 %vm153_vm0, %v5300_v30  ;;  %3872 = vmatprep.mubr.msk.bf16.mxu1 %vm153_vm0, %v5303_v31 }
  0x46   :  { %419 = vmatpush1.bf16.msra.mxu0 %v5698_v11  ;;  %536 = vmatpush1.bf16.msra.mxu1 %v5698_v11 }
  0x47   :  { %420 = vmatprep.subr.bf16.mxu0 %v5562_v1  ;;  %537 = vmatprep.subr.bf16.mxu1 %v5562_v1 }
  0x4a   :  { %421 = vmatpush1.bf16.msra.mxu0 %v5707_v13  ;;  %538 = vmatpush1.bf16.msra.mxu1 %v5707_v13 }
  0x4b   :  { %422 = vmatprep.subr.bf16.mxu0 %v5562_v1  ;;  %539 = vmatprep.subr.bf16.mxu1 %v5562_v1 }
  0x4e   :  { %423 = vmatpush1.bf16.msra.mxu0 %v5700_v12  ;;  %540 = vmatpush1.bf16.msra.mxu1 %v5700_v12 }
  0x51   :  { %437 = vmatmul.mubr.bf16.vlgmr.msra.gmra.mrb[16].mxu0 %v5298_v32  ;;  %554 = vmatmul.mubr.bf16.vlgmr.msra.gmra.mrb[16].mxu1 %v5301_v33 }
  0x52   :  { %3854 = vmatprep.mubr.msk.bf16.mxu0 %vm153_vm0, %v5304_v34  ;;  %3873 = vmatprep.mubr.msk.bf16.mxu1 %vm153_vm0, %v5306_v35 }
  0x59   :  { %445 = vmatmul.mubr.bf16.gmra.mrb[20].mxu0 %v5308_v36  ;;  %562 = vmatmul.mubr.bf16.gmra.mrb[20].mxu1 %v5309_v37 }
  0x5a   :  { %3855 = vmatprep.mubr.msk.bf16.mxu0 %vm153_vm0, %v5310_v38  ;;  %3874 = vmatprep.mubr.msk.bf16.mxu1 %vm153_vm0, %v5312_v39 }
  0x61   :  { %453 = vmatmul.mubr.bf16.gmra.mrb[24].mxu0 %v5314_v42  ;;  %570 = vmatmul.mubr.bf16.gmra.mrb[24].mxu1 %v5315_v43 }
  0x62   :  { %3856 = vmatprep.mubr.msk.bf16.mxu0 %vm153_vm0, %v3852_v44  ;;  %3875 = vmatprep.mubr.msk.bf16.mxu1 %vm153_vm0, %v3871_v45 }
  0x69   :  { %461 = vmatmul.mubr.bf16.gmra.mrb[28].mxu0 %v3851_v46  ;;  %578 = vmatmul.mubr.bf16.gmra.mrb[28].mxu1 %v3870_v47 }
  0x6a   :  { %15 = vsyncpa [#allocation3], 0  ;;  %v5320_v48 = vld [vmem:[%s7108_s4] sm:$0xff]   ;;  %v5563_v49 = vmov 0.0   ;;  %v5322_v51 = vld [vmem:[%s7108_s4 + $0x8] sm:$0xff]   ;;  %vm5564_vm2 = vmmov 0  }
  0x6b   :  { %4742 = vmatprep.subr.bf16.mxu1 %v5563_v49  ;;  %4722 = vmatprep.subr.bf16.mxu0 %v5563_v49  ;;  %v5321_v50 = vld [vmem:[%s7108_s4 + $0x40] sm:$0xff]   ;;  %v5323_v52 = vld [vmem:[%s7108_s4 + $0x48] sm:$0xff]   ;;  %v5324_v53 = vld [vmem:[%s7108_s4 + $0x10] sm:$0xff]   ;;  %vm592_vm3 = vcmask 1041408  }
  0x6c   :  { %4743 = vmatpush3.bf16.msra.mxu1 %v5320_v48  ;;  %4723 = vmatpush3.bf16.msra.mxu0 %v5321_v50  ;;  %v5325_v54 = vld [vmem:[%s7108_s4 + $0x50] sm:$0xff]   ;;  %v5326_v55 = vld [vmem:[%s7108_s4 + $0x18] sm:$0xff]   ;;  %v5328_v57 = vld [vmem:[%s7108_s4 + $0x20] sm:$0xff]  }
  0x6d   :  { %4744 = vmatprep.subr.bf16.mxu1 %v5563_v49  ;;  %4724 = vmatprep.subr.bf16.mxu0 %v5563_v49  ;;  %v5327_v56 = vld [vmem:[%s7108_s4 + $0x58] sm:$0xff]   ;;  %v5329_v58 = vld [vmem:[%s7108_s4 + $0x60] sm:$0xff]   ;;  %v5330_v59 = vld [vmem:[%s7108_s4 + $0x28] sm:$0xff]  }
  0x6e   :  { %v5331_v60 = vld [vmem:[%s7108_s4 + $0x68] sm:$0xff]   ;;  %v5332_v61 = vld [vmem:[%s7108_s4 + $0x30] sm:$0xff]   ;;  %v5334_v63 = vld [vmem:[%s7108_s4 + $0x38] sm:$0xff]   ;;  %4758 = vmatprep.mubr.msk.bf16.mxu1 %vm5564_vm2, %v5563_v49  ;;  %4738 = vmatprep.mubr.msk.bf16.mxu0 %vm5564_vm2, %v5563_v49 }
  0x6f   :  { %v5333_v62 = vld [vmem:[%s7108_s4 + $0x70] sm:$0xff]   ;;  %v5335_v0 = vld [vmem:[%s7108_s4 + $0x78] sm:$0xff]  }
  0x70   :  { %4745 = vmatpush3.bf16.msra.mxu1 %v5322_v51  ;;  %4725 = vmatpush3.bf16.msra.mxu0 %v5323_v52 }
  0x71   :  { %4746 = vmatprep.subr.bf16.mxu1 %v5563_v49  ;;  %4726 = vmatprep.subr.bf16.mxu0 %v5563_v49 }
  0x74   :  { %4747 = vmatpush3.bf16.msra.mxu1 %v5324_v53  ;;  %4727 = vmatpush3.bf16.msra.mxu0 %v5325_v54 }
  0x75   :  { %4748 = vmatprep.subr.bf16.mxu1 %v5563_v49  ;;  %4728 = vmatprep.subr.bf16.mxu0 %v5563_v49 }
  0x78   :  { %4749 = vmatpush3.bf16.msra.mxu1 %v5326_v55  ;;  %4729 = vmatpush3.bf16.msra.mxu0 %v5327_v56 }
  0x79   :  { %4750 = vmatprep.subr.bf16.mxu1 %v5563_v49  ;;  %4730 = vmatprep.subr.bf16.mxu0 %v5563_v49 }
  0x7c   :  { %4751 = vmatpush3.bf16.msra.mxu1 %v5328_v57  ;;  %4731 = vmatpush3.bf16.msra.mxu0 %v5329_v58 }
  0x7d   :  { %4752 = vmatprep.subr.bf16.mxu1 %v5563_v49  ;;  %4732 = vmatprep.subr.bf16.mxu0 %v5563_v49 }
  0x80   :  { %4753 = vmatpush3.bf16.msra.mxu1 %v5330_v59  ;;  %4733 = vmatpush3.bf16.msra.mxu0 %v5331_v60 }
  0x81   :  { %4754 = vmatprep.subr.bf16.mxu1 %v5563_v49  ;;  %4734 = vmatprep.subr.bf16.mxu0 %v5563_v49 }
  0x84   :  { %4755 = vmatpush3.bf16.msra.mxu1 %v5332_v61  ;;  %4735 = vmatpush3.bf16.msra.mxu0 %v5333_v62 }
  0x85   :  { %4756 = vmatprep.subr.bf16.mxu1 %v5563_v49  ;;  %4736 = vmatprep.subr.bf16.mxu0 %v5563_v49 }
  0x88   :  { %4757 = vmatpush3.bf16.msra.mxu1 %v5334_v63  ;;  %4737 = vmatpush3.bf16.msra.mxu0 %v5335_v0 }
  0x89   :  { %4782 = vmatprep.subr.bf16.mxu1 %v5563_v49  ;;  %4762 = vmatprep.subr.bf16.mxu0 %v5563_v49 }
  0xfc   :  { %v5921_v1 = vpop.f32.mrb[0].mxu0  ;;  %v5923_v2 = vpop.f32.mrb[0].mxu1 }
  0xfd   :  { %v601_v3 = vmul.f32 %v5921_v1, %v5921_v1  ;;  %v635_v4 = vmul.f32 %v5923_v2, %v5923_v2  ;;  %v206_v5 = vpop.f32.mrb[1].mxu0  ;;  %v323_v6 = vpop.f32.mrb[1].mxu1 }
  0xfe   :  { %v5929_v7 = vpop.f32.mrb[2].mxu0  ;;  %v5931_v8 = vpop.f32.mrb[2].mxu1 }
  0xff   :  { %v587_v9 = vadd.f32 %v5929_v7, %v5921_v1  ;;  %v602_v10 = vmul.f32 %v5929_v7, %v5929_v7  ;;  %v621_v11 = vadd.f32 %v5931_v8, %v5923_v2  ;;  %v636_v12 = vmul.f32 %v5931_v8, %v5931_v8  ;;  %v209_v13 = vpop.f32.mrb[3].mxu0  ;;  %v326_v14 = vpop.f32.mrb[3].mxu1 }
 0x101   :  { %v608_v15 = vadd.f32 %v602_v10, %v601_v3  ;;  %v642_v16 = vadd.f32 %v636_v12, %v635_v4 }
 0x104   :  { %v5941_v17 = vpop.f32.mrb[4].mxu0  ;;  %v5943_v18 = vpop.f32.mrb[4].mxu1 }
 0x105   :  { %v588_v19 = vadd.f32 %v587_v9, %v5941_v17  ;;  %v603_v20 = vmul.f32 %v5941_v17, %v5941_v17  ;;  %v622_v21 = vadd.f32 %v621_v11, %v5943_v18  ;;  %v637_v22 = vmul.f32 %v5943_v18, %v5943_v18  ;;  %v214_v23 = vpop.f32.mrb[5].mxu0  ;;  %v331_v24 = vpop.f32.mrb[5].mxu1 }
 0x106   :  { %v5951_v25 = vpop.f32.mrb[6].mxu0  ;;  %v5953_v26 = vpop.f32.mrb[6].mxu1 }
 0x107   :  { %v609_v27 = vadd.f32 %v608_v15, %v603_v20  ;;  %v643_v28 = vadd.f32 %v642_v16, %v637_v22  ;;  %v589_v29 = vadd.f32 %v588_v19, %v5951_v25  ;;  %v604_v30 = vmul.f32 %v5951_v25, %v5951_v25  ;;  %v217_v31 = vpop.f32.mrb[7].mxu0  ;;  %v334_v32 = vpop.f32.mrb[7].mxu1 }
 0x108   :  { %v623_v33 = vadd.f32 %v622_v21, %v5953_v26  ;;  %v638_v34 = vmul.f32 %v5953_v26, %v5953_v26 }
 0x109   :  { %v610_v35 = vadd.f32 %v609_v27, %v604_v30 }
 0x10a   :  { %v644_v36 = vadd.f32 %v643_v28, %v638_v34 }
 0x10c   :  { %v5961_v37 = vpop.f32.mrb[8].mxu0  ;;  %v5963_v38 = vpop.f32.mrb[8].mxu1 }
 0x10d   :  { %v590_v39 = vadd.f32 %v589_v29, %v5961_v37  ;;  %v605_v40 = vmul.f32 %v5961_v37, %v5961_v37  ;;  %v624_v41 = vadd.f32 %v623_v33, %v5963_v38  ;;  %v639_v42 = vmul.f32 %v5963_v38, %v5963_v38  ;;  %v222_v43 = vpop.f32.mrb[9].mxu0  ;;  %v339_v44 = vpop.f32.mrb[9].mxu1 }
 0x10e   :  { %v5971_v45 = vpop.f32.mrb[10].mxu0  ;;  %v5973_v46 = vpop.f32.mrb[10].mxu1 }
 0x10f   :  { %v611_v47 = vadd.f32 %v610_v35, %v605_v40  ;;  %v645_v48 = vadd.f32 %v644_v36, %v639_v42  ;;  %v591_v50 = vadd.f32 %v590_v39, %v5971_v45  ;;  %v606_v51 = vmul.f32 %v5971_v45, %v5971_v45  ;;  %v225_v52 = vpop.f32.mrb[11].mxu0  ;;  %v342_v53 = vpop.f32.mrb[11].mxu1 }
 0x110   :  { %v625_v54 = vadd.f32 %v624_v41, %v5973_v46  ;;  %v640_v55 = vmul.f32 %v5973_v46, %v5973_v46 }
 0x111   :  { %v612_v56 = vadd.f32 %v611_v47, %v606_v51 }
 0x112   :  { %v646_v57 = vadd.f32 %v645_v48, %v640_v55 }
 0x114   :  { %v5981_v58 = vpop.f32.mrb[12].mxu0  ;;  %v5983_v59 = vpop.f32.mrb[12].mxu1 }
 0x115   :  { %v593_v60 = vsel %vm592_vm3, %v5981_v58, 0.0  ;;  %v607_v61 = vmul.f32 %v5981_v58, %v5981_v58  ;;  %v626_v62 = vsel %vm592_vm3, %v5983_v59, 0.0  ;;  %v641_v63 = vmul.f32 %v5983_v59, %v5983_v59  ;;  %v230_v0 = vpop.f32.mrb[13].mxu0  ;;  %v347_v3 = vpop.f32.mrb[13].mxu1 }
 0x116   :  { %v594_v4 = vadd.f32 %v593_v60, %v591_v50  ;;  %v627_v5 = vadd.f32 %v626_v62, %v625_v54  ;;  %v231_v6 = vpop.f32.mrb[14].mxu0  ;;  %v348_v9 = vpop.f32.mrb[14].mxu1 }
 0x117   :  { %v613_v10 = vsel %vm592_vm3, %v607_v61, 0.0  ;;  %v647_v11 = vsel %vm592_vm3, %v641_v63, 0.0  ;;  %v232_v12 = vpop.f32.mrb[15].mxu0  ;;  %v349_v13 = vpop.f32.mrb[15].mxu1 }
 0x118   :  { %v595_v14 = vrot.slane %v594_v4, 4  ;;  %v614_v15 = vadd.f32 %v613_v10, %v612_v56  ;;  %v628_v16 = vrot.slane %v627_v5, 4  ;;  %v648_v19 = vadd.f32 %v647_v11, %v646_v57 }
 0x11a   :  { %v596_v20 = vadd.f32 %v595_v14, %v594_v4  ;;  %v615_v21 = vrot.slane %v614_v15, 4  ;;  %v629_v22 = vadd.f32 %v628_v16, %v627_v5  ;;  %v649_v23 = vrot.slane %v648_v19, 4 }
 0x11c   :  { %v597_v24 = vrot.slane %v596_v20, 2  ;;  %v616_v27 = vadd.f32 %v615_v21, %v614_v15  ;;  %v630_v28 = vrot.slane %v629_v22, 2  ;;  %v650_v29 = vadd.f32 %v649_v23, %v648_v19 }
 0x11e   :  { %v598_v30 = vadd.f32 %v597_v24, %v596_v20  ;;  %v617_v31 = vrot.slane %v616_v27, 2  ;;  %v631_v32 = vadd.f32 %v630_v28, %v629_v22  ;;  %v651_v33 = vrot.slane %v650_v29, 2 }
 0x120   :  { %v599_v34 = vrot.slane %v598_v30, 1  ;;  %v618_v35 = vadd.f32 %v617_v31, %v616_v27  ;;  %v632_v36 = vrot.slane %v631_v32, 1  ;;  %v652_v39 = vadd.f32 %v651_v33, %v650_v29 }
 0x122   :  { %v600_v40 = vadd.f32 %v599_v34, %v598_v30  ;;  %v619_v41 = vrot.slane %v618_v35, 1  ;;  %v633_v42 = vadd.f32 %v632_v36, %v631_v32  ;;  %v653_v43 = vrot.slane %v652_v39, 1 }
 0x124   :  { %v620_v44 = vadd.f32 %v619_v41, %v618_v35  ;;  %v5995_v47 = vadd.f32 %v633_v42, %v600_v40  ;;  %v654_v48 = vadd.f32 %v653_v43, %v652_v39  ;;  %v5997_v50 = vpop.f32.mrb[16].mxu0  ;;  %v5999_v51 = vpop.f32.mrb[16].mxu1 }
 0x125   :  { %v705_v52 = vmul.f32 %v5999_v51, %v5999_v51  ;;  %v440_v53 = vpop.f32.mrb[17].mxu0  ;;  %v557_v54 = vpop.f32.mrb[17].mxu1  ;;  %v670_v56 = vmul.f32 %v5997_v50, %v5997_v50 }
 0x126   :  { %v6003_v55 = vadd.f32 %v654_v48, %v620_v44  ;;  %v6007_v57 = vpop.f32.mrb[18].mxu0  ;;  %v6009_v60 = vpop.f32.mrb[18].mxu1 }
 0x127   :  { %v656_v61 = vadd.f32 %v6007_v57, %v5997_v50  ;;  %v671_v62 = vmul.f32 %v6007_v57, %v6007_v57  ;;  %v691_v63 = vadd.f32 %v6009_v60, %v5999_v51  ;;  %v706_v0 = vmul.f32 %v6009_v60, %v6009_v60  ;;  %v443_v3 = vpop.f32.mrb[19].mxu0  ;;  %v560_v4 = vpop.f32.mrb[19].mxu1 }
 0x129   :  { %v677_v5 = vadd.f32 %v671_v62, %v670_v56  ;;  %v712_v6 = vadd.f32 %v706_v0, %v705_v52 }
 0x12c   :  { %v6019_v9 = vpop.f32.mrb[20].mxu0  ;;  %v6021_v10 = vpop.f32.mrb[20].mxu1 }
 0x12d   :  { %v657_v11 = vadd.f32 %v656_v61, %v6019_v9  ;;  %v672_v12 = vmul.f32 %v6019_v9, %v6019_v9  ;;  %v692_v13 = vadd.f32 %v691_v63, %v6021_v10  ;;  %v707_v14 = vmul.f32 %v6021_v10, %v6021_v10  ;;  %v448_v15 = vpop.f32.mrb[21].mxu0  ;;  %v565_v16 = vpop.f32.mrb[21].mxu1 }
 0x12e   :  { %v6029_v19 = vpop.f32.mrb[22].mxu0  ;;  %v6031_v20 = vpop.f32.mrb[22].mxu1 }
 0x12f   :  { %v678_v21 = vadd.f32 %v677_v5, %v672_v12  ;;  %v713_v22 = vadd.f32 %v712_v6, %v707_v14  ;;  %v658_v23 = vadd.f32 %v657_v11, %v6029_v19  ;;  %v673_v24 = vmul.f32 %v6029_v19, %v6029_v19  ;;  %v451_v27 = vpop.f32.mrb[23].mxu0  ;;  %v568_v28 = vpop.f32.mrb[23].mxu1 }
 0x130   :  { %v693_v29 = vadd.f32 %v692_v13, %v6031_v20  ;;  %v708_v30 = vmul.f32 %v6031_v20, %v6031_v20 }
 0x131   :  { %v679_v31 = vadd.f32 %v678_v21, %v673_v24 }
 0x132   :  { %v714_v32 = vadd.f32 %v713_v22, %v708_v30 }
 0x134   :  { %v6039_v33 = vpop.f32.mrb[24].mxu0  ;;  %v6041_v34 = vpop.f32.mrb[24].mxu1 }
 0x135   :  { %v659_v35 = vadd.f32 %v658_v23, %v6039_v33  ;;  %v674_v36 = vmul.f32 %v6039_v33, %v6039_v33  ;;  %v694_v39 = vadd.f32 %v693_v29, %v6041_v34  ;;  %v709_v40 = vmul.f32 %v6041_v34, %v6041_v34  ;;  %v456_v41 = vpop.f32.mrb[25].mxu0  ;;  %v573_v42 = vpop.f32.mrb[25].mxu1 }
 0x136   :  { %v6049_v43 = vpop.f32.mrb[26].mxu0  ;;  %v6051_v44 = vpop.f32.mrb[26].mxu1 }
 0x137   :  { %v680_v48 = vadd.f32 %v679_v31, %v674_v36  ;;  %v715_v52 = vadd.f32 %v714_v32, %v709_v40  ;;  %v660_v53 = vadd.f32 %v659_v35, %v6049_v43  ;;  %v675_v54 = vmul.f32 %v6049_v43, %v6049_v43  ;;  %v459_v56 = vpop.f32.mrb[27].mxu0  ;;  %v576_v61 = vpop.f32.mrb[27].mxu1 }
 0x138   :  { %v695_v62 = vadd.f32 %v694_v39, %v6051_v44  ;;  %v710_v63 = vmul.f32 %v6051_v44, %v6051_v44 }
 0x139   :  { %v681_v0 = vadd.f32 %v680_v48, %v675_v54 }
 0x13a   :  { %v716_v3 = vadd.f32 %v715_v52, %v710_v63 }
 0x13c   :  { %v6059_v4 = vpop.f32.mrb[28].mxu0  ;;  %v6061_v5 = vpop.f32.mrb[28].mxu1 }
 0x13d   :  { %v661_v6 = vsel %vm592_vm3, %v6059_v4, 0.0  ;;  %v676_v11 = vmul.f32 %v6059_v4, %v6059_v4  ;;  %v696_v12 = vsel %vm592_vm3, %v6061_v5, 0.0  ;;  %v711_v13 = vmul.f32 %v6061_v5, %v6061_v5  ;;  %v464_v14 = vpop.f32.mrb[29].mxu0  ;;  %v581_v15 = vpop.f32.mrb[29].mxu1 }
 0x13e   :  { %v662_v16 = vadd.f32 %v661_v6, %v660_v53  ;;  %v697_v21 = vadd.f32 %v696_v12, %v695_v62  ;;  %v465_v22 = vpop.f32.mrb[30].mxu0  ;;  %v582_v23 = vpop.f32.mrb[30].mxu1 }
 0x13f   :  { %v682_v24 = vsel %vm592_vm3, %v676_v11, 0.0  ;;  %v717_v27 = vsel %vm592_vm3, %v711_v13, 0.0  ;;  %v466_v28 = vpop.f32.mrb[31].mxu0  ;;  %v583_v29 = vpop.f32.mrb[31].mxu1 }
 0x140   :  { %v663_v30 = vrot.slane %v662_v16, 4  ;;  %v683_v31 = vadd.f32 %v682_v24, %v681_v0  ;;  %v698_v32 = vrot.slane %v697_v21, 4  ;;  %v718_v35 = vadd.f32 %v717_v27, %v716_v3 }
 0x142   :  { %v664_v36 = vadd.f32 %v663_v30, %v662_v16  ;;  %v684_v39 = vrot.slane %v683_v31, 4  ;;  %v699_v40 = vadd.f32 %v698_v32, %v697_v21  ;;  %v719_v41 = vrot.slane %v718_v35, 4 }
 0x144   :  { %v665_v42 = vrot.slane %v664_v36, 2  ;;  %v685_v48 = vadd.f32 %v684_v39, %v683_v31  ;;  %v700_v52 = vrot.slane %v699_v40, 2  ;;  %v720_v53 = vadd.f32 %v719_v41, %v718_v35 }
 0x145   :  { %v737_v35 = vlaneseq }
 0x146   :  { %v666_v54 = vadd.f32 %v665_v42, %v664_v36  ;;  %v686_v56 = vrot.slane %v685_v48, 2  ;;  %v701_v61 = vadd.f32 %v700_v52, %v699_v40  ;;  %v721_v62 = vrot.slane %v720_v53, 2 }
 0x147   :  { %v738_v36 = vshrl.u32 %v737_v35, 7 }
 0x148   :  { %v667_v63 = vrot.slane %v666_v54, 1  ;;  %v687_v6 = vadd.f32 %v686_v56, %v685_v48  ;;  %v702_v11 = vrot.slane %v701_v61, 1  ;;  %v722_v12 = vadd.f32 %v721_v62, %v720_v53 }
 0x149   :  { %v739_v39 = vsub.s32 0, %v738_v36 }
 0x14a   :  { %v668_v13 = vadd.f32 %v667_v63, %v666_v54  ;;  %v688_v0 = vrot.slane %v687_v6, 1  ;;  %v723_v14 = vrot.slane %v722_v12, 1  ;;  %v703_v16 = vadd.f32 %v702_v11, %v701_v61 }
 0x14c   :  { %v669_v3 = vadd.f32 %v668_v13, %v5995_v47  ;;  %v689_v15 = vadd.f32 %v688_v0, %v687_v6  ;;  %v724_v23 = vadd.f32 %v723_v14, %v722_v12  ;;  %v585_v47 = vld [vmem:[%s7106_s2] sm:$0x1] }
 0x14e   :  { %v690_v21 = vadd.f32 %v689_v15, %v6003_v55  ;;  %v704_v22 = vadd.f32 %v703_v16, %v669_v3  ;;  %v586_v55 = vld [vmem:[%s7107_s3] sm:$0x1] }
 0x150   :  { %v725_v24 = vadd.f32 %v724_v23, %v690_v21  ;;  %v727_v27 = vmul.f32 0.005, %v704_v22 }
 0x152   :  { %v728_v28 = vmul.f32 0.005, %v725_v24  ;;  %v729_v29 = vmul.f32 %v727_v27, %v727_v27 }
 0x154   :  { %v730_v30 = vsub.f32 %v728_v28, %v729_v29 }
 0x156   :  { %v731_v31 = vmax.f32 %v730_v30, 0.0 }
 0x158   :  { %v732_v32 = vadd.f32 1e-05, %v731_v31 }
 0x15a   :  { %5536 = vrsqrt.f32 %v732_v32 }
 0x164   :  { %v5537_v40 = vpop.eup %5536 }
 0x165   :  { %v734_v41 = vmul.f32 %v5537_v40, %v585_v47 }
 0x167   :  { %v735_v42 = vmul.f32 %v734_v41, %v727_v27  ;;  %v6081_v48 = vrot.slane %v734_v41, %v739_v39 }
 0x169   :  { %v736_v52 = vsub.f32 %v586_v55, %v735_v42  ;;  %v795_v53 = vmul.f32 %v6081_v48, %v6059_v4  ;;  %v816_v54 = vmul.f32 %v6081_v48, %v6061_v5  ;;  %v741_v56 = vmul.f32 %v6081_v48, %v5921_v1 }
 0x16a   :  { %v768_v61 = vmul.f32 %v6081_v48, %v5923_v2  ;;  %v789_v62 = vmul.f32 %v6081_v48, %v5997_v50  ;;  %v810_v63 = vmul.f32 %v6081_v48, %v5999_v51  ;;  %v742_v6 = vmul.f32 %v6081_v48, %v5929_v7 }
 0x16b   :  { %v6097_v11 = vrot.slane %v736_v52, %v739_v39  ;;  %v769_v4 = vmul.f32 %v6081_v48, %v5931_v8  ;;  %v790_v1 = vmul.f32 %v6081_v48, %v6007_v57  ;;  %v811_v2 = vmul.f32 %v6081_v48, %v6009_v60  ;;  %v5336_v52 = vld [vmem:[%s7108_s4 + $0xc0] sm:$0xff]  }
 0x16c   :  { %v743_v50 = vmul.f32 %v6081_v48, %v5941_v17  ;;  %v770_v51 = vmul.f32 %v6081_v48, %v5943_v18  ;;  %v791_v7 = vmul.f32 %v6081_v48, %v6019_v9  ;;  %v812_v5 = vmul.f32 %v6081_v48, %v6021_v10 }
 0x16d   :  { %v802_v8 = vadd.f32 %v795_v53, %v6097_v11  ;;  %v823_v12 = vadd.f32 %v816_v54, %v6097_v11  ;;  %v754_v57 = vadd.f32 %v6097_v11, %v741_v56  ;;  %v775_v60 = vadd.f32 %v768_v61, %v6097_v11 }
 0x16e   :  { %v796_v13 = vadd.f32 %v789_v62, %v6097_v11  ;;  %v817_v17 = vadd.f32 %v810_v63, %v6097_v11  ;;  %v755_v18 = vadd.f32 %v6097_v11, %v742_v6  ;;  %v776_v0 = vadd.f32 %v769_v4, %v6097_v11 }
 0x16f   :  { %v809_v9 = vmax.f32 %v802_v8, 0.0  ;;  %v830_v14 = vmax.f32 %v823_v12, 0.0  ;;  %v761_v3 = vmax.f32 %v754_v57, 0.0  ;;  %v782_v10 = vmax.f32 %v775_v60, 0.0 }
 0x170   :  { %v803_v15 = vmax.f32 %v796_v13, 0.0  ;;  %v824_v16 = vmax.f32 %v817_v17, 0.0  ;;  %v762_v21 = vmax.f32 %v755_v18, 0.0  ;;  %v783_v22 = vmax.f32 %v776_v0, 0.0  ;;  %v5339_v13 = vld [vmem:[%s7108_s4 + $0x88] sm:$0xff]  }
 0x171   :  { %v6121_v23 = vmax.f32 %v809_v9, %v830_v14  ;;  %v831_v24 = vmax.f32 %v761_v3, %v782_v10  ;;  %v797_v27 = vadd.f32 %v790_v1, %v6097_v11  ;;  %v818_v28 = vadd.f32 %v811_v2, %v6097_v11 }
 0x172   :  { %v838_v29 = vmax.f32 %v803_v15, %v824_v16  ;;  %v832_v30 = vmax.f32 %v762_v21, %v783_v22  ;;  %v756_v31 = vadd.f32 %v6097_v11, %v743_v50  ;;  %v777_v32 = vadd.f32 %v770_v51, %v6097_v11  ;;  %v5341_v16 = vld [vmem:[%s7108_s4 + $0x90] sm:$0xff]  }
 0x173   :  { %v804_v35 = vmax.f32 %v797_v27, 0.0  ;;  %v825_v36 = vmax.f32 %v818_v28, 0.0  ;;  %v798_v47 = vadd.f32 %v791_v7, %v6097_v11  ;;  %v819_v39 = vadd.f32 %v812_v5, %v6097_v11 }
 0x174   :  { %v845_v40 = vmax.f32 %v831_v24, %v838_v29  ;;  %v763_v41 = vmax.f32 %v756_v31, 0.0  ;;  %v784_v55 = vmax.f32 %v777_v32, 0.0  ;;  %v744_v42 = vmul.f32 %v6081_v48, %v5951_v25  ;;  %v5337_v25 = vld [vmem:[%s7108_s4 + $0x80] sm:$0xff]  }
 0x175   :  { %v839_v53 = vmax.f32 %v804_v35, %v825_v36  ;;  %v805_v54 = vmax.f32 %v798_v47, 0.0  ;;  %v826_v56 = vmax.f32 %v819_v39, 0.0  ;;  %v771_v61 = vmul.f32 %v6081_v48, %v5953_v26 }
 0x176   :  { %v6136_v62 = vpack.c.bf16 %v845_v40, %v845_v40  ;;  %v833_v63 = vmax.f32 %v763_v41, %v784_v55  ;;  %v757_v6 = vadd.f32 %v6097_v11, %v744_v42  ;;  %v792_v4 = vmul.f32 %v6081_v48, %v6029_v19  ;;  %v5338_v19 = vld [vmem:[%s7108_s4 + $0xc8] sm:$0xff]   ;;  %v5344_v42 = vld [vmem:[%s7108_s4 + $0xe0] sm:$0xff]  }
 0x177   :  { %v6144_v1 = vmax.f32 %v832_v30, %v839_v53  ;;  %v840_v2 = vmax.f32 %v805_v54, %v826_v56  ;;  %v778_v50 = vadd.f32 %v771_v61, %v6097_v11  ;;  %v813_v26 = vmul.f32 %v6081_v48, %v6031_v20 }
 0x178   :  { %4759 = vmatmul.mubr.bf16.vlgmr.msra.gmra.mrb[32].mxu1 %v6136_v62  ;;  %v887_v51 = vrot.slane %v6136_v62, 1  ;;  %v764_v7 = vmax.f32 %v757_v6, 0.0  ;;  %v799_v12 = vadd.f32 %v792_v4, %v6097_v11  ;;  %v745_v57 = vmul.f32 %v6081_v48, %v5961_v37  ;;  %v5340_v37 = vld [vmem:[%s7108_s4 + $0xd0] sm:$0xff]  }
 0x179   :  { %4783 = vmatpush3.bf16.msra.mxu1 %v5336_v52  ;;  %4798 = vmatprep.mubr.msk.bf16.mxu1 %vm5564_vm2, %v5563_v49  ;;  %v6156_v5 = vmax.f32 %v833_v63, %v840_v2  ;;  %v785_v8 = vmax.f32 %v778_v50, 0.0  ;;  %v820_v20 = vadd.f32 %v813_v26, %v6097_v11  ;;  %v772_v60 = vmul.f32 %v6081_v48, %v5963_v38  ;;  %v5347_v2 = vld [vmem:[%s7108_s4 + $0xa8] sm:$0xff]  }
 0x17a   :  { %4739 = vmatmul.mubr.bf16.vlgmr.msra.gmra.mrb[32].mxu0 %v887_v51  ;;  %4784 = vmatprep.subr.bf16.mxu1 %v5563_v49  ;;  %v806_v17 = vmax.f32 %v799_v12, 0.0  ;;  %v758_v9 = vadd.f32 %v6097_v11, %v745_v57  ;;  %v793_v10 = vmul.f32 %v6081_v48, %v6039_v33  ;;  %v814_v15 = vmul.f32 %v6081_v48, %v6041_v34  ;;  %v5349_v51 = vld [vmem:[%s7108_s4 + $0xb0] sm:$0xff]   ;;  %v5353_v12 = vld [vmem:[%s7108_s4 + $0x100] sm:$0xff]   ;;  %v5354_v57 = vld [vmem:[%s7108_s4 + $0x148] sm:$0xff]  }
 0x17b   :  { %4763 = vmatpush3.bf16.msra.mxu0 %v5337_v25  ;;  %4778 = vmatprep.mubr.msk.bf16.mxu0 %vm5564_vm2, %v5563_v49  ;;  %v827_v18 = vmax.f32 %v820_v20, 0.0  ;;  %v834_v0 = vmax.f32 %v764_v7, %v785_v8  ;;  %v779_v38 = vadd.f32 %v772_v60, %v6097_v11  ;;  %v746_v22 = vmul.f32 %v6081_v48, %v5971_v45  ;;  %v5342_v45 = vld [vmem:[%s7108_s4 + $0xd8] sm:$0xff]   ;;  %v5355_v60 = vld [vmem:[%s7108_s4 + $0x108] sm:$0xff]  }
 0x17c   :  { %4764 = vmatprep.subr.bf16.mxu0 %v5563_v49  ;;  %v765_v3 = vmax.f32 %v758_v9, 0.0  ;;  %v773_v24 = vmul.f32 %v6081_v48, %v5973_v46  ;;  %v794_v27 = vmul.f32 %v6081_v48, %v6049_v43  ;;  %v800_v34 = vadd.f32 %v793_v10, %v6097_v11  ;;  %v5350_v7 = vld [vmem:[%s7108_s4 + $0xf8] sm:$0xff]   ;;  %v5361_v9 = vld [vmem:[%s7108_s4 + $0x120] sm:$0xff]  }
 0x17d   :  { %4785 = vmatpush3.bf16.msra.mxu1 %v5338_v19  ;;  %v841_v14 = vmax.f32 %v806_v17, %v827_v18  ;;  %v786_v21 = vmax.f32 %v779_v38, 0.0  ;;  %v821_v28 = vadd.f32 %v814_v15, %v6097_v11  ;;  %v815_v29 = vmul.f32 %v6081_v48, %v6051_v44  ;;  %v5343_v44 = vld [vmem:[%s7108_s4 + $0x98] sm:$0xff]   ;;  %v5352_v19 = vld [vmem:[%s7108_s4 + $0x140] sm:$0xff]   ;;  %v5363_v38 = vld [vmem:[%s7108_s4 + $0x128] sm:$0xff]  }
 0x17e   :  { %4786 = vmatprep.subr.bf16.mxu1 %v5563_v49  ;;  %v759_v30 = vadd.f32 %v6097_v11, %v746_v22  ;;  %v780_v43 = vadd.f32 %v773_v24, %v6097_v11  ;;  %v801_v31 = vadd.f32 %v794_v27, %v6097_v11  ;;  %v807_v32 = vmax.f32 %v800_v34, 0.0  ;;  %v5358_v17 = vld [vmem:[%s7108_s4 + $0x158] sm:$0xff]   ;;  %v5370_v24 = vld [vmem:[%s7108_s4 + $0x1c8] sm:$0xff]   ;;  %v5372_v34 = vld [vmem:[%s7108_s4 + $0x1d0] sm:$0xff]  }
 0x17f   :  { %4765 = vmatpush3.bf16.msra.mxu0 %v5339_v13  ;;  %v6191_v33 = vmax.f32 %v834_v0, %v841_v14  ;;  %v835_v46 = vmax.f32 %v765_v3, %v786_v21  ;;  %v828_v35 = vmax.f32 %v821_v28, 0.0  ;;  %v822_v36 = vadd.f32 %v815_v29, %v6097_v11  ;;  %v5357_v13 = vld [vmem:[%s7108_s4 + $0x110] sm:$0xff]   ;;  %v5359_v18 = vld [vmem:[%s7108_s4 + $0x118] sm:$0xff]   ;;  %v5360_v0 = vld [vmem:[%s7108_s4 + $0x160] sm:$0xff]  }
 0x180   :  { %4766 = vmatprep.subr.bf16.mxu0 %v5563_v49  ;;  %v766_v47 = vmax.f32 %v759_v30, 0.0  ;;  %v787_v39 = vmax.f32 %v780_v43, 0.0  ;;  %v808_v40 = vmax.f32 %v801_v31, 0.0  ;;  %v747_v41 = vmul.f32 %v6081_v48, %v5981_v58  ;;  %v5345_v58 = vld [vmem:[%s7108_s4 + $0xa0] sm:$0xff]   ;;  %v5364_v14 = vld [vmem:[%s7108_s4 + $0x170] sm:$0xff]   ;;  %v5366_v10 = vld [vmem:[%s7108_s4 + $0x178] sm:$0xff]  }
 0x181   :  { %4787 = vmatpush3.bf16.msra.mxu1 %v5340_v37  ;;  %v842_v55 = vmax.f32 %v807_v32, %v828_v35  ;;  %v829_v52 = vmax.f32 %v822_v36, 0.0  ;;  %v774_v56 = vmul.f32 %v6081_v48, %v5983_v59  ;;  %v5346_v59 = vld [vmem:[%s7108_s4 + $0xe8] sm:$0xff]   ;;  %v1190_v8 = vrot.slane %v6136_v62, 3  ;;  %v5365_v3 = vld [vmem:[%s7108_s4 + $0x130] sm:$0xff]   ;;  %v5368_v21 = vld [vmem:[%s7108_s4 + $0x1c0] sm:$0xff]  }
 0x182   :  { %4788 = vmatprep.subr.bf16.mxu1 %v5563_v49  ;;  %v836_v53 = vmax.f32 %v766_v47, %v787_v39  ;;  %v760_v54 = vadd.f32 %v6097_v11, %v747_v41  ;;  %v1082_v20 = vrot.slane %v6136_v62, 2  ;;  %v5356_v62 = vld [vmem:[%s7108_s4 + $0x150] sm:$0xff]   ;;  %v5362_v37 = vld [vmem:[%s7108_s4 + $0x168] sm:$0xff]   ;;  %v6322_v15 = vpack.c.bf16 %v6144_v1, %v6144_v1  ;;  %v5369_v1 = vld [vmem:[%s7108_s4 + $0x180] sm:$0xff]  }
 0x183   :  { %4767 = vmatpush3.bf16.msra.mxu0 %v5341_v16  ;;  %v6218_v61 = vmax.f32 %v835_v46, %v842_v55  ;;  %v843_v63 = vmax.f32 %v808_v40, %v829_v52  ;;  %v781_v4 = vadd.f32 %v774_v56, %v6097_v11  ;;  %v5348_v11 = vld [vmem:[%s7108_s4 + $0xf0] sm:$0xff]   ;;  %v5367_v16 = vld [vmem:[%s7108_s4 + $0x138] sm:$0xff]   ;;  %v5371_v27 = vld [vmem:[%s7108_s4 + $0x188] sm:$0xff]  }
 0x184   :  { %4768 = vmatprep.subr.bf16.mxu0 %v5563_v49  ;;  %v767_v6 = vmax.f32 %v760_v54, 0.0  ;;  %v1406_v22 = vrot.slane %v6322_v15, 1  ;;  %v5373_v28 = vld [vmem:[%s7108_s4 + $0x190] sm:$0xff]   ;;  %v5374_v29 = vld [vmem:[%s7108_s4 + $0x1d8] sm:$0xff]   ;;  %v5376_v46 = vld [vmem:[%s7108_s4 + $0x1e0] sm:$0xff]   ;;  %v1622_v39 = vrot.slane %v6322_v15, 3 }
 0x185   :  { %4789 = vmatpush3.bf16.msra.mxu1 %v5342_v45  ;;  %v6228_v48 = vmax.f32 %v836_v53, %v843_v63  ;;  %v788_v25 = vmax.f32 %v781_v4, 0.0  ;;  %v5375_v45 = vld [vmem:[%s7108_s4 + $0x198] sm:$0xff]   ;;  %v5377_v30 = vld [vmem:[%s7108_s4 + $0x1a0] sm:$0xff]   ;;  %v5378_v43 = vld [vmem:[%s7108_s4 + $0x1e8] sm:$0xff]   ;;  %v1514_v41 = vrot.slane %v6322_v15, 2 }
 0x186   :  { %4790 = vmatprep.subr.bf16.mxu1 %v5563_v49  ;;  %v5379_v31 = vld [vmem:[%s7108_s4 + $0x1a8] sm:$0xff]   ;;  %v5380_v32 = vld [vmem:[%s7108_s4 + $0x1f0] sm:$0xff]   ;;  %v5382_v36 = vld [vmem:[%s7108_s4 + $0x1f8] sm:$0xff]  }
 0x187   :  { %4769 = vmatpush3.bf16.msra.mxu0 %v5343_v44  ;;  %v837_v50 = vmax.f32 %v767_v6, %v788_v25  ;;  %v5381_v35 = vld [vmem:[%s7108_s4 + $0x1b0] sm:$0xff]   ;;  %v5383_v44 = vld [vmem:[%s7108_s4 + $0x1b8] sm:$0xff]   ;;  %v5384_v47 = vld [vmem:[%s7108_s4 + $0x240] sm:$0xff]  }
 0x188   :  { %4770 = vmatprep.subr.bf16.mxu0 %v5563_v49  ;;  %v5385_v40 = vld [vmem:[%s7108_s4 + $0x200] sm:$0xff]   ;;  %v5386_v55 = vld [vmem:[%s7108_s4 + $0x248] sm:$0xff]   ;;  %v5388_v52 = vld [vmem:[%s7108_s4 + $0x250] sm:$0xff]  }
 0x189   :  { %4791 = vmatpush3.bf16.msra.mxu1 %v5344_v42  ;;  %v6239_v26 = vmax.f32 %v837_v50, %v6121_v23  ;;  %v5351_v23 = vld [vmem:[%s7108_s4 + $0xb8] sm:$0xff]   ;;  %v5387_v42 = vld [vmem:[%s7108_s4 + $0x208] sm:$0xff]   ;;  %v5389_v53 = vld [vmem:[%s7108_s4 + $0x210] sm:$0xff]   ;;  %v6466_v50 = vpack.c.bf16 %v6156_v5, %v6156_v5 }
 0x18a   :  { %4792 = vmatprep.subr.bf16.mxu1 %v5563_v49  ;;  %v5390_v54 = vld [vmem:[%s7108_s4 + $0x258] sm:$0xff]   ;;  %v5393_v63 = vld [vmem:[%s7108_s4 + $0x220] sm:$0xff]   ;;  %v5394_v6 = vld [vmem:[%s7108_s4 + $0x268] sm:$0xff]  }
 0x18b   :  { %4771 = vmatpush3.bf16.msra.mxu0 %v5345_v58  ;;  %v5391_v56 = vld [vmem:[%s7108_s4 + $0x218] sm:$0xff]   ;;  %v5392_v58 = vld [vmem:[%s7108_s4 + $0x260] sm:$0xff]   ;;  %v5395_v4 = vld [vmem:[%s7108_s4 + $0x228] sm:$0xff]  }
 0x18c   :  { %4772 = vmatprep.subr.bf16.mxu0 %v5563_v49  ;;  %v5397_v25 = vld [vmem:[%s7108_s4 + $0x230] sm:$0xff]   ;;  %v5401_v5 = vld [vmem:[%s7108_s4 + $0x280] sm:$0xff]  }
 0x18d   :  { %4793 = vmatpush3.bf16.msra.mxu1 %v5346_v59  ;;  %v5396_v59 = vld [vmem:[%s7108_s4 + $0x270] sm:$0xff]  }
 0x18e   :  { %4794 = vmatprep.subr.bf16.mxu1 %v5563_v49 }
 0x18f   :  { %4773 = vmatpush3.bf16.msra.mxu0 %v5347_v2  ;;  %v5398_v2 = vld [vmem:[%s7108_s4 + $0x278] sm:$0xff]  }
 0x190   :  { %4774 = vmatprep.subr.bf16.mxu0 %v5563_v49 }
 0x191   :  { %4795 = vmatpush3.bf16.msra.mxu1 %v5348_v11  ;;  %v5399_v11 = vld [vmem:[%s7108_s4 + $0x238] sm:$0xff]  }
 0x192   :  { %4796 = vmatprep.subr.bf16.mxu1 %v5563_v49 }
 0x193   :  { %4775 = vmatpush3.bf16.msra.mxu0 %v5349_v51  ;;  %v5400_v51 = vld [vmem:[%s7108_s4 + $0x2c0] sm:$0xff]  }
 0x194   :  { %4776 = vmatprep.subr.bf16.mxu0 %v5563_v49 }
 0x195   :  { %4797 = vmatpush3.bf16.msra.mxu1 %v5350_v7  ;;  %v1838_v7 = vrot.slane %v6466_v50, 1 }
 0x196   :  { %4822 = vmatprep.subr.bf16.mxu1 %v5563_v49 }
 0x197   :  { %4777 = vmatpush3.bf16.msra.mxu0 %v5351_v23  ;;  %v5402_v23 = vld [vmem:[%s7108_s4 + $0x2c8] sm:$0xff]  }
 0x198   :  { %4799 = vmatmul.mubr.bf16.vlgmr.msra.gmra.mrb[36].mxu1 %v1190_v8  ;;  %4802 = vmatprep.subr.bf16.mxu0 %v5563_v49  ;;  %v5404_v8 = vld [vmem:[%s7108_s4 + $0x2d0] sm:$0xff]  }
 0x199   :  { %4823 = vmatpush3.bf16.msra.mxu1 %v5352_v19  ;;  %4838 = vmatprep.mubr.msk.bf16.mxu1 %vm5564_vm2, %v5563_v49  ;;  %v5403_v19 = vld [vmem:[%s7108_s4 + $0x288] sm:$0xff]  }
 0x19a   :  { %4779 = vmatmul.mubr.bf16.vlgmr.msra.gmra.mrb[36].mxu0 %v1082_v20  ;;  %4824 = vmatprep.subr.bf16.mxu1 %v5563_v49  ;;  %v5406_v20 = vld [vmem:[%s7108_s4 + $0x2d8] sm:$0xff]  }
 0x19b   :  { %4803 = vmatpush3.bf16.msra.mxu0 %v5353_v12  ;;  %4818 = vmatprep.mubr.msk.bf16.mxu0 %vm5564_vm2, %v5563_v49  ;;  %v5405_v12 = vld [vmem:[%s7108_s4 + $0x290] sm:$0xff]  }
 0x19c   :  { %4804 = vmatprep.subr.bf16.mxu0 %v5563_v49 }
 0x19d   :  { %4825 = vmatpush3.bf16.msra.mxu1 %v5354_v57  ;;  %v5407_v57 = vld [vmem:[%s7108_s4 + $0x298] sm:$0xff]  }
 0x19e   :  { %4826 = vmatprep.subr.bf16.mxu1 %v5563_v49 }
 0x19f   :  { %4805 = vmatpush3.bf16.msra.mxu0 %v5355_v60  ;;  %v5408_v60 = vld [vmem:[%s7108_s4 + $0x2e0] sm:$0xff]  }
 0x1a0   :  { %4806 = vmatprep.subr.bf16.mxu0 %v5563_v49 }
 0x1a1   :  { %4827 = vmatpush3.bf16.msra.mxu1 %v5356_v62  ;;  %v5409_v62 = vld [vmem:[%s7108_s4 + $0x2a0] sm:$0xff]  }
 0x1a2   :  { %4828 = vmatprep.subr.bf16.mxu1 %v5563_v49 }
 0x1a3   :  { %4807 = vmatpush3.bf16.msra.mxu0 %v5357_v13  ;;  %v5410_v13 = vld [vmem:[%s7108_s4 + $0x2e8] sm:$0xff]  }
 0x1a4   :  { %4808 = vmatprep.subr.bf16.mxu0 %v5563_v49 }
 0x1a5   :  { %4829 = vmatpush3.bf16.msra.mxu1 %v5358_v17  ;;  %v5411_v17 = vld [vmem:[%s7108_s4 + $0x2a8] sm:$0xff]  }
 0x1a6   :  { %4830 = vmatprep.subr.bf16.mxu1 %v5563_v49 }
 0x1a7   :  { %4809 = vmatpush3.bf16.msra.mxu0 %v5359_v18  ;;  %v5412_v18 = vld [vmem:[%s7108_s4 + $0x2f0] sm:$0xff]  }
 0x1a8   :  { %4810 = vmatprep.subr.bf16.mxu0 %v5563_v49 }
 0x1a9   :  { %4831 = vmatpush3.bf16.msra.mxu1 %v5360_v0  ;;  %v5413_v0 = vld [vmem:[%s7108_s4 + $0x2b0] sm:$0xff]  }
 0x1aa   :  { %4832 = vmatprep.subr.bf16.mxu1 %v5563_v49 }
 0x1ab   :  { %4811 = vmatpush3.bf16.msra.mxu0 %v5361_v9  ;;  %v5414_v9 = vld [vmem:[%s7108_s4 + $0x2f8] sm:$0xff]  }
 0x1ac   :  { %4812 = vmatprep.subr.bf16.mxu0 %v5563_v49 }
 0x1ad   :  { %4833 = vmatpush3.bf16.msra.mxu1 %v5362_v37  ;;  %v5415_v37 = vld [vmem:[%s7108_s4 + $0x2b8] sm:$0xff]  }
 0x1ae   :  { %4834 = vmatprep.subr.bf16.mxu1 %v5563_v49 }
 0x1af   :  { %4813 = vmatpush3.bf16.msra.mxu0 %v5363_v38  ;;  %v5416_v38 = vld [vmem:[%s7108_s4 + $0x340] sm:$0xff]  }
 0x1b0   :  { %4814 = vmatprep.subr.bf16.mxu0 %v5563_v49 }
 0x1b1   :  { %4835 = vmatpush3.bf16.msra.mxu1 %v5364_v14  ;;  %v2054_v14 = vrot.slane %v6466_v50, 3 }
 0x1b2   :  { %4836 = vmatprep.subr.bf16.mxu1 %v5563_v49 }
 0x1b3   :  { %4815 = vmatpush3.bf16.msra.mxu0 %v5365_v3  ;;  %v5417_v3 = vld [vmem:[%s7108_s4 + $0x300] sm:$0xff]  }
 0x1b4   :  { %4816 = vmatprep.subr.bf16.mxu0 %v5563_v49 }
 0x1b5   :  { %4837 = vmatpush3.bf16.msra.mxu1 %v5366_v10  ;;  %v1946_v10 = vrot.slane %v6466_v50, 2 }
 0x1b6   :  { %4862 = vmatprep.subr.bf16.mxu1 %v5563_v49 }
 0x1b7   :  { %4817 = vmatpush3.bf16.msra.mxu0 %v5367_v16  ;;  %v5419_v16 = vld [vmem:[%s7108_s4 + $0x308] sm:$0xff]  }
 0x1b8   :  { %4839 = vmatmul.mubr.bf16.vlgmr.msra.gmra.mrb[40].mxu1 %v1406_v22  ;;  %4842 = vmatprep.subr.bf16.mxu0 %v5563_v49  ;;  %v5421_v22 = vld [vmem:[%s7108_s4 + $0x310] sm:$0xff]  }
 0x1b9   :  { %4863 = vmatpush3.bf16.msra.mxu1 %v5368_v21  ;;  %4878 = vmatprep.mubr.msk.bf16.mxu1 %vm5564_vm2, %v5563_v49  ;;  %v5420_v21 = vld [vmem:[%s7108_s4 + $0x350] sm:$0xff]  }
 0x1ba   :  { %4819 = vmatmul.mubr.bf16.vlgmr.msra.gmra.mrb[40].mxu0 %v6322_v15  ;;  %4864 = vmatprep.subr.bf16.mxu1 %v5563_v49  ;;  %v5418_v15 = vld [vmem:[%s7108_s4 + $0x348] sm:$0xff]  }
 0x1bb   :  { %4843 = vmatpush3.bf16.msra.mxu0 %v5369_v1  ;;  %4858 = vmatprep.mubr.msk.bf16.mxu0 %vm5564_vm2, %v5563_v49  ;;  %v5422_v1 = vld [vmem:[%s7108_s4 + $0x358] sm:$0xff]  }
 0x1bc   :  { %4844 = vmatprep.subr.bf16.mxu0 %v5563_v49 }
 0x1bd   :  { %4865 = vmatpush3.bf16.msra.mxu1 %v5370_v24  ;;  %v5423_v24 = vld [vmem:[%s7108_s4 + $0x318] sm:$0xff]  }
 0x1be   :  { %4866 = vmatprep.subr.bf16.mxu1 %v5563_v49 }
 0x1bf   :  { %4845 = vmatpush3.bf16.msra.mxu0 %v5371_v27  ;;  %v5424_v27 = vld [vmem:[%s7108_s4 + $0x360] sm:$0xff]  }
 0x1c0   :  { %4846 = vmatprep.subr.bf16.mxu0 %v5563_v49 }
 0x1c1   :  { %4867 = vmatpush3.bf16.msra.mxu1 %v5372_v34  ;;  %v5425_v34 = vld [vmem:[%s7108_s4 + $0x320] sm:$0xff]  }
 0x1c2   :  { %4868 = vmatprep.subr.bf16.mxu1 %v5563_v49 }
 0x1c3   :  { %4847 = vmatpush3.bf16.msra.mxu0 %v5373_v28  ;;  %v5426_v28 = vld [vmem:[%s7108_s4 + $0x368] sm:$0xff]  }
 0x1c4   :  { %4848 = vmatprep.subr.bf16.mxu0 %v5563_v49 }
 0x1c5   :  { %4869 = vmatpush3.bf16.msra.mxu1 %v5374_v29  ;;  %v5427_v29 = vld [vmem:[%s7108_s4 + $0x328] sm:$0xff]  }
 0x1c6   :  { %4870 = vmatprep.subr.bf16.mxu1 %v5563_v49 }
 0x1c7   :  { %4849 = vmatpush3.bf16.msra.mxu0 %v5375_v45  ;;  %v5428_v45 = vld [vmem:[%s7108_s4 + $0x370] sm:$0xff]  }
 0x1c8   :  { %4850 = vmatprep.subr.bf16.mxu0 %v5563_v49 }
 0x1c9   :  { %4871 = vmatpush3.bf16.msra.mxu1 %v5376_v46  ;;  %v5429_v46 = vld [vmem:[%s7108_s4 + $0x330] sm:$0xff]  }
 0x1ca   :  { %4872 = vmatprep.subr.bf16.mxu1 %v5563_v49 }
 0x1cb   :  { %4851 = vmatpush3.bf16.msra.mxu0 %v5377_v30  ;;  %v5430_v30 = vld [vmem:[%s7108_s4 + $0x378] sm:$0xff]  }
 0x1cc   :  { %4852 = vmatprep.subr.bf16.mxu0 %v5563_v49 }
 0x1cd   :  { %4873 = vmatpush3.bf16.msra.mxu1 %v5378_v43  ;;  %v6610_v43 = vpack.c.bf16 %v6191_v33, %v6191_v33  ;;  %v5433_v33 = vld [vmem:[%s7108_s4 + $0x380] sm:$0xff]  }
 0x1ce   :  { %4874 = vmatprep.subr.bf16.mxu1 %v5563_v49 }
 0x1cf   :  { %4853 = vmatpush3.bf16.msra.mxu0 %v5379_v31  ;;  %v5431_v31 = vld [vmem:[%s7108_s4 + $0x338] sm:$0xff]  }
 0x1d0   :  { %4854 = vmatprep.subr.bf16.mxu0 %v5563_v49 }
 0x1d1   :  { %4875 = vmatpush3.bf16.msra.mxu1 %v5380_v32  ;;  %v5432_v32 = vld [vmem:[%s7108_s4 + $0x3c0] sm:$0xff]  }
 0x1d2   :  { %4876 = vmatprep.subr.bf16.mxu1 %v5563_v49 }
 0x1d3   :  { %4855 = vmatpush3.bf16.msra.mxu0 %v5381_v35  ;;  %v2270_v35 = vrot.slane %v6610_v43, 1 }
 0x1d4   :  { %4856 = vmatprep.subr.bf16.mxu0 %v5563_v49 }
 0x1d5   :  { %4877 = vmatpush3.bf16.msra.mxu1 %v5382_v36  ;;  %v5434_v36 = vld [vmem:[%s7108_s4 + $0x3c8] sm:$0xff]  }
 0x1d6   :  { %4902 = vmatprep.subr.bf16.mxu1 %v5563_v49 }
 0x1d7   :  { %4857 = vmatpush3.bf16.msra.mxu0 %v5383_v44  ;;  %v5435_v44 = vld [vmem:[%s7108_s4 + $0x388] sm:$0xff]  }
 0x1d8   :  { %4879 = vmatmul.mubr.bf16.vlgmr.msra.gmra.mrb[44].mxu1 %v1622_v39  ;;  %4882 = vmatprep.subr.bf16.mxu0 %v5563_v49  ;;  %v5437_v39 = vld [vmem:[%s7108_s4 + $0x390] sm:$0xff]  }
 0x1d9   :  { %4903 = vmatpush3.bf16.msra.mxu1 %v5384_v47  ;;  %4918 = vmatprep.mubr.msk.bf16.mxu1 %vm5564_vm2, %v5563_v49  ;;  %v5436_v47 = vld [vmem:[%s7108_s4 + $0x3d0] sm:$0xff]  }
 0x1da   :  { %4859 = vmatmul.mubr.bf16.vlgmr.msra.gmra.mrb[44].mxu0 %v1514_v41  ;;  %4904 = vmatprep.subr.bf16.mxu1 %v5563_v49  ;;  %v5439_v41 = vld [vmem:[%s7108_s4 + $0x398] sm:$0xff]  }
 0x1db   :  { %4883 = vmatpush3.bf16.msra.mxu0 %v5385_v40  ;;  %4898 = vmatprep.mubr.msk.bf16.mxu0 %vm5564_vm2, %v5563_v49  ;;  %v5438_v40 = vld [vmem:[%s7108_s4 + $0x3d8] sm:$0xff]  }
 0x1dc   :  { %4884 = vmatprep.subr.bf16.mxu0 %v5563_v49 }
 0x1dd   :  { %4905 = vmatpush3.bf16.msra.mxu1 %v5386_v55  ;;  %v5440_v55 = vld [vmem:[%s7108_s4 + $0x3e0] sm:$0xff]  }
 0x1de   :  { %4906 = vmatprep.subr.bf16.mxu1 %v5563_v49 }
 0x1df   :  { %4885 = vmatpush3.bf16.msra.mxu0 %v5387_v42  ;;  %v5441_v42 = vld [vmem:[%s7108_s4 + $0x3a0] sm:$0xff]  }
 0x1e0   :  { %4886 = vmatprep.subr.bf16.mxu0 %v5563_v49 }
 0x1e1   :  { %4907 = vmatpush3.bf16.msra.mxu1 %v5388_v52  ;;  %v5442_v52 = vld [vmem:[%s7108_s4 + $0x3e8] sm:$0xff]  }
 0x1e2   :  { %4908 = vmatprep.subr.bf16.mxu1 %v5563_v49 }
 0x1e3   :  { %4887 = vmatpush3.bf16.msra.mxu0 %v5389_v53 }
 0x1e4   :  { %4888 = vmatprep.subr.bf16.mxu0 %v5563_v49 }
 0x1e5   :  { %4909 = vmatpush3.bf16.msra.mxu1 %v5390_v54  ;;  %v5443_v54 = vld [vmem:[%s7108_s4 + $0x3a8] sm:$0xff]  }
 0x1e6   :  { %4910 = vmatprep.subr.bf16.mxu1 %v5563_v49 }
 0x1e7   :  { %4889 = vmatpush3.bf16.msra.mxu0 %v5391_v56 }
 0x1e8   :  { %4890 = vmatprep.subr.bf16.mxu0 %v5563_v49 }
 0x1e9   :  { %4911 = vmatpush3.bf16.msra.mxu1 %v5392_v58 }
 0x1ea   :  { %4912 = vmatprep.subr.bf16.mxu1 %v5563_v49 }
 0x1eb   :  { %4891 = vmatpush3.bf16.msra.mxu0 %v5393_v63 }
 0x1ec   :  { %4892 = vmatprep.subr.bf16.mxu0 %v5563_v49 }
 0x1ed   :  { %4913 = vmatpush3.bf16.msra.mxu1 %v5394_v6  ;;  %v5444_v6 = vld [vmem:[%s7108_s4 + $0x3f0] sm:$0xff]  }
 0x1ee   :  { %4914 = vmatprep.subr.bf16.mxu1 %v5563_v49 }
 0x1ef   :  { %4893 = vmatpush3.bf16.msra.mxu0 %v5395_v4 }
 0x1f0   :  { %4894 = vmatprep.subr.bf16.mxu0 %v5563_v49 }
 0x1f1   :  { %4915 = vmatpush3.bf16.msra.mxu1 %v5396_v59 }
 0x1f2   :  { %4916 = vmatprep.subr.bf16.mxu1 %v5563_v49 }
 0x1f3   :  { %4895 = vmatpush3.bf16.msra.mxu0 %v5397_v25 }
 0x1f4   :  { %4896 = vmatprep.subr.bf16.mxu0 %v5563_v49 }
 0x1f5   :  { %4917 = vmatpush3.bf16.msra.mxu1 %v5398_v2 }
 0x1f6   :  { %4942 = vmatprep.subr.bf16.mxu1 %v5563_v49 }
 0x1f7   :  { %4897 = vmatpush3.bf16.msra.mxu0 %v5399_v11 }
 0x1f8   :  { %4919 = vmatmul.mubr.bf16.vlgmr.msra.gmra.mrb[48].mxu1 %v1838_v7  ;;  %4922 = vmatprep.subr.bf16.mxu0 %v5563_v49  ;;  %v5447_v7 = vld [vmem:[%s7108_s4 + $0x3b8] sm:$0xff]  }
 0x1f9   :  { %4943 = vmatpush3.bf16.msra.mxu1 %v5400_v51  ;;  %4958 = vmatprep.mubr.msk.bf16.mxu1 %vm5564_vm2, %v5563_v49  ;;  %v5446_v51 = vld [vmem:[%s7108_s4 + $0x3f8] sm:$0xff]  }
 0x1fa   :  { %4899 = vmatmul.mubr.bf16.vlgmr.msra.gmra.mrb[48].mxu0 %v6466_v50  ;;  %4944 = vmatprep.subr.bf16.mxu1 %v5563_v49  ;;  %v5445_v50 = vld [vmem:[%s7108_s4 + $0x3b0] sm:$0xff]  }
 0x1fb   :  { %4923 = vmatpush3.bf16.msra.mxu0 %v5401_v5  ;;  %4938 = vmatprep.mubr.msk.bf16.mxu0 %vm5564_vm2, %v5563_v49  ;;  %v5448_v5 = vld [vmem:[%s7108_s4 + $0x440] sm:$0xff]  }
 0x1fc   :  { %4924 = vmatprep.subr.bf16.mxu0 %v5563_v49 }
 0x1fd   :  { %4945 = vmatpush3.bf16.msra.mxu1 %v5402_v23  ;;  %v2486_v23 = vrot.slane %v6610_v43, 3 }
 0x1fe   :  { %4946 = vmatprep.subr.bf16.mxu1 %v5563_v49 }
 0x1ff   :  { %4925 = vmatpush3.bf16.msra.mxu0 %v5403_v19  ;;  %v5449_v19 = vld [vmem:[%s7108_s4 + $0x400] sm:$0xff]  }
 0x200   :  { %4926 = vmatprep.subr.bf16.mxu0 %v5563_v49 }
 0x201   :  { %4947 = vmatpush3.bf16.msra.mxu1 %v5404_v8  ;;  %v2378_v8 = vrot.slane %v6610_v43, 2 }
 0x202   :  { %4948 = vmatprep.subr.bf16.mxu1 %v5563_v49 }
 0x203   :  { %4927 = vmatpush3.bf16.msra.mxu0 %v5405_v12  ;;  %v5450_v12 = vld [vmem:[%s7108_s4 + $0x448] sm:$0xff]  }
 0x204   :  { %4928 = vmatprep.subr.bf16.mxu0 %v5563_v49 }
 0x205   :  { %4949 = vmatpush3.bf16.msra.mxu1 %v5406_v20  ;;  %v5451_v20 = vld [vmem:[%s7108_s4 + $0x408] sm:$0xff]  }
 0x206   :  { %4950 = vmatprep.subr.bf16.mxu1 %v5563_v49 }
 0x207   :  { %4929 = vmatpush3.bf16.msra.mxu0 %v5407_v57  ;;  %v5452_v57 = vld [vmem:[%s7108_s4 + $0x450] sm:$0xff]  }
 0x208   :  { %4930 = vmatprep.subr.bf16.mxu0 %v5563_v49 }
 0x209   :  { %4951 = vmatpush3.bf16.msra.mxu1 %v5408_v60  ;;  %v5453_v60 = vld [vmem:[%s7108_s4 + $0x410] sm:$0xff]  }
 0x20a   :  { %4952 = vmatprep.subr.bf16.mxu1 %v5563_v49 }
 0x20b   :  { %4931 = vmatpush3.bf16.msra.mxu0 %v5409_v62  ;;  %v5454_v62 = vld [vmem:[%s7108_s4 + $0x458] sm:$0xff]  }
 0x20c   :  { %4932 = vmatprep.subr.bf16.mxu0 %v5563_v49 }
 0x20d   :  { %4953 = vmatpush3.bf16.msra.mxu1 %v5410_v13  ;;  %v5455_v13 = vld [vmem:[%s7108_s4 + $0x418] sm:$0xff]  }
 0x20e   :  { %4954 = vmatprep.subr.bf16.mxu1 %v5563_v49 }
 0x20f   :  { %4933 = vmatpush3.bf16.msra.mxu0 %v5411_v17  ;;  %v5456_v17 = vld [vmem:[%s7108_s4 + $0x460] sm:$0xff]  }
 0x210   :  { %4934 = vmatprep.subr.bf16.mxu0 %v5563_v49 }
 0x211   :  { %4955 = vmatpush3.bf16.msra.mxu1 %v5412_v18  ;;  %v5457_v18 = vld [vmem:[%s7108_s4 + $0x420] sm:$0xff]  }
 0x212   :  { %4956 = vmatprep.subr.bf16.mxu1 %v5563_v49 }
 0x213   :  { %4935 = vmatpush3.bf16.msra.mxu0 %v5413_v0  ;;  %v5458_v0 = vld [vmem:[%s7108_s4 + $0x468] sm:$0xff]  }
 0x214   :  { %4936 = vmatprep.subr.bf16.mxu0 %v5563_v49 }
 0x215   :  { %4957 = vmatpush3.bf16.msra.mxu1 %v5414_v9 }
 0x216   :  { %4982 = vmatprep.subr.bf16.mxu1 %v5563_v49 }
 0x217   :  { %4937 = vmatpush3.bf16.msra.mxu0 %v5415_v37  ;;  %v5459_v37 = vld [vmem:[%s7108_s4 + $0x428] sm:$0xff]  }
 0x218   :  { %4959 = vmatmul.mubr.bf16.vlgmr.msra.gmra.mrb[52].mxu1 %v2054_v14  ;;  %4962 = vmatprep.subr.bf16.mxu0 %v5563_v49 }
 0x219   :  { %4983 = vmatpush3.bf16.msra.mxu1 %v5416_v38  ;;  %4998 = vmatprep.mubr.msk.bf16.mxu1 %vm5564_vm2, %v5563_v49 }
 0x21a   :  { %4939 = vmatmul.mubr.bf16.vlgmr.msra.gmra.mrb[52].mxu0 %v1946_v10  ;;  %4984 = vmatprep.subr.bf16.mxu1 %v5563_v49  ;;  %v5460_v10 = vld [vmem:[%s7108_s4 + $0x470] sm:$0xff]  }
 0x21b   :  { %4963 = vmatpush3.bf16.msra.mxu0 %v5417_v3  ;;  %4978 = vmatprep.mubr.msk.bf16.mxu0 %vm5564_vm2, %v5563_v49 }
 0x21c   :  { %4964 = vmatprep.subr.bf16.mxu0 %v5563_v49 }
 0x21d   :  { %4985 = vmatpush3.bf16.msra.mxu1 %v5418_v15 }
 0x21e   :  { %4986 = vmatprep.subr.bf16.mxu1 %v5563_v49 }
 0x21f   :  { %4965 = vmatpush3.bf16.msra.mxu0 %v5419_v16 }
 0x220   :  { %4966 = vmatprep.subr.bf16.mxu0 %v5563_v49 }
 0x221   :  { %4987 = vmatpush3.bf16.msra.mxu1 %v5420_v21 }
 0x222   :  { %4988 = vmatprep.subr.bf16.mxu1 %v5563_v49 }
 0x223   :  { %4967 = vmatpush3.bf16.msra.mxu0 %v5421_v22 }
 0x224   :  { %4968 = vmatprep.subr.bf16.mxu0 %v5563_v49 }
 0x225   :  { %4989 = vmatpush3.bf16.msra.mxu1 %v5422_v1  ;;  %v5461_v1 = vld [vmem:[%s7108_s4 + $0x430] sm:$0xff]  }
 0x226   :  { %4990 = vmatprep.subr.bf16.mxu1 %v5563_v49 }
 0x227   :  { %4969 = vmatpush3.bf16.msra.mxu0 %v5423_v24 }
 0x228   :  { %4970 = vmatprep.subr.bf16.mxu0 %v5563_v49 }
 0x229   :  { %4991 = vmatpush3.bf16.msra.mxu1 %v5424_v27 }
 0x22a   :  { %4992 = vmatprep.subr.bf16.mxu1 %v5563_v49 }
 0x22b   :  { %4971 = vmatpush3.bf16.msra.mxu0 %v5425_v34  ;;  %v5462_v34 = vld [vmem:[%s7108_s4 + $0x478] sm:$0xff]  }
 0x22c   :  { %4972 = vmatprep.subr.bf16.mxu0 %v5563_v49 }
 0x22d   :  { %4993 = vmatpush3.bf16.msra.mxu1 %v5426_v28  ;;  %v6757_v28 = vpack.c.bf16 %v6218_v61, %v6218_v61  ;;  %v5465_v61 = vld [vmem:[%s7108_s4 + $0x480] sm:$0xff]  }
 0x22e   :  { %4994 = vmatprep.subr.bf16.mxu1 %v5563_v49 }
 0x22f   :  { %4973 = vmatpush3.bf16.msra.mxu0 %v5427_v29  ;;  %v5463_v29 = vld [vmem:[%s7108_s4 + $0x438] sm:$0xff]  }
 0x230   :  { %4974 = vmatprep.subr.bf16.mxu0 %v5563_v49 }
 0x231   :  { %4995 = vmatpush3.bf16.msra.mxu1 %v5428_v45  ;;  %v5464_v45 = vld [vmem:[%s7108_s4 + $0x4c0] sm:$0xff]  }
 0x232   :  { %4996 = vmatprep.subr.bf16.mxu1 %v5563_v49 }
 0x233   :  { %4975 = vmatpush3.bf16.msra.mxu0 %v5429_v46  ;;  %v2702_v46 = vrot.slane %v6757_v28, 1 }
 0x234   :  { %4976 = vmatprep.subr.bf16.mxu0 %v5563_v49 }
 0x235   :  { %4997 = vmatpush3.bf16.msra.mxu1 %v5430_v30  ;;  %v5466_v30 = vld [vmem:[%s7108_s4 + $0x4c8] sm:$0xff]  }
 0x236   :  { %5022 = vmatprep.subr.bf16.mxu1 %v5563_v49 }
 0x237   :  { %4977 = vmatpush3.bf16.msra.mxu0 %v5431_v31  ;;  %v5468_v31 = vld [vmem:[%s7108_s4 + $0x4d0] sm:$0xff]  }
 0x238   :  { %4999 = vmatmul.mubr.bf16.vlgmr.msra.gmra.mrb[56].mxu1 %v2270_v35  ;;  %5002 = vmatprep.subr.bf16.mxu0 %v5563_v49  ;;  %v5470_v35 = vld [vmem:[%s7108_s4 + $0x4d8] sm:$0xff]  }
 0x239   :  { %5023 = vmatpush3.bf16.msra.mxu1 %v5432_v32  ;;  %5038 = vmatprep.mubr.msk.bf16.mxu1 %vm5564_vm2, %v5563_v49  ;;  %v5469_v32 = vld [vmem:[%s7108_s4 + $0x490] sm:$0xff]  }
 0x23a   :  { %4979 = vmatmul.mubr.bf16.vlgmr.msra.gmra.mrb[56].mxu0 %v6610_v43  ;;  %5024 = vmatprep.subr.bf16.mxu1 %v5563_v49  ;;  %v5467_v43 = vld [vmem:[%s7108_s4 + $0x488] sm:$0xff]  }
 0x23b   :  { %5003 = vmatpush3.bf16.msra.mxu0 %v5433_v33  ;;  %5018 = vmatprep.mubr.msk.bf16.mxu0 %vm5564_vm2, %v5563_v49  ;;  %v5471_v33 = vld [vmem:[%s7108_s4 + $0x498] sm:$0xff]  }
 0x23c   :  { %5004 = vmatprep.subr.bf16.mxu0 %v5563_v49 }
 0x23d   :  { %5025 = vmatpush3.bf16.msra.mxu1 %v5434_v36  ;;  %v5472_v36 = vld [vmem:[%s7108_s4 + $0x4e0] sm:$0xff]  }
 0x23e   :  { %5026 = vmatprep.subr.bf16.mxu1 %v5563_v49 }
 0x23f   :  { %5005 = vmatpush3.bf16.msra.mxu0 %v5435_v44  ;;  %v5473_v44 = vld [vmem:[%s7108_s4 + $0x4a0] sm:$0xff]  }
 0x240   :  { %5006 = vmatprep.subr.bf16.mxu0 %v5563_v49 }
 0x241   :  { %5027 = vmatpush3.bf16.msra.mxu1 %v5436_v47  ;;  %v5474_v47 = vld [vmem:[%s7108_s4 + $0x4e8] sm:$0xff]  }
 0x242   :  { %5028 = vmatprep.subr.bf16.mxu1 %v5563_v49 }
 0x243   :  { %5007 = vmatpush3.bf16.msra.mxu0 %v5437_v39 }
 0x244   :  { %5008 = vmatprep.subr.bf16.mxu0 %v5563_v49 }
 0x245   :  { %5029 = vmatpush3.bf16.msra.mxu1 %v5438_v40  ;;  %v5475_v40 = vld [vmem:[%s7108_s4 + $0x4a8] sm:$0xff]  }
 0x246   :  { %5030 = vmatprep.subr.bf16.mxu1 %v5563_v49 }
 0x247   :  { %5009 = vmatpush3.bf16.msra.mxu0 %v5439_v41 }
 0x248   :  { %5010 = vmatprep.subr.bf16.mxu0 %v5563_v49 }
 0x249   :  { %5031 = vmatpush3.bf16.msra.mxu1 %v5440_v55 }
 0x24a   :  { %5032 = vmatprep.subr.bf16.mxu1 %v5563_v49 }
 0x24b   :  { %5011 = vmatpush3.bf16.msra.mxu0 %v5441_v42  ;;  %v1059_v53 = vpop.f32.mrb[32].mxu1 }
 0x24c   :  { %v4760_v56 = vpop.f32.mrb[33].mxu1  ;;  %5012 = vmatprep.subr.bf16.mxu0 %v5563_v49 }
 0x24d   :  { %5033 = vmatpush3.bf16.msra.mxu1 %v5442_v52  ;;  %v971_v58 = vpop.f32.mrb[32].mxu0  ;;  %v1062_v63 = vpop.f32.mrb[34].mxu1  ;;  %v5476_v52 = vld [vmem:[%s7108_s4 + $0x4f0] sm:$0xff]  }
 0x24e   :  { %v6673_v4 = vadd.f32 %v1059_v53, %v971_v58  ;;  %v4740_v59 = vpop.f32.mrb[33].mxu0  ;;  %v4761_v25 = vpop.f32.mrb[35].mxu1  ;;  %5034 = vmatprep.subr.bf16.mxu1 %v5563_v49  ;;  %v5477_v63 = vld [vmem:[%s7108_s4 + $0x4b0] sm:$0xff]  }
 0x24f   :  { %5013 = vmatpush3.bf16.msra.mxu0 %v5443_v54  ;;  %v974_v2 = vpop.f32.mrb[34].mxu0  ;;  %v5478_v59 = vld [vmem:[%s7108_s4 + $0x4f8] sm:$0xff]  }
 0x250   :  { %v4741_v11 = vpop.f32.mrb[35].mxu0  ;;  %5014 = vmatprep.subr.bf16.mxu0 %v5563_v49  ;;  %v5479_v25 = vld [vmem:[%s7108_s4 + $0x4b8] sm:$0xff]   ;;  %v5480_v2 = vld [vmem:[%s7108_s4 + $0x540] sm:$0xff]  }
 0x251   :  { %5035 = vmatpush3.bf16.msra.mxu1 %v5444_v6  ;;  %v5481_v11 = vld [vmem:[%s7108_s4 + $0x500] sm:$0xff]  }
 0x252   :  { %5036 = vmatprep.subr.bf16.mxu1 %v5563_v49 }
 0x253   :  { %5015 = vmatpush3.bf16.msra.mxu0 %v5445_v50  ;;  %v2918_v50 = vrot.slane %v6757_v28, 3 }
 0x254   :  { %5016 = vmatprep.subr.bf16.mxu0 %v5563_v49 }
 0x255   :  { %5037 = vmatpush3.bf16.msra.mxu1 %v5446_v51  ;;  %v2810_v51 = vrot.slane %v6757_v28, 2 }
 0x256   :  { %5062 = vmatprep.subr.bf16.mxu1 %v5563_v49 }
 0x257   :  { %5017 = vmatpush3.bf16.msra.mxu0 %v5447_v7  ;;  %v5482_v7 = vld [vmem:[%s7108_s4 + $0x548] sm:$0xff]  }
 0x258   :  { %5039 = vmatmul.mubr.bf16.vlgmr.msra.gmra.mrb[60].mxu1 %v2486_v23  ;;  %5042 = vmatprep.subr.bf16.mxu0 %v5563_v49  ;;  %v5484_v23 = vld [vmem:[%s7108_s4 + $0x550] sm:$0xff]  }
 0x259   :  { %5063 = vmatpush3.bf16.msra.mxu1 %v5448_v5  ;;  %5078 = vmatprep.mubr.msk.bf16.mxu1 %vm5564_vm2, %v5563_v49  ;;  %v5483_v5 = vld [vmem:[%s7108_s4 + $0x508] sm:$0xff]  }
 0x25a   :  { %5019 = vmatmul.mubr.bf16.vlgmr.msra.gmra.mrb[60].mxu0 %v2378_v8  ;;  %5064 = vmatprep.subr.bf16.mxu1 %v5563_v49  ;;  %v5486_v8 = vld [vmem:[%s7108_s4 + $0x558] sm:$0xff]  }
 0x25b   :  { %5043 = vmatpush3.bf16.msra.mxu0 %v5449_v19  ;;  %5058 = vmatprep.mubr.msk.bf16.mxu0 %vm5564_vm2, %v5563_v49  ;;  %v5485_v19 = vld [vmem:[%s7108_s4 + $0x510] sm:$0xff]  }
 0x25c   :  { %5044 = vmatprep.subr.bf16.mxu0 %v5563_v49 }
 0x25d   :  { %5065 = vmatpush3.bf16.msra.mxu1 %v5450_v12  ;;  %v5487_v12 = vld [vmem:[%s7108_s4 + $0x518] sm:$0xff]  }
 0x25e   :  { %5066 = vmatprep.subr.bf16.mxu1 %v5563_v49 }
 0x25f   :  { %5045 = vmatpush3.bf16.msra.mxu0 %v5451_v20  ;;  %v5488_v20 = vld [vmem:[%s7108_s4 + $0x560] sm:$0xff]  }
 0x260   :  { %5046 = vmatprep.subr.bf16.mxu0 %v5563_v49 }
 0x261   :  { %5067 = vmatpush3.bf16.msra.mxu1 %v5452_v57  ;;  %v5489_v57 = vld [vmem:[%s7108_s4 + $0x520] sm:$0xff]  }
 0x262   :  { %5068 = vmatprep.subr.bf16.mxu1 %v5563_v49 }
 0x263   :  { %5047 = vmatpush3.bf16.msra.mxu0 %v5453_v60  ;;  %v5490_v60 = vld [vmem:[%s7108_s4 + $0x568] sm:$0xff]  }
 0x264   :  { %5048 = vmatprep.subr.bf16.mxu0 %v5563_v49 }
 0x265   :  { %5069 = vmatpush3.bf16.msra.mxu1 %v5454_v62 }
 0x266   :  { %5070 = vmatprep.subr.bf16.mxu1 %v5563_v49 }
 0x267   :  { %5049 = vmatpush3.bf16.msra.mxu0 %v5455_v13  ;;  %v5491_v13 = vld [vmem:[%s7108_s4 + $0x528] sm:$0xff]  }
 0x268   :  { %5050 = vmatprep.subr.bf16.mxu0 %v5563_v49 }
 0x269   :  { %5071 = vmatpush3.bf16.msra.mxu1 %v5456_v17 }
 0x26a   :  { %5072 = vmatprep.subr.bf16.mxu1 %v5563_v49 }
 0x26b   :  { %v1274_v9 = vpop.f32.mrb[36].mxu1  ;;  %5051 = vmatpush3.bf16.msra.mxu0 %v5457_v18 }
 0x26c   :  { %v4800_v38 = vpop.f32.mrb[37].mxu1  ;;  %5052 = vmatprep.subr.bf16.mxu0 %v5563_v49 }
 0x26d   :  { %v1166_v14 = vpop.f32.mrb[36].mxu0  ;;  %v1277_v3 = vpop.f32.mrb[38].mxu1  ;;  %5073 = vmatpush3.bf16.msra.mxu1 %v5458_v0 }
 0x26e   :  { %v1172_v15 = vadd.f32 %v1166_v14, %v6673_v4  ;;  %v4780_v16 = vpop.f32.mrb[37].mxu0  ;;  %v4801_v21 = vpop.f32.mrb[39].mxu1  ;;  %5074 = vmatprep.subr.bf16.mxu1 %v5563_v49 }
 0x26f   :  { %v1169_v22 = vpop.f32.mrb[38].mxu0  ;;  %5053 = vmatpush3.bf16.msra.mxu0 %v5459_v37  ;;  %v5494_v21 = vld [vmem:[%s7108_s4 + $0x578] sm:$0xff]  }
 0x270   :  { %v4781_v24 = vpop.f32.mrb[39].mxu0  ;;  %5054 = vmatprep.subr.bf16.mxu0 %v5563_v49  ;;  %v1280_v27 = vadd.f32 %v1274_v9, %v1172_v15  ;;  %v5492_v9 = vld [vmem:[%s7108_s4 + $0x570] sm:$0xff]   ;;  %v6901_v22 = vpack.c.bf16 %v6228_v48, %v6228_v48  ;;  %v5497_v48 = vld [vmem:[%s7108_s4 + $0x580] sm:$0xff]  }
 0x271   :  { %5075 = vmatpush3.bf16.msra.mxu1 %v5460_v10  ;;  %v5493_v10 = vld [vmem:[%s7108_s4 + $0x530] sm:$0xff]   ;;  %v5496_v24 = vld [vmem:[%s7108_s4 + $0x5c0] sm:$0xff]  }
 0x272   :  { %5076 = vmatprep.subr.bf16.mxu1 %v5563_v49 }
 0x273   :  { %5055 = vmatpush3.bf16.msra.mxu0 %v5461_v1  ;;  %v5495_v1 = vld [vmem:[%s7108_s4 + $0x538] sm:$0xff]  }
 0x274   :  { %5056 = vmatprep.subr.bf16.mxu0 %v5563_v49 }
 0x275   :  { %5077 = vmatpush3.bf16.msra.mxu1 %v5462_v34  ;;  %v5498_v34 = vld [vmem:[%s7108_s4 + $0x5c8] sm:$0xff]  }
 0x276   :  { %5102 = vmatprep.subr.bf16.mxu1 %v5563_v49 }
 0x277   :  { %5057 = vmatpush3.bf16.msra.mxu0 %v5463_v29  ;;  %v5500_v29 = vld [vmem:[%s7108_s4 + $0x5d0] sm:$0xff]  }
 0x278   :  { %5079 = vmatmul.mubr.bf16.vlgmr.msra.gmra.mrb[64].mxu1 %v2702_v46  ;;  %5082 = vmatprep.subr.bf16.mxu0 %v5563_v49  ;;  %v5502_v46 = vld [vmem:[%s7108_s4 + $0x5d8] sm:$0xff]  }
 0x279   :  { %5103 = vmatpush3.bf16.msra.mxu1 %v5464_v45  ;;  %5118 = vmatprep.mubr.msk.bf16.mxu1 %vm5564_vm2, %v5563_v49  ;;  %v5501_v45 = vld [vmem:[%s7108_s4 + $0x590] sm:$0xff]  }
 0x27a   :  { %5059 = vmatmul.mubr.bf16.vlgmr.msra.gmra.mrb[64].mxu0 %v6757_v28  ;;  %5104 = vmatprep.subr.bf16.mxu1 %v5563_v49  ;;  %v5499_v28 = vld [vmem:[%s7108_s4 + $0x588] sm:$0xff]  }
 0x27b   :  { %5083 = vmatpush3.bf16.msra.mxu0 %v5465_v61  ;;  %5098 = vmatprep.mubr.msk.bf16.mxu0 %vm5564_vm2, %v5563_v49  ;;  %v5503_v61 = vld [vmem:[%s7108_s4 + $0x598] sm:$0xff]  }
 0x27c   :  { %5084 = vmatprep.subr.bf16.mxu0 %v5563_v49 }
 0x27d   :  { %5105 = vmatpush3.bf16.msra.mxu1 %v5466_v30  ;;  %v5504_v30 = vld [vmem:[%s7108_s4 + $0x5e0] sm:$0xff]  }
 0x27e   :  { %5106 = vmatprep.subr.bf16.mxu1 %v5563_v49 }
 0x27f   :  { %5085 = vmatpush3.bf16.msra.mxu0 %v5467_v43  ;;  %v5505_v43 = vld [vmem:[%s7108_s4 + $0x5a0] sm:$0xff]  }
 0x280   :  { %5086 = vmatprep.subr.bf16.mxu0 %v5563_v49 }
 0x281   :  { %5107 = vmatpush3.bf16.msra.mxu1 %v5468_v31  ;;  %v5506_v31 = vld [vmem:[%s7108_s4 + $0x5e8] sm:$0xff]  }
 0x282   :  { %5108 = vmatprep.subr.bf16.mxu1 %v5563_v49 }
 0x283   :  { %5087 = vmatpush3.bf16.msra.mxu0 %v5469_v32 }
 0x284   :  { %5088 = vmatprep.subr.bf16.mxu0 %v5563_v49 }
 0x285   :  { %5109 = vmatpush3.bf16.msra.mxu1 %v5470_v35  ;;  %v5507_v35 = vld [vmem:[%s7108_s4 + $0x5a8] sm:$0xff]  }
 0x286   :  { %5110 = vmatprep.subr.bf16.mxu1 %v5563_v49 }
 0x287   :  { %5089 = vmatpush3.bf16.msra.mxu0 %v5471_v33 }
 0x288   :  { %5090 = vmatprep.subr.bf16.mxu0 %v5563_v49 }
 0x289   :  { %5111 = vmatpush3.bf16.msra.mxu1 %v5472_v36 }
 0x28a   :  { %5112 = vmatprep.subr.bf16.mxu1 %v5563_v49 }
 0x28b   :  { %v1490_v39 = vpop.f32.mrb[40].mxu1  ;;  %5091 = vmatpush3.bf16.msra.mxu0 %v5473_v44 }
 0x28c   :  { %v4840_v41 = vpop.f32.mrb[41].mxu1  ;;  %5092 = vmatprep.subr.bf16.mxu0 %v5563_v49 }
 0x28d   :  { %v1381_v55 = vpop.f32.mrb[40].mxu0  ;;  %v1493_v42 = vpop.f32.mrb[42].mxu1  ;;  %5113 = vmatpush3.bf16.msra.mxu1 %v5474_v47  ;;  %v5508_v47 = vld [vmem:[%s7108_s4 + $0x5f0] sm:$0xff]  }
 0x28e   :  { %v1387_v53 = vadd.f32 %v1381_v55, %v1280_v27  ;;  %v4820_v54 = vpop.f32.mrb[41].mxu0  ;;  %v4841_v56 = vpop.f32.mrb[43].mxu1  ;;  %5114 = vmatprep.subr.bf16.mxu1 %v5563_v49  ;;  %v3134_v27 = vrot.slane %v6901_v22, 1  ;;  %v5509_v42 = vld [vmem:[%s7108_s4 + $0x5b0] sm:$0xff]  }
 0x28f   :  { %v1384_v58 = vpop.f32.mrb[42].mxu0  ;;  %5093 = vmatpush3.bf16.msra.mxu0 %v5475_v40  ;;  %v5510_v54 = vld [vmem:[%s7108_s4 + $0x5f8] sm:$0xff]  }
 0x290   :  { %v4821_v6 = vpop.f32.mrb[43].mxu0  ;;  %5094 = vmatprep.subr.bf16.mxu0 %v5563_v49  ;;  %v1496_v4 = vadd.f32 %v1490_v39, %v1387_v53  ;;  %v5511_v56 = vld [vmem:[%s7108_s4 + $0x5b8] sm:$0xff]   ;;  %v3350_v58 = vrot.slane %v6901_v22, 3 }
 0x291   :  { %5115 = vmatpush3.bf16.msra.mxu1 %v5476_v52  ;;  %v3242_v6 = vrot.slane %v6901_v22, 2 }
 0x292   :  { %5116 = vmatprep.subr.bf16.mxu1 %v5563_v49 }
 0x293   :  { %5095 = vmatpush3.bf16.msra.mxu0 %v5477_v63  ;;  %v5512_v63 = vld [vmem:[%s7108_s4 + $0x600] sm:$0xff]  }
 0x294   :  { %5096 = vmatprep.subr.bf16.mxu0 %v5563_v49 }
 0x295   :  { %5117 = vmatpush3.bf16.msra.mxu1 %v5478_v59  ;;  %v5514_v59 = vld [vmem:[%s7108_s4 + $0x610] sm:$0xff]  }
 0x296   :  { %5142 = vmatprep.subr.bf16.mxu1 %v5563_v49 }
 0x297   :  { %5097 = vmatpush3.bf16.msra.mxu0 %v5479_v25  ;;  %v5515_v25 = vld [vmem:[%s7108_s4 + $0x618] sm:$0xff]  }
 0x298   :  { %5119 = vmatmul.mubr.bf16.vlgmr.msra.gmra.mrb[68].mxu1 %v2918_v50  ;;  %5122 = vmatprep.subr.bf16.mxu0 %v5563_v49 }
 0x299   :  { %5143 = vmatpush3.bf16.msra.mxu1 %v5480_v2  ;;  %5158 = vmatprep.mubr.msk.bf16.mxu1 %vm5564_vm2, %v5563_v49  ;;  %v5516_v2 = vld [vmem:[%s7108_s4 + $0x620] sm:$0xff]  }
 0x29a   :  { %5099 = vmatmul.mubr.bf16.vlgmr.msra.gmra.mrb[68].mxu0 %v2810_v51  ;;  %5144 = vmatprep.subr.bf16.mxu1 %v5563_v49 }
 0x29b   :  { %5123 = vmatpush3.bf16.msra.mxu0 %v5481_v11  ;;  %5138 = vmatprep.mubr.msk.bf16.mxu0 %vm5564_vm2, %v5563_v49  ;;  %v5517_v11 = vld [vmem:[%s7108_s4 + $0x628] sm:$0xff]  }
 0x29c   :  { %5124 = vmatprep.subr.bf16.mxu0 %v5563_v49 }
 0x29d   :  { %5145 = vmatpush3.bf16.msra.mxu1 %v5482_v7 }
 0x29e   :  { %5146 = vmatprep.subr.bf16.mxu1 %v5563_v49 }
 0x29f   :  { %5125 = vmatpush3.bf16.msra.mxu0 %v5483_v5 }
 0x2a0   :  { %5126 = vmatprep.subr.bf16.mxu0 %v5563_v49 }
 0x2a1   :  { %5147 = vmatpush3.bf16.msra.mxu1 %v5484_v23 }
 0x2a2   :  { %5148 = vmatprep.subr.bf16.mxu1 %v5563_v49 }
 0x2a3   :  { %5127 = vmatpush3.bf16.msra.mxu0 %v5485_v19 }
 0x2a4   :  { %5128 = vmatprep.subr.bf16.mxu0 %v5563_v49 }
 0x2a5   :  { %5149 = vmatpush3.bf16.msra.mxu1 %v5486_v8 }
 0x2a6   :  { %5150 = vmatprep.subr.bf16.mxu1 %v5563_v49 }
 0x2a7   :  { %5129 = vmatpush3.bf16.msra.mxu0 %v5487_v12 }
 0x2a8   :  { %5130 = vmatprep.subr.bf16.mxu0 %v5563_v49 }
 0x2a9   :  { %5151 = vmatpush3.bf16.msra.mxu1 %v5488_v20  ;;  %v5518_v20 = vld [vmem:[%s7108_s4 + $0x630] sm:$0xff]  }
 0x2aa   :  { %5152 = vmatprep.subr.bf16.mxu1 %v5563_v49 }
 0x2ab   :  { %v1706_v62 = vpop.f32.mrb[44].mxu1  ;;  %5131 = vmatpush3.bf16.msra.mxu0 %v5489_v57 }
 0x2ac   :  { %v4880_v17 = vpop.f32.mrb[45].mxu1  ;;  %5132 = vmatprep.subr.bf16.mxu0 %v5563_v49 }
 0x2ad   :  { %v1598_v18 = vpop.f32.mrb[44].mxu0  ;;  %v1709_v0 = vpop.f32.mrb[46].mxu1  ;;  %5153 = vmatpush3.bf16.msra.mxu1 %v5490_v60 }
 0x2ae   :  { %v1604_v37 = vadd.f32 %v1598_v18, %v1496_v4  ;;  %v4860_v38 = vpop.f32.mrb[45].mxu0  ;;  %v4881_v14 = vpop.f32.mrb[47].mxu1  ;;  %5154 = vmatprep.subr.bf16.mxu1 %v5563_v49  ;;  %v5513_v4 = vld [vmem:[%s7108_s4 + $0x608] sm:$0xff]  }
 0x2af   :  { %v1601_v3 = vpop.f32.mrb[46].mxu0  ;;  %5133 = vmatpush3.bf16.msra.mxu0 %v5491_v13  ;;  %v3441_v13 = vpack.c.bf16 %v6239_v26, %v6239_v26 }
 0x2b0   :  { %v4861_v15 = vpop.f32.mrb[47].mxu0  ;;  %5134 = vmatprep.subr.bf16.mxu0 %v5563_v49  ;;  %v1712_v16 = vadd.f32 %v1706_v62, %v1604_v37  ;;  %v5519_v62 = vld [vmem:[%s7108_s4 + $0x638] sm:$0xff]  }
 0x2b1   :  { %5155 = vmatpush3.bf16.msra.mxu1 %v5492_v9 }
 0x2b2   :  { %5156 = vmatprep.subr.bf16.mxu1 %v5563_v49 }
 0x2b3   :  { %5135 = vmatpush3.bf16.msra.mxu0 %v5493_v10 }
 0x2b4   :  { %5136 = vmatprep.subr.bf16.mxu0 %v5563_v49 }
 0x2b5   :  { %5157 = vmatpush3.bf16.msra.mxu1 %v5494_v21 }
 0x2b6   :  { %5182 = vmatprep.subr.bf16.mxu1 %v5563_v49 }
 0x2b7   :  { %5137 = vmatpush3.bf16.msra.mxu0 %v5495_v1 }
 0x2b8   :  { %5159 = vmatmul.mubr.bf16.vlgmr.msra.gmra.mrb[72].mxu1 %v3134_v27  ;;  %5162 = vmatprep.subr.bf16.mxu0 %v5563_v49 }
 0x2b9   :  { %5183 = vmatpush3.bf16.msra.mxu1 %v5496_v24  ;;  %5198 = vmatprep.mubr.msk.bf16.mxu1 %vm5564_vm2, %v5563_v49 }
 0x2ba   :  { %5139 = vmatmul.mubr.bf16.vlgmr.msra.gmra.mrb[72].mxu0 %v6901_v22  ;;  %5184 = vmatprep.subr.bf16.mxu1 %v5563_v49 }
 0x2bb   :  { %5163 = vmatpush3.bf16.msra.mxu0 %v5497_v48  ;;  %5178 = vmatprep.mubr.msk.bf16.mxu0 %vm5564_vm2, %v5563_v49 }
 0x2bc   :  { %5164 = vmatprep.subr.bf16.mxu0 %v5563_v49 }
 0x2bd   :  { %5185 = vmatpush3.bf16.msra.mxu1 %v5498_v34 }
 0x2be   :  { %5186 = vmatprep.subr.bf16.mxu1 %v5563_v49 }
 0x2bf   :  { %5165 = vmatpush3.bf16.msra.mxu0 %v5499_v28 }
 0x2c0   :  { %5166 = vmatprep.subr.bf16.mxu0 %v5563_v49 }
 0x2c1   :  { %5187 = vmatpush3.bf16.msra.mxu1 %v5500_v29  ;;  %v5520_v29 = vld [vmem:[%s7110_s6] sm:$0xff]  }
 0x2c2   :  { %5188 = vmatprep.subr.bf16.mxu1 %v5563_v49 }
 0x2c3   :  { %5167 = vmatpush3.bf16.msra.mxu0 %v5501_v45  ;;  %v5521_v45 = vld [vmem:[%s7110_s6 + $0x8] sm:$0xff]  }
 0x2c4   :  { %5168 = vmatprep.subr.bf16.mxu0 %v5563_v49 }
 0x2c5   :  { %5189 = vmatpush3.bf16.msra.mxu1 %v5502_v46  ;;  %v5522_v46 = vld [vmem:[%s7110_s6 + $0x10] sm:$0xff]  }
 0x2c6   :  { %5190 = vmatprep.subr.bf16.mxu1 %v5563_v49 }
 0x2c7   :  { %5169 = vmatpush3.bf16.msra.mxu0 %v5503_v61  ;;  %v5523_v61 = vld [vmem:[%s7110_s6 + $0x18] sm:$0xff]  }
 0x2c8   :  { %5170 = vmatprep.subr.bf16.mxu0 %v5563_v49 }
 0x2c9   :  { %5191 = vmatpush3.bf16.msra.mxu1 %v5504_v30  ;;  %v5524_v30 = vld [vmem:[%s7110_s6 + $0x20] sm:$0xff]  }
 0x2ca   :  { %5192 = vmatprep.subr.bf16.mxu1 %v5563_v49 }
 0x2cb   :  { %v1922_v32 = vpop.f32.mrb[48].mxu1  ;;  %5171 = vmatpush3.bf16.msra.mxu0 %v5505_v43  ;;  %v5525_v43 = vld [vmem:[%s7110_s6 + $0x28] sm:$0xff]  }
 0x2cc   :  { %v4920_v33 = vpop.f32.mrb[49].mxu1  ;;  %5172 = vmatprep.subr.bf16.mxu0 %v5563_v49 }
 0x2cd   :  { %v1813_v36 = vpop.f32.mrb[48].mxu0  ;;  %v1925_v44 = vpop.f32.mrb[50].mxu1  ;;  %5193 = vmatpush3.bf16.msra.mxu1 %v5506_v31 }
 0x2ce   :  { %v1819_v39 = vadd.f32 %v1813_v36, %v1712_v16  ;;  %v4900_v40 = vpop.f32.mrb[49].mxu0  ;;  %v4921_v41 = vpop.f32.mrb[51].mxu1  ;;  %5194 = vmatprep.subr.bf16.mxu1 %v5563_v49 }
 0x2cf   :  { %v1816_v55 = vpop.f32.mrb[50].mxu0  ;;  %5173 = vmatpush3.bf16.msra.mxu0 %v5507_v35 }
 0x2d0   :  { %v4901_v52 = vpop.f32.mrb[51].mxu0  ;;  %5174 = vmatprep.subr.bf16.mxu0 %v5563_v49  ;;  %v1928_v53 = vadd.f32 %v1922_v32, %v1819_v39  ;;  %v5526_v55 = vld [vmem:[%s7110_s6 + $0x30] sm:$0xff]  }
 0x2d1   :  { %5195 = vmatpush3.bf16.msra.mxu1 %v5508_v47  ;;  %v5528_v52 = vld [vmem:[%s7112_s8] sm:$0xff]  }
 0x2d2   :  { %5196 = vmatprep.subr.bf16.mxu1 %v5563_v49 }
 0x2d3   :  { %5175 = vmatpush3.bf16.msra.mxu0 %v5509_v42  ;;  %v5527_v42 = vld [vmem:[%s7110_s6 + $0x38] sm:$0xff]  }
 0x2d4   :  { %5176 = vmatprep.subr.bf16.mxu0 %v5563_v49 }
 0x2d5   :  { %5197 = vmatpush3.bf16.msra.mxu1 %v5510_v54  ;;  %v5530_v54 = vld [vmem:[%s7112_s8 + $0x10] sm:$0xff]  }
 0x2d6   :  { %5222 = vmatprep.subr.bf16.mxu1 %v5563_v49 }
 0x2d7   :  { %5177 = vmatpush3.bf16.msra.mxu0 %v5511_v56  ;;  %v5531_v56 = vld [vmem:[%s7112_s8 + $0x18] sm:$0xff]  }
 0x2d8   :  { %5199 = vmatmul.mubr.bf16.vlgmr.msra.gmra.mrb[76].mxu1 %v3350_v58  ;;  %5202 = vmatprep.subr.bf16.mxu0 %v5563_v49  ;;  %v5532_v58 = vld [vmem:[%s7112_s8 + $0x20] sm:$0xff]  }
 0x2d9   :  { %5238 = vmatprep.mubr.msk.bf16.mxu1 %vm5564_vm2, %v5563_v49  ;;  %5223 = vmatpush3.bf16.msra.mxu1 %v5520_v29  ;;  %v5534_v29 = vld [vmem:[%s7112_s8 + $0x30] sm:$0xff]  }
 0x2da   :  { %5179 = vmatmul.mubr.bf16.vlgmr.msra.gmra.mrb[76].mxu0 %v3242_v6  ;;  %5224 = vmatprep.subr.bf16.mxu1 %v5563_v49 }
 0x2db   :  { %5203 = vmatpush3.bf16.msra.mxu0 %v5512_v63  ;;  %5218 = vmatprep.mubr.msk.bf16.mxu0 %vm5564_vm2, %v5563_v49  ;;  %v5533_v63 = vld [vmem:[%s7112_s8 + $0x28] sm:$0xff]  }
 0x2dc   :  { %5204 = vmatprep.subr.bf16.mxu0 %v5563_v49 }
 0x2dd   :  { %5225 = vmatpush3.bf16.msra.mxu1 %v5521_v45  ;;  %v5535_v45 = vld [vmem:[%s7112_s8 + $0x38] sm:$0xff]  }
 0x2de   :  { %5226 = vmatprep.subr.bf16.mxu1 %v5563_v49 }
 0x2df   :  { %5205 = vmatpush3.bf16.msra.mxu0 %v5513_v4 }
 0x2e0   :  { %5206 = vmatprep.subr.bf16.mxu0 %v5563_v49 }
 0x2e1   :  { %5227 = vmatpush3.bf16.msra.mxu1 %v5522_v46  ;;  %v4461_v46 = vld [vmem:[%s7111_s7] ss:$0 sm:$0xff] }
 0x2e2   :  { %5228 = vmatprep.subr.bf16.mxu1 %v5563_v49 }
 0x2e3   :  { %5207 = vmatpush3.bf16.msra.mxu0 %v5514_v59 }
 0x2e4   :  { %5208 = vmatprep.subr.bf16.mxu0 %v5563_v49 }
 0x2e5   :  { %5229 = vmatpush3.bf16.msra.mxu1 %v5523_v61 }
 0x2e6   :  { %5230 = vmatprep.subr.bf16.mxu1 %v5563_v49 }
 0x2e7   :  { %5209 = vmatpush3.bf16.msra.mxu0 %v5515_v25 }
 0x2e8   :  { %5210 = vmatprep.subr.bf16.mxu0 %v5563_v49 }
 0x2e9   :  { %5231 = vmatpush3.bf16.msra.mxu1 %v5524_v30 }
 0x2ea   :  { %5232 = vmatprep.subr.bf16.mxu1 %v5563_v49 }
 0x2eb   :  { %v2138_v50 = vpop.f32.mrb[52].mxu1  ;;  %5211 = vmatpush3.bf16.msra.mxu0 %v5516_v2 }
 0x2ec   :  { %v4960_v51 = vpop.f32.mrb[53].mxu1  ;;  %5212 = vmatprep.subr.bf16.mxu0 %v5563_v49 }
 0x2ed   :  { %v2030_v7 = vpop.f32.mrb[52].mxu0  ;;  %v2141_v5 = vpop.f32.mrb[54].mxu1  ;;  %5233 = vmatpush3.bf16.msra.mxu1 %v5525_v43 }
 0x2ee   :  { %v2036_v23 = vadd.f32 %v2030_v7, %v1928_v53  ;;  %v4940_v19 = vpop.f32.mrb[53].mxu0  ;;  %v4961_v8 = vpop.f32.mrb[55].mxu1  ;;  %5234 = vmatprep.subr.bf16.mxu1 %v5563_v49  ;;  %v5529_v53 = vld [vmem:[%s7112_s8 + $0x8] sm:$0xff]   ;;  %s5565_s8 = smov [#allocation2]  }
 0x2ef   :  { %v2033_v12 = vpop.f32.mrb[54].mxu0  ;;  %5213 = vmatpush3.bf16.msra.mxu0 %v5517_v11  ;;  %s3789_s13 = sshll.u32 %s5565_s8, 4  ;;  %s3790_s13 = int_to_ptr.vmem [resolvable:$true] %s3789_s13 }
 0x2f0   :  { %v4941_v57 = vpop.f32.mrb[55].mxu0  ;;  %5214 = vmatprep.subr.bf16.mxu0 %v5563_v49  ;;  %v2144_v60 = vadd.f32 %v2138_v50, %v2036_v23  ;;  %s5538_s7 = scalar_lea.vmem %s3790_s13, 32  ;;  %p5543_p1 = scmp.lt.s32.totalorder %s3790_s13, %s3790_s13 }
 0x2f1   :  { %5235 = vmatpush3.bf16.msra.mxu1 %v5526_v55  ;;  %p5539_p0 = scmp.ne.s32.totalorder %s3790_s13, %s5538_s7  ;;  %p5544_p2 = scmp.lt.s32.totalorder %s5538_s7, %s5538_s7 }
 0x2f2   :  { %5236 = vmatprep.subr.bf16.mxu1 %v5563_v49 }
 0x2f3   :  { %5215 = vmatpush3.bf16.msra.mxu0 %v5518_v20  ;;  %p5545_p3 = por %p5544_p2, %p5543_p1 }
 0x2f4   :  { %5216 = vmatprep.subr.bf16.mxu0 %v5563_v49 }
 0x2f5   :  { %5237 = vmatpush3.bf16.msra.mxu1 %v5527_v42  ;;  %p5546_p4 = pnand %p5545_p3, %p5539_p0 }
 0x2f7   :  { %5217 = vmatpush3.bf16.msra.mxu0 %v5519_v62 }
 0x2f8   :  { %5242 = vmatprep.subr.bf16.mxu0 %v5563_v49 }
 0x2fa   :  { %5219 = vmatmul.mubr.bf16.vlgmr.msra.gmra.mrb[80].mxu0 %v3441_v13 }
 0x2fb   :  { %5258 = vmatprep.mubr.msk.bf16.mxu0 %vm5564_vm2, %v5563_v49  ;;  %5243 = vmatpush3.bf16.msra.mxu0 %v5528_v52 }
 0x2fc   :  { %5244 = vmatprep.subr.bf16.mxu0 %v5563_v49 }
 0x2ff   :  { %5245 = vmatpush3.bf16.msra.mxu0 %v5529_v53 }
 0x300   :  { %5246 = vmatprep.subr.bf16.mxu0 %v5563_v49 }
 0x303   :  { %5247 = vmatpush3.bf16.msra.mxu0 %v5530_v54 }
 0x304   :  { %5248 = vmatprep.subr.bf16.mxu0 %v5563_v49 }
 0x307   :  { %5249 = vmatpush3.bf16.msra.mxu0 %v5531_v56 }
 0x308   :  { %5250 = vmatprep.subr.bf16.mxu0 %v5563_v49 }
 0x30b   :  { %v2354_v17 = vpop.f32.mrb[56].mxu1  ;;  %5251 = vmatpush3.bf16.msra.mxu0 %v5532_v58 }
 0x30c   :  { %v5000_v18 = vpop.f32.mrb[57].mxu1  ;;  %5252 = vmatprep.subr.bf16.mxu0 %v5563_v49 }
 0x30d   :  { %v2245_v0 = vpop.f32.mrb[56].mxu0  ;;  %v2357_v9 = vpop.f32.mrb[58].mxu1 }
 0x30e   :  { %v2251_v37 = vadd.f32 %v2245_v0, %v2144_v60  ;;  %v4980_v38 = vpop.f32.mrb[57].mxu0  ;;  %v5001_v14 = vpop.f32.mrb[59].mxu1 }
 0x30f   :  { %v2248_v3 = vpop.f32.mrb[58].mxu0  ;;  %5253 = vmatpush3.bf16.msra.mxu0 %v5533_v63 }
 0x310   :  { %v4981_v10 = vpop.f32.mrb[59].mxu0  ;;  %v2360_v15 = vadd.f32 %v2354_v17, %v2251_v37  ;;  %5254 = vmatprep.subr.bf16.mxu0 %v5563_v49 }
 0x313   :  { %5255 = vmatpush3.bf16.msra.mxu0 %v5534_v29 }
 0x314   :  { %5256 = vmatprep.subr.bf16.mxu0 %v5563_v49 }
 0x317   :  { %5257 = vmatpush3.bf16.msra.mxu0 %v5535_v45 }
 0x32b   :  { %v2570_v16 = vpop.f32.mrb[60].mxu1 }
 0x32c   :  { %v5040_v21 = vpop.f32.mrb[61].mxu1 }
 0x32d   :  { %v2462_v22 = vpop.f32.mrb[60].mxu0  ;;  %v2573_v26 = vpop.f32.mrb[62].mxu1 }
 0x32e   :  { %v2468_v1 = vadd.f32 %v2462_v22, %v2360_v15  ;;  %v5020_v24 = vpop.f32.mrb[61].mxu0  ;;  %v5041_v27 = vpop.f32.mrb[63].mxu1  ;;  %v4460_v22 = vld [vmem:[%s7109_s5] ss:$0 sm:$0xff] }
 0x32f   :  { %v2465_v48 = vpop.f32.mrb[62].mxu0 }
 0x330   :  { %v5021_v34 = vpop.f32.mrb[63].mxu0  ;;  %v2576_v28 = vadd.f32 %v2570_v16, %v2468_v1 }
 0x34b   :  { %v2786_v31 = vpop.f32.mrb[64].mxu1 }
 0x34c   :  { %v5080_v32 = vpop.f32.mrb[65].mxu1 }
 0x34d   :  { %v2677_v35 = vpop.f32.mrb[64].mxu0  ;;  %v2789_v33 = vpop.f32.mrb[66].mxu1 }
 0x34e   :  { %v2683_v36 = vadd.f32 %v2677_v35, %v2576_v28  ;;  %v5060_v44 = vpop.f32.mrb[65].mxu0  ;;  %v5081_v47 = vpop.f32.mrb[67].mxu1 }
 0x34f   :  { %v2680_v39 = vpop.f32.mrb[66].mxu0 }
 0x350   :  { %v5061_v40 = vpop.f32.mrb[67].mxu0  ;;  %v2792_v41 = vadd.f32 %v2786_v31, %v2683_v36  ;;  %v4470_v36 = vld [vmem:[%s7113_s9] ss:$0 sm:$0xff] }
 0x36b   :  { %v3002_v6 = vpop.f32.mrb[68].mxu1 }
 0x36c   :  { %v5120_v4 = vpop.f32.mrb[69].mxu1 }
 0x36d   :  { %v2894_v59 = vpop.f32.mrb[68].mxu0  ;;  %v3005_v25 = vpop.f32.mrb[70].mxu1 }
 0x36e   :  { %v2900_v2 = vadd.f32 %v2894_v59, %v2792_v41  ;;  %v5100_v50 = vpop.f32.mrb[69].mxu0  ;;  %v5121_v11 = vpop.f32.mrb[71].mxu1 }
 0x36f   :  { %v2897_v51 = vpop.f32.mrb[70].mxu0 }
 0x370   :  { %v5101_v7 = vpop.f32.mrb[71].mxu0  ;;  %v3008_v5 = vadd.f32 %v3002_v6, %v2900_v2 }
 0x38b   :  { %v3218_v23 = vpop.f32.mrb[72].mxu1 }
 0x38c   :  { %v5160_v19 = vpop.f32.mrb[73].mxu1 }
 0x38d   :  { %v3109_v8 = vpop.f32.mrb[72].mxu0  ;;  %v3221_v12 = vpop.f32.mrb[74].mxu1 }
 0x38e   :  { %v3115_v20 = vadd.f32 %v3109_v8, %v3008_v5  ;;  %v5140_v57 = vpop.f32.mrb[73].mxu0  ;;  %v5161_v60 = vpop.f32.mrb[75].mxu1 }
 0x38f   :  { %v3112_v62 = vpop.f32.mrb[74].mxu0 }
 0x390   :  { %v5141_v13 = vpop.f32.mrb[75].mxu0  ;;  %v3224_v17 = vadd.f32 %v3218_v23, %v3115_v20 }
 0x3ab   :  { %v3434_v18 = vpop.f32.mrb[76].mxu1 }
 0x3ac   :  { %v5200_v0 = vpop.f32.mrb[77].mxu1 }
 0x3ad   :  { %v3326_v9 = vpop.f32.mrb[76].mxu0  ;;  %v3437_v37 = vpop.f32.mrb[78].mxu1 }
 0x3ae   :  { %v3332_v38 = vadd.f32 %v3326_v9, %v3224_v17  ;;  %v5180_v14 = vpop.f32.mrb[77].mxu0  ;;  %v5201_v3 = vpop.f32.mrb[79].mxu1 }
 0x3af   :  { %v3329_v10 = vpop.f32.mrb[78].mxu0 }
 0x3b0   :  { %v5181_v15 = vpop.f32.mrb[79].mxu0  ;;  %v3440_v16 = vadd.f32 %v3434_v18, %v3332_v38 }
 0x3cd   :  { %v3541_v21 = vpop.f32.mrb[80].mxu0 }
 0x3ce   :  { %v3547_v26 = vadd.f32 %v3541_v21, %v3440_v16  ;;  %v5220_v1 = vpop.f32.mrb[81].mxu0 }
 0x3cf   :  { %v3544_v24 = vpop.f32.mrb[82].mxu0 }
 0x3d0   :  { %v3555_v27 = vadd.f32 %v4460_v22, %v3547_v26  ;;  %v5221_v48 = vpop.f32.mrb[83].mxu0 }
 0x3d2   :  { %v3556_v34 = vmax.f32 %v3555_v27, 0.0 }
 0x3d4   :  { %v3557_v28 = vpack.c.bf16 %v3556_v34, %v3556_v34 }
 0x3d6   :  { %5239 = vmatmul.mubr.bf16.vlgmr.msra.gmra.mrb[80].mxu1 %v3557_v28 }
 0x4a9   :  { %v3663_v61 = vpop.f32.mrb[80].mxu1 }
 0x4aa   :  { %v3664_v30 = vadd.f32 %v4461_v46, %v3663_v61  ;;  %v5240_v43 = vpop.f32.mrb[81].mxu1 }
 0x4ab   :  { %v3666_v31 = vpop.f32.mrb[82].mxu1 }
 0x4ac   :  { %v3669_v32 = vmax.f32 %v3664_v30, 0.0  ;;  %v5241_v35 = vpop.f32.mrb[83].mxu1 }
 0x4ae   :  { %v3670_v33 = vpack.c.bf16 %v3669_v32, %v3669_v32 }
 0x4b0   :  { %5259 = vmatmul.mubr.bf16.vlgmr.msra.gmra.mrb[84].mxu0 %v3670_v33 }
 0x583   :  { %v3776_v49 = vpop.f32.mrb[84].mxu0 }
 0x584   :  { %v3777_v44 = vadd.f32 %v4470_v36, %v3776_v49  ;;  %v5260_v47 = vpop.f32.mrb[85].mxu0 }
 0x585   :  { %v3779_v39 = vpop.f32.mrb[86].mxu0 }
 0x586   :  { %3782 = vst [vmem:[#allocation2] sm:$0x3] %v3777_v44  ;;  %v5261_v40 = vpop.f32.mrb[87].mxu0 }
 0x587   :  { %5549 = shalt.err (!%p5546_p4)
}
 0x588   :  { %s5550_s9 = scalar_lea.hbm %s7114_s10, 32 }
 0x589   :  { %p5551_p5 = scmp.ne.s32.totalorder %s7114_s10, %s5550_s9  ;;  %p5554_p6 = scmp.lt.u32.totalorder %s5550_s9, %s7114_s10 }
 0x58b   :  { %p5556_p7 = pnand %p5554_p6, %p5551_p5 }
 0x58d   :  { %5559 = shalt.err (!%p5556_p7)
}
 0x58e   :  { %3792 = dma.vmem_to_hbm [thread:$0]  %s3790_s13, 32, %s7114_s10, [#allocation3]  }
 0x58f   :  { %5560 = dma.done.wait [#allocation3], 32  }
 0x590   :  { %5561 = vsyncadd [#allocation3], 4294967264 }
 0x591   :  { %3796 = vsyncpa [#allocation3], 1 }

</bundles_post_ra>
